<compile_context>
chip_gen: v7x
topology: tpu7x:2x2x1
jax: 0.10.0
libtpu: 0.0.40
codegen_flags: <defaults>
</compile_context>

<pallas_src>
from functools import partial

import numpy as np
import jax
import jax.numpy as jnp
from jax import lax
from jax.experimental import pallas as pl
from jax.experimental.pallas import tpu as pltpu

EPS = 1e-5
LANES = 128      # channel (lane) padding of every activation / weight slab
STEM_K = 160     # stem GEMM K: 7*7*3 = 147 real, padded to a 16-multiple


def _conv_out(h, k, s, p):
    return (h + 2 * p - k) // s + 1


def _round8(n):
    return ((n + 7) // 8) * 8


# ----------------------------------------------------------------------------
# The single fused Pallas kernel (whole backbone forward)
# ----------------------------------------------------------------------------
def _backbone_kernel(*refs, plan):
    f32, bf16 = jnp.float32, jnp.bfloat16
    patches_ref, c1w_ref, wts_ref, bias_ref = refs[:4]
    g_refs = refs[4:4 + plan["n_gather_groups"]]
    o_ref = refs[4 + plan["n_gather_groups"]]

    def bias(idx):
        return bias_ref[pl.ds(idx, 1), :]                      # (1, 128) f32

    def shift_rows(x, d):
        """result[r] = x[r + d] (rows shifted toward 0 for d > 0), zero fill."""
        if d == 0:
            return x
        pad = jnp.zeros((abs(d), x.shape[1]), x.dtype)
        if d > 0:
            return jnp.concatenate([x[d:], pad], axis=0)
        return jnp.concatenate([pad, x[:d]], axis=0)

    def conv(x, cv):
        """x: (M, 128) f32 stage activation -> folded-BN conv output, f32."""
        cin = cv["cin"]
        xc = x[:, :cin]                                        # real channels only
        if cv["mode"] == "direct":
            # single valid tap with identity row mapping (1x1 spatial stages)
            z = xc
        elif cv["mode"] == "shift":
            # 3x3 / s1 / p1: taps are row shifts within each image + OOB mask
            H = cv["H"]
            W = cv["W"]
            m = x.shape[0]
            r = lax.broadcasted_iota(jnp.int32, (m, 1), 0)
            p = r & (H * W - 1)
            oh = p >> (W.bit_length() - 1)
            ow = p & (W - 1)
            cols = []
            for dh in (-1, 0, 1):
                for dw in (-1, 0, 1):
                    if dh == 0 and dw == 0:
                        cols.append(xc)
                        continue
                    tap = shift_rows(xc, dh * W + dw)
                    ok = ((oh + dh >= 0) & (oh + dh < H) &
                          (ow + dw >= 0) & (ow + dw < W)).astype(xc.dtype)
                    cols.append(tap * ok)                      # zero-padding halo
            z = jnp.concatenate(cols, axis=1)                  # (M, 9*cin)
        else:  # "gather": stride-2 convs / downsample — tiny row-selection GEMMs
            g = g_refs[cv["group"]]
            cols = [jnp.dot(g[t], xc, preferred_element_type=f32)
                    for t in cv["taps"]]
            z = cols[0] if len(cols) == 1 else jnp.concatenate(cols, axis=1)
        w = wts_ref[pl.ds(cv["off"], cv["K"]), :]              # (K, 128) bf16
        y = jnp.dot(z.astype(bf16), w, preferred_element_type=f32)
        return y + bias(cv["bias"])                            # folded-BN shift

    # ---- stem: conv1 (input pre-im2col'ed on host) + folded BN + ReLU -------
    y = jnp.dot(patches_ref[...], c1w_ref[...], preferred_element_type=f32)
    y = jnp.maximum(y + bias(plan["stem_bias"]), 0.0)          # (128, 128) f32

    # ---- maxpool 3x3 / s2 / p1: 9 row-selection taps + running max ----------
    # (post-ReLU, so the 0 from empty selections never exceeds the true max)
    pool = plan["pool"]
    gp = g_refs[pool["group"]]
    x = None
    for t in pool["taps"]:
        tap = jnp.dot(gp[t], y, preferred_element_type=f32)    # (32, 128)
        x = tap if x is None else jnp.maximum(x, tap)

    # ---- 8 residual BasicBlocks ---------------------------------------------
    for blk in plan["blocks"]:
        identity = x if blk["down"] is None else conv(x, blk["down"])
        h = jnp.maximum(conv(x, blk["conv1"]), 0.0)
        x = jnp.maximum(conv(h, blk["conv2"]) + identity, 0.0)

    o_ref[...] = x                                             # (8, 128) f32


# ----------------------------------------------------------------------------
# Host-side model build: fold BN, stack per-tap weights along K, pack tightly
# ----------------------------------------------------------------------------
def _fold_bn(bn):
    scale = np.asarray(bn["gamma"], np.float32) / np.sqrt(
        np.asarray(bn["var"], np.float32) + EPS)
    shift = np.asarray(bn["beta"], np.float32) - np.asarray(bn["mean"], np.float32) * scale
    return scale, shift


def build_model(params, batch=2, image=16):
    wt_slabs, bias_rows = [], []
    wt_off = 0
    gather_groups = {}                   # (m_out, rows_in) -> [np (m_out, rows_in)]

    def add_bias(shift):
        row = np.zeros((LANES,), np.float32)
        row[: shift.shape[0]] = shift
        bias_rows.append(row)
        return len(bias_rows) - 1

    def tap_pairs(hin, hout, k, stride, pad):
        taps = []
        for kh in range(k):
            for kw in range(k):
                pairs = []
                for n in range(batch):
                    for oh in range(hout):
                        for ow in range(hout):
                            ih, iw = oh * stride + kh - pad, ow * stride + kw - pad
                            if 0 <= ih < hin and 0 <= iw < hin:
                                pairs.append((n * hout * hout + oh * hout + ow,
                                              n * hin * hin + ih * hin + iw))
                taps.append((kh, kw, pairs))
        return [t for t in taps if t[2]]            # drop taps fully in the halo

    def add_gather(m_out, rows_in, pairs):
        g = np.zeros((m_out, rows_in), np.float32)
        for ro, ri in pairs:
            g[ro, ri] = 1.0
        key = (m_out, rows_in)
        lst = gather_groups.setdefault(key, [])
        for i, prev in enumerate(lst):
            if np.array_equal(prev, g):             # dedup (down == center tap)
                return key, i
        lst.append(g)
        return key, len(lst) - 1

    def add_conv(w_hwio, bnp, hin, stride, pad, m_in):
        nonlocal wt_off
        w = np.asarray(w_hwio, np.float32)
        k, _, cin, cout = w.shape
        hout = _conv_out(hin, k, stride, pad)
        scale, shift = _fold_bn(bnp)
        rows_in, rows_out = batch * hin * hin, batch * hout * hout
        taps = tap_pairs(hin, hout, k, stride, pad)
        if stride == 1 and hin == hout and hin > 1:
            # stride-1 3x3: implemented with sublane shifts + masks in-kernel
            assert len(taps) == k * k and (hin & (hin - 1)) == 0
            assert rows_in == rows_out == m_in
            mode, m_out = dict(mode="shift", H=hin, W=hin), m_in
        elif (len(taps) == 1 and rows_in == rows_out
              and all(ro == ri for ro, ri in taps[0][2])):
            mode, m_out = dict(mode="direct"), m_in
        else:
            assert rows_in == m_in
            m_out = _round8(rows_out)
            gkey, ids = None, []
            for kh, kw, pairs in taps:
                gkey, gi = add_gather(m_out, rows_in, pairs)
                ids.append(gi)
            mode = dict(mode="gather", group=gkey, taps=tuple(ids))
        # K-stacked, BN-scale-folded weight slab for this conv: (taps*cin, 128)
        slab = np.concatenate([w[kh, kw] * scale[None, :] for kh, kw, _ in taps], axis=0)
        slab = np.pad(slab, ((0, 0), (0, LANES - cout)))
        K = slab.shape[0]
        assert K % 16 == 0 and wt_off % 16 == 0     # aligned bf16 row slices
        wt_slabs.append(slab)
        cv = dict(off=wt_off, K=K, cin=cin, bias=add_bias(shift), **mode)
        wt_off += K
        return cv, hout, m_out

    # --- stem -----------------------------------------------------------------
    h1 = _conv_out(image, 7, 2, 3)                  # 8
    h2 = _conv_out(h1, 3, 2, 1)                     # 4
    assert batch * h1 * h1 == 128, "stem row tile must be exactly 128 rows"
    scale1, shift1 = _fold_bn(params["bn1"])
    w1 = np.asarray(params["conv1_w"], np.float32).reshape(49 * 3, 16) * scale1[None, :]
    c1w = np.zeros((STEM_K, LANES), np.float32)
    c1w[: 49 * 3, :16] = w1
    stem_bias = add_bias(shift1)

    # --- maxpool 3x3/s2/p1 taps -------------------------------------------------
    m_pool = _round8(batch * h2 * h2)
    pool_key, pool_ids = None, []
    for kh, kw, pairs in tap_pairs(h1, h2, 3, 2, 1):
        pool_key, gi = add_gather(m_pool, batch * h1 * h1, pairs)
        pool_ids.append(gi)

    # --- residual blocks --------------------------------------------------------
    blocks, h, cur_m = [], h2, m_pool
    for name, stride in (("layer1", 1), ("layer2", 2), ("layer3", 2), ("layer4", 2)):
        lp = params[name]
        b1 = lp["b1"]
        down, m_dn = None, None
        if "down_w" in b1:
            down, _, m_dn = add_conv(b1["down_w"], b1["down_bn"], h, stride, 0, cur_m)
        c1, hout, m1 = add_conv(b1["w1"], b1["bn1"], h, stride, 1, cur_m)
        c2, _, m2 = add_conv(b1["w2"], b1["bn2"], hout, 1, 1, m1)
        assert m2 == m1 and (m_dn is None or m_dn == m2)
        blocks.append(dict(conv1=c1, conv2=c2, down=down))
        cur_m = m2
        b2 = lp["b2"]
        c1, _, m1 = add_conv(b2["w1"], b2["bn1"], hout, 1, 1, cur_m)
        c2, _, m2 = add_conv(b2["w2"], b2["bn2"], hout, 1, 1, m1)
        blocks.append(dict(conv1=c1, conv2=c2, down=None))
        cur_m, h = m2, hout

    # --- pack -------------------------------------------------------------------
    group_keys = list(gather_groups.keys())
    key_to_idx = {kk: i for i, kk in enumerate(group_keys)}
    for blk in blocks:
        for cv in (blk["conv1"], blk["conv2"], blk["down"]):
            if cv is not None and cv["mode"] == "gather":
                cv["group"] = key_to_idx[cv["group"]]
    pool = dict(group=key_to_idx[pool_key], taps=tuple(pool_ids))

    wts = np.concatenate(wt_slabs, axis=0)
    wts = np.pad(wts, ((0, (-wts.shape[0]) % 16), (0, 0)))
    biases = np.stack(bias_rows, axis=0)
    biases = np.pad(biases, ((0, (-biases.shape[0]) % 8), (0, 0)))
    gathers = [jnp.asarray(np.stack(gather_groups[kk]), jnp.float32)
               for kk in group_keys]

    plan = dict(stem_bias=stem_bias, pool=pool, blocks=blocks,
                n_gather_groups=len(group_keys), batch=batch, h1=h1,
                stem_rows=128, stem_k=STEM_K, out_rows_pad=cur_m,
                out_h=h, out_c=128)
    packed = dict(
        c1w=jnp.asarray(c1w, jnp.bfloat16),
        weights=jnp.asarray(wts, jnp.bfloat16),
        biases=jnp.asarray(biases, jnp.float32),
        gathers=gathers,
    )
    return plan, packed


# ----------------------------------------------------------------------------
# Forward pass: NCHW in / NCHW out (matching PyTorch)
# ----------------------------------------------------------------------------
def cnn_backbone_forward(plan, packed, x_nchw):
    n, h1 = plan["batch"], plan["h1"]
    cin = x_nchw.shape[1]
    x = jnp.transpose(x_nchw, (0, 2, 3, 1))                     # NCHW -> NHWC
    # im2col of the (tiny) network input for the 7x7/s2/p3 stem conv.
    xp = jnp.pad(x, ((0, 0), (3, 3), (3, 3), (0, 0)))
    cols = [xp[:, kh::2, kw::2, :][:, :h1, :h1, :]
            for kh in range(7) for kw in range(7)]
    patches = jnp.concatenate(cols, axis=-1).reshape(n * h1 * h1, 49 * cin)
    patches = jnp.pad(patches, ((0, plan["stem_rows"] - n * h1 * h1),
                                (0, plan["stem_k"] - 49 * cin))).astype(jnp.bfloat16)

    n_in = 4 + plan["n_gather_groups"]
    out = pl.pallas_call(
        partial(_backbone_kernel, plan=plan),
        out_shape=jax.ShapeDtypeStruct((plan["out_rows_pad"], LANES), jnp.float32),
        in_specs=[pl.BlockSpec(memory_space=pltpu.MemorySpace.VMEM)] * n_in,
        out_specs=pl.BlockSpec(memory_space=pltpu.MemorySpace.VMEM),
        compiler_params=pltpu.CompilerParams(vmem_limit_bytes=32 * 1024 * 1024),
    )(patches, packed["c1w"], packed["weights"], packed["biases"],
      *packed["gathers"])

    ho, oc = plan["out_h"], plan["out_c"]
    out = out[: n * ho * ho, :oc].reshape(n, ho, ho, oc)
    return jnp.transpose(out, (0, 3, 1, 2))                     # NHWC -> NCHW


# ----------------------------------------------------------------------------
# Pure-JAX reference (eval-mode BN), for the in-script correctness check
# ----------------------------------------------------------------------------
def _ref_forward(params, x):
    def conv(x, w, stride, pad):
        return lax.conv_general_dilated(
            x, w, (stride, stride), [(pad, pad), (pad, pad)],
            dimension_numbers=("NCHW", "HWIO", "NCHW"))

    def bn(x, p):
        s = p["gamma"] / jnp.sqrt(p["var"] + EPS)
        b = p["beta"] - p["mean"] * s
        return x * s[None, :, None, None] + b[None, :, None, None]

    def block(x, bp, stride):
        idn = x
        if "down_w" in bp:
            idn = bn(conv(x, bp["down_w"], stride, 0), bp["down_bn"])
        h = jnp.maximum(bn(conv(x, bp["w1"], stride, 1), bp["bn1"]), 0.0)
        h = bn(conv(h, bp["w2"], 1, 1), bp["bn2"])
        return jnp.maximum(h + idn, 0.0)

    y = jnp.maximum(bn(conv(x, params["conv1_w"], 2, 3), params["bn1"]), 0.0)
    y = lax.reduce_window(y, -jnp.inf, lax.max, (1, 1, 3, 3), (1, 1, 2, 2),
                          [(0, 0), (0, 0), (1, 1), (1, 1)])
    for name, stride in (("layer1", 1), ("layer2", 2), ("layer3", 2), ("layer4", 2)):
        lp = params[name]
        y = block(y, lp["b1"], stride)
        y = block(y, lp["b2"], 1)
    return y


# ----------------------------------------------------------------------------
# Deterministic parameter initialization (shapes from CNNBackBone.__init__)
# ----------------------------------------------------------------------------
def _conv_init(key, kh, kw, cin, cout):
    fan_in = kh * kw * cin
    return jax.random.normal(key, (kh, kw, cin, cout), jnp.float32) * (2.0 / fan_in) ** 0.5


def _bn_init(key, c):
    k1, k2, k3, k4 = jax.random.split(key, 4)
    return dict(
        gamma=1.0 + 0.1 * jax.random.normal(k1, (c,), jnp.float32),
        beta=0.1 * jax.random.normal(k2, (c,), jnp.float32),
        mean=0.1 * jax.random.normal(k3, (c,), jnp.float32),
        var=0.5 + jax.random.uniform(k4, (c,), jnp.float32),
    )


def _make_layer_params(key, cin, stride):
    cout = cin * stride
    ks = jax.random.split(key, 10)
    b1 = dict(
        w1=_conv_init(ks[0], 3, 3, cin, cout), bn1=_bn_init(ks[1], cout),
        w2=_conv_init(ks[2], 3, 3, cout, cout), bn2=_bn_init(ks[3], cout),
    )
    if stride != 1:
        b1["down_w"] = _conv_init(ks[4], 1, 1, cin, cout)
        b1["down_bn"] = _bn_init(ks[5], cout)
    b2 = dict(
        w1=_conv_init(ks[6], 3, 3, cout, cout), bn1=_bn_init(ks[7], cout),
        w2=_conv_init(ks[8], 3, 3, cout, cout), bn2=_bn_init(ks[9], cout),
    )
    return dict(b1=b1, b2=b2)


def init_params(key):
    ks = jax.random.split(key, 6)
    return dict(
        conv1_w=_conv_init(ks[0], 7, 7, 3, 16),
        bn1=_bn_init(ks[1], 16),
        layer1=_make_layer_params(ks[2], 16, 1),
        layer2=_make_layer_params(ks[3], 16, 2),
        layer3=_make_layer_params(ks[4], 32, 2),
        layer4=_make_layer_params(ks[5], 64, 2),
    )


if __name__ == "__main__":
    key = jax.random.PRNGKey(0)
    pkey, xkey = jax.random.split(key)
    params = init_params(pkey)
    x = jax.random.normal(xkey, (2, 3, 16, 16), jnp.float32)

    plan, packed = build_model(params, batch=2, image=16)
    fwd = jax.jit(partial(cnn_backbone_forward, plan))
    out = jax.block_until_ready(fwd(packed, x))

    # 16x16 -> conv1(s2) 8x8 -> maxpool 4x4 -> layer2 2x2 -> layer3 1x1 -> layer4 1x1
    assert out.shape == (2, 128, 1, 1), out.shape
    assert bool(jnp.all(jnp.isfinite(out)))

    # Pure-JAX reference (eval-mode BN); tolerance sized for bf16 matmul inputs.
    ref = jax.block_until_ready(jax.jit(_ref_forward)(params, x))
    err = float(jnp.max(jnp.abs(out - ref)))
    scale = float(jnp.max(jnp.abs(ref)))
    assert err <= 0.05 * scale + 0.05, (err, scale)
    print("KERNEL_OK")
</pallas_src>

<mosaic_0001>
module attributes {stable_mosaic.version = 11 : i64} {
  func.func @_backbone_kernel(%arg0: memref<128x160xbf16, #tpu.memory_space<vmem>>, %arg1: memref<160x128xbf16, #tpu.memory_space<vmem>>, %arg2: memref<2464x128xbf16, #tpu.memory_space<vmem>>, %arg3: memref<24x128xf32, #tpu.memory_space<vmem>>, %arg4: memref<9x32x128xf32, #tpu.memory_space<vmem>>, %arg5: memref<9x8x32xf32, #tpu.memory_space<vmem>>, %arg6: memref<4x8x8xf32, #tpu.memory_space<vmem>>, %arg7: memref<8x128xf32, #tpu.memory_space<vmem>>) attributes {dimension_semantics = [], scalar_prefetch = 0 : i64, scratch_operands = 0 : i64, tpu.core_type = #tpu.core_type<tc>} {
    %c0 = arith.constant 0 : index
    %c0_0 = arith.constant 0 : index
    %0 = vector.load %arg0[%c0, %c0_0] : memref<128x160xbf16, #tpu.memory_space<vmem>>, vector<128x160xbf16>
    %c0_1 = arith.constant 0 : index
    %c0_2 = arith.constant 0 : index
    %1 = vector.load %arg1[%c0_1, %c0_2] : memref<160x128xbf16, #tpu.memory_space<vmem>>, vector<160x128xbf16>
    %cst = arith.constant dense<0.000000e+00> : vector<128x128xf32>
    %2 = tpu.matmul %0, %1, %cst {dimension_numbers = #tpu.dot_dimension_numbers<[1], [0], [0], [1], [0, 0, 1, 1], [], []>} : vector<128x160xbf16>, vector<160x128xbf16>, vector<128x128xf32> -> vector<128x128xf32>
    %c0_3 = arith.constant 0 : index
    %c0_4 = arith.constant 0 : index
    %3 = vector.load %arg3[%c0_3, %c0_4] : memref<24x128xf32, #tpu.memory_space<vmem>>, vector<1x128xf32>
    %4 = vector.broadcast %3 : vector<1x128xf32> to vector<128x128xf32>
    %5 = arith.addf %2, %4 : vector<128x128xf32>
    %cst_5 = arith.constant 0.000000e+00 : f32
    %6 = vector.broadcast %cst_5 : f32 to vector<128x128xf32>
    %7 = arith.maximumf %5, %6 : vector<128x128xf32>
    %c0_6 = arith.constant 0 : index
    %c0_7 = arith.constant 0 : index
    %c0_8 = arith.constant 0 : index
    %8 = vector.load %arg4[%c0_6, %c0_7, %c0_8] : memref<9x32x128xf32, #tpu.memory_space<vmem>>, vector<1x32x128xf32>
    %9 = vector.shape_cast %8 : vector<1x32x128xf32> to vector<32x128xf32>
    %cst_9 = arith.constant dense<0.000000e+00> : vector<32x128xf32>
    %10 = tpu.matmul %9, %7, %cst_9 {dimension_numbers = #tpu.dot_dimension_numbers<[1], [0], [0], [1], [0, 0, 1, 1], [], []>} : vector<32x128xf32>, vector<128x128xf32>, vector<32x128xf32> -> vector<32x128xf32>
    %c1 = arith.constant 1 : index
    %c0_10 = arith.constant 0 : index
    %c0_11 = arith.constant 0 : index
    %11 = vector.load %arg4[%c1, %c0_10, %c0_11] : memref<9x32x128xf32, #tpu.memory_space<vmem>>, vector<1x32x128xf32>
    %12 = vector.shape_cast %11 : vector<1x32x128xf32> to vector<32x128xf32>
    %cst_12 = arith.constant dense<0.000000e+00> : vector<32x128xf32>
    %13 = tpu.matmul %12, %7, %cst_12 {dimension_numbers = #tpu.dot_dimension_numbers<[1], [0], [0], [1], [0, 0, 1, 1], [], []>} : vector<32x128xf32>, vector<128x128xf32>, vector<32x128xf32> -> vector<32x128xf32>
    %14 = arith.maximumf %10, %13 : vector<32x128xf32>
    %c2 = arith.constant 2 : index
    %c0_13 = arith.constant 0 : index
    %c0_14 = arith.constant 0 : index
    %15 = vector.load %arg4[%c2, %c0_13, %c0_14] : memref<9x32x128xf32, #tpu.memory_space<vmem>>, vector<1x32x128xf32>
    %16 = vector.shape_cast %15 : vector<1x32x128xf32> to vector<32x128xf32>
    %cst_15 = arith.constant dense<0.000000e+00> : vector<32x128xf32>
    %17 = tpu.matmul %16, %7, %cst_15 {dimension_numbers = #tpu.dot_dimension_numbers<[1], [0], [0], [1], [0, 0, 1, 1], [], []>} : vector<32x128xf32>, vector<128x128xf32>, vector<32x128xf32> -> vector<32x128xf32>
    %18 = arith.maximumf %14, %17 : vector<32x128xf32>
    %c3 = arith.constant 3 : index
    %c0_16 = arith.constant 0 : index
    %c0_17 = arith.constant 0 : index
    %19 = vector.load %arg4[%c3, %c0_16, %c0_17] : memref<9x32x128xf32, #tpu.memory_space<vmem>>, vector<1x32x128xf32>
    %20 = vector.shape_cast %19 : vector<1x32x128xf32> to vector<32x128xf32>
    %cst_18 = arith.constant dense<0.000000e+00> : vector<32x128xf32>
    %21 = tpu.matmul %20, %7, %cst_18 {dimension_numbers = #tpu.dot_dimension_numbers<[1], [0], [0], [1], [0, 0, 1, 1], [], []>} : vector<32x128xf32>, vector<128x128xf32>, vector<32x128xf32> -> vector<32x128xf32>
    %22 = arith.maximumf %18, %21 : vector<32x128xf32>
    %c4 = arith.constant 4 : index
    %c0_19 = arith.constant 0 : index
    %c0_20 = arith.constant 0 : index
    %23 = vector.load %arg4[%c4, %c0_19, %c0_20] : memref<9x32x128xf32, #tpu.memory_space<vmem>>, vector<1x32x128xf32>
    %24 = vector.shape_cast %23 : vector<1x32x128xf32> to vector<32x128xf32>
    %cst_21 = arith.constant dense<0.000000e+00> : vector<32x128xf32>
    %25 = tpu.matmul %24, %7, %cst_21 {dimension_numbers = #tpu.dot_dimension_numbers<[1], [0], [0], [1], [0, 0, 1, 1], [], []>} : vector<32x128xf32>, vector<128x128xf32>, vector<32x128xf32> -> vector<32x128xf32>
    %26 = arith.maximumf %22, %25 : vector<32x128xf32>
    %c5 = arith.constant 5 : index
    %c0_22 = arith.constant 0 : index
    %c0_23 = arith.constant 0 : index
    %27 = vector.load %arg4[%c5, %c0_22, %c0_23] : memref<9x32x128xf32, #tpu.memory_space<vmem>>, vector<1x32x128xf32>
    %28 = vector.shape_cast %27 : vector<1x32x128xf32> to vector<32x128xf32>
    %cst_24 = arith.constant dense<0.000000e+00> : vector<32x128xf32>
    %29 = tpu.matmul %28, %7, %cst_24 {dimension_numbers = #tpu.dot_dimension_numbers<[1], [0], [0], [1], [0, 0, 1, 1], [], []>} : vector<32x128xf32>, vector<128x128xf32>, vector<32x128xf32> -> vector<32x128xf32>
    %30 = arith.maximumf %26, %29 : vector<32x128xf32>
    %c6 = arith.constant 6 : index
    %c0_25 = arith.constant 0 : index
    %c0_26 = arith.constant 0 : index
    %31 = vector.load %arg4[%c6, %c0_25, %c0_26] : memref<9x32x128xf32, #tpu.memory_space<vmem>>, vector<1x32x128xf32>
    %32 = vector.shape_cast %31 : vector<1x32x128xf32> to vector<32x128xf32>
    %cst_27 = arith.constant dense<0.000000e+00> : vector<32x128xf32>
    %33 = tpu.matmul %32, %7, %cst_27 {dimension_numbers = #tpu.dot_dimension_numbers<[1], [0], [0], [1], [0, 0, 1, 1], [], []>} : vector<32x128xf32>, vector<128x128xf32>, vector<32x128xf32> -> vector<32x128xf32>
    %34 = arith.maximumf %30, %33 : vector<32x128xf32>
    %c7 = arith.constant 7 : index
    %c0_28 = arith.constant 0 : index
    %c0_29 = arith.constant 0 : index
    %35 = vector.load %arg4[%c7, %c0_28, %c0_29] : memref<9x32x128xf32, #tpu.memory_space<vmem>>, vector<1x32x128xf32>
    %36 = vector.shape_cast %35 : vector<1x32x128xf32> to vector<32x128xf32>
    %cst_30 = arith.constant dense<0.000000e+00> : vector<32x128xf32>
    %37 = tpu.matmul %36, %7, %cst_30 {dimension_numbers = #tpu.dot_dimension_numbers<[1], [0], [0], [1], [0, 0, 1, 1], [], []>} : vector<32x128xf32>, vector<128x128xf32>, vector<32x128xf32> -> vector<32x128xf32>
    %38 = arith.maximumf %34, %37 : vector<32x128xf32>
    %c8 = arith.constant 8 : index
    %c0_31 = arith.constant 0 : index
    %c0_32 = arith.constant 0 : index
    %39 = vector.load %arg4[%c8, %c0_31, %c0_32] : memref<9x32x128xf32, #tpu.memory_space<vmem>>, vector<1x32x128xf32>
    %40 = vector.shape_cast %39 : vector<1x32x128xf32> to vector<32x128xf32>
    %cst_33 = arith.constant dense<0.000000e+00> : vector<32x128xf32>
    %41 = tpu.matmul %40, %7, %cst_33 {dimension_numbers = #tpu.dot_dimension_numbers<[1], [0], [0], [1], [0, 0, 1, 1], [], []>} : vector<32x128xf32>, vector<128x128xf32>, vector<32x128xf32> -> vector<32x128xf32>
    %42 = arith.maximumf %38, %41 : vector<32x128xf32>
    %43 = vector.extract_strided_slice %42 {offsets = [0, 0], sizes = [32, 16], strides = [1, 1]} : vector<32x128xf32> to vector<32x16xf32>
    %44 = tpu.iota {dimensions = array<i32: 0>} : vector<32x1xi32>
    %c15_i32 = arith.constant 15 : i32
    %45 = vector.broadcast %c15_i32 : i32 to vector<32x1xi32>
    %46 = arith.andi %44, %45 : vector<32x1xi32>
    %c2_i32 = arith.constant 2 : i32
    %47 = vector.broadcast %c2_i32 : i32 to vector<32x1xi32>
    %48 = arith.shrsi %46, %47 : vector<32x1xi32>
    %c3_i32 = arith.constant 3 : i32
    %49 = vector.broadcast %c3_i32 : i32 to vector<32x1xi32>
    %50 = arith.andi %46, %49 : vector<32x1xi32>
    %cst_34 = arith.constant 0.000000e+00 : f32
    %51 = vector.broadcast %cst_34 : f32 to vector<5x16xf32>
    %52 = vector.extract_strided_slice %43 {offsets = [0, 0], sizes = [27, 16], strides = [1, 1]} : vector<32x16xf32> to vector<27x16xf32>
    %53 = tpu.concatenate %51, %52 in 0 : vector<5x16xf32>, vector<27x16xf32> -> vector<32x16xf32>
    %c-1_i32 = arith.constant -1 : i32
    %54 = vector.broadcast %c-1_i32 : i32 to vector<32x1xi32>
    %55 = arith.addi %48, %54 : vector<32x1xi32>
    %c0_i32 = arith.constant 0 : i32
    %56 = vector.broadcast %c0_i32 : i32 to vector<32x1xi32>
    %57 = arith.cmpi sge, %55, %56 : vector<32x1xi32>
    %c-1_i32_35 = arith.constant -1 : i32
    %58 = vector.broadcast %c-1_i32_35 : i32 to vector<32x1xi32>
    %59 = arith.addi %48, %58 : vector<32x1xi32>
    %c4_i32 = arith.constant 4 : i32
    %60 = vector.broadcast %c4_i32 : i32 to vector<32x1xi32>
    %61 = arith.cmpi slt, %59, %60 : vector<32x1xi32>
    %62 = arith.andi %57, %61 : vector<32x1xi1>
    %c-1_i32_36 = arith.constant -1 : i32
    %63 = vector.broadcast %c-1_i32_36 : i32 to vector<32x1xi32>
    %64 = arith.addi %50, %63 : vector<32x1xi32>
    %c0_i32_37 = arith.constant 0 : i32
    %65 = vector.broadcast %c0_i32_37 : i32 to vector<32x1xi32>
    %66 = arith.cmpi sge, %64, %65 : vector<32x1xi32>
    %67 = arith.andi %62, %66 : vector<32x1xi1>
    %c-1_i32_38 = arith.constant -1 : i32
    %68 = vector.broadcast %c-1_i32_38 : i32 to vector<32x1xi32>
    %69 = arith.addi %50, %68 : vector<32x1xi32>
    %c4_i32_39 = arith.constant 4 : i32
    %70 = vector.broadcast %c4_i32_39 : i32 to vector<32x1xi32>
    %71 = arith.cmpi slt, %69, %70 : vector<32x1xi32>
    %72 = arith.andi %67, %71 : vector<32x1xi1>
    %73 = arith.extui %72 : vector<32x1xi1> to vector<32x1xi32>
    %74 = arith.sitofp %73 : vector<32x1xi32> to vector<32x1xf32>
    %75 = vector.broadcast %74 : vector<32x1xf32> to vector<32x16xf32>
    %76 = arith.mulf %53, %75 : vector<32x16xf32>
    %cst_40 = arith.constant 0.000000e+00 : f32
    %77 = vector.broadcast %cst_40 : f32 to vector<4x16xf32>
    %78 = vector.extract_strided_slice %43 {offsets = [0, 0], sizes = [28, 16], strides = [1, 1]} : vector<32x16xf32> to vector<28x16xf32>
    %79 = tpu.concatenate %77, %78 in 0 : vector<4x16xf32>, vector<28x16xf32> -> vector<32x16xf32>
    %c-1_i32_41 = arith.constant -1 : i32
    %80 = vector.broadcast %c-1_i32_41 : i32 to vector<32x1xi32>
    %81 = arith.addi %48, %80 : vector<32x1xi32>
    %c0_i32_42 = arith.constant 0 : i32
    %82 = vector.broadcast %c0_i32_42 : i32 to vector<32x1xi32>
    %83 = arith.cmpi sge, %81, %82 : vector<32x1xi32>
    %c-1_i32_43 = arith.constant -1 : i32
    %84 = vector.broadcast %c-1_i32_43 : i32 to vector<32x1xi32>
    %85 = arith.addi %48, %84 : vector<32x1xi32>
    %c4_i32_44 = arith.constant 4 : i32
    %86 = vector.broadcast %c4_i32_44 : i32 to vector<32x1xi32>
    %87 = arith.cmpi slt, %85, %86 : vector<32x1xi32>
    %88 = arith.andi %83, %87 : vector<32x1xi1>
    %c0_i32_45 = arith.constant 0 : i32
    %89 = vector.broadcast %c0_i32_45 : i32 to vector<32x1xi32>
    %90 = arith.addi %50, %89 : vector<32x1xi32>
    %c0_i32_46 = arith.constant 0 : i32
    %91 = vector.broadcast %c0_i32_46 : i32 to vector<32x1xi32>
    %92 = arith.cmpi sge, %90, %91 : vector<32x1xi32>
    %93 = arith.andi %88, %92 : vector<32x1xi1>
    %c0_i32_47 = arith.constant 0 : i32
    %94 = vector.broadcast %c0_i32_47 : i32 to vector<32x1xi32>
    %95 = arith.addi %50, %94 : vector<32x1xi32>
    %c4_i32_48 = arith.constant 4 : i32
    %96 = vector.broadcast %c4_i32_48 : i32 to vector<32x1xi32>
    %97 = arith.cmpi slt, %95, %96 : vector<32x1xi32>
    %98 = arith.andi %93, %97 : vector<32x1xi1>
    %99 = arith.extui %98 : vector<32x1xi1> to vector<32x1xi32>
    %100 = arith.sitofp %99 : vector<32x1xi32> to vector<32x1xf32>
    %101 = vector.broadcast %100 : vector<32x1xf32> to vector<32x16xf32>
    %102 = arith.mulf %79, %101 : vector<32x16xf32>
    %cst_49 = arith.constant 0.000000e+00 : f32
    %103 = vector.broadcast %cst_49 : f32 to vector<3x16xf32>
    %104 = vector.extract_strided_slice %43 {offsets = [0, 0], sizes = [29, 16], strides = [1, 1]} : vector<32x16xf32> to vector<29x16xf32>
    %105 = tpu.concatenate %103, %104 in 0 : vector<3x16xf32>, vector<29x16xf32> -> vector<32x16xf32>
    %c-1_i32_50 = arith.constant -1 : i32
    %106 = vector.broadcast %c-1_i32_50 : i32 to vector<32x1xi32>
    %107 = arith.addi %48, %106 : vector<32x1xi32>
    %c0_i32_51 = arith.constant 0 : i32
    %108 = vector.broadcast %c0_i32_51 : i32 to vector<32x1xi32>
    %109 = arith.cmpi sge, %107, %108 : vector<32x1xi32>
    %c-1_i32_52 = arith.constant -1 : i32
    %110 = vector.broadcast %c-1_i32_52 : i32 to vector<32x1xi32>
    %111 = arith.addi %48, %110 : vector<32x1xi32>
    %c4_i32_53 = arith.constant 4 : i32
    %112 = vector.broadcast %c4_i32_53 : i32 to vector<32x1xi32>
    %113 = arith.cmpi slt, %111, %112 : vector<32x1xi32>
    %114 = arith.andi %109, %113 : vector<32x1xi1>
    %c1_i32 = arith.constant 1 : i32
    %115 = vector.broadcast %c1_i32 : i32 to vector<32x1xi32>
    %116 = arith.addi %50, %115 : vector<32x1xi32>
    %c0_i32_54 = arith.constant 0 : i32
    %117 = vector.broadcast %c0_i32_54 : i32 to vector<32x1xi32>
    %118 = arith.cmpi sge, %116, %117 : vector<32x1xi32>
    %119 = arith.andi %114, %118 : vector<32x1xi1>
    %c1_i32_55 = arith.constant 1 : i32
    %120 = vector.broadcast %c1_i32_55 : i32 to vector<32x1xi32>
    %121 = arith.addi %50, %120 : vector<32x1xi32>
    %c4_i32_56 = arith.constant 4 : i32
    %122 = vector.broadcast %c4_i32_56 : i32 to vector<32x1xi32>
    %123 = arith.cmpi slt, %121, %122 : vector<32x1xi32>
    %124 = arith.andi %119, %123 : vector<32x1xi1>
    %125 = arith.extui %124 : vector<32x1xi1> to vector<32x1xi32>
    %126 = arith.sitofp %125 : vector<32x1xi32> to vector<32x1xf32>
    %127 = vector.broadcast %126 : vector<32x1xf32> to vector<32x16xf32>
    %128 = arith.mulf %105, %127 : vector<32x16xf32>
    %cst_57 = arith.constant 0.000000e+00 : f32
    %129 = vector.broadcast %cst_57 : f32 to vector<1x16xf32>
    %130 = vector.extract_strided_slice %43 {offsets = [0, 0], sizes = [31, 16], strides = [1, 1]} : vector<32x16xf32> to vector<31x16xf32>
    %131 = tpu.concatenate %129, %130 in 0 : vector<1x16xf32>, vector<31x16xf32> -> vector<32x16xf32>
    %c0_i32_58 = arith.constant 0 : i32
    %132 = vector.broadcast %c0_i32_58 : i32 to vector<32x1xi32>
    %133 = arith.addi %48, %132 : vector<32x1xi32>
    %c0_i32_59 = arith.constant 0 : i32
    %134 = vector.broadcast %c0_i32_59 : i32 to vector<32x1xi32>
    %135 = arith.cmpi sge, %133, %134 : vector<32x1xi32>
    %c0_i32_60 = arith.constant 0 : i32
    %136 = vector.broadcast %c0_i32_60 : i32 to vector<32x1xi32>
    %137 = arith.addi %48, %136 : vector<32x1xi32>
    %c4_i32_61 = arith.constant 4 : i32
    %138 = vector.broadcast %c4_i32_61 : i32 to vector<32x1xi32>
    %139 = arith.cmpi slt, %137, %138 : vector<32x1xi32>
    %140 = arith.andi %135, %139 : vector<32x1xi1>
    %c-1_i32_62 = arith.constant -1 : i32
    %141 = vector.broadcast %c-1_i32_62 : i32 to vector<32x1xi32>
    %142 = arith.addi %50, %141 : vector<32x1xi32>
    %c0_i32_63 = arith.constant 0 : i32
    %143 = vector.broadcast %c0_i32_63 : i32 to vector<32x1xi32>
    %144 = arith.cmpi sge, %142, %143 : vector<32x1xi32>
    %145 = arith.andi %140, %144 : vector<32x1xi1>
    %c-1_i32_64 = arith.constant -1 : i32
    %146 = vector.broadcast %c-1_i32_64 : i32 to vector<32x1xi32>
    %147 = arith.addi %50, %146 : vector<32x1xi32>
    %c4_i32_65 = arith.constant 4 : i32
    %148 = vector.broadcast %c4_i32_65 : i32 to vector<32x1xi32>
    %149 = arith.cmpi slt, %147, %148 : vector<32x1xi32>
    %150 = arith.andi %145, %149 : vector<32x1xi1>
    %151 = arith.extui %150 : vector<32x1xi1> to vector<32x1xi32>
    %152 = arith.sitofp %151 : vector<32x1xi32> to vector<32x1xf32>
    %153 = vector.broadcast %152 : vector<32x1xf32> to vector<32x16xf32>
    %154 = arith.mulf %131, %153 : vector<32x16xf32>
    %cst_66 = arith.constant 0.000000e+00 : f32
    %155 = vector.broadcast %cst_66 : f32 to vector<1x16xf32>
    %156 = vector.extract_strided_slice %43 {offsets = [1, 0], sizes = [31, 16], strides = [1, 1]} : vector<32x16xf32> to vector<31x16xf32>
    %157 = tpu.concatenate %156, %155 in 0 : vector<31x16xf32>, vector<1x16xf32> -> vector<32x16xf32>
    %c0_i32_67 = arith.constant 0 : i32
    %158 = vector.broadcast %c0_i32_67 : i32 to vector<32x1xi32>
    %159 = arith.addi %48, %158 : vector<32x1xi32>
    %c0_i32_68 = arith.constant 0 : i32
    %160 = vector.broadcast %c0_i32_68 : i32 to vector<32x1xi32>
    %161 = arith.cmpi sge, %159, %160 : vector<32x1xi32>
    %c0_i32_69 = arith.constant 0 : i32
    %162 = vector.broadcast %c0_i32_69 : i32 to vector<32x1xi32>
    %163 = arith.addi %48, %162 : vector<32x1xi32>
    %c4_i32_70 = arith.constant 4 : i32
    %164 = vector.broadcast %c4_i32_70 : i32 to vector<32x1xi32>
    %165 = arith.cmpi slt, %163, %164 : vector<32x1xi32>
    %166 = arith.andi %161, %165 : vector<32x1xi1>
    %c1_i32_71 = arith.constant 1 : i32
    %167 = vector.broadcast %c1_i32_71 : i32 to vector<32x1xi32>
    %168 = arith.addi %50, %167 : vector<32x1xi32>
    %c0_i32_72 = arith.constant 0 : i32
    %169 = vector.broadcast %c0_i32_72 : i32 to vector<32x1xi32>
    %170 = arith.cmpi sge, %168, %169 : vector<32x1xi32>
    %171 = arith.andi %166, %170 : vector<32x1xi1>
    %c1_i32_73 = arith.constant 1 : i32
    %172 = vector.broadcast %c1_i32_73 : i32 to vector<32x1xi32>
    %173 = arith.addi %50, %172 : vector<32x1xi32>
    %c4_i32_74 = arith.constant 4 : i32
    %174 = vector.broadcast %c4_i32_74 : i32 to vector<32x1xi32>
    %175 = arith.cmpi slt, %173, %174 : vector<32x1xi32>
    %176 = arith.andi %171, %175 : vector<32x1xi1>
    %177 = arith.extui %176 : vector<32x1xi1> to vector<32x1xi32>
    %178 = arith.sitofp %177 : vector<32x1xi32> to vector<32x1xf32>
    %179 = vector.broadcast %178 : vector<32x1xf32> to vector<32x16xf32>
    %180 = arith.mulf %157, %179 : vector<32x16xf32>
    %cst_75 = arith.constant 0.000000e+00 : f32
    %181 = vector.broadcast %cst_75 : f32 to vector<3x16xf32>
    %182 = vector.extract_strided_slice %43 {offsets = [3, 0], sizes = [29, 16], strides = [1, 1]} : vector<32x16xf32> to vector<29x16xf32>
    %183 = tpu.concatenate %182, %181 in 0 : vector<29x16xf32>, vector<3x16xf32> -> vector<32x16xf32>
    %c1_i32_76 = arith.constant 1 : i32
    %184 = vector.broadcast %c1_i32_76 : i32 to vector<32x1xi32>
    %185 = arith.addi %48, %184 : vector<32x1xi32>
    %c0_i32_77 = arith.constant 0 : i32
    %186 = vector.broadcast %c0_i32_77 : i32 to vector<32x1xi32>
    %187 = arith.cmpi sge, %185, %186 : vector<32x1xi32>
    %c1_i32_78 = arith.constant 1 : i32
    %188 = vector.broadcast %c1_i32_78 : i32 to vector<32x1xi32>
    %189 = arith.addi %48, %188 : vector<32x1xi32>
    %c4_i32_79 = arith.constant 4 : i32
    %190 = vector.broadcast %c4_i32_79 : i32 to vector<32x1xi32>
    %191 = arith.cmpi slt, %189, %190 : vector<32x1xi32>
    %192 = arith.andi %187, %191 : vector<32x1xi1>
    %c-1_i32_80 = arith.constant -1 : i32
    %193 = vector.broadcast %c-1_i32_80 : i32 to vector<32x1xi32>
    %194 = arith.addi %50, %193 : vector<32x1xi32>
    %c0_i32_81 = arith.constant 0 : i32
    %195 = vector.broadcast %c0_i32_81 : i32 to vector<32x1xi32>
    %196 = arith.cmpi sge, %194, %195 : vector<32x1xi32>
    %197 = arith.andi %192, %196 : vector<32x1xi1>
    %c-1_i32_82 = arith.constant -1 : i32
    %198 = vector.broadcast %c-1_i32_82 : i32 to vector<32x1xi32>
    %199 = arith.addi %50, %198 : vector<32x1xi32>
    %c4_i32_83 = arith.constant 4 : i32
    %200 = vector.broadcast %c4_i32_83 : i32 to vector<32x1xi32>
    %201 = arith.cmpi slt, %199, %200 : vector<32x1xi32>
    %202 = arith.andi %197, %201 : vector<32x1xi1>
    %203 = arith.extui %202 : vector<32x1xi1> to vector<32x1xi32>
    %204 = arith.sitofp %203 : vector<32x1xi32> to vector<32x1xf32>
    %205 = vector.broadcast %204 : vector<32x1xf32> to vector<32x16xf32>
    %206 = arith.mulf %183, %205 : vector<32x16xf32>
    %cst_84 = arith.constant 0.000000e+00 : f32
    %207 = vector.broadcast %cst_84 : f32 to vector<4x16xf32>
    %208 = vector.extract_strided_slice %43 {offsets = [4, 0], sizes = [28, 16], strides = [1, 1]} : vector<32x16xf32> to vector<28x16xf32>
    %209 = tpu.concatenate %208, %207 in 0 : vector<28x16xf32>, vector<4x16xf32> -> vector<32x16xf32>
    %c1_i32_85 = arith.constant 1 : i32
    %210 = vector.broadcast %c1_i32_85 : i32 to vector<32x1xi32>
    %211 = arith.addi %48, %210 : vector<32x1xi32>
    %c0_i32_86 = arith.constant 0 : i32
    %212 = vector.broadcast %c0_i32_86 : i32 to vector<32x1xi32>
    %213 = arith.cmpi sge, %211, %212 : vector<32x1xi32>
    %c1_i32_87 = arith.constant 1 : i32
    %214 = vector.broadcast %c1_i32_87 : i32 to vector<32x1xi32>
    %215 = arith.addi %48, %214 : vector<32x1xi32>
    %c4_i32_88 = arith.constant 4 : i32
    %216 = vector.broadcast %c4_i32_88 : i32 to vector<32x1xi32>
    %217 = arith.cmpi slt, %215, %216 : vector<32x1xi32>
    %218 = arith.andi %213, %217 : vector<32x1xi1>
    %c0_i32_89 = arith.constant 0 : i32
    %219 = vector.broadcast %c0_i32_89 : i32 to vector<32x1xi32>
    %220 = arith.addi %50, %219 : vector<32x1xi32>
    %c0_i32_90 = arith.constant 0 : i32
    %221 = vector.broadcast %c0_i32_90 : i32 to vector<32x1xi32>
    %222 = arith.cmpi sge, %220, %221 : vector<32x1xi32>
    %223 = arith.andi %218, %222 : vector<32x1xi1>
    %c0_i32_91 = arith.constant 0 : i32
    %224 = vector.broadcast %c0_i32_91 : i32 to vector<32x1xi32>
    %225 = arith.addi %50, %224 : vector<32x1xi32>
    %c4_i32_92 = arith.constant 4 : i32
    %226 = vector.broadcast %c4_i32_92 : i32 to vector<32x1xi32>
    %227 = arith.cmpi slt, %225, %226 : vector<32x1xi32>
    %228 = arith.andi %223, %227 : vector<32x1xi1>
    %229 = arith.extui %228 : vector<32x1xi1> to vector<32x1xi32>
    %230 = arith.sitofp %229 : vector<32x1xi32> to vector<32x1xf32>
    %231 = vector.broadcast %230 : vector<32x1xf32> to vector<32x16xf32>
    %232 = arith.mulf %209, %231 : vector<32x16xf32>
    %cst_93 = arith.constant 0.000000e+00 : f32
    %233 = vector.broadcast %cst_93 : f32 to vector<5x16xf32>
    %234 = vector.extract_strided_slice %43 {offsets = [5, 0], sizes = [27, 16], strides = [1, 1]} : vector<32x16xf32> to vector<27x16xf32>
    %235 = tpu.concatenate %234, %233 in 0 : vector<27x16xf32>, vector<5x16xf32> -> vector<32x16xf32>
    %c1_i32_94 = arith.constant 1 : i32
    %236 = vector.broadcast %c1_i32_94 : i32 to vector<32x1xi32>
    %237 = arith.addi %48, %236 : vector<32x1xi32>
    %c0_i32_95 = arith.constant 0 : i32
    %238 = vector.broadcast %c0_i32_95 : i32 to vector<32x1xi32>
    %239 = arith.cmpi sge, %237, %238 : vector<32x1xi32>
    %c1_i32_96 = arith.constant 1 : i32
    %240 = vector.broadcast %c1_i32_96 : i32 to vector<32x1xi32>
    %241 = arith.addi %48, %240 : vector<32x1xi32>
    %c4_i32_97 = arith.constant 4 : i32
    %242 = vector.broadcast %c4_i32_97 : i32 to vector<32x1xi32>
    %243 = arith.cmpi slt, %241, %242 : vector<32x1xi32>
    %244 = arith.andi %239, %243 : vector<32x1xi1>
    %c1_i32_98 = arith.constant 1 : i32
    %245 = vector.broadcast %c1_i32_98 : i32 to vector<32x1xi32>
    %246 = arith.addi %50, %245 : vector<32x1xi32>
    %c0_i32_99 = arith.constant 0 : i32
    %247 = vector.broadcast %c0_i32_99 : i32 to vector<32x1xi32>
    %248 = arith.cmpi sge, %246, %247 : vector<32x1xi32>
    %249 = arith.andi %244, %248 : vector<32x1xi1>
    %c1_i32_100 = arith.constant 1 : i32
    %250 = vector.broadcast %c1_i32_100 : i32 to vector<32x1xi32>
    %251 = arith.addi %50, %250 : vector<32x1xi32>
    %c4_i32_101 = arith.constant 4 : i32
    %252 = vector.broadcast %c4_i32_101 : i32 to vector<32x1xi32>
    %253 = arith.cmpi slt, %251, %252 : vector<32x1xi32>
    %254 = arith.andi %249, %253 : vector<32x1xi1>
    %255 = arith.extui %254 : vector<32x1xi1> to vector<32x1xi32>
    %256 = arith.sitofp %255 : vector<32x1xi32> to vector<32x1xf32>
    %257 = vector.broadcast %256 : vector<32x1xf32> to vector<32x16xf32>
    %258 = arith.mulf %235, %257 : vector<32x16xf32>
    %259 = tpu.concatenate %76, %102, %128, %154, %43, %180, %206, %232, %258 in 1 : vector<32x16xf32>, vector<32x16xf32>, vector<32x16xf32>, vector<32x16xf32>, vector<32x16xf32>, vector<32x16xf32>, vector<32x16xf32>, vector<32x16xf32>, vector<32x16xf32> -> vector<32x144xf32>
    %c0_102 = arith.constant 0 : index
    %c0_103 = arith.constant 0 : index
    %260 = vector.load %arg2[%c0_102, %c0_103] : memref<2464x128xbf16, #tpu.memory_space<vmem>>, vector<144x128xbf16>
    %261 = arith.truncf %259 : vector<32x144xf32> to vector<32x144xbf16>
    %cst_104 = arith.constant dense<0.000000e+00> : vector<32x128xf32>
    %262 = tpu.matmul %261, %260, %cst_104 {dimension_numbers = #tpu.dot_dimension_numbers<[1], [0], [0], [1], [0, 0, 1, 1], [], []>} : vector<32x144xbf16>, vector<144x128xbf16>, vector<32x128xf32> -> vector<32x128xf32>
    %c1_105 = arith.constant 1 : index
    %c0_106 = arith.constant 0 : index
    %263 = vector.load %arg3[%c1_105, %c0_106] : memref<24x128xf32, #tpu.memory_space<vmem>>, vector<1x128xf32>
    %264 = vector.broadcast %263 : vector<1x128xf32> to vector<32x128xf32>
    %265 = arith.addf %262, %264 : vector<32x128xf32>
    %cst_107 = arith.constant 0.000000e+00 : f32
    %266 = vector.broadcast %cst_107 : f32 to vector<32x128xf32>
    %267 = arith.maximumf %265, %266 : vector<32x128xf32>
    %268 = vector.extract_strided_slice %267 {offsets = [0, 0], sizes = [32, 16], strides = [1, 1]} : vector<32x128xf32> to vector<32x16xf32>
    %269 = tpu.iota {dimensions = array<i32: 0>} : vector<32x1xi32>
    %c15_i32_108 = arith.constant 15 : i32
    %270 = vector.broadcast %c15_i32_108 : i32 to vector<32x1xi32>
    %271 = arith.andi %269, %270 : vector<32x1xi32>
    %c2_i32_109 = arith.constant 2 : i32
    %272 = vector.broadcast %c2_i32_109 : i32 to vector<32x1xi32>
    %273 = arith.shrsi %271, %272 : vector<32x1xi32>
    %c3_i32_110 = arith.constant 3 : i32
    %274 = vector.broadcast %c3_i32_110 : i32 to vector<32x1xi32>
    %275 = arith.andi %271, %274 : vector<32x1xi32>
    %cst_111 = arith.constant 0.000000e+00 : f32
    %276 = vector.broadcast %cst_111 : f32 to vector<5x16xf32>
    %277 = vector.extract_strided_slice %268 {offsets = [0, 0], sizes = [27, 16], strides = [1, 1]} : vector<32x16xf32> to vector<27x16xf32>
    %278 = tpu.concatenate %276, %277 in 0 : vector<5x16xf32>, vector<27x16xf32> -> vector<32x16xf32>
    %c-1_i32_112 = arith.constant -1 : i32
    %279 = vector.broadcast %c-1_i32_112 : i32 to vector<32x1xi32>
    %280 = arith.addi %273, %279 : vector<32x1xi32>
    %c0_i32_113 = arith.constant 0 : i32
    %281 = vector.broadcast %c0_i32_113 : i32 to vector<32x1xi32>
    %282 = arith.cmpi sge, %280, %281 : vector<32x1xi32>
    %c-1_i32_114 = arith.constant -1 : i32
    %283 = vector.broadcast %c-1_i32_114 : i32 to vector<32x1xi32>
    %284 = arith.addi %273, %283 : vector<32x1xi32>
    %c4_i32_115 = arith.constant 4 : i32
    %285 = vector.broadcast %c4_i32_115 : i32 to vector<32x1xi32>
    %286 = arith.cmpi slt, %284, %285 : vector<32x1xi32>
    %287 = arith.andi %282, %286 : vector<32x1xi1>
    %c-1_i32_116 = arith.constant -1 : i32
    %288 = vector.broadcast %c-1_i32_116 : i32 to vector<32x1xi32>
    %289 = arith.addi %275, %288 : vector<32x1xi32>
    %c0_i32_117 = arith.constant 0 : i32
    %290 = vector.broadcast %c0_i32_117 : i32 to vector<32x1xi32>
    %291 = arith.cmpi sge, %289, %290 : vector<32x1xi32>
    %292 = arith.andi %287, %291 : vector<32x1xi1>
    %c-1_i32_118 = arith.constant -1 : i32
    %293 = vector.broadcast %c-1_i32_118 : i32 to vector<32x1xi32>
    %294 = arith.addi %275, %293 : vector<32x1xi32>
    %c4_i32_119 = arith.constant 4 : i32
    %295 = vector.broadcast %c4_i32_119 : i32 to vector<32x1xi32>
    %296 = arith.cmpi slt, %294, %295 : vector<32x1xi32>
    %297 = arith.andi %292, %296 : vector<32x1xi1>
    %298 = arith.extui %297 : vector<32x1xi1> to vector<32x1xi32>
    %299 = arith.sitofp %298 : vector<32x1xi32> to vector<32x1xf32>
    %300 = vector.broadcast %299 : vector<32x1xf32> to vector<32x16xf32>
    %301 = arith.mulf %278, %300 : vector<32x16xf32>
    %cst_120 = arith.constant 0.000000e+00 : f32
    %302 = vector.broadcast %cst_120 : f32 to vector<4x16xf32>
    %303 = vector.extract_strided_slice %268 {offsets = [0, 0], sizes = [28, 16], strides = [1, 1]} : vector<32x16xf32> to vector<28x16xf32>
    %304 = tpu.concatenate %302, %303 in 0 : vector<4x16xf32>, vector<28x16xf32> -> vector<32x16xf32>
    %c-1_i32_121 = arith.constant -1 : i32
    %305 = vector.broadcast %c-1_i32_121 : i32 to vector<32x1xi32>
    %306 = arith.addi %273, %305 : vector<32x1xi32>
    %c0_i32_122 = arith.constant 0 : i32
    %307 = vector.broadcast %c0_i32_122 : i32 to vector<32x1xi32>
    %308 = arith.cmpi sge, %306, %307 : vector<32x1xi32>
    %c-1_i32_123 = arith.constant -1 : i32
    %309 = vector.broadcast %c-1_i32_123 : i32 to vector<32x1xi32>
    %310 = arith.addi %273, %309 : vector<32x1xi32>
    %c4_i32_124 = arith.constant 4 : i32
    %311 = vector.broadcast %c4_i32_124 : i32 to vector<32x1xi32>
    %312 = arith.cmpi slt, %310, %311 : vector<32x1xi32>
    %313 = arith.andi %308, %312 : vector<32x1xi1>
    %c0_i32_125 = arith.constant 0 : i32
    %314 = vector.broadcast %c0_i32_125 : i32 to vector<32x1xi32>
    %315 = arith.addi %275, %314 : vector<32x1xi32>
    %c0_i32_126 = arith.constant 0 : i32
    %316 = vector.broadcast %c0_i32_126 : i32 to vector<32x1xi32>
    %317 = arith.cmpi sge, %315, %316 : vector<32x1xi32>
    %318 = arith.andi %313, %317 : vector<32x1xi1>
    %c0_i32_127 = arith.constant 0 : i32
    %319 = vector.broadcast %c0_i32_127 : i32 to vector<32x1xi32>
    %320 = arith.addi %275, %319 : vector<32x1xi32>
    %c4_i32_128 = arith.constant 4 : i32
    %321 = vector.broadcast %c4_i32_128 : i32 to vector<32x1xi32>
    %322 = arith.cmpi slt, %320, %321 : vector<32x1xi32>
    %323 = arith.andi %318, %322 : vector<32x1xi1>
    %324 = arith.extui %323 : vector<32x1xi1> to vector<32x1xi32>
    %325 = arith.sitofp %324 : vector<32x1xi32> to vector<32x1xf32>
    %326 = vector.broadcast %325 : vector<32x1xf32> to vector<32x16xf32>
    %327 = arith.mulf %304, %326 : vector<32x16xf32>
    %cst_129 = arith.constant 0.000000e+00 : f32
    %328 = vector.broadcast %cst_129 : f32 to vector<3x16xf32>
    %329 = vector.extract_strided_slice %268 {offsets = [0, 0], sizes = [29, 16], strides = [1, 1]} : vector<32x16xf32> to vector<29x16xf32>
    %330 = tpu.concatenate %328, %329 in 0 : vector<3x16xf32>, vector<29x16xf32> -> vector<32x16xf32>
    %c-1_i32_130 = arith.constant -1 : i32
    %331 = vector.broadcast %c-1_i32_130 : i32 to vector<32x1xi32>
    %332 = arith.addi %273, %331 : vector<32x1xi32>
    %c0_i32_131 = arith.constant 0 : i32
    %333 = vector.broadcast %c0_i32_131 : i32 to vector<32x1xi32>
    %334 = arith.cmpi sge, %332, %333 : vector<32x1xi32>
    %c-1_i32_132 = arith.constant -1 : i32
    %335 = vector.broadcast %c-1_i32_132 : i32 to vector<32x1xi32>
    %336 = arith.addi %273, %335 : vector<32x1xi32>
    %c4_i32_133 = arith.constant 4 : i32
    %337 = vector.broadcast %c4_i32_133 : i32 to vector<32x1xi32>
    %338 = arith.cmpi slt, %336, %337 : vector<32x1xi32>
    %339 = arith.andi %334, %338 : vector<32x1xi1>
    %c1_i32_134 = arith.constant 1 : i32
    %340 = vector.broadcast %c1_i32_134 : i32 to vector<32x1xi32>
    %341 = arith.addi %275, %340 : vector<32x1xi32>
    %c0_i32_135 = arith.constant 0 : i32
    %342 = vector.broadcast %c0_i32_135 : i32 to vector<32x1xi32>
    %343 = arith.cmpi sge, %341, %342 : vector<32x1xi32>
    %344 = arith.andi %339, %343 : vector<32x1xi1>
    %c1_i32_136 = arith.constant 1 : i32
    %345 = vector.broadcast %c1_i32_136 : i32 to vector<32x1xi32>
    %346 = arith.addi %275, %345 : vector<32x1xi32>
    %c4_i32_137 = arith.constant 4 : i32
    %347 = vector.broadcast %c4_i32_137 : i32 to vector<32x1xi32>
    %348 = arith.cmpi slt, %346, %347 : vector<32x1xi32>
    %349 = arith.andi %344, %348 : vector<32x1xi1>
    %350 = arith.extui %349 : vector<32x1xi1> to vector<32x1xi32>
    %351 = arith.sitofp %350 : vector<32x1xi32> to vector<32x1xf32>
    %352 = vector.broadcast %351 : vector<32x1xf32> to vector<32x16xf32>
    %353 = arith.mulf %330, %352 : vector<32x16xf32>
    %cst_138 = arith.constant 0.000000e+00 : f32
    %354 = vector.broadcast %cst_138 : f32 to vector<1x16xf32>
    %355 = vector.extract_strided_slice %268 {offsets = [0, 0], sizes = [31, 16], strides = [1, 1]} : vector<32x16xf32> to vector<31x16xf32>
    %356 = tpu.concatenate %354, %355 in 0 : vector<1x16xf32>, vector<31x16xf32> -> vector<32x16xf32>
    %c0_i32_139 = arith.constant 0 : i32
    %357 = vector.broadcast %c0_i32_139 : i32 to vector<32x1xi32>
    %358 = arith.addi %273, %357 : vector<32x1xi32>
    %c0_i32_140 = arith.constant 0 : i32
    %359 = vector.broadcast %c0_i32_140 : i32 to vector<32x1xi32>
    %360 = arith.cmpi sge, %358, %359 : vector<32x1xi32>
    %c0_i32_141 = arith.constant 0 : i32
    %361 = vector.broadcast %c0_i32_141 : i32 to vector<32x1xi32>
    %362 = arith.addi %273, %361 : vector<32x1xi32>
    %c4_i32_142 = arith.constant 4 : i32
    %363 = vector.broadcast %c4_i32_142 : i32 to vector<32x1xi32>
    %364 = arith.cmpi slt, %362, %363 : vector<32x1xi32>
    %365 = arith.andi %360, %364 : vector<32x1xi1>
    %c-1_i32_143 = arith.constant -1 : i32
    %366 = vector.broadcast %c-1_i32_143 : i32 to vector<32x1xi32>
    %367 = arith.addi %275, %366 : vector<32x1xi32>
    %c0_i32_144 = arith.constant 0 : i32
    %368 = vector.broadcast %c0_i32_144 : i32 to vector<32x1xi32>
    %369 = arith.cmpi sge, %367, %368 : vector<32x1xi32>
    %370 = arith.andi %365, %369 : vector<32x1xi1>
    %c-1_i32_145 = arith.constant -1 : i32
    %371 = vector.broadcast %c-1_i32_145 : i32 to vector<32x1xi32>
    %372 = arith.addi %275, %371 : vector<32x1xi32>
    %c4_i32_146 = arith.constant 4 : i32
    %373 = vector.broadcast %c4_i32_146 : i32 to vector<32x1xi32>
    %374 = arith.cmpi slt, %372, %373 : vector<32x1xi32>
    %375 = arith.andi %370, %374 : vector<32x1xi1>
    %376 = arith.extui %375 : vector<32x1xi1> to vector<32x1xi32>
    %377 = arith.sitofp %376 : vector<32x1xi32> to vector<32x1xf32>
    %378 = vector.broadcast %377 : vector<32x1xf32> to vector<32x16xf32>
    %379 = arith.mulf %356, %378 : vector<32x16xf32>
    %cst_147 = arith.constant 0.000000e+00 : f32
    %380 = vector.broadcast %cst_147 : f32 to vector<1x16xf32>
    %381 = vector.extract_strided_slice %268 {offsets = [1, 0], sizes = [31, 16], strides = [1, 1]} : vector<32x16xf32> to vector<31x16xf32>
    %382 = tpu.concatenate %381, %380 in 0 : vector<31x16xf32>, vector<1x16xf32> -> vector<32x16xf32>
    %c0_i32_148 = arith.constant 0 : i32
    %383 = vector.broadcast %c0_i32_148 : i32 to vector<32x1xi32>
    %384 = arith.addi %273, %383 : vector<32x1xi32>
    %c0_i32_149 = arith.constant 0 : i32
    %385 = vector.broadcast %c0_i32_149 : i32 to vector<32x1xi32>
    %386 = arith.cmpi sge, %384, %385 : vector<32x1xi32>
    %c0_i32_150 = arith.constant 0 : i32
    %387 = vector.broadcast %c0_i32_150 : i32 to vector<32x1xi32>
    %388 = arith.addi %273, %387 : vector<32x1xi32>
    %c4_i32_151 = arith.constant 4 : i32
    %389 = vector.broadcast %c4_i32_151 : i32 to vector<32x1xi32>
    %390 = arith.cmpi slt, %388, %389 : vector<32x1xi32>
    %391 = arith.andi %386, %390 : vector<32x1xi1>
    %c1_i32_152 = arith.constant 1 : i32
    %392 = vector.broadcast %c1_i32_152 : i32 to vector<32x1xi32>
    %393 = arith.addi %275, %392 : vector<32x1xi32>
    %c0_i32_153 = arith.constant 0 : i32
    %394 = vector.broadcast %c0_i32_153 : i32 to vector<32x1xi32>
    %395 = arith.cmpi sge, %393, %394 : vector<32x1xi32>
    %396 = arith.andi %391, %395 : vector<32x1xi1>
    %c1_i32_154 = arith.constant 1 : i32
    %397 = vector.broadcast %c1_i32_154 : i32 to vector<32x1xi32>
    %398 = arith.addi %275, %397 : vector<32x1xi32>
    %c4_i32_155 = arith.constant 4 : i32
    %399 = vector.broadcast %c4_i32_155 : i32 to vector<32x1xi32>
    %400 = arith.cmpi slt, %398, %399 : vector<32x1xi32>
    %401 = arith.andi %396, %400 : vector<32x1xi1>
    %402 = arith.extui %401 : vector<32x1xi1> to vector<32x1xi32>
    %403 = arith.sitofp %402 : vector<32x1xi32> to vector<32x1xf32>
    %404 = vector.broadcast %403 : vector<32x1xf32> to vector<32x16xf32>
    %405 = arith.mulf %382, %404 : vector<32x16xf32>
    %cst_156 = arith.constant 0.000000e+00 : f32
    %406 = vector.broadcast %cst_156 : f32 to vector<3x16xf32>
    %407 = vector.extract_strided_slice %268 {offsets = [3, 0], sizes = [29, 16], strides = [1, 1]} : vector<32x16xf32> to vector<29x16xf32>
    %408 = tpu.concatenate %407, %406 in 0 : vector<29x16xf32>, vector<3x16xf32> -> vector<32x16xf32>
    %c1_i32_157 = arith.constant 1 : i32
    %409 = vector.broadcast %c1_i32_157 : i32 to vector<32x1xi32>
    %410 = arith.addi %273, %409 : vector<32x1xi32>
    %c0_i32_158 = arith.constant 0 : i32
    %411 = vector.broadcast %c0_i32_158 : i32 to vector<32x1xi32>
    %412 = arith.cmpi sge, %410, %411 : vector<32x1xi32>
    %c1_i32_159 = arith.constant 1 : i32
    %413 = vector.broadcast %c1_i32_159 : i32 to vector<32x1xi32>
    %414 = arith.addi %273, %413 : vector<32x1xi32>
    %c4_i32_160 = arith.constant 4 : i32
    %415 = vector.broadcast %c4_i32_160 : i32 to vector<32x1xi32>
    %416 = arith.cmpi slt, %414, %415 : vector<32x1xi32>
    %417 = arith.andi %412, %416 : vector<32x1xi1>
    %c-1_i32_161 = arith.constant -1 : i32
    %418 = vector.broadcast %c-1_i32_161 : i32 to vector<32x1xi32>
    %419 = arith.addi %275, %418 : vector<32x1xi32>
    %c0_i32_162 = arith.constant 0 : i32
    %420 = vector.broadcast %c0_i32_162 : i32 to vector<32x1xi32>
    %421 = arith.cmpi sge, %419, %420 : vector<32x1xi32>
    %422 = arith.andi %417, %421 : vector<32x1xi1>
    %c-1_i32_163 = arith.constant -1 : i32
    %423 = vector.broadcast %c-1_i32_163 : i32 to vector<32x1xi32>
    %424 = arith.addi %275, %423 : vector<32x1xi32>
    %c4_i32_164 = arith.constant 4 : i32
    %425 = vector.broadcast %c4_i32_164 : i32 to vector<32x1xi32>
    %426 = arith.cmpi slt, %424, %425 : vector<32x1xi32>
    %427 = arith.andi %422, %426 : vector<32x1xi1>
    %428 = arith.extui %427 : vector<32x1xi1> to vector<32x1xi32>
    %429 = arith.sitofp %428 : vector<32x1xi32> to vector<32x1xf32>
    %430 = vector.broadcast %429 : vector<32x1xf32> to vector<32x16xf32>
    %431 = arith.mulf %408, %430 : vector<32x16xf32>
    %cst_165 = arith.constant 0.000000e+00 : f32
    %432 = vector.broadcast %cst_165 : f32 to vector<4x16xf32>
    %433 = vector.extract_strided_slice %268 {offsets = [4, 0], sizes = [28, 16], strides = [1, 1]} : vector<32x16xf32> to vector<28x16xf32>
    %434 = tpu.concatenate %433, %432 in 0 : vector<28x16xf32>, vector<4x16xf32> -> vector<32x16xf32>
    %c1_i32_166 = arith.constant 1 : i32
    %435 = vector.broadcast %c1_i32_166 : i32 to vector<32x1xi32>
    %436 = arith.addi %273, %435 : vector<32x1xi32>
    %c0_i32_167 = arith.constant 0 : i32
    %437 = vector.broadcast %c0_i32_167 : i32 to vector<32x1xi32>
    %438 = arith.cmpi sge, %436, %437 : vector<32x1xi32>
    %c1_i32_168 = arith.constant 1 : i32
    %439 = vector.broadcast %c1_i32_168 : i32 to vector<32x1xi32>
    %440 = arith.addi %273, %439 : vector<32x1xi32>
    %c4_i32_169 = arith.constant 4 : i32
    %441 = vector.broadcast %c4_i32_169 : i32 to vector<32x1xi32>
    %442 = arith.cmpi slt, %440, %441 : vector<32x1xi32>
    %443 = arith.andi %438, %442 : vector<32x1xi1>
    %c0_i32_170 = arith.constant 0 : i32
    %444 = vector.broadcast %c0_i32_170 : i32 to vector<32x1xi32>
    %445 = arith.addi %275, %444 : vector<32x1xi32>
    %c0_i32_171 = arith.constant 0 : i32
    %446 = vector.broadcast %c0_i32_171 : i32 to vector<32x1xi32>
    %447 = arith.cmpi sge, %445, %446 : vector<32x1xi32>
    %448 = arith.andi %443, %447 : vector<32x1xi1>
    %c0_i32_172 = arith.constant 0 : i32
    %449 = vector.broadcast %c0_i32_172 : i32 to vector<32x1xi32>
    %450 = arith.addi %275, %449 : vector<32x1xi32>
    %c4_i32_173 = arith.constant 4 : i32
    %451 = vector.broadcast %c4_i32_173 : i32 to vector<32x1xi32>
    %452 = arith.cmpi slt, %450, %451 : vector<32x1xi32>
    %453 = arith.andi %448, %452 : vector<32x1xi1>
    %454 = arith.extui %453 : vector<32x1xi1> to vector<32x1xi32>
    %455 = arith.sitofp %454 : vector<32x1xi32> to vector<32x1xf32>
    %456 = vector.broadcast %455 : vector<32x1xf32> to vector<32x16xf32>
    %457 = arith.mulf %434, %456 : vector<32x16xf32>
    %cst_174 = arith.constant 0.000000e+00 : f32
    %458 = vector.broadcast %cst_174 : f32 to vector<5x16xf32>
    %459 = vector.extract_strided_slice %268 {offsets = [5, 0], sizes = [27, 16], strides = [1, 1]} : vector<32x16xf32> to vector<27x16xf32>
    %460 = tpu.concatenate %459, %458 in 0 : vector<27x16xf32>, vector<5x16xf32> -> vector<32x16xf32>
    %c1_i32_175 = arith.constant 1 : i32
    %461 = vector.broadcast %c1_i32_175 : i32 to vector<32x1xi32>
    %462 = arith.addi %273, %461 : vector<32x1xi32>
    %c0_i32_176 = arith.constant 0 : i32
    %463 = vector.broadcast %c0_i32_176 : i32 to vector<32x1xi32>
    %464 = arith.cmpi sge, %462, %463 : vector<32x1xi32>
    %c1_i32_177 = arith.constant 1 : i32
    %465 = vector.broadcast %c1_i32_177 : i32 to vector<32x1xi32>
    %466 = arith.addi %273, %465 : vector<32x1xi32>
    %c4_i32_178 = arith.constant 4 : i32
    %467 = vector.broadcast %c4_i32_178 : i32 to vector<32x1xi32>
    %468 = arith.cmpi slt, %466, %467 : vector<32x1xi32>
    %469 = arith.andi %464, %468 : vector<32x1xi1>
    %c1_i32_179 = arith.constant 1 : i32
    %470 = vector.broadcast %c1_i32_179 : i32 to vector<32x1xi32>
    %471 = arith.addi %275, %470 : vector<32x1xi32>
    %c0_i32_180 = arith.constant 0 : i32
    %472 = vector.broadcast %c0_i32_180 : i32 to vector<32x1xi32>
    %473 = arith.cmpi sge, %471, %472 : vector<32x1xi32>
    %474 = arith.andi %469, %473 : vector<32x1xi1>
    %c1_i32_181 = arith.constant 1 : i32
    %475 = vector.broadcast %c1_i32_181 : i32 to vector<32x1xi32>
    %476 = arith.addi %275, %475 : vector<32x1xi32>
    %c4_i32_182 = arith.constant 4 : i32
    %477 = vector.broadcast %c4_i32_182 : i32 to vector<32x1xi32>
    %478 = arith.cmpi slt, %476, %477 : vector<32x1xi32>
    %479 = arith.andi %474, %478 : vector<32x1xi1>
    %480 = arith.extui %479 : vector<32x1xi1> to vector<32x1xi32>
    %481 = arith.sitofp %480 : vector<32x1xi32> to vector<32x1xf32>
    %482 = vector.broadcast %481 : vector<32x1xf32> to vector<32x16xf32>
    %483 = arith.mulf %460, %482 : vector<32x16xf32>
    %484 = tpu.concatenate %301, %327, %353, %379, %268, %405, %431, %457, %483 in 1 : vector<32x16xf32>, vector<32x16xf32>, vector<32x16xf32>, vector<32x16xf32>, vector<32x16xf32>, vector<32x16xf32>, vector<32x16xf32>, vector<32x16xf32>, vector<32x16xf32> -> vector<32x144xf32>
    %c144 = arith.constant 144 : index
    %c0_183 = arith.constant 0 : index
    %485 = vector.load %arg2[%c144, %c0_183] : memref<2464x128xbf16, #tpu.memory_space<vmem>>, vector<144x128xbf16>
    %486 = arith.truncf %484 : vector<32x144xf32> to vector<32x144xbf16>
    %cst_184 = arith.constant dense<0.000000e+00> : vector<32x128xf32>
    %487 = tpu.matmul %486, %485, %cst_184 {dimension_numbers = #tpu.dot_dimension_numbers<[1], [0], [0], [1], [0, 0, 1, 1], [], []>} : vector<32x144xbf16>, vector<144x128xbf16>, vector<32x128xf32> -> vector<32x128xf32>
    %c2_185 = arith.constant 2 : index
    %c0_186 = arith.constant 0 : index
    %488 = vector.load %arg3[%c2_185, %c0_186] : memref<24x128xf32, #tpu.memory_space<vmem>>, vector<1x128xf32>
    %489 = vector.broadcast %488 : vector<1x128xf32> to vector<32x128xf32>
    %490 = arith.addf %487, %489 : vector<32x128xf32>
    %491 = arith.addf %490, %42 : vector<32x128xf32>
    %cst_187 = arith.constant 0.000000e+00 : f32
    %492 = vector.broadcast %cst_187 : f32 to vector<32x128xf32>
    %493 = arith.maximumf %491, %492 : vector<32x128xf32>
    %494 = vector.extract_strided_slice %493 {offsets = [0, 0], sizes = [32, 16], strides = [1, 1]} : vector<32x128xf32> to vector<32x16xf32>
    %495 = tpu.iota {dimensions = array<i32: 0>} : vector<32x1xi32>
    %c15_i32_188 = arith.constant 15 : i32
    %496 = vector.broadcast %c15_i32_188 : i32 to vector<32x1xi32>
    %497 = arith.andi %495, %496 : vector<32x1xi32>
    %c2_i32_189 = arith.constant 2 : i32
    %498 = vector.broadcast %c2_i32_189 : i32 to vector<32x1xi32>
    %499 = arith.shrsi %497, %498 : vector<32x1xi32>
    %c3_i32_190 = arith.constant 3 : i32
    %500 = vector.broadcast %c3_i32_190 : i32 to vector<32x1xi32>
    %501 = arith.andi %497, %500 : vector<32x1xi32>
    %cst_191 = arith.constant 0.000000e+00 : f32
    %502 = vector.broadcast %cst_191 : f32 to vector<5x16xf32>
    %503 = vector.extract_strided_slice %494 {offsets = [0, 0], sizes = [27, 16], strides = [1, 1]} : vector<32x16xf32> to vector<27x16xf32>
    %504 = tpu.concatenate %502, %503 in 0 : vector<5x16xf32>, vector<27x16xf32> -> vector<32x16xf32>
    %c-1_i32_192 = arith.constant -1 : i32
    %505 = vector.broadcast %c-1_i32_192 : i32 to vector<32x1xi32>
    %506 = arith.addi %499, %505 : vector<32x1xi32>
    %c0_i32_193 = arith.constant 0 : i32
    %507 = vector.broadcast %c0_i32_193 : i32 to vector<32x1xi32>
    %508 = arith.cmpi sge, %506, %507 : vector<32x1xi32>
    %c-1_i32_194 = arith.constant -1 : i32
    %509 = vector.broadcast %c-1_i32_194 : i32 to vector<32x1xi32>
    %510 = arith.addi %499, %509 : vector<32x1xi32>
    %c4_i32_195 = arith.constant 4 : i32
    %511 = vector.broadcast %c4_i32_195 : i32 to vector<32x1xi32>
    %512 = arith.cmpi slt, %510, %511 : vector<32x1xi32>
    %513 = arith.andi %508, %512 : vector<32x1xi1>
    %c-1_i32_196 = arith.constant -1 : i32
    %514 = vector.broadcast %c-1_i32_196 : i32 to vector<32x1xi32>
    %515 = arith.addi %501, %514 : vector<32x1xi32>
    %c0_i32_197 = arith.constant 0 : i32
    %516 = vector.broadcast %c0_i32_197 : i32 to vector<32x1xi32>
    %517 = arith.cmpi sge, %515, %516 : vector<32x1xi32>
    %518 = arith.andi %513, %517 : vector<32x1xi1>
    %c-1_i32_198 = arith.constant -1 : i32
    %519 = vector.broadcast %c-1_i32_198 : i32 to vector<32x1xi32>
    %520 = arith.addi %501, %519 : vector<32x1xi32>
    %c4_i32_199 = arith.constant 4 : i32
    %521 = vector.broadcast %c4_i32_199 : i32 to vector<32x1xi32>
    %522 = arith.cmpi slt, %520, %521 : vector<32x1xi32>
    %523 = arith.andi %518, %522 : vector<32x1xi1>
    %524 = arith.extui %523 : vector<32x1xi1> to vector<32x1xi32>
    %525 = arith.sitofp %524 : vector<32x1xi32> to vector<32x1xf32>
    %526 = vector.broadcast %525 : vector<32x1xf32> to vector<32x16xf32>
    %527 = arith.mulf %504, %526 : vector<32x16xf32>
    %cst_200 = arith.constant 0.000000e+00 : f32
    %528 = vector.broadcast %cst_200 : f32 to vector<4x16xf32>
    %529 = vector.extract_strided_slice %494 {offsets = [0, 0], sizes = [28, 16], strides = [1, 1]} : vector<32x16xf32> to vector<28x16xf32>
    %530 = tpu.concatenate %528, %529 in 0 : vector<4x16xf32>, vector<28x16xf32> -> vector<32x16xf32>
    %c-1_i32_201 = arith.constant -1 : i32
    %531 = vector.broadcast %c-1_i32_201 : i32 to vector<32x1xi32>
    %532 = arith.addi %499, %531 : vector<32x1xi32>
    %c0_i32_202 = arith.constant 0 : i32
    %533 = vector.broadcast %c0_i32_202 : i32 to vector<32x1xi32>
    %534 = arith.cmpi sge, %532, %533 : vector<32x1xi32>
    %c-1_i32_203 = arith.constant -1 : i32
    %535 = vector.broadcast %c-1_i32_203 : i32 to vector<32x1xi32>
    %536 = arith.addi %499, %535 : vector<32x1xi32>
    %c4_i32_204 = arith.constant 4 : i32
    %537 = vector.broadcast %c4_i32_204 : i32 to vector<32x1xi32>
    %538 = arith.cmpi slt, %536, %537 : vector<32x1xi32>
    %539 = arith.andi %534, %538 : vector<32x1xi1>
    %c0_i32_205 = arith.constant 0 : i32
    %540 = vector.broadcast %c0_i32_205 : i32 to vector<32x1xi32>
    %541 = arith.addi %501, %540 : vector<32x1xi32>
    %c0_i32_206 = arith.constant 0 : i32
    %542 = vector.broadcast %c0_i32_206 : i32 to vector<32x1xi32>
    %543 = arith.cmpi sge, %541, %542 : vector<32x1xi32>
    %544 = arith.andi %539, %543 : vector<32x1xi1>
    %c0_i32_207 = arith.constant 0 : i32
    %545 = vector.broadcast %c0_i32_207 : i32 to vector<32x1xi32>
    %546 = arith.addi %501, %545 : vector<32x1xi32>
    %c4_i32_208 = arith.constant 4 : i32
    %547 = vector.broadcast %c4_i32_208 : i32 to vector<32x1xi32>
    %548 = arith.cmpi slt, %546, %547 : vector<32x1xi32>
    %549 = arith.andi %544, %548 : vector<32x1xi1>
    %550 = arith.extui %549 : vector<32x1xi1> to vector<32x1xi32>
    %551 = arith.sitofp %550 : vector<32x1xi32> to vector<32x1xf32>
    %552 = vector.broadcast %551 : vector<32x1xf32> to vector<32x16xf32>
    %553 = arith.mulf %530, %552 : vector<32x16xf32>
    %cst_209 = arith.constant 0.000000e+00 : f32
    %554 = vector.broadcast %cst_209 : f32 to vector<3x16xf32>
    %555 = vector.extract_strided_slice %494 {offsets = [0, 0], sizes = [29, 16], strides = [1, 1]} : vector<32x16xf32> to vector<29x16xf32>
    %556 = tpu.concatenate %554, %555 in 0 : vector<3x16xf32>, vector<29x16xf32> -> vector<32x16xf32>
    %c-1_i32_210 = arith.constant -1 : i32
    %557 = vector.broadcast %c-1_i32_210 : i32 to vector<32x1xi32>
    %558 = arith.addi %499, %557 : vector<32x1xi32>
    %c0_i32_211 = arith.constant 0 : i32
    %559 = vector.broadcast %c0_i32_211 : i32 to vector<32x1xi32>
    %560 = arith.cmpi sge, %558, %559 : vector<32x1xi32>
    %c-1_i32_212 = arith.constant -1 : i32
    %561 = vector.broadcast %c-1_i32_212 : i32 to vector<32x1xi32>
    %562 = arith.addi %499, %561 : vector<32x1xi32>
    %c4_i32_213 = arith.constant 4 : i32
    %563 = vector.broadcast %c4_i32_213 : i32 to vector<32x1xi32>
    %564 = arith.cmpi slt, %562, %563 : vector<32x1xi32>
    %565 = arith.andi %560, %564 : vector<32x1xi1>
    %c1_i32_214 = arith.constant 1 : i32
    %566 = vector.broadcast %c1_i32_214 : i32 to vector<32x1xi32>
    %567 = arith.addi %501, %566 : vector<32x1xi32>
    %c0_i32_215 = arith.constant 0 : i32
    %568 = vector.broadcast %c0_i32_215 : i32 to vector<32x1xi32>
    %569 = arith.cmpi sge, %567, %568 : vector<32x1xi32>
    %570 = arith.andi %565, %569 : vector<32x1xi1>
    %c1_i32_216 = arith.constant 1 : i32
    %571 = vector.broadcast %c1_i32_216 : i32 to vector<32x1xi32>
    %572 = arith.addi %501, %571 : vector<32x1xi32>
    %c4_i32_217 = arith.constant 4 : i32
    %573 = vector.broadcast %c4_i32_217 : i32 to vector<32x1xi32>
    %574 = arith.cmpi slt, %572, %573 : vector<32x1xi32>
    %575 = arith.andi %570, %574 : vector<32x1xi1>
    %576 = arith.extui %575 : vector<32x1xi1> to vector<32x1xi32>
    %577 = arith.sitofp %576 : vector<32x1xi32> to vector<32x1xf32>
    %578 = vector.broadcast %577 : vector<32x1xf32> to vector<32x16xf32>
    %579 = arith.mulf %556, %578 : vector<32x16xf32>
    %cst_218 = arith.constant 0.000000e+00 : f32
    %580 = vector.broadcast %cst_218 : f32 to vector<1x16xf32>
    %581 = vector.extract_strided_slice %494 {offsets = [0, 0], sizes = [31, 16], strides = [1, 1]} : vector<32x16xf32> to vector<31x16xf32>
    %582 = tpu.concatenate %580, %581 in 0 : vector<1x16xf32>, vector<31x16xf32> -> vector<32x16xf32>
    %c0_i32_219 = arith.constant 0 : i32
    %583 = vector.broadcast %c0_i32_219 : i32 to vector<32x1xi32>
    %584 = arith.addi %499, %583 : vector<32x1xi32>
    %c0_i32_220 = arith.constant 0 : i32
    %585 = vector.broadcast %c0_i32_220 : i32 to vector<32x1xi32>
    %586 = arith.cmpi sge, %584, %585 : vector<32x1xi32>
    %c0_i32_221 = arith.constant 0 : i32
    %587 = vector.broadcast %c0_i32_221 : i32 to vector<32x1xi32>
    %588 = arith.addi %499, %587 : vector<32x1xi32>
    %c4_i32_222 = arith.constant 4 : i32
    %589 = vector.broadcast %c4_i32_222 : i32 to vector<32x1xi32>
    %590 = arith.cmpi slt, %588, %589 : vector<32x1xi32>
    %591 = arith.andi %586, %590 : vector<32x1xi1>
    %c-1_i32_223 = arith.constant -1 : i32
    %592 = vector.broadcast %c-1_i32_223 : i32 to vector<32x1xi32>
    %593 = arith.addi %501, %592 : vector<32x1xi32>
    %c0_i32_224 = arith.constant 0 : i32
    %594 = vector.broadcast %c0_i32_224 : i32 to vector<32x1xi32>
    %595 = arith.cmpi sge, %593, %594 : vector<32x1xi32>
    %596 = arith.andi %591, %595 : vector<32x1xi1>
    %c-1_i32_225 = arith.constant -1 : i32
    %597 = vector.broadcast %c-1_i32_225 : i32 to vector<32x1xi32>
    %598 = arith.addi %501, %597 : vector<32x1xi32>
    %c4_i32_226 = arith.constant 4 : i32
    %599 = vector.broadcast %c4_i32_226 : i32 to vector<32x1xi32>
    %600 = arith.cmpi slt, %598, %599 : vector<32x1xi32>
    %601 = arith.andi %596, %600 : vector<32x1xi1>
    %602 = arith.extui %601 : vector<32x1xi1> to vector<32x1xi32>
    %603 = arith.sitofp %602 : vector<32x1xi32> to vector<32x1xf32>
    %604 = vector.broadcast %603 : vector<32x1xf32> to vector<32x16xf32>
    %605 = arith.mulf %582, %604 : vector<32x16xf32>
    %cst_227 = arith.constant 0.000000e+00 : f32
    %606 = vector.broadcast %cst_227 : f32 to vector<1x16xf32>
    %607 = vector.extract_strided_slice %494 {offsets = [1, 0], sizes = [31, 16], strides = [1, 1]} : vector<32x16xf32> to vector<31x16xf32>
    %608 = tpu.concatenate %607, %606 in 0 : vector<31x16xf32>, vector<1x16xf32> -> vector<32x16xf32>
    %c0_i32_228 = arith.constant 0 : i32
    %609 = vector.broadcast %c0_i32_228 : i32 to vector<32x1xi32>
    %610 = arith.addi %499, %609 : vector<32x1xi32>
    %c0_i32_229 = arith.constant 0 : i32
    %611 = vector.broadcast %c0_i32_229 : i32 to vector<32x1xi32>
    %612 = arith.cmpi sge, %610, %611 : vector<32x1xi32>
    %c0_i32_230 = arith.constant 0 : i32
    %613 = vector.broadcast %c0_i32_230 : i32 to vector<32x1xi32>
    %614 = arith.addi %499, %613 : vector<32x1xi32>
    %c4_i32_231 = arith.constant 4 : i32
    %615 = vector.broadcast %c4_i32_231 : i32 to vector<32x1xi32>
    %616 = arith.cmpi slt, %614, %615 : vector<32x1xi32>
    %617 = arith.andi %612, %616 : vector<32x1xi1>
    %c1_i32_232 = arith.constant 1 : i32
    %618 = vector.broadcast %c1_i32_232 : i32 to vector<32x1xi32>
    %619 = arith.addi %501, %618 : vector<32x1xi32>
    %c0_i32_233 = arith.constant 0 : i32
    %620 = vector.broadcast %c0_i32_233 : i32 to vector<32x1xi32>
    %621 = arith.cmpi sge, %619, %620 : vector<32x1xi32>
    %622 = arith.andi %617, %621 : vector<32x1xi1>
    %c1_i32_234 = arith.constant 1 : i32
    %623 = vector.broadcast %c1_i32_234 : i32 to vector<32x1xi32>
    %624 = arith.addi %501, %623 : vector<32x1xi32>
    %c4_i32_235 = arith.constant 4 : i32
    %625 = vector.broadcast %c4_i32_235 : i32 to vector<32x1xi32>
    %626 = arith.cmpi slt, %624, %625 : vector<32x1xi32>
    %627 = arith.andi %622, %626 : vector<32x1xi1>
    %628 = arith.extui %627 : vector<32x1xi1> to vector<32x1xi32>
    %629 = arith.sitofp %628 : vector<32x1xi32> to vector<32x1xf32>
    %630 = vector.broadcast %629 : vector<32x1xf32> to vector<32x16xf32>
    %631 = arith.mulf %608, %630 : vector<32x16xf32>
    %cst_236 = arith.constant 0.000000e+00 : f32
    %632 = vector.broadcast %cst_236 : f32 to vector<3x16xf32>
    %633 = vector.extract_strided_slice %494 {offsets = [3, 0], sizes = [29, 16], strides = [1, 1]} : vector<32x16xf32> to vector<29x16xf32>
    %634 = tpu.concatenate %633, %632 in 0 : vector<29x16xf32>, vector<3x16xf32> -> vector<32x16xf32>
    %c1_i32_237 = arith.constant 1 : i32
    %635 = vector.broadcast %c1_i32_237 : i32 to vector<32x1xi32>
    %636 = arith.addi %499, %635 : vector<32x1xi32>
    %c0_i32_238 = arith.constant 0 : i32
    %637 = vector.broadcast %c0_i32_238 : i32 to vector<32x1xi32>
    %638 = arith.cmpi sge, %636, %637 : vector<32x1xi32>
    %c1_i32_239 = arith.constant 1 : i32
    %639 = vector.broadcast %c1_i32_239 : i32 to vector<32x1xi32>
    %640 = arith.addi %499, %639 : vector<32x1xi32>
    %c4_i32_240 = arith.constant 4 : i32
    %641 = vector.broadcast %c4_i32_240 : i32 to vector<32x1xi32>
    %642 = arith.cmpi slt, %640, %641 : vector<32x1xi32>
    %643 = arith.andi %638, %642 : vector<32x1xi1>
    %c-1_i32_241 = arith.constant -1 : i32
    %644 = vector.broadcast %c-1_i32_241 : i32 to vector<32x1xi32>
    %645 = arith.addi %501, %644 : vector<32x1xi32>
    %c0_i32_242 = arith.constant 0 : i32
    %646 = vector.broadcast %c0_i32_242 : i32 to vector<32x1xi32>
    %647 = arith.cmpi sge, %645, %646 : vector<32x1xi32>
    %648 = arith.andi %643, %647 : vector<32x1xi1>
    %c-1_i32_243 = arith.constant -1 : i32
    %649 = vector.broadcast %c-1_i32_243 : i32 to vector<32x1xi32>
    %650 = arith.addi %501, %649 : vector<32x1xi32>
    %c4_i32_244 = arith.constant 4 : i32
    %651 = vector.broadcast %c4_i32_244 : i32 to vector<32x1xi32>
    %652 = arith.cmpi slt, %650, %651 : vector<32x1xi32>
    %653 = arith.andi %648, %652 : vector<32x1xi1>
    %654 = arith.extui %653 : vector<32x1xi1> to vector<32x1xi32>
    %655 = arith.sitofp %654 : vector<32x1xi32> to vector<32x1xf32>
    %656 = vector.broadcast %655 : vector<32x1xf32> to vector<32x16xf32>
    %657 = arith.mulf %634, %656 : vector<32x16xf32>
    %cst_245 = arith.constant 0.000000e+00 : f32
    %658 = vector.broadcast %cst_245 : f32 to vector<4x16xf32>
    %659 = vector.extract_strided_slice %494 {offsets = [4, 0], sizes = [28, 16], strides = [1, 1]} : vector<32x16xf32> to vector<28x16xf32>
    %660 = tpu.concatenate %659, %658 in 0 : vector<28x16xf32>, vector<4x16xf32> -> vector<32x16xf32>
    %c1_i32_246 = arith.constant 1 : i32
    %661 = vector.broadcast %c1_i32_246 : i32 to vector<32x1xi32>
    %662 = arith.addi %499, %661 : vector<32x1xi32>
    %c0_i32_247 = arith.constant 0 : i32
    %663 = vector.broadcast %c0_i32_247 : i32 to vector<32x1xi32>
    %664 = arith.cmpi sge, %662, %663 : vector<32x1xi32>
    %c1_i32_248 = arith.constant 1 : i32
    %665 = vector.broadcast %c1_i32_248 : i32 to vector<32x1xi32>
    %666 = arith.addi %499, %665 : vector<32x1xi32>
    %c4_i32_249 = arith.constant 4 : i32
    %667 = vector.broadcast %c4_i32_249 : i32 to vector<32x1xi32>
    %668 = arith.cmpi slt, %666, %667 : vector<32x1xi32>
    %669 = arith.andi %664, %668 : vector<32x1xi1>
    %c0_i32_250 = arith.constant 0 : i32
    %670 = vector.broadcast %c0_i32_250 : i32 to vector<32x1xi32>
    %671 = arith.addi %501, %670 : vector<32x1xi32>
    %c0_i32_251 = arith.constant 0 : i32
    %672 = vector.broadcast %c0_i32_251 : i32 to vector<32x1xi32>
    %673 = arith.cmpi sge, %671, %672 : vector<32x1xi32>
    %674 = arith.andi %669, %673 : vector<32x1xi1>
    %c0_i32_252 = arith.constant 0 : i32
    %675 = vector.broadcast %c0_i32_252 : i32 to vector<32x1xi32>
    %676 = arith.addi %501, %675 : vector<32x1xi32>
    %c4_i32_253 = arith.constant 4 : i32
    %677 = vector.broadcast %c4_i32_253 : i32 to vector<32x1xi32>
    %678 = arith.cmpi slt, %676, %677 : vector<32x1xi32>
    %679 = arith.andi %674, %678 : vector<32x1xi1>
    %680 = arith.extui %679 : vector<32x1xi1> to vector<32x1xi32>
    %681 = arith.sitofp %680 : vector<32x1xi32> to vector<32x1xf32>
    %682 = vector.broadcast %681 : vector<32x1xf32> to vector<32x16xf32>
    %683 = arith.mulf %660, %682 : vector<32x16xf32>
    %cst_254 = arith.constant 0.000000e+00 : f32
    %684 = vector.broadcast %cst_254 : f32 to vector<5x16xf32>
    %685 = vector.extract_strided_slice %494 {offsets = [5, 0], sizes = [27, 16], strides = [1, 1]} : vector<32x16xf32> to vector<27x16xf32>
    %686 = tpu.concatenate %685, %684 in 0 : vector<27x16xf32>, vector<5x16xf32> -> vector<32x16xf32>
    %c1_i32_255 = arith.constant 1 : i32
    %687 = vector.broadcast %c1_i32_255 : i32 to vector<32x1xi32>
    %688 = arith.addi %499, %687 : vector<32x1xi32>
    %c0_i32_256 = arith.constant 0 : i32
    %689 = vector.broadcast %c0_i32_256 : i32 to vector<32x1xi32>
    %690 = arith.cmpi sge, %688, %689 : vector<32x1xi32>
    %c1_i32_257 = arith.constant 1 : i32
    %691 = vector.broadcast %c1_i32_257 : i32 to vector<32x1xi32>
    %692 = arith.addi %499, %691 : vector<32x1xi32>
    %c4_i32_258 = arith.constant 4 : i32
    %693 = vector.broadcast %c4_i32_258 : i32 to vector<32x1xi32>
    %694 = arith.cmpi slt, %692, %693 : vector<32x1xi32>
    %695 = arith.andi %690, %694 : vector<32x1xi1>
    %c1_i32_259 = arith.constant 1 : i32
    %696 = vector.broadcast %c1_i32_259 : i32 to vector<32x1xi32>
    %697 = arith.addi %501, %696 : vector<32x1xi32>
    %c0_i32_260 = arith.constant 0 : i32
    %698 = vector.broadcast %c0_i32_260 : i32 to vector<32x1xi32>
    %699 = arith.cmpi sge, %697, %698 : vector<32x1xi32>
    %700 = arith.andi %695, %699 : vector<32x1xi1>
    %c1_i32_261 = arith.constant 1 : i32
    %701 = vector.broadcast %c1_i32_261 : i32 to vector<32x1xi32>
    %702 = arith.addi %501, %701 : vector<32x1xi32>
    %c4_i32_262 = arith.constant 4 : i32
    %703 = vector.broadcast %c4_i32_262 : i32 to vector<32x1xi32>
    %704 = arith.cmpi slt, %702, %703 : vector<32x1xi32>
    %705 = arith.andi %700, %704 : vector<32x1xi1>
    %706 = arith.extui %705 : vector<32x1xi1> to vector<32x1xi32>
    %707 = arith.sitofp %706 : vector<32x1xi32> to vector<32x1xf32>
    %708 = vector.broadcast %707 : vector<32x1xf32> to vector<32x16xf32>
    %709 = arith.mulf %686, %708 : vector<32x16xf32>
    %710 = tpu.concatenate %527, %553, %579, %605, %494, %631, %657, %683, %709 in 1 : vector<32x16xf32>, vector<32x16xf32>, vector<32x16xf32>, vector<32x16xf32>, vector<32x16xf32>, vector<32x16xf32>, vector<32x16xf32>, vector<32x16xf32>, vector<32x16xf32> -> vector<32x144xf32>
    %c288 = arith.constant 288 : index
    %c0_263 = arith.constant 0 : index
    %711 = vector.load %arg2[%c288, %c0_263] : memref<2464x128xbf16, #tpu.memory_space<vmem>>, vector<144x128xbf16>
    %712 = arith.truncf %710 : vector<32x144xf32> to vector<32x144xbf16>
    %cst_264 = arith.constant dense<0.000000e+00> : vector<32x128xf32>
    %713 = tpu.matmul %712, %711, %cst_264 {dimension_numbers = #tpu.dot_dimension_numbers<[1], [0], [0], [1], [0, 0, 1, 1], [], []>} : vector<32x144xbf16>, vector<144x128xbf16>, vector<32x128xf32> -> vector<32x128xf32>
    %c3_265 = arith.constant 3 : index
    %c0_266 = arith.constant 0 : index
    %714 = vector.load %arg3[%c3_265, %c0_266] : memref<24x128xf32, #tpu.memory_space<vmem>>, vector<1x128xf32>
    %715 = vector.broadcast %714 : vector<1x128xf32> to vector<32x128xf32>
    %716 = arith.addf %713, %715 : vector<32x128xf32>
    %cst_267 = arith.constant 0.000000e+00 : f32
    %717 = vector.broadcast %cst_267 : f32 to vector<32x128xf32>
    %718 = arith.maximumf %716, %717 : vector<32x128xf32>
    %719 = vector.extract_strided_slice %718 {offsets = [0, 0], sizes = [32, 16], strides = [1, 1]} : vector<32x128xf32> to vector<32x16xf32>
    %720 = tpu.iota {dimensions = array<i32: 0>} : vector<32x1xi32>
    %c15_i32_268 = arith.constant 15 : i32
    %721 = vector.broadcast %c15_i32_268 : i32 to vector<32x1xi32>
    %722 = arith.andi %720, %721 : vector<32x1xi32>
    %c2_i32_269 = arith.constant 2 : i32
    %723 = vector.broadcast %c2_i32_269 : i32 to vector<32x1xi32>
    %724 = arith.shrsi %722, %723 : vector<32x1xi32>
    %c3_i32_270 = arith.constant 3 : i32
    %725 = vector.broadcast %c3_i32_270 : i32 to vector<32x1xi32>
    %726 = arith.andi %722, %725 : vector<32x1xi32>
    %cst_271 = arith.constant 0.000000e+00 : f32
    %727 = vector.broadcast %cst_271 : f32 to vector<5x16xf32>
    %728 = vector.extract_strided_slice %719 {offsets = [0, 0], sizes = [27, 16], strides = [1, 1]} : vector<32x16xf32> to vector<27x16xf32>
    %729 = tpu.concatenate %727, %728 in 0 : vector<5x16xf32>, vector<27x16xf32> -> vector<32x16xf32>
    %c-1_i32_272 = arith.constant -1 : i32
    %730 = vector.broadcast %c-1_i32_272 : i32 to vector<32x1xi32>
    %731 = arith.addi %724, %730 : vector<32x1xi32>
    %c0_i32_273 = arith.constant 0 : i32
    %732 = vector.broadcast %c0_i32_273 : i32 to vector<32x1xi32>
    %733 = arith.cmpi sge, %731, %732 : vector<32x1xi32>
    %c-1_i32_274 = arith.constant -1 : i32
    %734 = vector.broadcast %c-1_i32_274 : i32 to vector<32x1xi32>
    %735 = arith.addi %724, %734 : vector<32x1xi32>
    %c4_i32_275 = arith.constant 4 : i32
    %736 = vector.broadcast %c4_i32_275 : i32 to vector<32x1xi32>
    %737 = arith.cmpi slt, %735, %736 : vector<32x1xi32>
    %738 = arith.andi %733, %737 : vector<32x1xi1>
    %c-1_i32_276 = arith.constant -1 : i32
    %739 = vector.broadcast %c-1_i32_276 : i32 to vector<32x1xi32>
    %740 = arith.addi %726, %739 : vector<32x1xi32>
    %c0_i32_277 = arith.constant 0 : i32
    %741 = vector.broadcast %c0_i32_277 : i32 to vector<32x1xi32>
    %742 = arith.cmpi sge, %740, %741 : vector<32x1xi32>
    %743 = arith.andi %738, %742 : vector<32x1xi1>
    %c-1_i32_278 = arith.constant -1 : i32
    %744 = vector.broadcast %c-1_i32_278 : i32 to vector<32x1xi32>
    %745 = arith.addi %726, %744 : vector<32x1xi32>
    %c4_i32_279 = arith.constant 4 : i32
    %746 = vector.broadcast %c4_i32_279 : i32 to vector<32x1xi32>
    %747 = arith.cmpi slt, %745, %746 : vector<32x1xi32>
    %748 = arith.andi %743, %747 : vector<32x1xi1>
    %749 = arith.extui %748 : vector<32x1xi1> to vector<32x1xi32>
    %750 = arith.sitofp %749 : vector<32x1xi32> to vector<32x1xf32>
    %751 = vector.broadcast %750 : vector<32x1xf32> to vector<32x16xf32>
    %752 = arith.mulf %729, %751 : vector<32x16xf32>
    %cst_280 = arith.constant 0.000000e+00 : f32
    %753 = vector.broadcast %cst_280 : f32 to vector<4x16xf32>
    %754 = vector.extract_strided_slice %719 {offsets = [0, 0], sizes = [28, 16], strides = [1, 1]} : vector<32x16xf32> to vector<28x16xf32>
    %755 = tpu.concatenate %753, %754 in 0 : vector<4x16xf32>, vector<28x16xf32> -> vector<32x16xf32>
    %c-1_i32_281 = arith.constant -1 : i32
    %756 = vector.broadcast %c-1_i32_281 : i32 to vector<32x1xi32>
    %757 = arith.addi %724, %756 : vector<32x1xi32>
    %c0_i32_282 = arith.constant 0 : i32
    %758 = vector.broadcast %c0_i32_282 : i32 to vector<32x1xi32>
    %759 = arith.cmpi sge, %757, %758 : vector<32x1xi32>
    %c-1_i32_283 = arith.constant -1 : i32
    %760 = vector.broadcast %c-1_i32_283 : i32 to vector<32x1xi32>
    %761 = arith.addi %724, %760 : vector<32x1xi32>
    %c4_i32_284 = arith.constant 4 : i32
    %762 = vector.broadcast %c4_i32_284 : i32 to vector<32x1xi32>
    %763 = arith.cmpi slt, %761, %762 : vector<32x1xi32>
    %764 = arith.andi %759, %763 : vector<32x1xi1>
    %c0_i32_285 = arith.constant 0 : i32
    %765 = vector.broadcast %c0_i32_285 : i32 to vector<32x1xi32>
    %766 = arith.addi %726, %765 : vector<32x1xi32>
    %c0_i32_286 = arith.constant 0 : i32
    %767 = vector.broadcast %c0_i32_286 : i32 to vector<32x1xi32>
    %768 = arith.cmpi sge, %766, %767 : vector<32x1xi32>
    %769 = arith.andi %764, %768 : vector<32x1xi1>
    %c0_i32_287 = arith.constant 0 : i32
    %770 = vector.broadcast %c0_i32_287 : i32 to vector<32x1xi32>
    %771 = arith.addi %726, %770 : vector<32x1xi32>
    %c4_i32_288 = arith.constant 4 : i32
    %772 = vector.broadcast %c4_i32_288 : i32 to vector<32x1xi32>
    %773 = arith.cmpi slt, %771, %772 : vector<32x1xi32>
    %774 = arith.andi %769, %773 : vector<32x1xi1>
    %775 = arith.extui %774 : vector<32x1xi1> to vector<32x1xi32>
    %776 = arith.sitofp %775 : vector<32x1xi32> to vector<32x1xf32>
    %777 = vector.broadcast %776 : vector<32x1xf32> to vector<32x16xf32>
    %778 = arith.mulf %755, %777 : vector<32x16xf32>
    %cst_289 = arith.constant 0.000000e+00 : f32
    %779 = vector.broadcast %cst_289 : f32 to vector<3x16xf32>
    %780 = vector.extract_strided_slice %719 {offsets = [0, 0], sizes = [29, 16], strides = [1, 1]} : vector<32x16xf32> to vector<29x16xf32>
    %781 = tpu.concatenate %779, %780 in 0 : vector<3x16xf32>, vector<29x16xf32> -> vector<32x16xf32>
    %c-1_i32_290 = arith.constant -1 : i32
    %782 = vector.broadcast %c-1_i32_290 : i32 to vector<32x1xi32>
    %783 = arith.addi %724, %782 : vector<32x1xi32>
    %c0_i32_291 = arith.constant 0 : i32
    %784 = vector.broadcast %c0_i32_291 : i32 to vector<32x1xi32>
    %785 = arith.cmpi sge, %783, %784 : vector<32x1xi32>
    %c-1_i32_292 = arith.constant -1 : i32
    %786 = vector.broadcast %c-1_i32_292 : i32 to vector<32x1xi32>
    %787 = arith.addi %724, %786 : vector<32x1xi32>
    %c4_i32_293 = arith.constant 4 : i32
    %788 = vector.broadcast %c4_i32_293 : i32 to vector<32x1xi32>
    %789 = arith.cmpi slt, %787, %788 : vector<32x1xi32>
    %790 = arith.andi %785, %789 : vector<32x1xi1>
    %c1_i32_294 = arith.constant 1 : i32
    %791 = vector.broadcast %c1_i32_294 : i32 to vector<32x1xi32>
    %792 = arith.addi %726, %791 : vector<32x1xi32>
    %c0_i32_295 = arith.constant 0 : i32
    %793 = vector.broadcast %c0_i32_295 : i32 to vector<32x1xi32>
    %794 = arith.cmpi sge, %792, %793 : vector<32x1xi32>
    %795 = arith.andi %790, %794 : vector<32x1xi1>
    %c1_i32_296 = arith.constant 1 : i32
    %796 = vector.broadcast %c1_i32_296 : i32 to vector<32x1xi32>
    %797 = arith.addi %726, %796 : vector<32x1xi32>
    %c4_i32_297 = arith.constant 4 : i32
    %798 = vector.broadcast %c4_i32_297 : i32 to vector<32x1xi32>
    %799 = arith.cmpi slt, %797, %798 : vector<32x1xi32>
    %800 = arith.andi %795, %799 : vector<32x1xi1>
    %801 = arith.extui %800 : vector<32x1xi1> to vector<32x1xi32>
    %802 = arith.sitofp %801 : vector<32x1xi32> to vector<32x1xf32>
    %803 = vector.broadcast %802 : vector<32x1xf32> to vector<32x16xf32>
    %804 = arith.mulf %781, %803 : vector<32x16xf32>
    %cst_298 = arith.constant 0.000000e+00 : f32
    %805 = vector.broadcast %cst_298 : f32 to vector<1x16xf32>
    %806 = vector.extract_strided_slice %719 {offsets = [0, 0], sizes = [31, 16], strides = [1, 1]} : vector<32x16xf32> to vector<31x16xf32>
    %807 = tpu.concatenate %805, %806 in 0 : vector<1x16xf32>, vector<31x16xf32> -> vector<32x16xf32>
    %c0_i32_299 = arith.constant 0 : i32
    %808 = vector.broadcast %c0_i32_299 : i32 to vector<32x1xi32>
    %809 = arith.addi %724, %808 : vector<32x1xi32>
    %c0_i32_300 = arith.constant 0 : i32
    %810 = vector.broadcast %c0_i32_300 : i32 to vector<32x1xi32>
    %811 = arith.cmpi sge, %809, %810 : vector<32x1xi32>
    %c0_i32_301 = arith.constant 0 : i32
    %812 = vector.broadcast %c0_i32_301 : i32 to vector<32x1xi32>
    %813 = arith.addi %724, %812 : vector<32x1xi32>
    %c4_i32_302 = arith.constant 4 : i32
    %814 = vector.broadcast %c4_i32_302 : i32 to vector<32x1xi32>
    %815 = arith.cmpi slt, %813, %814 : vector<32x1xi32>
    %816 = arith.andi %811, %815 : vector<32x1xi1>
    %c-1_i32_303 = arith.constant -1 : i32
    %817 = vector.broadcast %c-1_i32_303 : i32 to vector<32x1xi32>
    %818 = arith.addi %726, %817 : vector<32x1xi32>
    %c0_i32_304 = arith.constant 0 : i32
    %819 = vector.broadcast %c0_i32_304 : i32 to vector<32x1xi32>
    %820 = arith.cmpi sge, %818, %819 : vector<32x1xi32>
    %821 = arith.andi %816, %820 : vector<32x1xi1>
    %c-1_i32_305 = arith.constant -1 : i32
    %822 = vector.broadcast %c-1_i32_305 : i32 to vector<32x1xi32>
    %823 = arith.addi %726, %822 : vector<32x1xi32>
    %c4_i32_306 = arith.constant 4 : i32
    %824 = vector.broadcast %c4_i32_306 : i32 to vector<32x1xi32>
    %825 = arith.cmpi slt, %823, %824 : vector<32x1xi32>
    %826 = arith.andi %821, %825 : vector<32x1xi1>
    %827 = arith.extui %826 : vector<32x1xi1> to vector<32x1xi32>
    %828 = arith.sitofp %827 : vector<32x1xi32> to vector<32x1xf32>
    %829 = vector.broadcast %828 : vector<32x1xf32> to vector<32x16xf32>
    %830 = arith.mulf %807, %829 : vector<32x16xf32>
    %cst_307 = arith.constant 0.000000e+00 : f32
    %831 = vector.broadcast %cst_307 : f32 to vector<1x16xf32>
    %832 = vector.extract_strided_slice %719 {offsets = [1, 0], sizes = [31, 16], strides = [1, 1]} : vector<32x16xf32> to vector<31x16xf32>
    %833 = tpu.concatenate %832, %831 in 0 : vector<31x16xf32>, vector<1x16xf32> -> vector<32x16xf32>
    %c0_i32_308 = arith.constant 0 : i32
    %834 = vector.broadcast %c0_i32_308 : i32 to vector<32x1xi32>
    %835 = arith.addi %724, %834 : vector<32x1xi32>
    %c0_i32_309 = arith.constant 0 : i32
    %836 = vector.broadcast %c0_i32_309 : i32 to vector<32x1xi32>
    %837 = arith.cmpi sge, %835, %836 : vector<32x1xi32>
    %c0_i32_310 = arith.constant 0 : i32
    %838 = vector.broadcast %c0_i32_310 : i32 to vector<32x1xi32>
    %839 = arith.addi %724, %838 : vector<32x1xi32>
    %c4_i32_311 = arith.constant 4 : i32
    %840 = vector.broadcast %c4_i32_311 : i32 to vector<32x1xi32>
    %841 = arith.cmpi slt, %839, %840 : vector<32x1xi32>
    %842 = arith.andi %837, %841 : vector<32x1xi1>
    %c1_i32_312 = arith.constant 1 : i32
    %843 = vector.broadcast %c1_i32_312 : i32 to vector<32x1xi32>
    %844 = arith.addi %726, %843 : vector<32x1xi32>
    %c0_i32_313 = arith.constant 0 : i32
    %845 = vector.broadcast %c0_i32_313 : i32 to vector<32x1xi32>
    %846 = arith.cmpi sge, %844, %845 : vector<32x1xi32>
    %847 = arith.andi %842, %846 : vector<32x1xi1>
    %c1_i32_314 = arith.constant 1 : i32
    %848 = vector.broadcast %c1_i32_314 : i32 to vector<32x1xi32>
    %849 = arith.addi %726, %848 : vector<32x1xi32>
    %c4_i32_315 = arith.constant 4 : i32
    %850 = vector.broadcast %c4_i32_315 : i32 to vector<32x1xi32>
    %851 = arith.cmpi slt, %849, %850 : vector<32x1xi32>
    %852 = arith.andi %847, %851 : vector<32x1xi1>
    %853 = arith.extui %852 : vector<32x1xi1> to vector<32x1xi32>
    %854 = arith.sitofp %853 : vector<32x1xi32> to vector<32x1xf32>
    %855 = vector.broadcast %854 : vector<32x1xf32> to vector<32x16xf32>
    %856 = arith.mulf %833, %855 : vector<32x16xf32>
    %cst_316 = arith.constant 0.000000e+00 : f32
    %857 = vector.broadcast %cst_316 : f32 to vector<3x16xf32>
    %858 = vector.extract_strided_slice %719 {offsets = [3, 0], sizes = [29, 16], strides = [1, 1]} : vector<32x16xf32> to vector<29x16xf32>
    %859 = tpu.concatenate %858, %857 in 0 : vector<29x16xf32>, vector<3x16xf32> -> vector<32x16xf32>
    %c1_i32_317 = arith.constant 1 : i32
    %860 = vector.broadcast %c1_i32_317 : i32 to vector<32x1xi32>
    %861 = arith.addi %724, %860 : vector<32x1xi32>
    %c0_i32_318 = arith.constant 0 : i32
    %862 = vector.broadcast %c0_i32_318 : i32 to vector<32x1xi32>
    %863 = arith.cmpi sge, %861, %862 : vector<32x1xi32>
    %c1_i32_319 = arith.constant 1 : i32
    %864 = vector.broadcast %c1_i32_319 : i32 to vector<32x1xi32>
    %865 = arith.addi %724, %864 : vector<32x1xi32>
    %c4_i32_320 = arith.constant 4 : i32
    %866 = vector.broadcast %c4_i32_320 : i32 to vector<32x1xi32>
    %867 = arith.cmpi slt, %865, %866 : vector<32x1xi32>
    %868 = arith.andi %863, %867 : vector<32x1xi1>
    %c-1_i32_321 = arith.constant -1 : i32
    %869 = vector.broadcast %c-1_i32_321 : i32 to vector<32x1xi32>
    %870 = arith.addi %726, %869 : vector<32x1xi32>
    %c0_i32_322 = arith.constant 0 : i32
    %871 = vector.broadcast %c0_i32_322 : i32 to vector<32x1xi32>
    %872 = arith.cmpi sge, %870, %871 : vector<32x1xi32>
    %873 = arith.andi %868, %872 : vector<32x1xi1>
    %c-1_i32_323 = arith.constant -1 : i32
    %874 = vector.broadcast %c-1_i32_323 : i32 to vector<32x1xi32>
    %875 = arith.addi %726, %874 : vector<32x1xi32>
    %c4_i32_324 = arith.constant 4 : i32
    %876 = vector.broadcast %c4_i32_324 : i32 to vector<32x1xi32>
    %877 = arith.cmpi slt, %875, %876 : vector<32x1xi32>
    %878 = arith.andi %873, %877 : vector<32x1xi1>
    %879 = arith.extui %878 : vector<32x1xi1> to vector<32x1xi32>
    %880 = arith.sitofp %879 : vector<32x1xi32> to vector<32x1xf32>
    %881 = vector.broadcast %880 : vector<32x1xf32> to vector<32x16xf32>
    %882 = arith.mulf %859, %881 : vector<32x16xf32>
    %cst_325 = arith.constant 0.000000e+00 : f32
    %883 = vector.broadcast %cst_325 : f32 to vector<4x16xf32>
    %884 = vector.extract_strided_slice %719 {offsets = [4, 0], sizes = [28, 16], strides = [1, 1]} : vector<32x16xf32> to vector<28x16xf32>
    %885 = tpu.concatenate %884, %883 in 0 : vector<28x16xf32>, vector<4x16xf32> -> vector<32x16xf32>
    %c1_i32_326 = arith.constant 1 : i32
    %886 = vector.broadcast %c1_i32_326 : i32 to vector<32x1xi32>
    %887 = arith.addi %724, %886 : vector<32x1xi32>
    %c0_i32_327 = arith.constant 0 : i32
    %888 = vector.broadcast %c0_i32_327 : i32 to vector<32x1xi32>
    %889 = arith.cmpi sge, %887, %888 : vector<32x1xi32>
    %c1_i32_328 = arith.constant 1 : i32
    %890 = vector.broadcast %c1_i32_328 : i32 to vector<32x1xi32>
    %891 = arith.addi %724, %890 : vector<32x1xi32>
    %c4_i32_329 = arith.constant 4 : i32
    %892 = vector.broadcast %c4_i32_329 : i32 to vector<32x1xi32>
    %893 = arith.cmpi slt, %891, %892 : vector<32x1xi32>
    %894 = arith.andi %889, %893 : vector<32x1xi1>
    %c0_i32_330 = arith.constant 0 : i32
    %895 = vector.broadcast %c0_i32_330 : i32 to vector<32x1xi32>
    %896 = arith.addi %726, %895 : vector<32x1xi32>
    %c0_i32_331 = arith.constant 0 : i32
    %897 = vector.broadcast %c0_i32_331 : i32 to vector<32x1xi32>
    %898 = arith.cmpi sge, %896, %897 : vector<32x1xi32>
    %899 = arith.andi %894, %898 : vector<32x1xi1>
    %c0_i32_332 = arith.constant 0 : i32
    %900 = vector.broadcast %c0_i32_332 : i32 to vector<32x1xi32>
    %901 = arith.addi %726, %900 : vector<32x1xi32>
    %c4_i32_333 = arith.constant 4 : i32
    %902 = vector.broadcast %c4_i32_333 : i32 to vector<32x1xi32>
    %903 = arith.cmpi slt, %901, %902 : vector<32x1xi32>
    %904 = arith.andi %899, %903 : vector<32x1xi1>
    %905 = arith.extui %904 : vector<32x1xi1> to vector<32x1xi32>
    %906 = arith.sitofp %905 : vector<32x1xi32> to vector<32x1xf32>
    %907 = vector.broadcast %906 : vector<32x1xf32> to vector<32x16xf32>
    %908 = arith.mulf %885, %907 : vector<32x16xf32>
    %cst_334 = arith.constant 0.000000e+00 : f32
    %909 = vector.broadcast %cst_334 : f32 to vector<5x16xf32>
    %910 = vector.extract_strided_slice %719 {offsets = [5, 0], sizes = [27, 16], strides = [1, 1]} : vector<32x16xf32> to vector<27x16xf32>
    %911 = tpu.concatenate %910, %909 in 0 : vector<27x16xf32>, vector<5x16xf32> -> vector<32x16xf32>
    %c1_i32_335 = arith.constant 1 : i32
    %912 = vector.broadcast %c1_i32_335 : i32 to vector<32x1xi32>
    %913 = arith.addi %724, %912 : vector<32x1xi32>
    %c0_i32_336 = arith.constant 0 : i32
    %914 = vector.broadcast %c0_i32_336 : i32 to vector<32x1xi32>
    %915 = arith.cmpi sge, %913, %914 : vector<32x1xi32>
    %c1_i32_337 = arith.constant 1 : i32
    %916 = vector.broadcast %c1_i32_337 : i32 to vector<32x1xi32>
    %917 = arith.addi %724, %916 : vector<32x1xi32>
    %c4_i32_338 = arith.constant 4 : i32
    %918 = vector.broadcast %c4_i32_338 : i32 to vector<32x1xi32>
    %919 = arith.cmpi slt, %917, %918 : vector<32x1xi32>
    %920 = arith.andi %915, %919 : vector<32x1xi1>
    %c1_i32_339 = arith.constant 1 : i32
    %921 = vector.broadcast %c1_i32_339 : i32 to vector<32x1xi32>
    %922 = arith.addi %726, %921 : vector<32x1xi32>
    %c0_i32_340 = arith.constant 0 : i32
    %923 = vector.broadcast %c0_i32_340 : i32 to vector<32x1xi32>
    %924 = arith.cmpi sge, %922, %923 : vector<32x1xi32>
    %925 = arith.andi %920, %924 : vector<32x1xi1>
    %c1_i32_341 = arith.constant 1 : i32
    %926 = vector.broadcast %c1_i32_341 : i32 to vector<32x1xi32>
    %927 = arith.addi %726, %926 : vector<32x1xi32>
    %c4_i32_342 = arith.constant 4 : i32
    %928 = vector.broadcast %c4_i32_342 : i32 to vector<32x1xi32>
    %929 = arith.cmpi slt, %927, %928 : vector<32x1xi32>
    %930 = arith.andi %925, %929 : vector<32x1xi1>
    %931 = arith.extui %930 : vector<32x1xi1> to vector<32x1xi32>
    %932 = arith.sitofp %931 : vector<32x1xi32> to vector<32x1xf32>
    %933 = vector.broadcast %932 : vector<32x1xf32> to vector<32x16xf32>
    %934 = arith.mulf %911, %933 : vector<32x16xf32>
    %935 = tpu.concatenate %752, %778, %804, %830, %719, %856, %882, %908, %934 in 1 : vector<32x16xf32>, vector<32x16xf32>, vector<32x16xf32>, vector<32x16xf32>, vector<32x16xf32>, vector<32x16xf32>, vector<32x16xf32>, vector<32x16xf32>, vector<32x16xf32> -> vector<32x144xf32>
    %c432 = arith.constant 432 : index
    %c0_343 = arith.constant 0 : index
    %936 = vector.load %arg2[%c432, %c0_343] : memref<2464x128xbf16, #tpu.memory_space<vmem>>, vector<144x128xbf16>
    %937 = arith.truncf %935 : vector<32x144xf32> to vector<32x144xbf16>
    %cst_344 = arith.constant dense<0.000000e+00> : vector<32x128xf32>
    %938 = tpu.matmul %937, %936, %cst_344 {dimension_numbers = #tpu.dot_dimension_numbers<[1], [0], [0], [1], [0, 0, 1, 1], [], []>} : vector<32x144xbf16>, vector<144x128xbf16>, vector<32x128xf32> -> vector<32x128xf32>
    %c4_345 = arith.constant 4 : index
    %c0_346 = arith.constant 0 : index
    %939 = vector.load %arg3[%c4_345, %c0_346] : memref<24x128xf32, #tpu.memory_space<vmem>>, vector<1x128xf32>
    %940 = vector.broadcast %939 : vector<1x128xf32> to vector<32x128xf32>
    %941 = arith.addf %938, %940 : vector<32x128xf32>
    %942 = arith.addf %941, %493 : vector<32x128xf32>
    %cst_347 = arith.constant 0.000000e+00 : f32
    %943 = vector.broadcast %cst_347 : f32 to vector<32x128xf32>
    %944 = arith.maximumf %942, %943 : vector<32x128xf32>
    %945 = vector.extract_strided_slice %944 {offsets = [0, 0], sizes = [32, 16], strides = [1, 1]} : vector<32x128xf32> to vector<32x16xf32>
    %c0_348 = arith.constant 0 : index
    %c0_349 = arith.constant 0 : index
    %c0_350 = arith.constant 0 : index
    %946 = vector.load %arg5[%c0_348, %c0_349, %c0_350] : memref<9x8x32xf32, #tpu.memory_space<vmem>>, vector<1x8x32xf32>
    %947 = vector.shape_cast %946 : vector<1x8x32xf32> to vector<8x32xf32>
    %cst_351 = arith.constant dense<0.000000e+00> : vector<8x16xf32>
    %948 = tpu.matmul %947, %945, %cst_351 {dimension_numbers = #tpu.dot_dimension_numbers<[1], [0], [0], [1], [0, 0, 1, 1], [], []>} : vector<8x32xf32>, vector<32x16xf32>, vector<8x16xf32> -> vector<8x16xf32>
    %c576 = arith.constant 576 : index
    %c0_352 = arith.constant 0 : index
    %949 = vector.load %arg2[%c576, %c0_352] : memref<2464x128xbf16, #tpu.memory_space<vmem>>, vector<16x128xbf16>
    %950 = arith.truncf %948 : vector<8x16xf32> to vector<8x16xbf16>
    %cst_353 = arith.constant dense<0.000000e+00> : vector<8x128xf32>
    %951 = tpu.matmul %950, %949, %cst_353 {dimension_numbers = #tpu.dot_dimension_numbers<[1], [0], [0], [1], [0, 0, 1, 1], [], []>} : vector<8x16xbf16>, vector<16x128xbf16>, vector<8x128xf32> -> vector<8x128xf32>
    %c5_354 = arith.constant 5 : index
    %c0_355 = arith.constant 0 : index
    %952 = vector.load %arg3[%c5_354, %c0_355] : memref<24x128xf32, #tpu.memory_space<vmem>>, vector<1x128xf32>
    %953 = vector.broadcast %952 : vector<1x128xf32> to vector<8x128xf32>
    %954 = arith.addf %951, %953 : vector<8x128xf32>
    %955 = vector.extract_strided_slice %944 {offsets = [0, 0], sizes = [32, 16], strides = [1, 1]} : vector<32x128xf32> to vector<32x16xf32>
    %c1_356 = arith.constant 1 : index
    %c0_357 = arith.constant 0 : index
    %c0_358 = arith.constant 0 : index
    %956 = vector.load %arg5[%c1_356, %c0_357, %c0_358] : memref<9x8x32xf32, #tpu.memory_space<vmem>>, vector<1x8x32xf32>
    %957 = vector.shape_cast %956 : vector<1x8x32xf32> to vector<8x32xf32>
    %cst_359 = arith.constant dense<0.000000e+00> : vector<8x16xf32>
    %958 = tpu.matmul %957, %955, %cst_359 {dimension_numbers = #tpu.dot_dimension_numbers<[1], [0], [0], [1], [0, 0, 1, 1], [], []>} : vector<8x32xf32>, vector<32x16xf32>, vector<8x16xf32> -> vector<8x16xf32>
    %c2_360 = arith.constant 2 : index
    %c0_361 = arith.constant 0 : index
    %c0_362 = arith.constant 0 : index
    %959 = vector.load %arg5[%c2_360, %c0_361, %c0_362] : memref<9x8x32xf32, #tpu.memory_space<vmem>>, vector<1x8x32xf32>
    %960 = vector.shape_cast %959 : vector<1x8x32xf32> to vector<8x32xf32>
    %cst_363 = arith.constant dense<0.000000e+00> : vector<8x16xf32>
    %961 = tpu.matmul %960, %955, %cst_363 {dimension_numbers = #tpu.dot_dimension_numbers<[1], [0], [0], [1], [0, 0, 1, 1], [], []>} : vector<8x32xf32>, vector<32x16xf32>, vector<8x16xf32> -> vector<8x16xf32>
    %c3_364 = arith.constant 3 : index
    %c0_365 = arith.constant 0 : index
    %c0_366 = arith.constant 0 : index
    %962 = vector.load %arg5[%c3_364, %c0_365, %c0_366] : memref<9x8x32xf32, #tpu.memory_space<vmem>>, vector<1x8x32xf32>
    %963 = vector.shape_cast %962 : vector<1x8x32xf32> to vector<8x32xf32>
    %cst_367 = arith.constant dense<0.000000e+00> : vector<8x16xf32>
    %964 = tpu.matmul %963, %955, %cst_367 {dimension_numbers = #tpu.dot_dimension_numbers<[1], [0], [0], [1], [0, 0, 1, 1], [], []>} : vector<8x32xf32>, vector<32x16xf32>, vector<8x16xf32> -> vector<8x16xf32>
    %c4_368 = arith.constant 4 : index
    %c0_369 = arith.constant 0 : index
    %c0_370 = arith.constant 0 : index
    %965 = vector.load %arg5[%c4_368, %c0_369, %c0_370] : memref<9x8x32xf32, #tpu.memory_space<vmem>>, vector<1x8x32xf32>
    %966 = vector.shape_cast %965 : vector<1x8x32xf32> to vector<8x32xf32>
    %cst_371 = arith.constant dense<0.000000e+00> : vector<8x16xf32>
    %967 = tpu.matmul %966, %955, %cst_371 {dimension_numbers = #tpu.dot_dimension_numbers<[1], [0], [0], [1], [0, 0, 1, 1], [], []>} : vector<8x32xf32>, vector<32x16xf32>, vector<8x16xf32> -> vector<8x16xf32>
    %c0_372 = arith.constant 0 : index
    %c0_373 = arith.constant 0 : index
    %c0_374 = arith.constant 0 : index
    %968 = vector.load %arg5[%c0_372, %c0_373, %c0_374] : memref<9x8x32xf32, #tpu.memory_space<vmem>>, vector<1x8x32xf32>
    %969 = vector.shape_cast %968 : vector<1x8x32xf32> to vector<8x32xf32>
    %cst_375 = arith.constant dense<0.000000e+00> : vector<8x16xf32>
    %970 = tpu.matmul %969, %955, %cst_375 {dimension_numbers = #tpu.dot_dimension_numbers<[1], [0], [0], [1], [0, 0, 1, 1], [], []>} : vector<8x32xf32>, vector<32x16xf32>, vector<8x16xf32> -> vector<8x16xf32>
    %c5_376 = arith.constant 5 : index
    %c0_377 = arith.constant 0 : index
    %c0_378 = arith.constant 0 : index
    %971 = vector.load %arg5[%c5_376, %c0_377, %c0_378] : memref<9x8x32xf32, #tpu.memory_space<vmem>>, vector<1x8x32xf32>
    %972 = vector.shape_cast %971 : vector<1x8x32xf32> to vector<8x32xf32>
    %cst_379 = arith.constant dense<0.000000e+00> : vector<8x16xf32>
    %973 = tpu.matmul %972, %955, %cst_379 {dimension_numbers = #tpu.dot_dimension_numbers<[1], [0], [0], [1], [0, 0, 1, 1], [], []>} : vector<8x32xf32>, vector<32x16xf32>, vector<8x16xf32> -> vector<8x16xf32>
    %c6_380 = arith.constant 6 : index
    %c0_381 = arith.constant 0 : index
    %c0_382 = arith.constant 0 : index
    %974 = vector.load %arg5[%c6_380, %c0_381, %c0_382] : memref<9x8x32xf32, #tpu.memory_space<vmem>>, vector<1x8x32xf32>
    %975 = vector.shape_cast %974 : vector<1x8x32xf32> to vector<8x32xf32>
    %cst_383 = arith.constant dense<0.000000e+00> : vector<8x16xf32>
    %976 = tpu.matmul %975, %955, %cst_383 {dimension_numbers = #tpu.dot_dimension_numbers<[1], [0], [0], [1], [0, 0, 1, 1], [], []>} : vector<8x32xf32>, vector<32x16xf32>, vector<8x16xf32> -> vector<8x16xf32>
    %c7_384 = arith.constant 7 : index
    %c0_385 = arith.constant 0 : index
    %c0_386 = arith.constant 0 : index
    %977 = vector.load %arg5[%c7_384, %c0_385, %c0_386] : memref<9x8x32xf32, #tpu.memory_space<vmem>>, vector<1x8x32xf32>
    %978 = vector.shape_cast %977 : vector<1x8x32xf32> to vector<8x32xf32>
    %cst_387 = arith.constant dense<0.000000e+00> : vector<8x16xf32>
    %979 = tpu.matmul %978, %955, %cst_387 {dimension_numbers = #tpu.dot_dimension_numbers<[1], [0], [0], [1], [0, 0, 1, 1], [], []>} : vector<8x32xf32>, vector<32x16xf32>, vector<8x16xf32> -> vector<8x16xf32>
    %c8_388 = arith.constant 8 : index
    %c0_389 = arith.constant 0 : index
    %c0_390 = arith.constant 0 : index
    %980 = vector.load %arg5[%c8_388, %c0_389, %c0_390] : memref<9x8x32xf32, #tpu.memory_space<vmem>>, vector<1x8x32xf32>
    %981 = vector.shape_cast %980 : vector<1x8x32xf32> to vector<8x32xf32>
    %cst_391 = arith.constant dense<0.000000e+00> : vector<8x16xf32>
    %982 = tpu.matmul %981, %955, %cst_391 {dimension_numbers = #tpu.dot_dimension_numbers<[1], [0], [0], [1], [0, 0, 1, 1], [], []>} : vector<8x32xf32>, vector<32x16xf32>, vector<8x16xf32> -> vector<8x16xf32>
    %983 = tpu.concatenate %958, %961, %964, %967, %970, %973, %976, %979, %982 in 1 : vector<8x16xf32>, vector<8x16xf32>, vector<8x16xf32>, vector<8x16xf32>, vector<8x16xf32>, vector<8x16xf32>, vector<8x16xf32>, vector<8x16xf32>, vector<8x16xf32> -> vector<8x144xf32>
    %c592 = arith.constant 592 : index
    %c0_392 = arith.constant 0 : index
    %984 = vector.load %arg2[%c592, %c0_392] : memref<2464x128xbf16, #tpu.memory_space<vmem>>, vector<144x128xbf16>
    %985 = arith.truncf %983 : vector<8x144xf32> to vector<8x144xbf16>
    %cst_393 = arith.constant dense<0.000000e+00> : vector<8x128xf32>
    %986 = tpu.matmul %985, %984, %cst_393 {dimension_numbers = #tpu.dot_dimension_numbers<[1], [0], [0], [1], [0, 0, 1, 1], [], []>} : vector<8x144xbf16>, vector<144x128xbf16>, vector<8x128xf32> -> vector<8x128xf32>
    %c6_394 = arith.constant 6 : index
    %c0_395 = arith.constant 0 : index
    %987 = vector.load %arg3[%c6_394, %c0_395] : memref<24x128xf32, #tpu.memory_space<vmem>>, vector<1x128xf32>
    %988 = vector.broadcast %987 : vector<1x128xf32> to vector<8x128xf32>
    %989 = arith.addf %986, %988 : vector<8x128xf32>
    %cst_396 = arith.constant 0.000000e+00 : f32
    %990 = vector.broadcast %cst_396 : f32 to vector<8x128xf32>
    %991 = arith.maximumf %989, %990 : vector<8x128xf32>
    %992 = vector.extract_strided_slice %991 {offsets = [0, 0], sizes = [8, 32], strides = [1, 1]} : vector<8x128xf32> to vector<8x32xf32>
    %993 = tpu.iota {dimensions = array<i32: 0>} : vector<8x1xi32>
    %c3_i32_397 = arith.constant 3 : i32
    %994 = vector.broadcast %c3_i32_397 : i32 to vector<8x1xi32>
    %995 = arith.andi %993, %994 : vector<8x1xi32>
    %c1_i32_398 = arith.constant 1 : i32
    %996 = vector.broadcast %c1_i32_398 : i32 to vector<8x1xi32>
    %997 = arith.shrsi %995, %996 : vector<8x1xi32>
    %c1_i32_399 = arith.constant 1 : i32
    %998 = vector.broadcast %c1_i32_399 : i32 to vector<8x1xi32>
    %999 = arith.andi %995, %998 : vector<8x1xi32>
    %cst_400 = arith.constant 0.000000e+00 : f32
    %1000 = vector.broadcast %cst_400 : f32 to vector<3x32xf32>
    %1001 = vector.extract_strided_slice %992 {offsets = [0, 0], sizes = [5, 32], strides = [1, 1]} : vector<8x32xf32> to vector<5x32xf32>
    %1002 = tpu.concatenate %1000, %1001 in 0 : vector<3x32xf32>, vector<5x32xf32> -> vector<8x32xf32>
    %c-1_i32_401 = arith.constant -1 : i32
    %1003 = vector.broadcast %c-1_i32_401 : i32 to vector<8x1xi32>
    %1004 = arith.addi %997, %1003 : vector<8x1xi32>
    %c0_i32_402 = arith.constant 0 : i32
    %1005 = vector.broadcast %c0_i32_402 : i32 to vector<8x1xi32>
    %1006 = arith.cmpi sge, %1004, %1005 : vector<8x1xi32>
    %c-1_i32_403 = arith.constant -1 : i32
    %1007 = vector.broadcast %c-1_i32_403 : i32 to vector<8x1xi32>
    %1008 = arith.addi %997, %1007 : vector<8x1xi32>
    %c2_i32_404 = arith.constant 2 : i32
    %1009 = vector.broadcast %c2_i32_404 : i32 to vector<8x1xi32>
    %1010 = arith.cmpi slt, %1008, %1009 : vector<8x1xi32>
    %1011 = arith.andi %1006, %1010 : vector<8x1xi1>
    %c-1_i32_405 = arith.constant -1 : i32
    %1012 = vector.broadcast %c-1_i32_405 : i32 to vector<8x1xi32>
    %1013 = arith.addi %999, %1012 : vector<8x1xi32>
    %c0_i32_406 = arith.constant 0 : i32
    %1014 = vector.broadcast %c0_i32_406 : i32 to vector<8x1xi32>
    %1015 = arith.cmpi sge, %1013, %1014 : vector<8x1xi32>
    %1016 = arith.andi %1011, %1015 : vector<8x1xi1>
    %c-1_i32_407 = arith.constant -1 : i32
    %1017 = vector.broadcast %c-1_i32_407 : i32 to vector<8x1xi32>
    %1018 = arith.addi %999, %1017 : vector<8x1xi32>
    %c2_i32_408 = arith.constant 2 : i32
    %1019 = vector.broadcast %c2_i32_408 : i32 to vector<8x1xi32>
    %1020 = arith.cmpi slt, %1018, %1019 : vector<8x1xi32>
    %1021 = arith.andi %1016, %1020 : vector<8x1xi1>
    %1022 = arith.extui %1021 : vector<8x1xi1> to vector<8x1xi32>
    %1023 = arith.sitofp %1022 : vector<8x1xi32> to vector<8x1xf32>
    %1024 = vector.broadcast %1023 : vector<8x1xf32> to vector<8x32xf32>
    %1025 = arith.mulf %1002, %1024 : vector<8x32xf32>
    %cst_409 = arith.constant 0.000000e+00 : f32
    %1026 = vector.broadcast %cst_409 : f32 to vector<2x32xf32>
    %1027 = vector.extract_strided_slice %992 {offsets = [0, 0], sizes = [6, 32], strides = [1, 1]} : vector<8x32xf32> to vector<6x32xf32>
    %1028 = tpu.concatenate %1026, %1027 in 0 : vector<2x32xf32>, vector<6x32xf32> -> vector<8x32xf32>
    %c-1_i32_410 = arith.constant -1 : i32
    %1029 = vector.broadcast %c-1_i32_410 : i32 to vector<8x1xi32>
    %1030 = arith.addi %997, %1029 : vector<8x1xi32>
    %c0_i32_411 = arith.constant 0 : i32
    %1031 = vector.broadcast %c0_i32_411 : i32 to vector<8x1xi32>
    %1032 = arith.cmpi sge, %1030, %1031 : vector<8x1xi32>
    %c-1_i32_412 = arith.constant -1 : i32
    %1033 = vector.broadcast %c-1_i32_412 : i32 to vector<8x1xi32>
    %1034 = arith.addi %997, %1033 : vector<8x1xi32>
    %c2_i32_413 = arith.constant 2 : i32
    %1035 = vector.broadcast %c2_i32_413 : i32 to vector<8x1xi32>
    %1036 = arith.cmpi slt, %1034, %1035 : vector<8x1xi32>
    %1037 = arith.andi %1032, %1036 : vector<8x1xi1>
    %c0_i32_414 = arith.constant 0 : i32
    %1038 = vector.broadcast %c0_i32_414 : i32 to vector<8x1xi32>
    %1039 = arith.addi %999, %1038 : vector<8x1xi32>
    %c0_i32_415 = arith.constant 0 : i32
    %1040 = vector.broadcast %c0_i32_415 : i32 to vector<8x1xi32>
    %1041 = arith.cmpi sge, %1039, %1040 : vector<8x1xi32>
    %1042 = arith.andi %1037, %1041 : vector<8x1xi1>
    %c0_i32_416 = arith.constant 0 : i32
    %1043 = vector.broadcast %c0_i32_416 : i32 to vector<8x1xi32>
    %1044 = arith.addi %999, %1043 : vector<8x1xi32>
    %c2_i32_417 = arith.constant 2 : i32
    %1045 = vector.broadcast %c2_i32_417 : i32 to vector<8x1xi32>
    %1046 = arith.cmpi slt, %1044, %1045 : vector<8x1xi32>
    %1047 = arith.andi %1042, %1046 : vector<8x1xi1>
    %1048 = arith.extui %1047 : vector<8x1xi1> to vector<8x1xi32>
    %1049 = arith.sitofp %1048 : vector<8x1xi32> to vector<8x1xf32>
    %1050 = vector.broadcast %1049 : vector<8x1xf32> to vector<8x32xf32>
    %1051 = arith.mulf %1028, %1050 : vector<8x32xf32>
    %cst_418 = arith.constant 0.000000e+00 : f32
    %1052 = vector.broadcast %cst_418 : f32 to vector<1x32xf32>
    %1053 = vector.extract_strided_slice %992 {offsets = [0, 0], sizes = [7, 32], strides = [1, 1]} : vector<8x32xf32> to vector<7x32xf32>
    %1054 = tpu.concatenate %1052, %1053 in 0 : vector<1x32xf32>, vector<7x32xf32> -> vector<8x32xf32>
    %c-1_i32_419 = arith.constant -1 : i32
    %1055 = vector.broadcast %c-1_i32_419 : i32 to vector<8x1xi32>
    %1056 = arith.addi %997, %1055 : vector<8x1xi32>
    %c0_i32_420 = arith.constant 0 : i32
    %1057 = vector.broadcast %c0_i32_420 : i32 to vector<8x1xi32>
    %1058 = arith.cmpi sge, %1056, %1057 : vector<8x1xi32>
    %c-1_i32_421 = arith.constant -1 : i32
    %1059 = vector.broadcast %c-1_i32_421 : i32 to vector<8x1xi32>
    %1060 = arith.addi %997, %1059 : vector<8x1xi32>
    %c2_i32_422 = arith.constant 2 : i32
    %1061 = vector.broadcast %c2_i32_422 : i32 to vector<8x1xi32>
    %1062 = arith.cmpi slt, %1060, %1061 : vector<8x1xi32>
    %1063 = arith.andi %1058, %1062 : vector<8x1xi1>
    %c1_i32_423 = arith.constant 1 : i32
    %1064 = vector.broadcast %c1_i32_423 : i32 to vector<8x1xi32>
    %1065 = arith.addi %999, %1064 : vector<8x1xi32>
    %c0_i32_424 = arith.constant 0 : i32
    %1066 = vector.broadcast %c0_i32_424 : i32 to vector<8x1xi32>
    %1067 = arith.cmpi sge, %1065, %1066 : vector<8x1xi32>
    %1068 = arith.andi %1063, %1067 : vector<8x1xi1>
    %c1_i32_425 = arith.constant 1 : i32
    %1069 = vector.broadcast %c1_i32_425 : i32 to vector<8x1xi32>
    %1070 = arith.addi %999, %1069 : vector<8x1xi32>
    %c2_i32_426 = arith.constant 2 : i32
    %1071 = vector.broadcast %c2_i32_426 : i32 to vector<8x1xi32>
    %1072 = arith.cmpi slt, %1070, %1071 : vector<8x1xi32>
    %1073 = arith.andi %1068, %1072 : vector<8x1xi1>
    %1074 = arith.extui %1073 : vector<8x1xi1> to vector<8x1xi32>
    %1075 = arith.sitofp %1074 : vector<8x1xi32> to vector<8x1xf32>
    %1076 = vector.broadcast %1075 : vector<8x1xf32> to vector<8x32xf32>
    %1077 = arith.mulf %1054, %1076 : vector<8x32xf32>
    %cst_427 = arith.constant 0.000000e+00 : f32
    %1078 = vector.broadcast %cst_427 : f32 to vector<1x32xf32>
    %1079 = vector.extract_strided_slice %992 {offsets = [0, 0], sizes = [7, 32], strides = [1, 1]} : vector<8x32xf32> to vector<7x32xf32>
    %1080 = tpu.concatenate %1078, %1079 in 0 : vector<1x32xf32>, vector<7x32xf32> -> vector<8x32xf32>
    %c0_i32_428 = arith.constant 0 : i32
    %1081 = vector.broadcast %c0_i32_428 : i32 to vector<8x1xi32>
    %1082 = arith.addi %997, %1081 : vector<8x1xi32>
    %c0_i32_429 = arith.constant 0 : i32
    %1083 = vector.broadcast %c0_i32_429 : i32 to vector<8x1xi32>
    %1084 = arith.cmpi sge, %1082, %1083 : vector<8x1xi32>
    %c0_i32_430 = arith.constant 0 : i32
    %1085 = vector.broadcast %c0_i32_430 : i32 to vector<8x1xi32>
    %1086 = arith.addi %997, %1085 : vector<8x1xi32>
    %c2_i32_431 = arith.constant 2 : i32
    %1087 = vector.broadcast %c2_i32_431 : i32 to vector<8x1xi32>
    %1088 = arith.cmpi slt, %1086, %1087 : vector<8x1xi32>
    %1089 = arith.andi %1084, %1088 : vector<8x1xi1>
    %c-1_i32_432 = arith.constant -1 : i32
    %1090 = vector.broadcast %c-1_i32_432 : i32 to vector<8x1xi32>
    %1091 = arith.addi %999, %1090 : vector<8x1xi32>
    %c0_i32_433 = arith.constant 0 : i32
    %1092 = vector.broadcast %c0_i32_433 : i32 to vector<8x1xi32>
    %1093 = arith.cmpi sge, %1091, %1092 : vector<8x1xi32>
    %1094 = arith.andi %1089, %1093 : vector<8x1xi1>
    %c-1_i32_434 = arith.constant -1 : i32
    %1095 = vector.broadcast %c-1_i32_434 : i32 to vector<8x1xi32>
    %1096 = arith.addi %999, %1095 : vector<8x1xi32>
    %c2_i32_435 = arith.constant 2 : i32
    %1097 = vector.broadcast %c2_i32_435 : i32 to vector<8x1xi32>
    %1098 = arith.cmpi slt, %1096, %1097 : vector<8x1xi32>
    %1099 = arith.andi %1094, %1098 : vector<8x1xi1>
    %1100 = arith.extui %1099 : vector<8x1xi1> to vector<8x1xi32>
    %1101 = arith.sitofp %1100 : vector<8x1xi32> to vector<8x1xf32>
    %1102 = vector.broadcast %1101 : vector<8x1xf32> to vector<8x32xf32>
    %1103 = arith.mulf %1080, %1102 : vector<8x32xf32>
    %cst_436 = arith.constant 0.000000e+00 : f32
    %1104 = vector.broadcast %cst_436 : f32 to vector<1x32xf32>
    %1105 = vector.extract_strided_slice %992 {offsets = [1, 0], sizes = [7, 32], strides = [1, 1]} : vector<8x32xf32> to vector<7x32xf32>
    %1106 = tpu.concatenate %1105, %1104 in 0 : vector<7x32xf32>, vector<1x32xf32> -> vector<8x32xf32>
    %c0_i32_437 = arith.constant 0 : i32
    %1107 = vector.broadcast %c0_i32_437 : i32 to vector<8x1xi32>
    %1108 = arith.addi %997, %1107 : vector<8x1xi32>
    %c0_i32_438 = arith.constant 0 : i32
    %1109 = vector.broadcast %c0_i32_438 : i32 to vector<8x1xi32>
    %1110 = arith.cmpi sge, %1108, %1109 : vector<8x1xi32>
    %c0_i32_439 = arith.constant 0 : i32
    %1111 = vector.broadcast %c0_i32_439 : i32 to vector<8x1xi32>
    %1112 = arith.addi %997, %1111 : vector<8x1xi32>
    %c2_i32_440 = arith.constant 2 : i32
    %1113 = vector.broadcast %c2_i32_440 : i32 to vector<8x1xi32>
    %1114 = arith.cmpi slt, %1112, %1113 : vector<8x1xi32>
    %1115 = arith.andi %1110, %1114 : vector<8x1xi1>
    %c1_i32_441 = arith.constant 1 : i32
    %1116 = vector.broadcast %c1_i32_441 : i32 to vector<8x1xi32>
    %1117 = arith.addi %999, %1116 : vector<8x1xi32>
    %c0_i32_442 = arith.constant 0 : i32
    %1118 = vector.broadcast %c0_i32_442 : i32 to vector<8x1xi32>
    %1119 = arith.cmpi sge, %1117, %1118 : vector<8x1xi32>
    %1120 = arith.andi %1115, %1119 : vector<8x1xi1>
    %c1_i32_443 = arith.constant 1 : i32
    %1121 = vector.broadcast %c1_i32_443 : i32 to vector<8x1xi32>
    %1122 = arith.addi %999, %1121 : vector<8x1xi32>
    %c2_i32_444 = arith.constant 2 : i32
    %1123 = vector.broadcast %c2_i32_444 : i32 to vector<8x1xi32>
    %1124 = arith.cmpi slt, %1122, %1123 : vector<8x1xi32>
    %1125 = arith.andi %1120, %1124 : vector<8x1xi1>
    %1126 = arith.extui %1125 : vector<8x1xi1> to vector<8x1xi32>
    %1127 = arith.sitofp %1126 : vector<8x1xi32> to vector<8x1xf32>
    %1128 = vector.broadcast %1127 : vector<8x1xf32> to vector<8x32xf32>
    %1129 = arith.mulf %1106, %1128 : vector<8x32xf32>
    %cst_445 = arith.constant 0.000000e+00 : f32
    %1130 = vector.broadcast %cst_445 : f32 to vector<1x32xf32>
    %1131 = vector.extract_strided_slice %992 {offsets = [1, 0], sizes = [7, 32], strides = [1, 1]} : vector<8x32xf32> to vector<7x32xf32>
    %1132 = tpu.concatenate %1131, %1130 in 0 : vector<7x32xf32>, vector<1x32xf32> -> vector<8x32xf32>
    %c1_i32_446 = arith.constant 1 : i32
    %1133 = vector.broadcast %c1_i32_446 : i32 to vector<8x1xi32>
    %1134 = arith.addi %997, %1133 : vector<8x1xi32>
    %c0_i32_447 = arith.constant 0 : i32
    %1135 = vector.broadcast %c0_i32_447 : i32 to vector<8x1xi32>
    %1136 = arith.cmpi sge, %1134, %1135 : vector<8x1xi32>
    %c1_i32_448 = arith.constant 1 : i32
    %1137 = vector.broadcast %c1_i32_448 : i32 to vector<8x1xi32>
    %1138 = arith.addi %997, %1137 : vector<8x1xi32>
    %c2_i32_449 = arith.constant 2 : i32
    %1139 = vector.broadcast %c2_i32_449 : i32 to vector<8x1xi32>
    %1140 = arith.cmpi slt, %1138, %1139 : vector<8x1xi32>
    %1141 = arith.andi %1136, %1140 : vector<8x1xi1>
    %c-1_i32_450 = arith.constant -1 : i32
    %1142 = vector.broadcast %c-1_i32_450 : i32 to vector<8x1xi32>
    %1143 = arith.addi %999, %1142 : vector<8x1xi32>
    %c0_i32_451 = arith.constant 0 : i32
    %1144 = vector.broadcast %c0_i32_451 : i32 to vector<8x1xi32>
    %1145 = arith.cmpi sge, %1143, %1144 : vector<8x1xi32>
    %1146 = arith.andi %1141, %1145 : vector<8x1xi1>
    %c-1_i32_452 = arith.constant -1 : i32
    %1147 = vector.broadcast %c-1_i32_452 : i32 to vector<8x1xi32>
    %1148 = arith.addi %999, %1147 : vector<8x1xi32>
    %c2_i32_453 = arith.constant 2 : i32
    %1149 = vector.broadcast %c2_i32_453 : i32 to vector<8x1xi32>
    %1150 = arith.cmpi slt, %1148, %1149 : vector<8x1xi32>
    %1151 = arith.andi %1146, %1150 : vector<8x1xi1>
    %1152 = arith.extui %1151 : vector<8x1xi1> to vector<8x1xi32>
    %1153 = arith.sitofp %1152 : vector<8x1xi32> to vector<8x1xf32>
    %1154 = vector.broadcast %1153 : vector<8x1xf32> to vector<8x32xf32>
    %1155 = arith.mulf %1132, %1154 : vector<8x32xf32>
    %cst_454 = arith.constant 0.000000e+00 : f32
    %1156 = vector.broadcast %cst_454 : f32 to vector<2x32xf32>
    %1157 = vector.extract_strided_slice %992 {offsets = [2, 0], sizes = [6, 32], strides = [1, 1]} : vector<8x32xf32> to vector<6x32xf32>
    %1158 = tpu.concatenate %1157, %1156 in 0 : vector<6x32xf32>, vector<2x32xf32> -> vector<8x32xf32>
    %c1_i32_455 = arith.constant 1 : i32
    %1159 = vector.broadcast %c1_i32_455 : i32 to vector<8x1xi32>
    %1160 = arith.addi %997, %1159 : vector<8x1xi32>
    %c0_i32_456 = arith.constant 0 : i32
    %1161 = vector.broadcast %c0_i32_456 : i32 to vector<8x1xi32>
    %1162 = arith.cmpi sge, %1160, %1161 : vector<8x1xi32>
    %c1_i32_457 = arith.constant 1 : i32
    %1163 = vector.broadcast %c1_i32_457 : i32 to vector<8x1xi32>
    %1164 = arith.addi %997, %1163 : vector<8x1xi32>
    %c2_i32_458 = arith.constant 2 : i32
    %1165 = vector.broadcast %c2_i32_458 : i32 to vector<8x1xi32>
    %1166 = arith.cmpi slt, %1164, %1165 : vector<8x1xi32>
    %1167 = arith.andi %1162, %1166 : vector<8x1xi1>
    %c0_i32_459 = arith.constant 0 : i32
    %1168 = vector.broadcast %c0_i32_459 : i32 to vector<8x1xi32>
    %1169 = arith.addi %999, %1168 : vector<8x1xi32>
    %c0_i32_460 = arith.constant 0 : i32
    %1170 = vector.broadcast %c0_i32_460 : i32 to vector<8x1xi32>
    %1171 = arith.cmpi sge, %1169, %1170 : vector<8x1xi32>
    %1172 = arith.andi %1167, %1171 : vector<8x1xi1>
    %c0_i32_461 = arith.constant 0 : i32
    %1173 = vector.broadcast %c0_i32_461 : i32 to vector<8x1xi32>
    %1174 = arith.addi %999, %1173 : vector<8x1xi32>
    %c2_i32_462 = arith.constant 2 : i32
    %1175 = vector.broadcast %c2_i32_462 : i32 to vector<8x1xi32>
    %1176 = arith.cmpi slt, %1174, %1175 : vector<8x1xi32>
    %1177 = arith.andi %1172, %1176 : vector<8x1xi1>
    %1178 = arith.extui %1177 : vector<8x1xi1> to vector<8x1xi32>
    %1179 = arith.sitofp %1178 : vector<8x1xi32> to vector<8x1xf32>
    %1180 = vector.broadcast %1179 : vector<8x1xf32> to vector<8x32xf32>
    %1181 = arith.mulf %1158, %1180 : vector<8x32xf32>
    %cst_463 = arith.constant 0.000000e+00 : f32
    %1182 = vector.broadcast %cst_463 : f32 to vector<3x32xf32>
    %1183 = vector.extract_strided_slice %992 {offsets = [3, 0], sizes = [5, 32], strides = [1, 1]} : vector<8x32xf32> to vector<5x32xf32>
    %1184 = tpu.concatenate %1183, %1182 in 0 : vector<5x32xf32>, vector<3x32xf32> -> vector<8x32xf32>
    %c1_i32_464 = arith.constant 1 : i32
    %1185 = vector.broadcast %c1_i32_464 : i32 to vector<8x1xi32>
    %1186 = arith.addi %997, %1185 : vector<8x1xi32>
    %c0_i32_465 = arith.constant 0 : i32
    %1187 = vector.broadcast %c0_i32_465 : i32 to vector<8x1xi32>
    %1188 = arith.cmpi sge, %1186, %1187 : vector<8x1xi32>
    %c1_i32_466 = arith.constant 1 : i32
    %1189 = vector.broadcast %c1_i32_466 : i32 to vector<8x1xi32>
    %1190 = arith.addi %997, %1189 : vector<8x1xi32>
    %c2_i32_467 = arith.constant 2 : i32
    %1191 = vector.broadcast %c2_i32_467 : i32 to vector<8x1xi32>
    %1192 = arith.cmpi slt, %1190, %1191 : vector<8x1xi32>
    %1193 = arith.andi %1188, %1192 : vector<8x1xi1>
    %c1_i32_468 = arith.constant 1 : i32
    %1194 = vector.broadcast %c1_i32_468 : i32 to vector<8x1xi32>
    %1195 = arith.addi %999, %1194 : vector<8x1xi32>
    %c0_i32_469 = arith.constant 0 : i32
    %1196 = vector.broadcast %c0_i32_469 : i32 to vector<8x1xi32>
    %1197 = arith.cmpi sge, %1195, %1196 : vector<8x1xi32>
    %1198 = arith.andi %1193, %1197 : vector<8x1xi1>
    %c1_i32_470 = arith.constant 1 : i32
    %1199 = vector.broadcast %c1_i32_470 : i32 to vector<8x1xi32>
    %1200 = arith.addi %999, %1199 : vector<8x1xi32>
    %c2_i32_471 = arith.constant 2 : i32
    %1201 = vector.broadcast %c2_i32_471 : i32 to vector<8x1xi32>
    %1202 = arith.cmpi slt, %1200, %1201 : vector<8x1xi32>
    %1203 = arith.andi %1198, %1202 : vector<8x1xi1>
    %1204 = arith.extui %1203 : vector<8x1xi1> to vector<8x1xi32>
    %1205 = arith.sitofp %1204 : vector<8x1xi32> to vector<8x1xf32>
    %1206 = vector.broadcast %1205 : vector<8x1xf32> to vector<8x32xf32>
    %1207 = arith.mulf %1184, %1206 : vector<8x32xf32>
    %1208 = tpu.concatenate %1025, %1051, %1077, %1103, %992, %1129, %1155, %1181, %1207 in 1 : vector<8x32xf32>, vector<8x32xf32>, vector<8x32xf32>, vector<8x32xf32>, vector<8x32xf32>, vector<8x32xf32>, vector<8x32xf32>, vector<8x32xf32>, vector<8x32xf32> -> vector<8x288xf32>
    %c736 = arith.constant 736 : index
    %c0_472 = arith.constant 0 : index
    %1209 = vector.load %arg2[%c736, %c0_472] : memref<2464x128xbf16, #tpu.memory_space<vmem>>, vector<288x128xbf16>
    %1210 = arith.truncf %1208 : vector<8x288xf32> to vector<8x288xbf16>
    %cst_473 = arith.constant dense<0.000000e+00> : vector<8x128xf32>
    %1211 = tpu.matmul %1210, %1209, %cst_473 {dimension_numbers = #tpu.dot_dimension_numbers<[1], [0], [0], [1], [0, 0, 1, 1], [], []>} : vector<8x288xbf16>, vector<288x128xbf16>, vector<8x128xf32> -> vector<8x128xf32>
    %c7_474 = arith.constant 7 : index
    %c0_475 = arith.constant 0 : index
    %1212 = vector.load %arg3[%c7_474, %c0_475] : memref<24x128xf32, #tpu.memory_space<vmem>>, vector<1x128xf32>
    %1213 = vector.broadcast %1212 : vector<1x128xf32> to vector<8x128xf32>
    %1214 = arith.addf %1211, %1213 : vector<8x128xf32>
    %1215 = arith.addf %1214, %954 : vector<8x128xf32>
    %cst_476 = arith.constant 0.000000e+00 : f32
    %1216 = vector.broadcast %cst_476 : f32 to vector<8x128xf32>
    %1217 = arith.maximumf %1215, %1216 : vector<8x128xf32>
    %1218 = vector.extract_strided_slice %1217 {offsets = [0, 0], sizes = [8, 32], strides = [1, 1]} : vector<8x128xf32> to vector<8x32xf32>
    %1219 = tpu.iota {dimensions = array<i32: 0>} : vector<8x1xi32>
    %c3_i32_477 = arith.constant 3 : i32
    %1220 = vector.broadcast %c3_i32_477 : i32 to vector<8x1xi32>
    %1221 = arith.andi %1219, %1220 : vector<8x1xi32>
    %c1_i32_478 = arith.constant 1 : i32
    %1222 = vector.broadcast %c1_i32_478 : i32 to vector<8x1xi32>
    %1223 = arith.shrsi %1221, %1222 : vector<8x1xi32>
    %c1_i32_479 = arith.constant 1 : i32
    %1224 = vector.broadcast %c1_i32_479 : i32 to vector<8x1xi32>
    %1225 = arith.andi %1221, %1224 : vector<8x1xi32>
    %cst_480 = arith.constant 0.000000e+00 : f32
    %1226 = vector.broadcast %cst_480 : f32 to vector<3x32xf32>
    %1227 = vector.extract_strided_slice %1218 {offsets = [0, 0], sizes = [5, 32], strides = [1, 1]} : vector<8x32xf32> to vector<5x32xf32>
    %1228 = tpu.concatenate %1226, %1227 in 0 : vector<3x32xf32>, vector<5x32xf32> -> vector<8x32xf32>
    %c-1_i32_481 = arith.constant -1 : i32
    %1229 = vector.broadcast %c-1_i32_481 : i32 to vector<8x1xi32>
    %1230 = arith.addi %1223, %1229 : vector<8x1xi32>
    %c0_i32_482 = arith.constant 0 : i32
    %1231 = vector.broadcast %c0_i32_482 : i32 to vector<8x1xi32>
    %1232 = arith.cmpi sge, %1230, %1231 : vector<8x1xi32>
    %c-1_i32_483 = arith.constant -1 : i32
    %1233 = vector.broadcast %c-1_i32_483 : i32 to vector<8x1xi32>
    %1234 = arith.addi %1223, %1233 : vector<8x1xi32>
    %c2_i32_484 = arith.constant 2 : i32
    %1235 = vector.broadcast %c2_i32_484 : i32 to vector<8x1xi32>
    %1236 = arith.cmpi slt, %1234, %1235 : vector<8x1xi32>
    %1237 = arith.andi %1232, %1236 : vector<8x1xi1>
    %c-1_i32_485 = arith.constant -1 : i32
    %1238 = vector.broadcast %c-1_i32_485 : i32 to vector<8x1xi32>
    %1239 = arith.addi %1225, %1238 : vector<8x1xi32>
    %c0_i32_486 = arith.constant 0 : i32
    %1240 = vector.broadcast %c0_i32_486 : i32 to vector<8x1xi32>
    %1241 = arith.cmpi sge, %1239, %1240 : vector<8x1xi32>
    %1242 = arith.andi %1237, %1241 : vector<8x1xi1>
    %c-1_i32_487 = arith.constant -1 : i32
    %1243 = vector.broadcast %c-1_i32_487 : i32 to vector<8x1xi32>
    %1244 = arith.addi %1225, %1243 : vector<8x1xi32>
    %c2_i32_488 = arith.constant 2 : i32
    %1245 = vector.broadcast %c2_i32_488 : i32 to vector<8x1xi32>
    %1246 = arith.cmpi slt, %1244, %1245 : vector<8x1xi32>
    %1247 = arith.andi %1242, %1246 : vector<8x1xi1>
    %1248 = arith.extui %1247 : vector<8x1xi1> to vector<8x1xi32>
    %1249 = arith.sitofp %1248 : vector<8x1xi32> to vector<8x1xf32>
    %1250 = vector.broadcast %1249 : vector<8x1xf32> to vector<8x32xf32>
    %1251 = arith.mulf %1228, %1250 : vector<8x32xf32>
    %cst_489 = arith.constant 0.000000e+00 : f32
    %1252 = vector.broadcast %cst_489 : f32 to vector<2x32xf32>
    %1253 = vector.extract_strided_slice %1218 {offsets = [0, 0], sizes = [6, 32], strides = [1, 1]} : vector<8x32xf32> to vector<6x32xf32>
    %1254 = tpu.concatenate %1252, %1253 in 0 : vector<2x32xf32>, vector<6x32xf32> -> vector<8x32xf32>
    %c-1_i32_490 = arith.constant -1 : i32
    %1255 = vector.broadcast %c-1_i32_490 : i32 to vector<8x1xi32>
    %1256 = arith.addi %1223, %1255 : vector<8x1xi32>
    %c0_i32_491 = arith.constant 0 : i32
    %1257 = vector.broadcast %c0_i32_491 : i32 to vector<8x1xi32>
    %1258 = arith.cmpi sge, %1256, %1257 : vector<8x1xi32>
    %c-1_i32_492 = arith.constant -1 : i32
    %1259 = vector.broadcast %c-1_i32_492 : i32 to vector<8x1xi32>
    %1260 = arith.addi %1223, %1259 : vector<8x1xi32>
    %c2_i32_493 = arith.constant 2 : i32
    %1261 = vector.broadcast %c2_i32_493 : i32 to vector<8x1xi32>
    %1262 = arith.cmpi slt, %1260, %1261 : vector<8x1xi32>
    %1263 = arith.andi %1258, %1262 : vector<8x1xi1>
    %c0_i32_494 = arith.constant 0 : i32
    %1264 = vector.broadcast %c0_i32_494 : i32 to vector<8x1xi32>
    %1265 = arith.addi %1225, %1264 : vector<8x1xi32>
    %c0_i32_495 = arith.constant 0 : i32
    %1266 = vector.broadcast %c0_i32_495 : i32 to vector<8x1xi32>
    %1267 = arith.cmpi sge, %1265, %1266 : vector<8x1xi32>
    %1268 = arith.andi %1263, %1267 : vector<8x1xi1>
    %c0_i32_496 = arith.constant 0 : i32
    %1269 = vector.broadcast %c0_i32_496 : i32 to vector<8x1xi32>
    %1270 = arith.addi %1225, %1269 : vector<8x1xi32>
    %c2_i32_497 = arith.constant 2 : i32
    %1271 = vector.broadcast %c2_i32_497 : i32 to vector<8x1xi32>
    %1272 = arith.cmpi slt, %1270, %1271 : vector<8x1xi32>
    %1273 = arith.andi %1268, %1272 : vector<8x1xi1>
    %1274 = arith.extui %1273 : vector<8x1xi1> to vector<8x1xi32>
    %1275 = arith.sitofp %1274 : vector<8x1xi32> to vector<8x1xf32>
    %1276 = vector.broadcast %1275 : vector<8x1xf32> to vector<8x32xf32>
    %1277 = arith.mulf %1254, %1276 : vector<8x32xf32>
    %cst_498 = arith.constant 0.000000e+00 : f32
    %1278 = vector.broadcast %cst_498 : f32 to vector<1x32xf32>
    %1279 = vector.extract_strided_slice %1218 {offsets = [0, 0], sizes = [7, 32], strides = [1, 1]} : vector<8x32xf32> to vector<7x32xf32>
    %1280 = tpu.concatenate %1278, %1279 in 0 : vector<1x32xf32>, vector<7x32xf32> -> vector<8x32xf32>
    %c-1_i32_499 = arith.constant -1 : i32
    %1281 = vector.broadcast %c-1_i32_499 : i32 to vector<8x1xi32>
    %1282 = arith.addi %1223, %1281 : vector<8x1xi32>
    %c0_i32_500 = arith.constant 0 : i32
    %1283 = vector.broadcast %c0_i32_500 : i32 to vector<8x1xi32>
    %1284 = arith.cmpi sge, %1282, %1283 : vector<8x1xi32>
    %c-1_i32_501 = arith.constant -1 : i32
    %1285 = vector.broadcast %c-1_i32_501 : i32 to vector<8x1xi32>
    %1286 = arith.addi %1223, %1285 : vector<8x1xi32>
    %c2_i32_502 = arith.constant 2 : i32
    %1287 = vector.broadcast %c2_i32_502 : i32 to vector<8x1xi32>
    %1288 = arith.cmpi slt, %1286, %1287 : vector<8x1xi32>
    %1289 = arith.andi %1284, %1288 : vector<8x1xi1>
    %c1_i32_503 = arith.constant 1 : i32
    %1290 = vector.broadcast %c1_i32_503 : i32 to vector<8x1xi32>
    %1291 = arith.addi %1225, %1290 : vector<8x1xi32>
    %c0_i32_504 = arith.constant 0 : i32
    %1292 = vector.broadcast %c0_i32_504 : i32 to vector<8x1xi32>
    %1293 = arith.cmpi sge, %1291, %1292 : vector<8x1xi32>
    %1294 = arith.andi %1289, %1293 : vector<8x1xi1>
    %c1_i32_505 = arith.constant 1 : i32
    %1295 = vector.broadcast %c1_i32_505 : i32 to vector<8x1xi32>
    %1296 = arith.addi %1225, %1295 : vector<8x1xi32>
    %c2_i32_506 = arith.constant 2 : i32
    %1297 = vector.broadcast %c2_i32_506 : i32 to vector<8x1xi32>
    %1298 = arith.cmpi slt, %1296, %1297 : vector<8x1xi32>
    %1299 = arith.andi %1294, %1298 : vector<8x1xi1>
    %1300 = arith.extui %1299 : vector<8x1xi1> to vector<8x1xi32>
    %1301 = arith.sitofp %1300 : vector<8x1xi32> to vector<8x1xf32>
    %1302 = vector.broadcast %1301 : vector<8x1xf32> to vector<8x32xf32>
    %1303 = arith.mulf %1280, %1302 : vector<8x32xf32>
    %cst_507 = arith.constant 0.000000e+00 : f32
    %1304 = vector.broadcast %cst_507 : f32 to vector<1x32xf32>
    %1305 = vector.extract_strided_slice %1218 {offsets = [0, 0], sizes = [7, 32], strides = [1, 1]} : vector<8x32xf32> to vector<7x32xf32>
    %1306 = tpu.concatenate %1304, %1305 in 0 : vector<1x32xf32>, vector<7x32xf32> -> vector<8x32xf32>
    %c0_i32_508 = arith.constant 0 : i32
    %1307 = vector.broadcast %c0_i32_508 : i32 to vector<8x1xi32>
    %1308 = arith.addi %1223, %1307 : vector<8x1xi32>
    %c0_i32_509 = arith.constant 0 : i32
    %1309 = vector.broadcast %c0_i32_509 : i32 to vector<8x1xi32>
    %1310 = arith.cmpi sge, %1308, %1309 : vector<8x1xi32>
    %c0_i32_510 = arith.constant 0 : i32
    %1311 = vector.broadcast %c0_i32_510 : i32 to vector<8x1xi32>
    %1312 = arith.addi %1223, %1311 : vector<8x1xi32>
    %c2_i32_511 = arith.constant 2 : i32
    %1313 = vector.broadcast %c2_i32_511 : i32 to vector<8x1xi32>
    %1314 = arith.cmpi slt, %1312, %1313 : vector<8x1xi32>
    %1315 = arith.andi %1310, %1314 : vector<8x1xi1>
    %c-1_i32_512 = arith.constant -1 : i32
    %1316 = vector.broadcast %c-1_i32_512 : i32 to vector<8x1xi32>
    %1317 = arith.addi %1225, %1316 : vector<8x1xi32>
    %c0_i32_513 = arith.constant 0 : i32
    %1318 = vector.broadcast %c0_i32_513 : i32 to vector<8x1xi32>
    %1319 = arith.cmpi sge, %1317, %1318 : vector<8x1xi32>
    %1320 = arith.andi %1315, %1319 : vector<8x1xi1>
    %c-1_i32_514 = arith.constant -1 : i32
    %1321 = vector.broadcast %c-1_i32_514 : i32 to vector<8x1xi32>
    %1322 = arith.addi %1225, %1321 : vector<8x1xi32>
    %c2_i32_515 = arith.constant 2 : i32
    %1323 = vector.broadcast %c2_i32_515 : i32 to vector<8x1xi32>
    %1324 = arith.cmpi slt, %1322, %1323 : vector<8x1xi32>
    %1325 = arith.andi %1320, %1324 : vector<8x1xi1>
    %1326 = arith.extui %1325 : vector<8x1xi1> to vector<8x1xi32>
    %1327 = arith.sitofp %1326 : vector<8x1xi32> to vector<8x1xf32>
    %1328 = vector.broadcast %1327 : vector<8x1xf32> to vector<8x32xf32>
    %1329 = arith.mulf %1306, %1328 : vector<8x32xf32>
    %cst_516 = arith.constant 0.000000e+00 : f32
    %1330 = vector.broadcast %cst_516 : f32 to vector<1x32xf32>
    %1331 = vector.extract_strided_slice %1218 {offsets = [1, 0], sizes = [7, 32], strides = [1, 1]} : vector<8x32xf32> to vector<7x32xf32>
    %1332 = tpu.concatenate %1331, %1330 in 0 : vector<7x32xf32>, vector<1x32xf32> -> vector<8x32xf32>
    %c0_i32_517 = arith.constant 0 : i32
    %1333 = vector.broadcast %c0_i32_517 : i32 to vector<8x1xi32>
    %1334 = arith.addi %1223, %1333 : vector<8x1xi32>
    %c0_i32_518 = arith.constant 0 : i32
    %1335 = vector.broadcast %c0_i32_518 : i32 to vector<8x1xi32>
    %1336 = arith.cmpi sge, %1334, %1335 : vector<8x1xi32>
    %c0_i32_519 = arith.constant 0 : i32
    %1337 = vector.broadcast %c0_i32_519 : i32 to vector<8x1xi32>
    %1338 = arith.addi %1223, %1337 : vector<8x1xi32>
    %c2_i32_520 = arith.constant 2 : i32
    %1339 = vector.broadcast %c2_i32_520 : i32 to vector<8x1xi32>
    %1340 = arith.cmpi slt, %1338, %1339 : vector<8x1xi32>
    %1341 = arith.andi %1336, %1340 : vector<8x1xi1>
    %c1_i32_521 = arith.constant 1 : i32
    %1342 = vector.broadcast %c1_i32_521 : i32 to vector<8x1xi32>
    %1343 = arith.addi %1225, %1342 : vector<8x1xi32>
    %c0_i32_522 = arith.constant 0 : i32
    %1344 = vector.broadcast %c0_i32_522 : i32 to vector<8x1xi32>
    %1345 = arith.cmpi sge, %1343, %1344 : vector<8x1xi32>
    %1346 = arith.andi %1341, %1345 : vector<8x1xi1>
    %c1_i32_523 = arith.constant 1 : i32
    %1347 = vector.broadcast %c1_i32_523 : i32 to vector<8x1xi32>
    %1348 = arith.addi %1225, %1347 : vector<8x1xi32>
    %c2_i32_524 = arith.constant 2 : i32
    %1349 = vector.broadcast %c2_i32_524 : i32 to vector<8x1xi32>
    %1350 = arith.cmpi slt, %1348, %1349 : vector<8x1xi32>
    %1351 = arith.andi %1346, %1350 : vector<8x1xi1>
    %1352 = arith.extui %1351 : vector<8x1xi1> to vector<8x1xi32>
    %1353 = arith.sitofp %1352 : vector<8x1xi32> to vector<8x1xf32>
    %1354 = vector.broadcast %1353 : vector<8x1xf32> to vector<8x32xf32>
    %1355 = arith.mulf %1332, %1354 : vector<8x32xf32>
    %cst_525 = arith.constant 0.000000e+00 : f32
    %1356 = vector.broadcast %cst_525 : f32 to vector<1x32xf32>
    %1357 = vector.extract_strided_slice %1218 {offsets = [1, 0], sizes = [7, 32], strides = [1, 1]} : vector<8x32xf32> to vector<7x32xf32>
    %1358 = tpu.concatenate %1357, %1356 in 0 : vector<7x32xf32>, vector<1x32xf32> -> vector<8x32xf32>
    %c1_i32_526 = arith.constant 1 : i32
    %1359 = vector.broadcast %c1_i32_526 : i32 to vector<8x1xi32>
    %1360 = arith.addi %1223, %1359 : vector<8x1xi32>
    %c0_i32_527 = arith.constant 0 : i32
    %1361 = vector.broadcast %c0_i32_527 : i32 to vector<8x1xi32>
    %1362 = arith.cmpi sge, %1360, %1361 : vector<8x1xi32>
    %c1_i32_528 = arith.constant 1 : i32
    %1363 = vector.broadcast %c1_i32_528 : i32 to vector<8x1xi32>
    %1364 = arith.addi %1223, %1363 : vector<8x1xi32>
    %c2_i32_529 = arith.constant 2 : i32
    %1365 = vector.broadcast %c2_i32_529 : i32 to vector<8x1xi32>
    %1366 = arith.cmpi slt, %1364, %1365 : vector<8x1xi32>
    %1367 = arith.andi %1362, %1366 : vector<8x1xi1>
    %c-1_i32_530 = arith.constant -1 : i32
    %1368 = vector.broadcast %c-1_i32_530 : i32 to vector<8x1xi32>
    %1369 = arith.addi %1225, %1368 : vector<8x1xi32>
    %c0_i32_531 = arith.constant 0 : i32
    %1370 = vector.broadcast %c0_i32_531 : i32 to vector<8x1xi32>
    %1371 = arith.cmpi sge, %1369, %1370 : vector<8x1xi32>
    %1372 = arith.andi %1367, %1371 : vector<8x1xi1>
    %c-1_i32_532 = arith.constant -1 : i32
    %1373 = vector.broadcast %c-1_i32_532 : i32 to vector<8x1xi32>
    %1374 = arith.addi %1225, %1373 : vector<8x1xi32>
    %c2_i32_533 = arith.constant 2 : i32
    %1375 = vector.broadcast %c2_i32_533 : i32 to vector<8x1xi32>
    %1376 = arith.cmpi slt, %1374, %1375 : vector<8x1xi32>
    %1377 = arith.andi %1372, %1376 : vector<8x1xi1>
    %1378 = arith.extui %1377 : vector<8x1xi1> to vector<8x1xi32>
    %1379 = arith.sitofp %1378 : vector<8x1xi32> to vector<8x1xf32>
    %1380 = vector.broadcast %1379 : vector<8x1xf32> to vector<8x32xf32>
    %1381 = arith.mulf %1358, %1380 : vector<8x32xf32>
    %cst_534 = arith.constant 0.000000e+00 : f32
    %1382 = vector.broadcast %cst_534 : f32 to vector<2x32xf32>
    %1383 = vector.extract_strided_slice %1218 {offsets = [2, 0], sizes = [6, 32], strides = [1, 1]} : vector<8x32xf32> to vector<6x32xf32>
    %1384 = tpu.concatenate %1383, %1382 in 0 : vector<6x32xf32>, vector<2x32xf32> -> vector<8x32xf32>
    %c1_i32_535 = arith.constant 1 : i32
    %1385 = vector.broadcast %c1_i32_535 : i32 to vector<8x1xi32>
    %1386 = arith.addi %1223, %1385 : vector<8x1xi32>
    %c0_i32_536 = arith.constant 0 : i32
    %1387 = vector.broadcast %c0_i32_536 : i32 to vector<8x1xi32>
    %1388 = arith.cmpi sge, %1386, %1387 : vector<8x1xi32>
    %c1_i32_537 = arith.constant 1 : i32
    %1389 = vector.broadcast %c1_i32_537 : i32 to vector<8x1xi32>
    %1390 = arith.addi %1223, %1389 : vector<8x1xi32>
    %c2_i32_538 = arith.constant 2 : i32
    %1391 = vector.broadcast %c2_i32_538 : i32 to vector<8x1xi32>
    %1392 = arith.cmpi slt, %1390, %1391 : vector<8x1xi32>
    %1393 = arith.andi %1388, %1392 : vector<8x1xi1>
    %c0_i32_539 = arith.constant 0 : i32
    %1394 = vector.broadcast %c0_i32_539 : i32 to vector<8x1xi32>
    %1395 = arith.addi %1225, %1394 : vector<8x1xi32>
    %c0_i32_540 = arith.constant 0 : i32
    %1396 = vector.broadcast %c0_i32_540 : i32 to vector<8x1xi32>
    %1397 = arith.cmpi sge, %1395, %1396 : vector<8x1xi32>
    %1398 = arith.andi %1393, %1397 : vector<8x1xi1>
    %c0_i32_541 = arith.constant 0 : i32
    %1399 = vector.broadcast %c0_i32_541 : i32 to vector<8x1xi32>
    %1400 = arith.addi %1225, %1399 : vector<8x1xi32>
    %c2_i32_542 = arith.constant 2 : i32
    %1401 = vector.broadcast %c2_i32_542 : i32 to vector<8x1xi32>
    %1402 = arith.cmpi slt, %1400, %1401 : vector<8x1xi32>
    %1403 = arith.andi %1398, %1402 : vector<8x1xi1>
    %1404 = arith.extui %1403 : vector<8x1xi1> to vector<8x1xi32>
    %1405 = arith.sitofp %1404 : vector<8x1xi32> to vector<8x1xf32>
    %1406 = vector.broadcast %1405 : vector<8x1xf32> to vector<8x32xf32>
    %1407 = arith.mulf %1384, %1406 : vector<8x32xf32>
    %cst_543 = arith.constant 0.000000e+00 : f32
    %1408 = vector.broadcast %cst_543 : f32 to vector<3x32xf32>
    %1409 = vector.extract_strided_slice %1218 {offsets = [3, 0], sizes = [5, 32], strides = [1, 1]} : vector<8x32xf32> to vector<5x32xf32>
    %1410 = tpu.concatenate %1409, %1408 in 0 : vector<5x32xf32>, vector<3x32xf32> -> vector<8x32xf32>
    %c1_i32_544 = arith.constant 1 : i32
    %1411 = vector.broadcast %c1_i32_544 : i32 to vector<8x1xi32>
    %1412 = arith.addi %1223, %1411 : vector<8x1xi32>
    %c0_i32_545 = arith.constant 0 : i32
    %1413 = vector.broadcast %c0_i32_545 : i32 to vector<8x1xi32>
    %1414 = arith.cmpi sge, %1412, %1413 : vector<8x1xi32>
    %c1_i32_546 = arith.constant 1 : i32
    %1415 = vector.broadcast %c1_i32_546 : i32 to vector<8x1xi32>
    %1416 = arith.addi %1223, %1415 : vector<8x1xi32>
    %c2_i32_547 = arith.constant 2 : i32
    %1417 = vector.broadcast %c2_i32_547 : i32 to vector<8x1xi32>
    %1418 = arith.cmpi slt, %1416, %1417 : vector<8x1xi32>
    %1419 = arith.andi %1414, %1418 : vector<8x1xi1>
    %c1_i32_548 = arith.constant 1 : i32
    %1420 = vector.broadcast %c1_i32_548 : i32 to vector<8x1xi32>
    %1421 = arith.addi %1225, %1420 : vector<8x1xi32>
    %c0_i32_549 = arith.constant 0 : i32
    %1422 = vector.broadcast %c0_i32_549 : i32 to vector<8x1xi32>
    %1423 = arith.cmpi sge, %1421, %1422 : vector<8x1xi32>
    %1424 = arith.andi %1419, %1423 : vector<8x1xi1>
    %c1_i32_550 = arith.constant 1 : i32
    %1425 = vector.broadcast %c1_i32_550 : i32 to vector<8x1xi32>
    %1426 = arith.addi %1225, %1425 : vector<8x1xi32>
    %c2_i32_551 = arith.constant 2 : i32
    %1427 = vector.broadcast %c2_i32_551 : i32 to vector<8x1xi32>
    %1428 = arith.cmpi slt, %1426, %1427 : vector<8x1xi32>
    %1429 = arith.andi %1424, %1428 : vector<8x1xi1>
    %1430 = arith.extui %1429 : vector<8x1xi1> to vector<8x1xi32>
    %1431 = arith.sitofp %1430 : vector<8x1xi32> to vector<8x1xf32>
    %1432 = vector.broadcast %1431 : vector<8x1xf32> to vector<8x32xf32>
    %1433 = arith.mulf %1410, %1432 : vector<8x32xf32>
    %1434 = tpu.concatenate %1251, %1277, %1303, %1329, %1218, %1355, %1381, %1407, %1433 in 1 : vector<8x32xf32>, vector<8x32xf32>, vector<8x32xf32>, vector<8x32xf32>, vector<8x32xf32>, vector<8x32xf32>, vector<8x32xf32>, vector<8x32xf32>, vector<8x32xf32> -> vector<8x288xf32>
    %c1024 = arith.constant 1024 : index
    %c0_552 = arith.constant 0 : index
    %1435 = vector.load %arg2[%c1024, %c0_552] : memref<2464x128xbf16, #tpu.memory_space<vmem>>, vector<288x128xbf16>
    %1436 = arith.truncf %1434 : vector<8x288xf32> to vector<8x288xbf16>
    %cst_553 = arith.constant dense<0.000000e+00> : vector<8x128xf32>
    %1437 = tpu.matmul %1436, %1435, %cst_553 {dimension_numbers = #tpu.dot_dimension_numbers<[1], [0], [0], [1], [0, 0, 1, 1], [], []>} : vector<8x288xbf16>, vector<288x128xbf16>, vector<8x128xf32> -> vector<8x128xf32>
    %c8_554 = arith.constant 8 : index
    %c0_555 = arith.constant 0 : index
    %1438 = vector.load %arg3[%c8_554, %c0_555] : memref<24x128xf32, #tpu.memory_space<vmem>>, vector<1x128xf32>
    %1439 = vector.broadcast %1438 : vector<1x128xf32> to vector<8x128xf32>
    %1440 = arith.addf %1437, %1439 : vector<8x128xf32>
    %cst_556 = arith.constant 0.000000e+00 : f32
    %1441 = vector.broadcast %cst_556 : f32 to vector<8x128xf32>
    %1442 = arith.maximumf %1440, %1441 : vector<8x128xf32>
    %1443 = vector.extract_strided_slice %1442 {offsets = [0, 0], sizes = [8, 32], strides = [1, 1]} : vector<8x128xf32> to vector<8x32xf32>
    %1444 = tpu.iota {dimensions = array<i32: 0>} : vector<8x1xi32>
    %c3_i32_557 = arith.constant 3 : i32
    %1445 = vector.broadcast %c3_i32_557 : i32 to vector<8x1xi32>
    %1446 = arith.andi %1444, %1445 : vector<8x1xi32>
    %c1_i32_558 = arith.constant 1 : i32
    %1447 = vector.broadcast %c1_i32_558 : i32 to vector<8x1xi32>
    %1448 = arith.shrsi %1446, %1447 : vector<8x1xi32>
    %c1_i32_559 = arith.constant 1 : i32
    %1449 = vector.broadcast %c1_i32_559 : i32 to vector<8x1xi32>
    %1450 = arith.andi %1446, %1449 : vector<8x1xi32>
    %cst_560 = arith.constant 0.000000e+00 : f32
    %1451 = vector.broadcast %cst_560 : f32 to vector<3x32xf32>
    %1452 = vector.extract_strided_slice %1443 {offsets = [0, 0], sizes = [5, 32], strides = [1, 1]} : vector<8x32xf32> to vector<5x32xf32>
    %1453 = tpu.concatenate %1451, %1452 in 0 : vector<3x32xf32>, vector<5x32xf32> -> vector<8x32xf32>
    %c-1_i32_561 = arith.constant -1 : i32
    %1454 = vector.broadcast %c-1_i32_561 : i32 to vector<8x1xi32>
    %1455 = arith.addi %1448, %1454 : vector<8x1xi32>
    %c0_i32_562 = arith.constant 0 : i32
    %1456 = vector.broadcast %c0_i32_562 : i32 to vector<8x1xi32>
    %1457 = arith.cmpi sge, %1455, %1456 : vector<8x1xi32>
    %c-1_i32_563 = arith.constant -1 : i32
    %1458 = vector.broadcast %c-1_i32_563 : i32 to vector<8x1xi32>
    %1459 = arith.addi %1448, %1458 : vector<8x1xi32>
    %c2_i32_564 = arith.constant 2 : i32
    %1460 = vector.broadcast %c2_i32_564 : i32 to vector<8x1xi32>
    %1461 = arith.cmpi slt, %1459, %1460 : vector<8x1xi32>
    %1462 = arith.andi %1457, %1461 : vector<8x1xi1>
    %c-1_i32_565 = arith.constant -1 : i32
    %1463 = vector.broadcast %c-1_i32_565 : i32 to vector<8x1xi32>
    %1464 = arith.addi %1450, %1463 : vector<8x1xi32>
    %c0_i32_566 = arith.constant 0 : i32
    %1465 = vector.broadcast %c0_i32_566 : i32 to vector<8x1xi32>
    %1466 = arith.cmpi sge, %1464, %1465 : vector<8x1xi32>
    %1467 = arith.andi %1462, %1466 : vector<8x1xi1>
    %c-1_i32_567 = arith.constant -1 : i32
    %1468 = vector.broadcast %c-1_i32_567 : i32 to vector<8x1xi32>
    %1469 = arith.addi %1450, %1468 : vector<8x1xi32>
    %c2_i32_568 = arith.constant 2 : i32
    %1470 = vector.broadcast %c2_i32_568 : i32 to vector<8x1xi32>
    %1471 = arith.cmpi slt, %1469, %1470 : vector<8x1xi32>
    %1472 = arith.andi %1467, %1471 : vector<8x1xi1>
    %1473 = arith.extui %1472 : vector<8x1xi1> to vector<8x1xi32>
    %1474 = arith.sitofp %1473 : vector<8x1xi32> to vector<8x1xf32>
    %1475 = vector.broadcast %1474 : vector<8x1xf32> to vector<8x32xf32>
    %1476 = arith.mulf %1453, %1475 : vector<8x32xf32>
    %cst_569 = arith.constant 0.000000e+00 : f32
    %1477 = vector.broadcast %cst_569 : f32 to vector<2x32xf32>
    %1478 = vector.extract_strided_slice %1443 {offsets = [0, 0], sizes = [6, 32], strides = [1, 1]} : vector<8x32xf32> to vector<6x32xf32>
    %1479 = tpu.concatenate %1477, %1478 in 0 : vector<2x32xf32>, vector<6x32xf32> -> vector<8x32xf32>
    %c-1_i32_570 = arith.constant -1 : i32
    %1480 = vector.broadcast %c-1_i32_570 : i32 to vector<8x1xi32>
    %1481 = arith.addi %1448, %1480 : vector<8x1xi32>
    %c0_i32_571 = arith.constant 0 : i32
    %1482 = vector.broadcast %c0_i32_571 : i32 to vector<8x1xi32>
    %1483 = arith.cmpi sge, %1481, %1482 : vector<8x1xi32>
    %c-1_i32_572 = arith.constant -1 : i32
    %1484 = vector.broadcast %c-1_i32_572 : i32 to vector<8x1xi32>
    %1485 = arith.addi %1448, %1484 : vector<8x1xi32>
    %c2_i32_573 = arith.constant 2 : i32
    %1486 = vector.broadcast %c2_i32_573 : i32 to vector<8x1xi32>
    %1487 = arith.cmpi slt, %1485, %1486 : vector<8x1xi32>
    %1488 = arith.andi %1483, %1487 : vector<8x1xi1>
    %c0_i32_574 = arith.constant 0 : i32
    %1489 = vector.broadcast %c0_i32_574 : i32 to vector<8x1xi32>
    %1490 = arith.addi %1450, %1489 : vector<8x1xi32>
    %c0_i32_575 = arith.constant 0 : i32
    %1491 = vector.broadcast %c0_i32_575 : i32 to vector<8x1xi32>
    %1492 = arith.cmpi sge, %1490, %1491 : vector<8x1xi32>
    %1493 = arith.andi %1488, %1492 : vector<8x1xi1>
    %c0_i32_576 = arith.constant 0 : i32
    %1494 = vector.broadcast %c0_i32_576 : i32 to vector<8x1xi32>
    %1495 = arith.addi %1450, %1494 : vector<8x1xi32>
    %c2_i32_577 = arith.constant 2 : i32
    %1496 = vector.broadcast %c2_i32_577 : i32 to vector<8x1xi32>
    %1497 = arith.cmpi slt, %1495, %1496 : vector<8x1xi32>
    %1498 = arith.andi %1493, %1497 : vector<8x1xi1>
    %1499 = arith.extui %1498 : vector<8x1xi1> to vector<8x1xi32>
    %1500 = arith.sitofp %1499 : vector<8x1xi32> to vector<8x1xf32>
    %1501 = vector.broadcast %1500 : vector<8x1xf32> to vector<8x32xf32>
    %1502 = arith.mulf %1479, %1501 : vector<8x32xf32>
    %cst_578 = arith.constant 0.000000e+00 : f32
    %1503 = vector.broadcast %cst_578 : f32 to vector<1x32xf32>
    %1504 = vector.extract_strided_slice %1443 {offsets = [0, 0], sizes = [7, 32], strides = [1, 1]} : vector<8x32xf32> to vector<7x32xf32>
    %1505 = tpu.concatenate %1503, %1504 in 0 : vector<1x32xf32>, vector<7x32xf32> -> vector<8x32xf32>
    %c-1_i32_579 = arith.constant -1 : i32
    %1506 = vector.broadcast %c-1_i32_579 : i32 to vector<8x1xi32>
    %1507 = arith.addi %1448, %1506 : vector<8x1xi32>
    %c0_i32_580 = arith.constant 0 : i32
    %1508 = vector.broadcast %c0_i32_580 : i32 to vector<8x1xi32>
    %1509 = arith.cmpi sge, %1507, %1508 : vector<8x1xi32>
    %c-1_i32_581 = arith.constant -1 : i32
    %1510 = vector.broadcast %c-1_i32_581 : i32 to vector<8x1xi32>
    %1511 = arith.addi %1448, %1510 : vector<8x1xi32>
    %c2_i32_582 = arith.constant 2 : i32
    %1512 = vector.broadcast %c2_i32_582 : i32 to vector<8x1xi32>
    %1513 = arith.cmpi slt, %1511, %1512 : vector<8x1xi32>
    %1514 = arith.andi %1509, %1513 : vector<8x1xi1>
    %c1_i32_583 = arith.constant 1 : i32
    %1515 = vector.broadcast %c1_i32_583 : i32 to vector<8x1xi32>
    %1516 = arith.addi %1450, %1515 : vector<8x1xi32>
    %c0_i32_584 = arith.constant 0 : i32
    %1517 = vector.broadcast %c0_i32_584 : i32 to vector<8x1xi32>
    %1518 = arith.cmpi sge, %1516, %1517 : vector<8x1xi32>
    %1519 = arith.andi %1514, %1518 : vector<8x1xi1>
    %c1_i32_585 = arith.constant 1 : i32
    %1520 = vector.broadcast %c1_i32_585 : i32 to vector<8x1xi32>
    %1521 = arith.addi %1450, %1520 : vector<8x1xi32>
    %c2_i32_586 = arith.constant 2 : i32
    %1522 = vector.broadcast %c2_i32_586 : i32 to vector<8x1xi32>
    %1523 = arith.cmpi slt, %1521, %1522 : vector<8x1xi32>
    %1524 = arith.andi %1519, %1523 : vector<8x1xi1>
    %1525 = arith.extui %1524 : vector<8x1xi1> to vector<8x1xi32>
    %1526 = arith.sitofp %1525 : vector<8x1xi32> to vector<8x1xf32>
    %1527 = vector.broadcast %1526 : vector<8x1xf32> to vector<8x32xf32>
    %1528 = arith.mulf %1505, %1527 : vector<8x32xf32>
    %cst_587 = arith.constant 0.000000e+00 : f32
    %1529 = vector.broadcast %cst_587 : f32 to vector<1x32xf32>
    %1530 = vector.extract_strided_slice %1443 {offsets = [0, 0], sizes = [7, 32], strides = [1, 1]} : vector<8x32xf32> to vector<7x32xf32>
    %1531 = tpu.concatenate %1529, %1530 in 0 : vector<1x32xf32>, vector<7x32xf32> -> vector<8x32xf32>
    %c0_i32_588 = arith.constant 0 : i32
    %1532 = vector.broadcast %c0_i32_588 : i32 to vector<8x1xi32>
    %1533 = arith.addi %1448, %1532 : vector<8x1xi32>
    %c0_i32_589 = arith.constant 0 : i32
    %1534 = vector.broadcast %c0_i32_589 : i32 to vector<8x1xi32>
    %1535 = arith.cmpi sge, %1533, %1534 : vector<8x1xi32>
    %c0_i32_590 = arith.constant 0 : i32
    %1536 = vector.broadcast %c0_i32_590 : i32 to vector<8x1xi32>
    %1537 = arith.addi %1448, %1536 : vector<8x1xi32>
    %c2_i32_591 = arith.constant 2 : i32
    %1538 = vector.broadcast %c2_i32_591 : i32 to vector<8x1xi32>
    %1539 = arith.cmpi slt, %1537, %1538 : vector<8x1xi32>
    %1540 = arith.andi %1535, %1539 : vector<8x1xi1>
    %c-1_i32_592 = arith.constant -1 : i32
    %1541 = vector.broadcast %c-1_i32_592 : i32 to vector<8x1xi32>
    %1542 = arith.addi %1450, %1541 : vector<8x1xi32>
    %c0_i32_593 = arith.constant 0 : i32
    %1543 = vector.broadcast %c0_i32_593 : i32 to vector<8x1xi32>
    %1544 = arith.cmpi sge, %1542, %1543 : vector<8x1xi32>
    %1545 = arith.andi %1540, %1544 : vector<8x1xi1>
    %c-1_i32_594 = arith.constant -1 : i32
    %1546 = vector.broadcast %c-1_i32_594 : i32 to vector<8x1xi32>
    %1547 = arith.addi %1450, %1546 : vector<8x1xi32>
    %c2_i32_595 = arith.constant 2 : i32
    %1548 = vector.broadcast %c2_i32_595 : i32 to vector<8x1xi32>
    %1549 = arith.cmpi slt, %1547, %1548 : vector<8x1xi32>
    %1550 = arith.andi %1545, %1549 : vector<8x1xi1>
    %1551 = arith.extui %1550 : vector<8x1xi1> to vector<8x1xi32>
    %1552 = arith.sitofp %1551 : vector<8x1xi32> to vector<8x1xf32>
    %1553 = vector.broadcast %1552 : vector<8x1xf32> to vector<8x32xf32>
    %1554 = arith.mulf %1531, %1553 : vector<8x32xf32>
    %cst_596 = arith.constant 0.000000e+00 : f32
    %1555 = vector.broadcast %cst_596 : f32 to vector<1x32xf32>
    %1556 = vector.extract_strided_slice %1443 {offsets = [1, 0], sizes = [7, 32], strides = [1, 1]} : vector<8x32xf32> to vector<7x32xf32>
    %1557 = tpu.concatenate %1556, %1555 in 0 : vector<7x32xf32>, vector<1x32xf32> -> vector<8x32xf32>
    %c0_i32_597 = arith.constant 0 : i32
    %1558 = vector.broadcast %c0_i32_597 : i32 to vector<8x1xi32>
    %1559 = arith.addi %1448, %1558 : vector<8x1xi32>
    %c0_i32_598 = arith.constant 0 : i32
    %1560 = vector.broadcast %c0_i32_598 : i32 to vector<8x1xi32>
    %1561 = arith.cmpi sge, %1559, %1560 : vector<8x1xi32>
    %c0_i32_599 = arith.constant 0 : i32
    %1562 = vector.broadcast %c0_i32_599 : i32 to vector<8x1xi32>
    %1563 = arith.addi %1448, %1562 : vector<8x1xi32>
    %c2_i32_600 = arith.constant 2 : i32
    %1564 = vector.broadcast %c2_i32_600 : i32 to vector<8x1xi32>
    %1565 = arith.cmpi slt, %1563, %1564 : vector<8x1xi32>
    %1566 = arith.andi %1561, %1565 : vector<8x1xi1>
    %c1_i32_601 = arith.constant 1 : i32
    %1567 = vector.broadcast %c1_i32_601 : i32 to vector<8x1xi32>
    %1568 = arith.addi %1450, %1567 : vector<8x1xi32>
    %c0_i32_602 = arith.constant 0 : i32
    %1569 = vector.broadcast %c0_i32_602 : i32 to vector<8x1xi32>
    %1570 = arith.cmpi sge, %1568, %1569 : vector<8x1xi32>
    %1571 = arith.andi %1566, %1570 : vector<8x1xi1>
    %c1_i32_603 = arith.constant 1 : i32
    %1572 = vector.broadcast %c1_i32_603 : i32 to vector<8x1xi32>
    %1573 = arith.addi %1450, %1572 : vector<8x1xi32>
    %c2_i32_604 = arith.constant 2 : i32
    %1574 = vector.broadcast %c2_i32_604 : i32 to vector<8x1xi32>
    %1575 = arith.cmpi slt, %1573, %1574 : vector<8x1xi32>
    %1576 = arith.andi %1571, %1575 : vector<8x1xi1>
    %1577 = arith.extui %1576 : vector<8x1xi1> to vector<8x1xi32>
    %1578 = arith.sitofp %1577 : vector<8x1xi32> to vector<8x1xf32>
    %1579 = vector.broadcast %1578 : vector<8x1xf32> to vector<8x32xf32>
    %1580 = arith.mulf %1557, %1579 : vector<8x32xf32>
    %cst_605 = arith.constant 0.000000e+00 : f32
    %1581 = vector.broadcast %cst_605 : f32 to vector<1x32xf32>
    %1582 = vector.extract_strided_slice %1443 {offsets = [1, 0], sizes = [7, 32], strides = [1, 1]} : vector<8x32xf32> to vector<7x32xf32>
    %1583 = tpu.concatenate %1582, %1581 in 0 : vector<7x32xf32>, vector<1x32xf32> -> vector<8x32xf32>
    %c1_i32_606 = arith.constant 1 : i32
    %1584 = vector.broadcast %c1_i32_606 : i32 to vector<8x1xi32>
    %1585 = arith.addi %1448, %1584 : vector<8x1xi32>
    %c0_i32_607 = arith.constant 0 : i32
    %1586 = vector.broadcast %c0_i32_607 : i32 to vector<8x1xi32>
    %1587 = arith.cmpi sge, %1585, %1586 : vector<8x1xi32>
    %c1_i32_608 = arith.constant 1 : i32
    %1588 = vector.broadcast %c1_i32_608 : i32 to vector<8x1xi32>
    %1589 = arith.addi %1448, %1588 : vector<8x1xi32>
    %c2_i32_609 = arith.constant 2 : i32
    %1590 = vector.broadcast %c2_i32_609 : i32 to vector<8x1xi32>
    %1591 = arith.cmpi slt, %1589, %1590 : vector<8x1xi32>
    %1592 = arith.andi %1587, %1591 : vector<8x1xi1>
    %c-1_i32_610 = arith.constant -1 : i32
    %1593 = vector.broadcast %c-1_i32_610 : i32 to vector<8x1xi32>
    %1594 = arith.addi %1450, %1593 : vector<8x1xi32>
    %c0_i32_611 = arith.constant 0 : i32
    %1595 = vector.broadcast %c0_i32_611 : i32 to vector<8x1xi32>
    %1596 = arith.cmpi sge, %1594, %1595 : vector<8x1xi32>
    %1597 = arith.andi %1592, %1596 : vector<8x1xi1>
    %c-1_i32_612 = arith.constant -1 : i32
    %1598 = vector.broadcast %c-1_i32_612 : i32 to vector<8x1xi32>
    %1599 = arith.addi %1450, %1598 : vector<8x1xi32>
    %c2_i32_613 = arith.constant 2 : i32
    %1600 = vector.broadcast %c2_i32_613 : i32 to vector<8x1xi32>
    %1601 = arith.cmpi slt, %1599, %1600 : vector<8x1xi32>
    %1602 = arith.andi %1597, %1601 : vector<8x1xi1>
    %1603 = arith.extui %1602 : vector<8x1xi1> to vector<8x1xi32>
    %1604 = arith.sitofp %1603 : vector<8x1xi32> to vector<8x1xf32>
    %1605 = vector.broadcast %1604 : vector<8x1xf32> to vector<8x32xf32>
    %1606 = arith.mulf %1583, %1605 : vector<8x32xf32>
    %cst_614 = arith.constant 0.000000e+00 : f32
    %1607 = vector.broadcast %cst_614 : f32 to vector<2x32xf32>
    %1608 = vector.extract_strided_slice %1443 {offsets = [2, 0], sizes = [6, 32], strides = [1, 1]} : vector<8x32xf32> to vector<6x32xf32>
    %1609 = tpu.concatenate %1608, %1607 in 0 : vector<6x32xf32>, vector<2x32xf32> -> vector<8x32xf32>
    %c1_i32_615 = arith.constant 1 : i32
    %1610 = vector.broadcast %c1_i32_615 : i32 to vector<8x1xi32>
    %1611 = arith.addi %1448, %1610 : vector<8x1xi32>
    %c0_i32_616 = arith.constant 0 : i32
    %1612 = vector.broadcast %c0_i32_616 : i32 to vector<8x1xi32>
    %1613 = arith.cmpi sge, %1611, %1612 : vector<8x1xi32>
    %c1_i32_617 = arith.constant 1 : i32
    %1614 = vector.broadcast %c1_i32_617 : i32 to vector<8x1xi32>
    %1615 = arith.addi %1448, %1614 : vector<8x1xi32>
    %c2_i32_618 = arith.constant 2 : i32
    %1616 = vector.broadcast %c2_i32_618 : i32 to vector<8x1xi32>
    %1617 = arith.cmpi slt, %1615, %1616 : vector<8x1xi32>
    %1618 = arith.andi %1613, %1617 : vector<8x1xi1>
    %c0_i32_619 = arith.constant 0 : i32
    %1619 = vector.broadcast %c0_i32_619 : i32 to vector<8x1xi32>
    %1620 = arith.addi %1450, %1619 : vector<8x1xi32>
    %c0_i32_620 = arith.constant 0 : i32
    %1621 = vector.broadcast %c0_i32_620 : i32 to vector<8x1xi32>
    %1622 = arith.cmpi sge, %1620, %1621 : vector<8x1xi32>
    %1623 = arith.andi %1618, %1622 : vector<8x1xi1>
    %c0_i32_621 = arith.constant 0 : i32
    %1624 = vector.broadcast %c0_i32_621 : i32 to vector<8x1xi32>
    %1625 = arith.addi %1450, %1624 : vector<8x1xi32>
    %c2_i32_622 = arith.constant 2 : i32
    %1626 = vector.broadcast %c2_i32_622 : i32 to vector<8x1xi32>
    %1627 = arith.cmpi slt, %1625, %1626 : vector<8x1xi32>
    %1628 = arith.andi %1623, %1627 : vector<8x1xi1>
    %1629 = arith.extui %1628 : vector<8x1xi1> to vector<8x1xi32>
    %1630 = arith.sitofp %1629 : vector<8x1xi32> to vector<8x1xf32>
    %1631 = vector.broadcast %1630 : vector<8x1xf32> to vector<8x32xf32>
    %1632 = arith.mulf %1609, %1631 : vector<8x32xf32>
    %cst_623 = arith.constant 0.000000e+00 : f32
    %1633 = vector.broadcast %cst_623 : f32 to vector<3x32xf32>
    %1634 = vector.extract_strided_slice %1443 {offsets = [3, 0], sizes = [5, 32], strides = [1, 1]} : vector<8x32xf32> to vector<5x32xf32>
    %1635 = tpu.concatenate %1634, %1633 in 0 : vector<5x32xf32>, vector<3x32xf32> -> vector<8x32xf32>
    %c1_i32_624 = arith.constant 1 : i32
    %1636 = vector.broadcast %c1_i32_624 : i32 to vector<8x1xi32>
    %1637 = arith.addi %1448, %1636 : vector<8x1xi32>
    %c0_i32_625 = arith.constant 0 : i32
    %1638 = vector.broadcast %c0_i32_625 : i32 to vector<8x1xi32>
    %1639 = arith.cmpi sge, %1637, %1638 : vector<8x1xi32>
    %c1_i32_626 = arith.constant 1 : i32
    %1640 = vector.broadcast %c1_i32_626 : i32 to vector<8x1xi32>
    %1641 = arith.addi %1448, %1640 : vector<8x1xi32>
    %c2_i32_627 = arith.constant 2 : i32
    %1642 = vector.broadcast %c2_i32_627 : i32 to vector<8x1xi32>
    %1643 = arith.cmpi slt, %1641, %1642 : vector<8x1xi32>
    %1644 = arith.andi %1639, %1643 : vector<8x1xi1>
    %c1_i32_628 = arith.constant 1 : i32
    %1645 = vector.broadcast %c1_i32_628 : i32 to vector<8x1xi32>
    %1646 = arith.addi %1450, %1645 : vector<8x1xi32>
    %c0_i32_629 = arith.constant 0 : i32
    %1647 = vector.broadcast %c0_i32_629 : i32 to vector<8x1xi32>
    %1648 = arith.cmpi sge, %1646, %1647 : vector<8x1xi32>
    %1649 = arith.andi %1644, %1648 : vector<8x1xi1>
    %c1_i32_630 = arith.constant 1 : i32
    %1650 = vector.broadcast %c1_i32_630 : i32 to vector<8x1xi32>
    %1651 = arith.addi %1450, %1650 : vector<8x1xi32>
    %c2_i32_631 = arith.constant 2 : i32
    %1652 = vector.broadcast %c2_i32_631 : i32 to vector<8x1xi32>
    %1653 = arith.cmpi slt, %1651, %1652 : vector<8x1xi32>
    %1654 = arith.andi %1649, %1653 : vector<8x1xi1>
    %1655 = arith.extui %1654 : vector<8x1xi1> to vector<8x1xi32>
    %1656 = arith.sitofp %1655 : vector<8x1xi32> to vector<8x1xf32>
    %1657 = vector.broadcast %1656 : vector<8x1xf32> to vector<8x32xf32>
    %1658 = arith.mulf %1635, %1657 : vector<8x32xf32>
    %1659 = tpu.concatenate %1476, %1502, %1528, %1554, %1443, %1580, %1606, %1632, %1658 in 1 : vector<8x32xf32>, vector<8x32xf32>, vector<8x32xf32>, vector<8x32xf32>, vector<8x32xf32>, vector<8x32xf32>, vector<8x32xf32>, vector<8x32xf32>, vector<8x32xf32> -> vector<8x288xf32>
    %c1312 = arith.constant 1312 : index
    %c0_632 = arith.constant 0 : index
    %1660 = vector.load %arg2[%c1312, %c0_632] : memref<2464x128xbf16, #tpu.memory_space<vmem>>, vector<288x128xbf16>
    %1661 = arith.truncf %1659 : vector<8x288xf32> to vector<8x288xbf16>
    %cst_633 = arith.constant dense<0.000000e+00> : vector<8x128xf32>
    %1662 = tpu.matmul %1661, %1660, %cst_633 {dimension_numbers = #tpu.dot_dimension_numbers<[1], [0], [0], [1], [0, 0, 1, 1], [], []>} : vector<8x288xbf16>, vector<288x128xbf16>, vector<8x128xf32> -> vector<8x128xf32>
    %c9 = arith.constant 9 : index
    %c0_634 = arith.constant 0 : index
    %1663 = vector.load %arg3[%c9, %c0_634] : memref<24x128xf32, #tpu.memory_space<vmem>>, vector<1x128xf32>
    %1664 = vector.broadcast %1663 : vector<1x128xf32> to vector<8x128xf32>
    %1665 = arith.addf %1662, %1664 : vector<8x128xf32>
    %1666 = arith.addf %1665, %1217 : vector<8x128xf32>
    %cst_635 = arith.constant 0.000000e+00 : f32
    %1667 = vector.broadcast %cst_635 : f32 to vector<8x128xf32>
    %1668 = arith.maximumf %1666, %1667 : vector<8x128xf32>
    %1669 = vector.extract_strided_slice %1668 {offsets = [0, 0], sizes = [8, 32], strides = [1, 1]} : vector<8x128xf32> to vector<8x32xf32>
    %c0_636 = arith.constant 0 : index
    %c0_637 = arith.constant 0 : index
    %c0_638 = arith.constant 0 : index
    %1670 = vector.load %arg6[%c0_636, %c0_637, %c0_638] : memref<4x8x8xf32, #tpu.memory_space<vmem>>, vector<1x8x8xf32>
    %1671 = vector.shape_cast %1670 : vector<1x8x8xf32> to vector<8x8xf32>
    %cst_639 = arith.constant dense<0.000000e+00> : vector<8x32xf32>
    %1672 = tpu.matmul %1671, %1669, %cst_639 {dimension_numbers = #tpu.dot_dimension_numbers<[1], [0], [0], [1], [0, 0, 1, 1], [], []>} : vector<8x8xf32>, vector<8x32xf32>, vector<8x32xf32> -> vector<8x32xf32>
    %c1600 = arith.constant 1600 : index
    %c0_640 = arith.constant 0 : index
    %1673 = vector.load %arg2[%c1600, %c0_640] : memref<2464x128xbf16, #tpu.memory_space<vmem>>, vector<32x128xbf16>
    %1674 = arith.truncf %1672 : vector<8x32xf32> to vector<8x32xbf16>
    %cst_641 = arith.constant dense<0.000000e+00> : vector<8x128xf32>
    %1675 = tpu.matmul %1674, %1673, %cst_641 {dimension_numbers = #tpu.dot_dimension_numbers<[1], [0], [0], [1], [0, 0, 1, 1], [], []>} : vector<8x32xbf16>, vector<32x128xbf16>, vector<8x128xf32> -> vector<8x128xf32>
    %c10 = arith.constant 10 : index
    %c0_642 = arith.constant 0 : index
    %1676 = vector.load %arg3[%c10, %c0_642] : memref<24x128xf32, #tpu.memory_space<vmem>>, vector<1x128xf32>
    %1677 = vector.broadcast %1676 : vector<1x128xf32> to vector<8x128xf32>
    %1678 = arith.addf %1675, %1677 : vector<8x128xf32>
    %1679 = vector.extract_strided_slice %1668 {offsets = [0, 0], sizes = [8, 32], strides = [1, 1]} : vector<8x128xf32> to vector<8x32xf32>
    %c0_643 = arith.constant 0 : index
    %c0_644 = arith.constant 0 : index
    %c0_645 = arith.constant 0 : index
    %1680 = vector.load %arg6[%c0_643, %c0_644, %c0_645] : memref<4x8x8xf32, #tpu.memory_space<vmem>>, vector<1x8x8xf32>
    %1681 = vector.shape_cast %1680 : vector<1x8x8xf32> to vector<8x8xf32>
    %cst_646 = arith.constant dense<0.000000e+00> : vector<8x32xf32>
    %1682 = tpu.matmul %1681, %1679, %cst_646 {dimension_numbers = #tpu.dot_dimension_numbers<[1], [0], [0], [1], [0, 0, 1, 1], [], []>} : vector<8x8xf32>, vector<8x32xf32>, vector<8x32xf32> -> vector<8x32xf32>
    %c1_647 = arith.constant 1 : index
    %c0_648 = arith.constant 0 : index
    %c0_649 = arith.constant 0 : index
    %1683 = vector.load %arg6[%c1_647, %c0_648, %c0_649] : memref<4x8x8xf32, #tpu.memory_space<vmem>>, vector<1x8x8xf32>
    %1684 = vector.shape_cast %1683 : vector<1x8x8xf32> to vector<8x8xf32>
    %cst_650 = arith.constant dense<0.000000e+00> : vector<8x32xf32>
    %1685 = tpu.matmul %1684, %1679, %cst_650 {dimension_numbers = #tpu.dot_dimension_numbers<[1], [0], [0], [1], [0, 0, 1, 1], [], []>} : vector<8x8xf32>, vector<8x32xf32>, vector<8x32xf32> -> vector<8x32xf32>
    %c2_651 = arith.constant 2 : index
    %c0_652 = arith.constant 0 : index
    %c0_653 = arith.constant 0 : index
    %1686 = vector.load %arg6[%c2_651, %c0_652, %c0_653] : memref<4x8x8xf32, #tpu.memory_space<vmem>>, vector<1x8x8xf32>
    %1687 = vector.shape_cast %1686 : vector<1x8x8xf32> to vector<8x8xf32>
    %cst_654 = arith.constant dense<0.000000e+00> : vector<8x32xf32>
    %1688 = tpu.matmul %1687, %1679, %cst_654 {dimension_numbers = #tpu.dot_dimension_numbers<[1], [0], [0], [1], [0, 0, 1, 1], [], []>} : vector<8x8xf32>, vector<8x32xf32>, vector<8x32xf32> -> vector<8x32xf32>
    %c3_655 = arith.constant 3 : index
    %c0_656 = arith.constant 0 : index
    %c0_657 = arith.constant 0 : index
    %1689 = vector.load %arg6[%c3_655, %c0_656, %c0_657] : memref<4x8x8xf32, #tpu.memory_space<vmem>>, vector<1x8x8xf32>
    %1690 = vector.shape_cast %1689 : vector<1x8x8xf32> to vector<8x8xf32>
    %cst_658 = arith.constant dense<0.000000e+00> : vector<8x32xf32>
    %1691 = tpu.matmul %1690, %1679, %cst_658 {dimension_numbers = #tpu.dot_dimension_numbers<[1], [0], [0], [1], [0, 0, 1, 1], [], []>} : vector<8x8xf32>, vector<8x32xf32>, vector<8x32xf32> -> vector<8x32xf32>
    %1692 = tpu.concatenate %1682, %1685, %1688, %1691 in 1 : vector<8x32xf32>, vector<8x32xf32>, vector<8x32xf32>, vector<8x32xf32> -> vector<8x128xf32>
    %c1632 = arith.constant 1632 : index
    %c0_659 = arith.constant 0 : index
    %1693 = vector.load %arg2[%c1632, %c0_659] : memref<2464x128xbf16, #tpu.memory_space<vmem>>, vector<128x128xbf16>
    %1694 = arith.truncf %1692 : vector<8x128xf32> to vector<8x128xbf16>
    %cst_660 = arith.constant dense<0.000000e+00> : vector<8x128xf32>
    %1695 = tpu.matmul %1694, %1693, %cst_660 {dimension_numbers = #tpu.dot_dimension_numbers<[1], [0], [0], [1], [0, 0, 1, 1], [], []>} : vector<8x128xbf16>, vector<128x128xbf16>, vector<8x128xf32> -> vector<8x128xf32>
    %c11 = arith.constant 11 : index
    %c0_661 = arith.constant 0 : index
    %1696 = vector.load %arg3[%c11, %c0_661] : memref<24x128xf32, #tpu.memory_space<vmem>>, vector<1x128xf32>
    %1697 = vector.broadcast %1696 : vector<1x128xf32> to vector<8x128xf32>
    %1698 = arith.addf %1695, %1697 : vector<8x128xf32>
    %cst_662 = arith.constant 0.000000e+00 : f32
    %1699 = vector.broadcast %cst_662 : f32 to vector<8x128xf32>
    %1700 = arith.maximumf %1698, %1699 : vector<8x128xf32>
    %1701 = vector.extract_strided_slice %1700 {offsets = [0, 0], sizes = [8, 64], strides = [1, 1]} : vector<8x128xf32> to vector<8x64xf32>
    %c1760 = arith.constant 1760 : index
    %c0_663 = arith.constant 0 : index
    %1702 = vector.load %arg2[%c1760, %c0_663] : memref<2464x128xbf16, #tpu.memory_space<vmem>>, vector<64x128xbf16>
    %1703 = arith.truncf %1701 : vector<8x64xf32> to vector<8x64xbf16>
    %cst_664 = arith.constant dense<0.000000e+00> : vector<8x128xf32>
    %1704 = tpu.matmul %1703, %1702, %cst_664 {dimension_numbers = #tpu.dot_dimension_numbers<[1], [0], [0], [1], [0, 0, 1, 1], [], []>} : vector<8x64xbf16>, vector<64x128xbf16>, vector<8x128xf32> -> vector<8x128xf32>
    %c12 = arith.constant 12 : index
    %c0_665 = arith.constant 0 : index
    %1705 = vector.load %arg3[%c12, %c0_665] : memref<24x128xf32, #tpu.memory_space<vmem>>, vector<1x128xf32>
    %1706 = vector.broadcast %1705 : vector<1x128xf32> to vector<8x128xf32>
    %1707 = arith.addf %1704, %1706 : vector<8x128xf32>
    %1708 = arith.addf %1707, %1678 : vector<8x128xf32>
    %cst_666 = arith.constant 0.000000e+00 : f32
    %1709 = vector.broadcast %cst_666 : f32 to vector<8x128xf32>
    %1710 = arith.maximumf %1708, %1709 : vector<8x128xf32>
    %1711 = vector.extract_strided_slice %1710 {offsets = [0, 0], sizes = [8, 64], strides = [1, 1]} : vector<8x128xf32> to vector<8x64xf32>
    %c1824 = arith.constant 1824 : index
    %c0_667 = arith.constant 0 : index
    %1712 = vector.load %arg2[%c1824, %c0_667] : memref<2464x128xbf16, #tpu.memory_space<vmem>>, vector<64x128xbf16>
    %1713 = arith.truncf %1711 : vector<8x64xf32> to vector<8x64xbf16>
    %cst_668 = arith.constant dense<0.000000e+00> : vector<8x128xf32>
    %1714 = tpu.matmul %1713, %1712, %cst_668 {dimension_numbers = #tpu.dot_dimension_numbers<[1], [0], [0], [1], [0, 0, 1, 1], [], []>} : vector<8x64xbf16>, vector<64x128xbf16>, vector<8x128xf32> -> vector<8x128xf32>
    %c13 = arith.constant 13 : index
    %c0_669 = arith.constant 0 : index
    %1715 = vector.load %arg3[%c13, %c0_669] : memref<24x128xf32, #tpu.memory_space<vmem>>, vector<1x128xf32>
    %1716 = vector.broadcast %1715 : vector<1x128xf32> to vector<8x128xf32>
    %1717 = arith.addf %1714, %1716 : vector<8x128xf32>
    %cst_670 = arith.constant 0.000000e+00 : f32
    %1718 = vector.broadcast %cst_670 : f32 to vector<8x128xf32>
    %1719 = arith.maximumf %1717, %1718 : vector<8x128xf32>
    %1720 = vector.extract_strided_slice %1719 {offsets = [0, 0], sizes = [8, 64], strides = [1, 1]} : vector<8x128xf32> to vector<8x64xf32>
    %c1888 = arith.constant 1888 : index
    %c0_671 = arith.constant 0 : index
    %1721 = vector.load %arg2[%c1888, %c0_671] : memref<2464x128xbf16, #tpu.memory_space<vmem>>, vector<64x128xbf16>
    %1722 = arith.truncf %1720 : vector<8x64xf32> to vector<8x64xbf16>
    %cst_672 = arith.constant dense<0.000000e+00> : vector<8x128xf32>
    %1723 = tpu.matmul %1722, %1721, %cst_672 {dimension_numbers = #tpu.dot_dimension_numbers<[1], [0], [0], [1], [0, 0, 1, 1], [], []>} : vector<8x64xbf16>, vector<64x128xbf16>, vector<8x128xf32> -> vector<8x128xf32>
    %c14 = arith.constant 14 : index
    %c0_673 = arith.constant 0 : index
    %1724 = vector.load %arg3[%c14, %c0_673] : memref<24x128xf32, #tpu.memory_space<vmem>>, vector<1x128xf32>
    %1725 = vector.broadcast %1724 : vector<1x128xf32> to vector<8x128xf32>
    %1726 = arith.addf %1723, %1725 : vector<8x128xf32>
    %1727 = arith.addf %1726, %1710 : vector<8x128xf32>
    %cst_674 = arith.constant 0.000000e+00 : f32
    %1728 = vector.broadcast %cst_674 : f32 to vector<8x128xf32>
    %1729 = arith.maximumf %1727, %1728 : vector<8x128xf32>
    %1730 = vector.extract_strided_slice %1729 {offsets = [0, 0], sizes = [8, 64], strides = [1, 1]} : vector<8x128xf32> to vector<8x64xf32>
    %c1952 = arith.constant 1952 : index
    %c0_675 = arith.constant 0 : index
    %1731 = vector.load %arg2[%c1952, %c0_675] : memref<2464x128xbf16, #tpu.memory_space<vmem>>, vector<64x128xbf16>
    %1732 = arith.truncf %1730 : vector<8x64xf32> to vector<8x64xbf16>
    %cst_676 = arith.constant dense<0.000000e+00> : vector<8x128xf32>
    %1733 = tpu.matmul %1732, %1731, %cst_676 {dimension_numbers = #tpu.dot_dimension_numbers<[1], [0], [0], [1], [0, 0, 1, 1], [], []>} : vector<8x64xbf16>, vector<64x128xbf16>, vector<8x128xf32> -> vector<8x128xf32>
    %c15 = arith.constant 15 : index
    %c0_677 = arith.constant 0 : index
    %1734 = vector.load %arg3[%c15, %c0_677] : memref<24x128xf32, #tpu.memory_space<vmem>>, vector<1x128xf32>
    %1735 = vector.broadcast %1734 : vector<1x128xf32> to vector<8x128xf32>
    %1736 = arith.addf %1733, %1735 : vector<8x128xf32>
    %1737 = vector.extract_strided_slice %1729 {offsets = [0, 0], sizes = [8, 64], strides = [1, 1]} : vector<8x128xf32> to vector<8x64xf32>
    %c2016 = arith.constant 2016 : index
    %c0_678 = arith.constant 0 : index
    %1738 = vector.load %arg2[%c2016, %c0_678] : memref<2464x128xbf16, #tpu.memory_space<vmem>>, vector<64x128xbf16>
    %1739 = arith.truncf %1737 : vector<8x64xf32> to vector<8x64xbf16>
    %cst_679 = arith.constant dense<0.000000e+00> : vector<8x128xf32>
    %1740 = tpu.matmul %1739, %1738, %cst_679 {dimension_numbers = #tpu.dot_dimension_numbers<[1], [0], [0], [1], [0, 0, 1, 1], [], []>} : vector<8x64xbf16>, vector<64x128xbf16>, vector<8x128xf32> -> vector<8x128xf32>
    %c16 = arith.constant 16 : index
    %c0_680 = arith.constant 0 : index
    %1741 = vector.load %arg3[%c16, %c0_680] : memref<24x128xf32, #tpu.memory_space<vmem>>, vector<1x128xf32>
    %1742 = vector.broadcast %1741 : vector<1x128xf32> to vector<8x128xf32>
    %1743 = arith.addf %1740, %1742 : vector<8x128xf32>
    %cst_681 = arith.constant 0.000000e+00 : f32
    %1744 = vector.broadcast %cst_681 : f32 to vector<8x128xf32>
    %1745 = arith.maximumf %1743, %1744 : vector<8x128xf32>
    %c2080 = arith.constant 2080 : index
    %c0_682 = arith.constant 0 : index
    %1746 = vector.load %arg2[%c2080, %c0_682] : memref<2464x128xbf16, #tpu.memory_space<vmem>>, vector<128x128xbf16>
    %1747 = arith.truncf %1745 : vector<8x128xf32> to vector<8x128xbf16>
    %cst_683 = arith.constant dense<0.000000e+00> : vector<8x128xf32>
    %1748 = tpu.matmul %1747, %1746, %cst_683 {dimension_numbers = #tpu.dot_dimension_numbers<[1], [0], [0], [1], [0, 0, 1, 1], [], []>} : vector<8x128xbf16>, vector<128x128xbf16>, vector<8x128xf32> -> vector<8x128xf32>
    %c17 = arith.constant 17 : index
    %c0_684 = arith.constant 0 : index
    %1749 = vector.load %arg3[%c17, %c0_684] : memref<24x128xf32, #tpu.memory_space<vmem>>, vector<1x128xf32>
    %1750 = vector.broadcast %1749 : vector<1x128xf32> to vector<8x128xf32>
    %1751 = arith.addf %1748, %1750 : vector<8x128xf32>
    %1752 = arith.addf %1751, %1736 : vector<8x128xf32>
    %cst_685 = arith.constant 0.000000e+00 : f32
    %1753 = vector.broadcast %cst_685 : f32 to vector<8x128xf32>
    %1754 = arith.maximumf %1752, %1753 : vector<8x128xf32>
    %c2208 = arith.constant 2208 : index
    %c0_686 = arith.constant 0 : index
    %1755 = vector.load %arg2[%c2208, %c0_686] : memref<2464x128xbf16, #tpu.memory_space<vmem>>, vector<128x128xbf16>
    %1756 = arith.truncf %1754 : vector<8x128xf32> to vector<8x128xbf16>
    %cst_687 = arith.constant dense<0.000000e+00> : vector<8x128xf32>
    %1757 = tpu.matmul %1756, %1755, %cst_687 {dimension_numbers = #tpu.dot_dimension_numbers<[1], [0], [0], [1], [0, 0, 1, 1], [], []>} : vector<8x128xbf16>, vector<128x128xbf16>, vector<8x128xf32> -> vector<8x128xf32>
    %c18 = arith.constant 18 : index
    %c0_688 = arith.constant 0 : index
    %1758 = vector.load %arg3[%c18, %c0_688] : memref<24x128xf32, #tpu.memory_space<vmem>>, vector<1x128xf32>
    %1759 = vector.broadcast %1758 : vector<1x128xf32> to vector<8x128xf32>
    %1760 = arith.addf %1757, %1759 : vector<8x128xf32>
    %cst_689 = arith.constant 0.000000e+00 : f32
    %1761 = vector.broadcast %cst_689 : f32 to vector<8x128xf32>
    %1762 = arith.maximumf %1760, %1761 : vector<8x128xf32>
    %c2336 = arith.constant 2336 : index
    %c0_690 = arith.constant 0 : index
    %1763 = vector.load %arg2[%c2336, %c0_690] : memref<2464x128xbf16, #tpu.memory_space<vmem>>, vector<128x128xbf16>
    %1764 = arith.truncf %1762 : vector<8x128xf32> to vector<8x128xbf16>
    %cst_691 = arith.constant dense<0.000000e+00> : vector<8x128xf32>
    %1765 = tpu.matmul %1764, %1763, %cst_691 {dimension_numbers = #tpu.dot_dimension_numbers<[1], [0], [0], [1], [0, 0, 1, 1], [], []>} : vector<8x128xbf16>, vector<128x128xbf16>, vector<8x128xf32> -> vector<8x128xf32>
    %c19 = arith.constant 19 : index
    %c0_692 = arith.constant 0 : index
    %1766 = vector.load %arg3[%c19, %c0_692] : memref<24x128xf32, #tpu.memory_space<vmem>>, vector<1x128xf32>
    %1767 = vector.broadcast %1766 : vector<1x128xf32> to vector<8x128xf32>
    %1768 = arith.addf %1765, %1767 : vector<8x128xf32>
    %1769 = arith.addf %1768, %1754 : vector<8x128xf32>
    %cst_693 = arith.constant 0.000000e+00 : f32
    %1770 = vector.broadcast %cst_693 : f32 to vector<8x128xf32>
    %1771 = arith.maximumf %1769, %1770 : vector<8x128xf32>
    %c0_694 = arith.constant 0 : index
    %c0_695 = arith.constant 0 : index
    %1772 = vector.load %arg7[%c0_694, %c0_695] : memref<8x128xf32, #tpu.memory_space<vmem>>, vector<8x128xf32>
    tpu.vector_store %arg7[%c0_694, %c0_695], %1771 {strides = array<i32>} : memref<8x128xf32, #tpu.memory_space<vmem>>, vector<8x128xf32>,
    return
  }
}

</mosaic_0001>

<bundles_post_ra>
// kernel: cnn_backbone_forward.1
= control target key start
LH: loop header
LB: loop body
LE: loop exit
PB: predicated region body
PF: predicated region fallthrough
CT: control target
= control target key end

     0   :  { %v10856_v0 = vmov 0   ;;  %vm10827_vm0 = vcmask 261120   ;;  %s8217_s14 = smov 64   ;;  %s8218_s17 = smov 48   ;;  %s10819_s1 = inlined_call_operand.vmem [shape: bf16[160,128], index: 1, kind: input, shape index: {}]   ;;  %s10820_s0 = inlined_call_operand.vmem [shape: bf16[128,160], index: 0, kind: input, shape index: {}]   ;;  %s10821_s4 = inlined_call_operand.vmem [shape: f32[9,32,128], index: 4, kind: input, shape index: {}]   ;;  %s10822_s3 = inlined_call_operand.vmem [shape: f32[24,128], index: 3, kind: input, shape index: {}]   ;;  %s10823_s2 = inlined_call_operand.vmem [shape: bf16[2464,128], index: 2, kind: input, shape index: {}]   ;;  %s10824_s5 = inlined_call_operand.vmem [shape: f32[9,8,32], index: 5, kind: input, shape index: {}]   ;;  %s10825_s6 = inlined_call_operand.vmem [shape: f32[4,8,8], index: 6, kind: input, shape index: {}]   ;;  %s10826_s7 = inlined_call_operand.vmem [shape: f32[8,128], index: 7, kind: output, shape index: {}]  }
   0x1   :  { %225 = vmatprep.subr.bf16.mxu0 %v10856_v0  ;;  %v8027_v1 = vld [vmem:[%s10819_s1] sm:$0xff]   ;;  %v8028_v2 = vld [vmem:[%s10819_s1 + $0x8] sm:$0xff]   ;;  %v8029_v3 = vld [vmem:[%s10819_s1 + $0x10] sm:$0xff]   ;;  %s8219_s20 = smov 16   ;;  %s8220_s21 = smov 96  }
   0x2   :  { %226 = vmatpush1.bf16.msra.mxu0 %v8027_v1  ;;  %v8030_v4 = vld [vmem:[%s10819_s1 + $0x18] sm:$0xff]   ;;  %v8039_v5 = vld [vmem:[%s10820_s0 + $0x4] ss:$8 sps:$4 sm:$0xff]   ;;  %v8033_v8 = vld [vmem:[%s10819_s1 + $0x30] sm:$0xff]   ;;  %s8221_s24 = smov 32   ;;  %s8222_s25 = smov 80  }
   0x3   :  { %227 = vmatprep.subr.bf16.mxu0 %v10856_v0  ;;  %6022 = vmatprep.mubr.msk.bf16.mxu0 %vm10827_vm0, %v8039_v5  ;;  %v8031_v6 = vld [vmem:[%s10819_s1 + $0x20] sm:$0xff]   ;;  %v8032_v7 = vld [vmem:[%s10819_s1 + $0x28] sm:$0xff]   ;;  %v8034_v9 = vld [vmem:[%s10819_s1 + $0x38] sm:$0xff]   ;;  %s8223_s26 = smov 112  }
   0x4   :  { %v8035_v10 = vld [vmem:[%s10819_s1 + $0x40] sm:$0xff]   ;;  %v8036_v11 = vld [vmem:[%s10819_s1 + $0x48] sm:$0xff]   ;;  %v8040_v13 = vld [vmem:[%s10820_s0 + $0x14] ss:$8 sps:$4 sm:$0xff]  }
   0x5   :  { %v8037_v12 = vld [vmem:[%s10820_s0] ss:$8 sps:$4 sm:$0xff]   ;;  %v8042_v14 = vld [vmem:[%s10820_s0 + $0x10] ss:$8 sps:$4 sm:$0xff]   ;;  %v8043_v15 = vld [vmem:[%s10820_s0 + $0x24] ss:$8 sps:$4 sm:$0xff]  }
   0x6   :  { %228 = vmatpush1.bf16.msra.mxu0 %v8028_v2  ;;  %v8045_v16 = vld [vmem:[%s10820_s0 + $0x20] ss:$8 sps:$4 sm:$0xff]   ;;  %v8046_v17 = vld [vmem:[%s10820_s0 + $0x34] ss:$8 sps:$4 sm:$0xff]   ;;  %v8048_v18 = vld [vmem:[%s10820_s0 + $0x30] ss:$8 sps:$4 sm:$0xff]  }
   0x7   :  { %229 = vmatprep.subr.bf16.mxu0 %v10856_v0  ;;  %v8049_v19 = vld [vmem:[%s10820_s0 + $0x44] ss:$8 sps:$4 sm:$0xff]   ;;  %v8051_v20 = vld [vmem:[%s10820_s0 + $0x40] ss:$8 sps:$4 sm:$0xff]   ;;  %v8052_v21 = vld [vmem:[%s10820_s0 + $0x54] ss:$8 sps:$4 sm:$0xff]  }
   0x8   :  { %v8054_v22 = vld [vmem:[%s10820_s0 + $0x50] ss:$8 sps:$4 sm:$0xff]   ;;  %v8055_v23 = vld [vmem:[%s10820_s0 + $0x64] ss:$8 sps:$4 sm:$0xff]   ;;  %v8057_v24 = vld [vmem:[%s10820_s0 + $0x60] ss:$8 sps:$4 sm:$0xff]  }
   0x9   :  { %v8058_v25 = vld [vmem:[%s10820_s0 + $0x74] ss:$8 sps:$4 sm:$0xff]   ;;  %v8060_v26 = vld [vmem:[%s10820_s0 + $0x70] ss:$8 sps:$4 sm:$0xff]   ;;  %v338_v27 = vld [vmem:[%s10821_s4] sm:$0xff] }
   0xa   :  { %230 = vmatpush1.bf16.msra.mxu0 %v8029_v3  ;;  %6724 = vmatprep.mubr.f32.mxu1 %v338_v27  ;;  %v6038_v28 = vld [vmem:[%s10821_s4 + $0x60] sm:$0xff] }
   0xb   :  { %231 = vmatprep.subr.bf16.mxu0 %v10856_v0  ;;  %v8371_v29 = vld [vmem:[%s10822_s3] ss:$0 sm:$0xff] }
   0xe   :  { %232 = vmatpush1.bf16.msra.mxu0 %v8030_v4 }
   0xf   :  { %233 = vmatprep.subr.bf16.mxu0 %v10856_v0 }
  0x12   :  { %234 = vmatpush1.bf16.msra.mxu0 %v8031_v6 }
  0x13   :  { %235 = vmatprep.subr.bf16.mxu0 %v10856_v0 }
  0x16   :  { %236 = vmatpush1.bf16.msra.mxu0 %v8032_v7 }
  0x17   :  { %237 = vmatprep.subr.bf16.mxu0 %v10856_v0 }
  0x1a   :  { %238 = vmatpush1.bf16.msra.mxu0 %v8033_v8 }
  0x1b   :  { %239 = vmatprep.subr.bf16.mxu0 %v10856_v0 }
  0x1e   :  { %240 = vmatpush1.bf16.msra.mxu0 %v8034_v9 }
  0x1f   :  { %241 = vmatprep.subr.bf16.mxu0 %v10856_v0 }
  0x22   :  { %242 = vmatpush1.bf16.msra.mxu0 %v8035_v10 }
  0x23   :  { %243 = vmatprep.subr.bf16.mxu0 %v10856_v0 }
  0x26   :  { %244 = vmatpush1.bf16.msra.mxu0 %v8036_v11 }
  0x29   :  { %258 = vmatmul.mubr.bf16.vlgmr.msra.gmra.mrb[0].mxu0 %v8037_v12 }
  0x2a   :  { %6023 = vmatprep.mubr.msk.bf16.mxu0 %vm10827_vm0, %v8040_v13 }
  0x31   :  { %266 = vmatmul.mubr.bf16.gmra.mrb[4].mxu0 %v8042_v14 }
  0x32   :  { %6024 = vmatprep.mubr.msk.bf16.mxu0 %vm10827_vm0, %v8043_v15 }
  0x39   :  { %274 = vmatmul.mubr.bf16.gmra.mrb[8].mxu0 %v8045_v16 }
  0x3a   :  { %6025 = vmatprep.mubr.msk.bf16.mxu0 %vm10827_vm0, %v8046_v17 }
  0x41   :  { %282 = vmatmul.mubr.bf16.gmra.mrb[12].mxu0 %v8048_v18 }
  0x42   :  { %6026 = vmatprep.mubr.msk.bf16.mxu0 %vm10827_vm0, %v8049_v19 }
  0x49   :  { %290 = vmatmul.mubr.bf16.gmra.mrb[16].mxu0 %v8051_v20 }
  0x4a   :  { %6027 = vmatprep.mubr.msk.bf16.mxu0 %vm10827_vm0, %v8052_v21 }
  0x51   :  { %298 = vmatmul.mubr.bf16.gmra.mrb[20].mxu0 %v8054_v22 }
  0x52   :  { %6028 = vmatprep.mubr.msk.bf16.mxu0 %vm10827_vm0, %v8055_v23 }
  0x59   :  { %306 = vmatmul.mubr.bf16.gmra.mrb[24].mxu0 %v8057_v24 }
  0x5a   :  { %6029 = vmatprep.mubr.msk.bf16.mxu0 %vm10827_vm0, %v8058_v25 }
  0x61   :  { %314 = vmatmul.mubr.bf16.gmra.mrb[28].mxu0 %v8060_v26 }
  0x62   :  { %6838 = vmatprep.mubr.f32.mxu0 %v6038_v28 }
  0xfc   :  { %v259_v30 = vpop.f32.mrb[0].mxu0 }
  0xfd   :  { %v260_v31 = vadd.f32 %v8371_v29, %v259_v30  ;;  %v261_v32 = vpop.f32.mrb[1].mxu0 }
  0xfe   :  { %v262_v33 = vpop.f32.mrb[2].mxu0 }
  0xff   :  { %v263_v34 = vadd.f32 %v8371_v29, %v262_v33  ;;  %v264_v35 = vpop.f32.mrb[3].mxu0  ;;  %v322_v36 = vmax.f32 %v260_v31, 0.0 }
 0x101   :  { %v323_v37 = vmax.f32 %v263_v34, 0.0 }
 0x103   :  { %v8375_v38 = vpack.c.bf16 %v323_v37, %v322_v36 }
 0x104   :  { %v267_v39 = vpop.f32.mrb[4].mxu0 }
 0x105   :  { %v268_v40 = vadd.f32 %v8371_v29, %v267_v39  ;;  %v269_v41 = vpop.f32.mrb[5].mxu0  ;;  %7332 = vmatprep.subr.bf16.mxu1 %v8375_v38  ;;  %7428 = vmatprep.subr.bf16.mxu0 %v8375_v38 }
 0x106   :  { %v270_v42 = vpop.f32.mrb[6].mxu0  ;;  %7334 = vmatpush3.bf16.msra.mxu1 %v8375_v38  ;;  %7430 = vmatpush3.bf16.msra.mxu0 %v8375_v38  ;;  %v339_v41 = vld [vmem:[%s10821_s4 + $0x8] sm:$0xff] }
 0x107   :  { %v271_v43 = vadd.f32 %v8371_v29, %v270_v42  ;;  %v272_v44 = vpop.f32.mrb[7].mxu0  ;;  %v324_v45 = vmax.f32 %v268_v40, 0.0  ;;  %v340_v42 = vld [vmem:[%s10821_s4 + $0x10] sm:$0xff] }
 0x108   :  { %v341_v44 = vld [vmem:[%s10821_s4 + $0x18] sm:$0xff] }
 0x109   :  { %v325_v46 = vmax.f32 %v271_v43, 0.0  ;;  %v6040_v43 = vld [vmem:[%s10821_s4 + $0x70] sm:$0xff] }
 0x10b   :  { %v8383_v47 = vpack.c.bf16 %v325_v46, %v324_v45  ;;  %v6041_v45 = vld [vmem:[%s10821_s4 + $0x78] sm:$0xff]  ;;  %v6030_v46 = vld [vmem:[%s10821_s4 + $0x20] sm:$0xff] }
 0x10c   :  { %v275_v48 = vpop.f32.mrb[8].mxu0 }
 0x10d   :  { %v276_v49 = vadd.f32 %v8371_v29, %v275_v48  ;;  %v277_v50 = vpop.f32.mrb[9].mxu0  ;;  %7336 = vmatprep.subr.bf16.mxu1 %v8383_v47  ;;  %7432 = vmatprep.subr.bf16.mxu0 %v8383_v47  ;;  %v6046_v48 = vld [vmem:[%s10821_s4 + $0xa0] sm:$0xff] }
 0x10e   :  { %v278_v51 = vpop.f32.mrb[10].mxu0  ;;  %7338 = vmatpush3.bf16.msra.mxu1 %v8383_v47  ;;  %7434 = vmatpush3.bf16.msra.mxu0 %v8383_v47  ;;  %v6047_v50 = vld [vmem:[%s10821_s4 + $0xa8] sm:$0xff] }
 0x10f   :  { %v279_v52 = vadd.f32 %v8371_v29, %v278_v51  ;;  %v280_v53 = vpop.f32.mrb[11].mxu0  ;;  %v326_v54 = vmax.f32 %v276_v49, 0.0  ;;  %v6031_v49 = vld [vmem:[%s10821_s4 + $0x28] sm:$0xff]  ;;  %v6032_v51 = vld [vmem:[%s10821_s4 + $0x30] sm:$0xff] }
 0x110   :  { %v6033_v53 = vld [vmem:[%s10821_s4 + $0x38] sm:$0xff] }
 0x111   :  { %v327_v55 = vmax.f32 %v279_v52, 0.0  ;;  %v6048_v52 = vld [vmem:[%s10821_s4 + $0xb0] sm:$0xff] }
 0x113   :  { %v8391_v56 = vpack.c.bf16 %v327_v55, %v326_v54  ;;  %v6049_v54 = vld [vmem:[%s10821_s4 + $0xb8] sm:$0xff]  ;;  %v6034_v55 = vld [vmem:[%s10821_s4 + $0x40] sm:$0xff] }
 0x114   :  { %v283_v57 = vpop.f32.mrb[12].mxu0 }
 0x115   :  { %v284_v58 = vadd.f32 %v8371_v29, %v283_v57  ;;  %v285_v59 = vpop.f32.mrb[13].mxu0  ;;  %7340 = vmatprep.subr.bf16.mxu1 %v8391_v56  ;;  %7436 = vmatprep.subr.bf16.mxu0 %v8391_v56  ;;  %v6054_v57 = vld [vmem:[%s10821_s4 + $0xe0] sm:$0xff] }
 0x116   :  { %v286_v60 = vpop.f32.mrb[14].mxu0  ;;  %7342 = vmatpush3.bf16.msra.mxu1 %v8391_v56  ;;  %7438 = vmatpush3.bf16.msra.mxu0 %v8391_v56  ;;  %v6055_v59 = vld [vmem:[%s10821_s4 + $0xe8] sm:$0xff] }
 0x117   :  { %v287_v61 = vadd.f32 %v8371_v29, %v286_v60  ;;  %v288_v62 = vpop.f32.mrb[15].mxu0  ;;  %v328_v63 = vmax.f32 %v284_v58, 0.0  ;;  %v6035_v58 = vld [vmem:[%s10821_s4 + $0x48] sm:$0xff]  ;;  %v6036_v60 = vld [vmem:[%s10821_s4 + $0x50] sm:$0xff] }
 0x118   :  { %v6037_v62 = vld [vmem:[%s10821_s4 + $0x58] sm:$0xff] }
 0x119   :  { %v329_v1 = vmax.f32 %v287_v61, 0.0  ;;  %v6056_v61 = vld [vmem:[%s10821_s4 + $0xf0] sm:$0xff] }
 0x11b   :  { %v8399_v2 = vpack.c.bf16 %v329_v1, %v328_v63  ;;  %v6057_v63 = vld [vmem:[%s10821_s4 + $0xf8] sm:$0xff]  ;;  %v6042_v1 = vld [vmem:[%s10821_s4 + $0x80] sm:$0xff] }
 0x11c   :  { %v291_v3 = vpop.f32.mrb[16].mxu0 }
 0x11d   :  { %v292_v4 = vadd.f32 %v8371_v29, %v291_v3  ;;  %v293_v5 = vpop.f32.mrb[17].mxu0  ;;  %7344 = vmatprep.subr.bf16.mxu1 %v8399_v2  ;;  %7440 = vmatprep.subr.bf16.mxu0 %v8399_v2  ;;  %v6043_v3 = vld [vmem:[%s10821_s4 + $0x88] sm:$0xff] }
 0x11e   :  { %v294_v6 = vpop.f32.mrb[18].mxu0  ;;  %7346 = vmatpush3.bf16.msra.mxu1 %v8399_v2  ;;  %7442 = vmatpush3.bf16.msra.mxu0 %v8399_v2  ;;  %v6045_v5 = vld [vmem:[%s10821_s4 + $0x98] sm:$0xff] }
 0x11f   :  { %v295_v7 = vadd.f32 %v8371_v29, %v294_v6  ;;  %v296_v8 = vpop.f32.mrb[19].mxu0  ;;  %v330_v9 = vmax.f32 %v292_v4, 0.0  ;;  %v6044_v4 = vld [vmem:[%s10821_s4 + $0x90] sm:$0xff]  ;;  %v6050_v6 = vld [vmem:[%s10821_s4 + $0xc0] sm:$0xff] }
 0x120   :  { %v6052_v8 = vld [vmem:[%s10821_s4 + $0xd0] sm:$0xff] }
 0x121   :  { %v331_v10 = vmax.f32 %v295_v7, 0.0  ;;  %v6051_v7 = vld [vmem:[%s10821_s4 + $0xc8] sm:$0xff] }
 0x123   :  { %v8407_v11 = vpack.c.bf16 %v331_v10, %v330_v9  ;;  %v6053_v9 = vld [vmem:[%s10821_s4 + $0xd8] sm:$0xff]  ;;  %v6058_v10 = vld [vmem:[%s10821_s4 + $0x100] sm:$0xff] }
 0x124   :  { %v299_v12 = vpop.f32.mrb[20].mxu0 }
 0x125   :  { %v300_v13 = vadd.f32 %v8371_v29, %v299_v12  ;;  %v301_v14 = vpop.f32.mrb[21].mxu0  ;;  %7348 = vmatprep.subr.bf16.mxu1 %v8407_v11  ;;  %7444 = vmatprep.subr.bf16.mxu0 %v8407_v11 }
 0x126   :  { %v302_v15 = vpop.f32.mrb[22].mxu0  ;;  %7350 = vmatpush3.bf16.msra.mxu1 %v8407_v11  ;;  %7446 = vmatpush3.bf16.msra.mxu0 %v8407_v11 }
 0x127   :  { %v303_v16 = vadd.f32 %v8371_v29, %v302_v15  ;;  %v304_v17 = vpop.f32.mrb[23].mxu0  ;;  %v332_v18 = vmax.f32 %v300_v13, 0.0 }
 0x129   :  { %v333_v19 = vmax.f32 %v303_v16, 0.0 }
 0x12b   :  { %v8415_v20 = vpack.c.bf16 %v333_v19, %v332_v18  ;;  %v1179_v18 = vlaneseq }
 0x12c   :  { %v307_v21 = vpop.f32.mrb[24].mxu0 }
 0x12d   :  { %v308_v22 = vadd.f32 %v8371_v29, %v307_v21  ;;  %v309_v23 = vpop.f32.mrb[25].mxu0  ;;  %7352 = vmatprep.subr.bf16.mxu1 %v8415_v20  ;;  %7448 = vmatprep.subr.bf16.mxu0 %v8415_v20  ;;  %v8669_v19 = vshrl.u32 %v1179_v18, 7 }
 0x12e   :  { %v310_v24 = vpop.f32.mrb[26].mxu0  ;;  %7354 = vmatpush3.bf16.msra.mxu1 %v8415_v20  ;;  %7450 = vmatpush3.bf16.msra.mxu0 %v8415_v20 }
 0x12f   :  { %v311_v25 = vadd.f32 %v8371_v29, %v310_v24  ;;  %v312_v26 = vpop.f32.mrb[27].mxu0  ;;  %v334_v27 = vmax.f32 %v308_v22, 0.0  ;;  %10882 = vst [vmem:[#allocation2_spill] sm:$0xff] %v8669_v19  ;;  %v1184_v21 = vand.u32 15, %v8669_v19 }
 0x131   :  { %v335_v28 = vmax.f32 %v311_v25, 0.0  ;;  %v8673_v23 = vshra.s32 %v1184_v21, 2  ;;  %v8677_v26 = vand.u32 3, %v1184_v21 }
 0x133   :  { %v8423_v30 = vpack.c.bf16 %v335_v28, %v334_v27 }
 0x134   :  { %v315_v31 = vpop.f32.mrb[28].mxu0 }
 0x135   :  { %v316_v32 = vadd.f32 %v8371_v29, %v315_v31  ;;  %v317_v33 = vpop.f32.mrb[29].mxu0  ;;  %7356 = vmatprep.subr.bf16.mxu1 %v8423_v30  ;;  %7452 = vmatprep.subr.bf16.mxu0 %v8423_v30  ;;  %v1213_v31 = vadd.s32 4294967295, %v8673_v23 }
 0x136   :  { %v318_v34 = vpop.f32.mrb[30].mxu0  ;;  %7358 = vmatpush3.bf16.msra.mxu1 %v8423_v30  ;;  %7454 = vmatpush3.bf16.msra.mxu0 %v8423_v30 }
 0x137   :  { %v319_v35 = vadd.f32 %v8371_v29, %v318_v34  ;;  %v320_v36 = vpop.f32.mrb[31].mxu0  ;;  %v336_v37 = vmax.f32 %v316_v32, 0.0  ;;  %v6039_v29 = vld [vmem:[%s10821_s4 + $0x68] sm:$0xff]  ;;  %v8685_v34 = vadd.s32 4294967295, %v8677_v26  ;;  %vm1217_vm1 = vcmp.ge.s32.totalorder %v1213_v31, 0 }
 0x138   :  { %vm1221_vm2 = vcmp.lt.s32.totalorder %v1213_v31, 4 }
 0x139   :  { %v337_v39 = vmax.f32 %v319_v35, 0.0  ;;  %vm10831_vm3 = vcmp.ge.s32.totalorder %v8685_v34, 0  ;;  %vm8698_vm4 = vmand %vm1217_vm1, %vm1221_vm2 }
 0x13a   :  { %vm8708_vm5 = vmand %vm8698_vm4, %vm10831_vm3 }
 0x13b   :  { %v8431_v40 = vpack.c.bf16 %v337_v39, %v336_v37  ;;  %v1182_v37 = vadd.s32 16, %v8669_v19 }
 0x13d   :  { %7360 = vmatprep.subr.bf16.mxu1 %v8431_v40  ;;  %7456 = vmatprep.subr.bf16.mxu0 %v8431_v40 }
 0x13e   :  { %7362 = vmatpush3.bf16.msra.mxu1 %v8431_v40  ;;  %7458 = vmatpush3.bf16.msra.mxu0 %v8431_v40 }
 0x13f   :  { %7364 = vmatprep.subr.bf16.mxu1 %v8375_v38  ;;  %7492 = vmatprep.subr.bf16.mxu0 %v8375_v38 }
 0x141   :  { %6725 = vmatmul.mubr.f32.vlgmr.msra.gmra.mrb[0].mxu1 %v339_v41  ;;  %6839 = vmatmul.mubr.f32.vlgmr.msra.gmra.mrb[32].mxu0 %v6039_v29 }
 0x142   :  { %7366 = vmatpush3.bf16.msra.mxu1 %v8375_v38  ;;  %7494 = vmatpush3.bf16.msra.mxu0 %v8375_v38 }
 0x143   :  { %7368 = vmatprep.subr.bf16.mxu1 %v8383_v47  ;;  %7496 = vmatprep.subr.bf16.mxu0 %v8383_v47 }
 0x144   :  { %6727 = vmatprep.mubr.f32.mxu1 %v340_v42  ;;  %6841 = vmatprep.mubr.f32.mxu0 %v6040_v43 }
 0x145   :  { %6728 = vmatmul.mubr.f32.gmra.mrb[2].mxu1 %v341_v44  ;;  %6842 = vmatmul.mubr.f32.gmra.mrb[34].mxu0 %v6041_v45  ;;  %v10883_v44 = vmov 0  ;;  %v1186_v45 = vand.u32 15, %v1182_v37 }
 0x146   :  { %7370 = vmatpush3.bf16.msra.mxu1 %v8383_v47  ;;  %7498 = vmatpush3.bf16.msra.mxu0 %v8383_v47  ;;  %v10884_v44 = vsel %vm8698_vm4, 4294967295, %v10883_v44 }
 0x147   :  { %7372 = vmatprep.subr.bf16.mxu1 %v8391_v56  ;;  %7500 = vmatprep.subr.bf16.mxu0 %v8391_v56 }
 0x148   :  { %6762 = vmatprep.mubr.f32.mxu1 %v6030_v46  ;;  %6914 = vmatprep.mubr.f32.mxu0 %v6046_v48  ;;  %v10885_v48 = vmov 0 }
 0x149   :  { %v10886_v48 = vsel %vm8708_vm5, 4294967295, %v10885_v48 }
 0x14a   :  { %7374 = vmatpush3.bf16.msra.mxu1 %v8391_v56  ;;  %7502 = vmatpush3.bf16.msra.mxu0 %v8391_v56 }
 0x14b   :  { %7376 = vmatprep.subr.bf16.mxu1 %v8399_v2  ;;  %7504 = vmatprep.subr.bf16.mxu0 %v8399_v2 }
 0x14e   :  { %7378 = vmatpush3.bf16.msra.mxu1 %v8399_v2  ;;  %7506 = vmatpush3.bf16.msra.mxu0 %v8399_v2 }
 0x14f   :  { %7380 = vmatprep.subr.bf16.mxu1 %v8407_v11  ;;  %7508 = vmatprep.subr.bf16.mxu0 %v8407_v11 }
 0x152   :  { %7382 = vmatpush3.bf16.msra.mxu1 %v8407_v11  ;;  %7510 = vmatpush3.bf16.msra.mxu0 %v8407_v11 }
 0x153   :  { %7384 = vmatprep.subr.bf16.mxu1 %v8415_v20  ;;  %7512 = vmatprep.subr.bf16.mxu0 %v8415_v20 }
 0x156   :  { %7386 = vmatpush3.bf16.msra.mxu1 %v8415_v20  ;;  %7514 = vmatpush3.bf16.msra.mxu0 %v8415_v20 }
 0x157   :  { %7388 = vmatprep.subr.bf16.mxu1 %v8423_v30  ;;  %7516 = vmatprep.subr.bf16.mxu0 %v8423_v30 }
 0x15a   :  { %7390 = vmatpush3.bf16.msra.mxu1 %v8423_v30  ;;  %7518 = vmatpush3.bf16.msra.mxu0 %v8423_v30 }
 0x15b   :  { %7392 = vmatprep.subr.bf16.mxu1 %v8431_v40  ;;  %7520 = vmatprep.subr.bf16.mxu0 %v8431_v40 }
 0x15e   :  { %7394 = vmatpush3.bf16.msra.mxu1 %v8431_v40  ;;  %7522 = vmatpush3.bf16.msra.mxu0 %v8431_v40 }
 0x15f   :  { %7396 = vmatprep.subr.bf16.mxu1 %v8375_v38  ;;  %7556 = vmatprep.subr.bf16.mxu0 %v8375_v38 }
 0x161   :  { %6763 = vmatmul.mubr.f32.vlgmr.msra.gmra.mrb[4].mxu1 %v6031_v49  ;;  %6915 = vmatmul.mubr.f32.vlgmr.msra.gmra.mrb[36].mxu0 %v6047_v50  ;;  %v8712_v49 = vshra.s32 %v1186_v45, 2  ;;  %v1194_v50 = vand.u32 3, %v1186_v45  ;;  %v1315_v45 = vadd.s32 1, %v8677_v26  ;;  %v10922_v26 = vmov 0 }
 0x162   :  { %7398 = vmatpush3.bf16.msra.mxu1 %v8375_v38  ;;  %7558 = vmatpush3.bf16.msra.mxu0 %v8375_v38 }
 0x163   :  { %7400 = vmatprep.subr.bf16.mxu1 %v8383_v47  ;;  %7560 = vmatprep.subr.bf16.mxu0 %v8383_v47  ;;  %v1429_v21 = vadd.s32 1, %v8712_v49 }
 0x164   :  { %6765 = vmatprep.mubr.f32.mxu1 %v6032_v51  ;;  %6917 = vmatprep.mubr.f32.mxu0 %v6048_v52  ;;  %v1215_v51 = vadd.s32 4294967295, %v8712_v49  ;;  %v8715_v52 = vadd.s32 4294967295, %v1194_v50 }
 0x165   :  { %6766 = vmatmul.mubr.f32.gmra.mrb[6].mxu1 %v6033_v53  ;;  %6918 = vmatmul.mubr.f32.gmra.mrb[38].mxu0 %v6049_v54  ;;  %v10887_v53 = vmov 0  ;;  %v10889_v54 = vmov 0  ;;  %vm1433_vm3 = vcmp.ge.s32.totalorder %v1429_v21, 0 }
 0x166   :  { %7402 = vmatpush3.bf16.msra.mxu1 %v8383_v47  ;;  %7562 = vmatpush3.bf16.msra.mxu0 %v8383_v47  ;;  %vm1219_vm10 = vcmp.ge.s32.totalorder %v1215_v51, 0  ;;  %vm1223_vm11 = vcmp.lt.s32.totalorder %v1215_v51, 4  ;;  %vm10829_vm12 = vcmp.ge.s32.totalorder %v8715_v52, 0  ;;  %vm10828_vm1 = vcmp.lt.s32.totalorder %v8715_v52, 4 }
 0x167   :  { %7404 = vmatprep.subr.bf16.mxu1 %v8391_v56  ;;  %7564 = vmatprep.subr.bf16.mxu0 %v8391_v56  ;;  %vm8724_vm14 = vmand %vm1219_vm10, %vm1223_vm11  ;;  %vm1360_vm10 = vcmp.ge.s32.totalorder %v8673_v23, 0  ;;  %v10919_v51 = vmov 0 }
 0x168   :  { %6800 = vmatprep.mubr.f32.mxu1 %v6034_v55  ;;  %6990 = vmatprep.mubr.f32.mxu0 %v6054_v57  ;;  %v10890_v54 = vsel %vm8724_vm14, 4294967295, %v10889_v54  ;;  %vm1239_vm2 = vmand %vm8724_vm14, %vm10829_vm12  ;;  %v10891_v55 = vmov 0  ;;  %v10893_v57 = vmov 0 }
 0x16a   :  { %7406 = vmatpush3.bf16.msra.mxu1 %v8391_v56  ;;  %7566 = vmatpush3.bf16.msra.mxu0 %v8391_v56 }
 0x16b   :  { %7408 = vmatprep.subr.bf16.mxu1 %v8399_v2  ;;  %7568 = vmatprep.subr.bf16.mxu0 %v8399_v2 }
 0x16e   :  { %7410 = vmatpush3.bf16.msra.mxu1 %v8399_v2  ;;  %7570 = vmatpush3.bf16.msra.mxu0 %v8399_v2 }
 0x16f   :  { %7412 = vmatprep.subr.bf16.mxu1 %v8407_v11  ;;  %7572 = vmatprep.subr.bf16.mxu0 %v8407_v11 }
 0x172   :  { %7414 = vmatpush3.bf16.msra.mxu1 %v8407_v11  ;;  %7574 = vmatpush3.bf16.msra.mxu0 %v8407_v11 }
 0x173   :  { %7416 = vmatprep.subr.bf16.mxu1 %v8415_v20  ;;  %7576 = vmatprep.subr.bf16.mxu0 %v8415_v20 }
 0x176   :  { %7418 = vmatpush3.bf16.msra.mxu1 %v8415_v20  ;;  %7578 = vmatpush3.bf16.msra.mxu0 %v8415_v20 }
 0x177   :  { %7420 = vmatprep.subr.bf16.mxu1 %v8423_v30  ;;  %7580 = vmatprep.subr.bf16.mxu0 %v8423_v30 }
 0x17a   :  { %7422 = vmatpush3.bf16.msra.mxu1 %v8423_v30  ;;  %7582 = vmatpush3.bf16.msra.mxu0 %v8423_v30 }
 0x17b   :  { %7424 = vmatprep.subr.bf16.mxu1 %v8431_v40  ;;  %7584 = vmatprep.subr.bf16.mxu0 %v8431_v40 }
 0x17e   :  { %7426 = vmatpush3.bf16.msra.mxu1 %v8431_v40  ;;  %7586 = vmatpush3.bf16.msra.mxu0 %v8431_v40 }
 0x17f   :  { %7460 = vmatprep.subr.bf16.mxu1 %v8375_v38  ;;  %1736 = vmatprep.subr.bf16.mxu0 %v10856_v0 }
 0x181   :  { %6801 = vmatmul.mubr.f32.vlgmr.msra.gmra.mrb[8].mxu1 %v6035_v58  ;;  %6991 = vmatmul.mubr.f32.vlgmr.msra.gmra.mrb[40].mxu0 %v6055_v59  ;;  %v1183_v58 = vadd.s32 24, %v8669_v19 }
 0x182   :  { %7462 = vmatpush3.bf16.msra.mxu1 %v8375_v38  ;;  %6803 = vmatprep.mubr.f32.mxu1 %v6036_v60  ;;  %v1427_v60 = vadd.s32 1, %v8673_v23 }
 0x183   :  { %7464 = vmatprep.subr.bf16.mxu1 %v8383_v47  ;;  %6993 = vmatprep.mubr.f32.mxu0 %v6056_v61  ;;  %v1187_v59 = vand.u32 15, %v1183_v58  ;;  %v10924_v58 = vmov 0 }
 0x185   :  { %6804 = vmatmul.mubr.f32.gmra.mrb[10].mxu1 %v6037_v62  ;;  %6994 = vmatmul.mubr.f32.gmra.mrb[42].mxu0 %v6057_v63  ;;  %v8751_v62 = vshra.s32 %v1187_v59, 2 }
 0x186   :  { %7466 = vmatpush3.bf16.msra.mxu1 %v8383_v47  ;;  %6876 = vmatprep.mubr.f32.mxu1 %v6042_v1 }
 0x187   :  { %7468 = vmatprep.subr.bf16.mxu1 %v8391_v56  ;;  %v1430_v37 = vadd.s32 1, %v8751_v62 }
 0x189   :  { %vm1434_vm14 = vcmp.ge.s32.totalorder %v1430_v37, 0 }
 0x18a   :  { %7470 = vmatpush3.bf16.msra.mxu1 %v8391_v56 }
 0x18b   :  { %7472 = vmatprep.subr.bf16.mxu1 %v8399_v2 }
 0x18e   :  { %7474 = vmatpush3.bf16.msra.mxu1 %v8399_v2 }
 0x18f   :  { %7476 = vmatprep.subr.bf16.mxu1 %v8407_v11 }
 0x192   :  { %7478 = vmatpush3.bf16.msra.mxu1 %v8407_v11 }
 0x193   :  { %7480 = vmatprep.subr.bf16.mxu1 %v8415_v20 }
 0x196   :  { %7482 = vmatpush3.bf16.msra.mxu1 %v8415_v20 }
 0x197   :  { %7484 = vmatprep.subr.bf16.mxu1 %v8423_v30 }
 0x19a   :  { %7486 = vmatpush3.bf16.msra.mxu1 %v8423_v30 }
 0x19b   :  { %7488 = vmatprep.subr.bf16.mxu1 %v8431_v40 }
 0x19e   :  { %7490 = vmatpush3.bf16.msra.mxu1 %v8431_v40 }
 0x19f   :  { %7524 = vmatprep.subr.bf16.mxu1 %v8375_v38 }
 0x1a1   :  { %6877 = vmatmul.mubr.f32.vlgmr.msra.gmra.mrb[12].mxu1 %v6043_v3 }
 0x1a2   :  { %7526 = vmatpush3.bf16.msra.mxu1 %v8375_v38  ;;  %6879 = vmatprep.mubr.f32.mxu1 %v6044_v4 }
 0x1a3   :  { %7528 = vmatprep.subr.bf16.mxu1 %v8383_v47 }
 0x1a5   :  { %6880 = vmatmul.mubr.f32.gmra.mrb[14].mxu1 %v6045_v5 }
 0x1a6   :  { %7530 = vmatpush3.bf16.msra.mxu1 %v8383_v47  ;;  %6952 = vmatprep.mubr.f32.mxu1 %v6050_v6 }
 0x1a7   :  { %7532 = vmatprep.subr.bf16.mxu1 %v8391_v56 }
 0x1aa   :  { %7534 = vmatpush3.bf16.msra.mxu1 %v8391_v56 }
 0x1ab   :  { %7536 = vmatprep.subr.bf16.mxu1 %v8399_v2 }
 0x1ae   :  { %7538 = vmatpush3.bf16.msra.mxu1 %v8399_v2 }
 0x1af   :  { %7540 = vmatprep.subr.bf16.mxu1 %v8407_v11 }
 0x1b2   :  { %7542 = vmatpush3.bf16.msra.mxu1 %v8407_v11 }
 0x1b3   :  { %7544 = vmatprep.subr.bf16.mxu1 %v8415_v20 }
 0x1b6   :  { %7546 = vmatpush3.bf16.msra.mxu1 %v8415_v20 }
 0x1b7   :  { %7548 = vmatprep.subr.bf16.mxu1 %v8423_v30 }
 0x1ba   :  { %7550 = vmatpush3.bf16.msra.mxu1 %v8423_v30 }
 0x1bb   :  { %7552 = vmatprep.subr.bf16.mxu1 %v8431_v40 }
 0x1be   :  { %7554 = vmatpush3.bf16.msra.mxu1 %v8431_v40 }
 0x1bf   :  { %7588 = vmatprep.subr.bf16.mxu1 %v8375_v38 }
 0x1c1   :  { %6953 = vmatmul.mubr.f32.vlgmr.msra.gmra.mrb[16].mxu1 %v6051_v7 }
 0x1c2   :  { %7590 = vmatpush3.bf16.msra.mxu1 %v8375_v38  ;;  %6955 = vmatprep.mubr.f32.mxu1 %v6052_v8  ;;  %v6059_v38 = vld [vmem:[%s10821_s4 + $0x108] sm:$0xff] }
 0x1c3   :  { %7592 = vmatprep.subr.bf16.mxu1 %v8383_v47 }
 0x1c5   :  { %6956 = vmatmul.mubr.f32.gmra.mrb[18].mxu1 %v6053_v9  ;;  %v1216_v9 = vadd.s32 4294967295, %v8751_v62 }
 0x1c6   :  { %7594 = vmatpush3.bf16.msra.mxu1 %v8383_v47  ;;  %7028 = vmatprep.mubr.f32.mxu1 %v6058_v10  ;;  %v6060_v47 = vld [vmem:[%s10821_s4 + $0x110] sm:$0xff] }
 0x1c7   :  { %7596 = vmatprep.subr.bf16.mxu1 %v8391_v56 }
 0x1ca   :  { %7598 = vmatpush3.bf16.msra.mxu1 %v8391_v56  ;;  %v6061_v56 = vld [vmem:[%s10821_s4 + $0x118] sm:$0xff] }
 0x1cb   :  { %7600 = vmatprep.subr.bf16.mxu1 %v8399_v2 }
 0x1ce   :  { %7602 = vmatpush3.bf16.msra.mxu1 %v8399_v2 }
 0x1cf   :  { %7604 = vmatprep.subr.bf16.mxu1 %v8407_v11 }
 0x1d2   :  { %7606 = vmatpush3.bf16.msra.mxu1 %v8407_v11 }
 0x1d3   :  { %7608 = vmatprep.subr.bf16.mxu1 %v8415_v20 }
 0x1d6   :  { %7610 = vmatpush3.bf16.msra.mxu1 %v8415_v20  ;;  %v1181_v20 = vadd.s32 8, %v8669_v19 }
 0x1d7   :  { %7612 = vmatprep.subr.bf16.mxu1 %v8423_v30 }
 0x1d8   :  { %v1185_v22 = vand.u32 15, %v1181_v20  ;;  %v10897_v20 = vmov 0 }
 0x1da   :  { %7614 = vmatpush3.bf16.msra.mxu1 %v8423_v30  ;;  %v1189_v33 = vshra.s32 %v1185_v22, 2  ;;  %v1193_v42 = vand.u32 3, %v1185_v22 }
 0x1db   :  { %7616 = vmatprep.subr.bf16.mxu1 %v8431_v40 }
 0x1dc   :  { %v1214_v43 = vadd.s32 4294967295, %v1189_v33  ;;  %v8702_v46 = vadd.s32 4294967295, %v1193_v42  ;;  %v1428_v61 = vadd.s32 1, %v1189_v33  ;;  %vm1361_vm11 = vcmp.ge.s32.totalorder %v1189_v33, 0 }
 0x1dd   :  { %v8763_v7 = vadd.s32 1, %v1193_v42 }
 0x1de   :  { %7618 = vmatpush3.bf16.msra.mxu1 %v8431_v40  ;;  %vm1218_vm6 = vcmp.ge.s32.totalorder %v1214_v43, 0  ;;  %vm1222_vm7 = vcmp.lt.s32.totalorder %v1214_v43, 4  ;;  %vm10832_vm8 = vcmp.ge.s32.totalorder %v8702_v46, 0  ;;  %vm10830_vm13 = vcmp.lt.s32.totalorder %v8702_v46, 4 }
 0x1df   :  { %2114 = vmatprep.subr.bf16.mxu1 %v10856_v0  ;;  %vm8718_vm9 = vmand %vm1218_vm6, %vm1222_vm7 }
 0x1e0   :  { %v10888_v53 = vsel %vm8718_vm9, 4294967295, %v10887_v53  ;;  %vm1238_vm15 = vmand %vm8718_vm9, %vm10832_vm8 }
 0x1e1   :  { %7029 = vmatmul.mubr.f32.vlgmr.msra.gmra.mrb[20].mxu1 %v6059_v38  ;;  %vm8739_vm6 = vmand %vm1238_vm15, %vm10830_vm13  ;;  %vm1365_vm15 = vcmp.lt.s32.totalorder %v1189_v33, 4 }
 0x1e2   :  { %7031 = vmatprep.mubr.f32.mxu1 %v6060_v47  ;;  %v10892_v55 = vsel %vm8739_vm6, 4294967295, %v10891_v55  ;;  %vm8745_vm7 = vmand %vm1239_vm2, %vm10828_vm1  ;;  %vm1364_vm2 = vcmp.lt.s32.totalorder %v8673_v23, 4  ;;  %vm1432_vm1 = vcmp.ge.s32.totalorder %v1428_v61, 0 }
 0x1e3   :  { %v10894_v57 = vsel %vm8745_vm7, 4294967295, %v10893_v57  ;;  %vm8772_vm12 = vmand %vm1361_vm11, %vm1365_vm15  ;;  %vm1436_vm11 = vcmp.lt.s32.totalorder %v1428_v61, 4  ;;  %vm1435_vm15 = vcmp.lt.s32.totalorder %v1427_v60, 4  ;;  %vm10912_vm7 = vcmp.ge.s32.totalorder %v8763_v7, 0 }
 0x1e4   :  { %vm8787_vm13 = vmand %vm1360_vm10, %vm1364_vm2  ;;  %vm1437_vm2 = vcmp.lt.s32.totalorder %v1429_v21, 4  ;;  %v10858_v61 = vmov 0.0  }
 0x1e5   :  { %7032 = vmatmul.mubr.f32.gmra.mrb[22].mxu1 %v6061_v56  ;;  %v10895_v56 = vmov 0  ;;  %v10898_v20 = vsel %vm8787_vm13, 4294967295, %v10897_v20  ;;  %vm8803_vm10 = vmand %vm8772_vm12, %vm10832_vm8  ;;  %vm10903_vm8 = vcmp.ge.s32.totalorder %v1427_v60, 0  ;;  %v10930_v60 = vmov 0 }
 0x1e6   :  { %v10896_v56 = vsel %vm8772_vm12, 4294967295, %v10895_v56  ;;  %vm8814_vm0 = vmand %vm1432_vm1, %vm1436_vm11  ;;  %vm10906_vm1 = vcmp.ge.s32.totalorder %v8685_v34, 0 }
 0x1e7   :  { %vm8821_vm5 = vmand %vm10903_vm8, %vm1435_vm15  ;;  %vm10909_vm8 = vcmp.lt.s32.totalorder %v8702_v46, 4 }
 0x1e8   :  { %vm8833_vm11 = vmand %vm8787_vm13, %vm10906_vm1  ;;  %vm10848_vm1 = vcmp.lt.s32.totalorder %v1315_v45, 4  ;;  %v8964_v21 = vsel %vm8821_vm5, 1.0, %v10858_v61 }
 0x1e9   :  { %vm8841_vm15 = vmand %vm8803_vm10, %vm10909_vm8  ;;  %vm10915_vm10 = vcmp.lt.s32.totalorder %v1216_v9, 4  ;;  %vm10916_vm8 = vcmp.ge.s32.totalorder %v1216_v9, 0  ;;  %10940 = vst [vmem:[#allocation3_spill] sm:$0xff] %v8964_v21 }
 0x1ea   :  { %vm8849_vm6 = vmand %vm8814_vm0, %vm10912_vm7 }
 0x1eb   :  { %vm8860_vm13 = vmand %vm10916_vm8, %vm10915_vm10 }
 0x1ec   :  { %vm8865_vm7 = vmand %vm1433_vm3, %vm1437_vm2 }
 0x1ed   :  { %v10920_v51 = vsel %vm8865_vm7, 4294967295, %v10919_v51 }
 0x214   :  { %v8653_v2 = vpop.f32.mrb[0].mxu1  ;;  %v8655_v11 = vpop.f32.mrb[32].mxu0 }
 0x215   :  { %v8657_v12 = vpop.f32.mrb[1].mxu1  ;;  %v8659_v13 = vpop.f32.mrb[33].mxu0 }
 0x218   :  { %v8661_v14 = vpop.f32.mrb[2].mxu1  ;;  %v8663_v15 = vpop.f32.mrb[34].mxu0 }
 0x219   :  { %v8665_v16 = vpop.f32.mrb[3].mxu1  ;;  %v8667_v17 = vpop.f32.mrb[35].mxu0 }
 0x234   :  { %v6764_v24 = vpop.f32.mrb[4].mxu1  ;;  %v8675_v25 = vpop.f32.mrb[36].mxu0 }
 0x235   :  { %v518_v27 = vmax.f32 %v8653_v2, %v6764_v24  ;;  %v498_v28 = vpop.f32.mrb[5].mxu1  ;;  %v8680_v30 = vpop.f32.mrb[37].mxu0  ;;  %v1195_v2 = vand.u32 3, %v1187_v59  ;;  %v8062_v24 = vld [vmem:[%s10823_s2 + $0x8] sm:$0xff]  }
 0x236   :  { %v517_v32 = vmax.f32 %v8657_v12, %v498_v28  ;;  %v8061_v12 = vld [vmem:[%s10823_s2] sm:$0xff]   ;;  %v8808_v28 = vadd.s32 1, %v1194_v50  ;;  %v10917_v50 = vmov 0 }
 0x237   :  { %1737 = vmatpush1.bf16.msra.mxu0 %v8061_v12  ;;  %v8818_v33 = vadd.s32 1, %v1195_v2  ;;  %v8853_v43 = vadd.s32 4294967295, %v1195_v2  ;;  %v10918_v50 = vsel %vm8860_vm13, 4294967295, %v10917_v50 }
 0x238   :  { %v6767_v35 = vpop.f32.mrb[6].mxu1  ;;  %v8687_v36 = vpop.f32.mrb[38].mxu0  ;;  %1738 = vmatprep.subr.bf16.mxu0 %v10856_v0  ;;  %vm10843_vm12 = vcmp.lt.s32.totalorder %v8808_v28, 4  ;;  %vm10921_vm9 = vcmp.ge.s32.totalorder %v8808_v28, 0 }
 0x239   :  { %v520_v39 = vmax.f32 %v8661_v14, %v6767_v35  ;;  %v8691_v40 = vpop.f32.mrb[7].mxu1  ;;  %v8693_v41 = vpop.f32.mrb[39].mxu0  ;;  %vm1489_vm4 = vmand %vm8865_vm7, %vm10921_vm9  ;;  %vm10846_vm3 = vcmp.lt.s32.totalorder %v8853_v43, 4  ;;  %vm10926_vm9 = vcmp.ge.s32.totalorder %v8818_v33, 0  ;;  %vm1363_vm7 = vcmp.ge.s32.totalorder %v8751_v62, 0 }
 0x23a   :  { %v519_v29 = vmax.f32 %v8665_v16, %v8691_v40  ;;  %vm8877_vm8 = vmand %vm1489_vm4, %vm10843_vm12  ;;  %vm10929_vm4 = vcmp.ge.s32.totalorder %v8853_v43, 0 }
 0x23b   :  { %1739 = vmatpush1.bf16.msra.mxu0 %v8062_v24  ;;  %v10923_v26 = vsel %vm8877_vm8, 4294967295, %v10922_v26  ;;  %vm1240_vm12 = vmand %vm8860_vm13, %vm10929_vm4  ;;  %vm10934_vm4 = vcmp.ge.s32.totalorder %v8685_v34, 0 }
 0x23c   :  { %1740 = vmatprep.subr.bf16.mxu0 %v10856_v0 }
 0x254   :  { %v6802_v63 = vpop.f32.mrb[8].mxu1  ;;  %v8753_v1 = vpop.f32.mrb[40].mxu0 }
 0x255   :  { %v8755_v3 = vmax.f32 %v518_v27, %v6802_v63  ;;  %v592_v4 = vpop.f32.mrb[9].mxu1  ;;  %v8757_v5 = vpop.f32.mrb[41].mxu0  ;;  %v8917_v63 = vsel %vm8833_vm11, 1.0, %v10858_v61  ;;  %vm1443_vm11 = vmand %vm8821_vm5, %vm10934_vm4 }
 0x256   :  { %v8760_v6 = vmax.f32 %v517_v32, %v592_v4  ;;  %v10901_v32 = vmov 0  ;;  %v8922_v4 = vsel %vm8841_vm15, 1.0, %v10858_v61  ;;  %v8977_v40 = vsel %vm1443_vm11, 1.0, %v10858_v61 }
 0x257   :  { %v706_v8 = vmax.f32 %v8755_v3, %v8655_v11  ;;  %v10902_v32 = vsel %vm8814_vm0, 4294967295, %v10901_v32  ;;  %vm1438_vm0 = vcmp.lt.s32.totalorder %v1430_v37, 4  ;;  %10942 = vst [vmem:[#allocation4_spill] sm:$0xff] %v8977_v40 }
 0x258   :  { %v705_v10 = vmax.f32 %v8760_v6, %v8659_v13  ;;  %v6805_v38 = vpop.f32.mrb[10].mxu1  ;;  %v8770_v47 = vpop.f32.mrb[42].mxu0  ;;  %vm8883_vm2 = vmand %vm1434_vm14, %vm1438_vm0  ;;  %vm10847_vm14 = vcmp.lt.s32.totalorder %v8763_v7, 4 }
 0x259   :  { %v8779_v14 = vmax.f32 %v520_v39, %v6805_v38  ;;  %v602_v16 = vpop.f32.mrb[11].mxu1  ;;  %v8781_v18 = vpop.f32.mrb[43].mxu0  ;;  %v8063_v39 = vld [vmem:[%s10823_s2 + $0x10] sm:$0xff]   ;;  %v10925_v58 = vsel %vm8883_vm2, 4294967295, %v10924_v58  ;;  %vm8891_vm10 = vmand %vm8883_vm2, %vm10926_vm9  ;;  %vm10849_vm2 = vcmp.lt.s32.totalorder %v8818_v33, 4 }
 0x25a   :  { %v8792_v22 = vmax.f32 %v519_v29, %v602_v16  ;;  %1741 = vmatpush1.bf16.msra.mxu0 %v8063_v39  ;;  %vm8901_vm0 = vmand %vm1240_vm12, %vm10846_vm3  ;;  %vm10932_vm12 = vnez %v10884_v44  ;;  %v10935_v16 = vmov 0  ;;  %vm10937_vm3 = vcmp.ge.s32.totalorder %v8702_v46, 0 }
 0x25b   :  { %v708_v27 = vmax.f32 %v8779_v14, %v8663_v15  ;;  %1742 = vmatprep.subr.bf16.mxu0 %v10856_v0  ;;  %v10931_v60 = vsel %vm8901_vm0, 4294967295, %v10930_v60  ;;  %vm1491_vm9 = vmand %vm8821_vm5, %vm10848_vm1  ;;  %v8927_v9 = vsel %vm10932_vm12, 1.0, %v10858_v61  ;;  %vm10950_vm0 = vnez %v10898_v20 }
 0x25c   :  { %v707_v31 = vmax.f32 %v8792_v22, %v8667_v17  ;;  %vm1492_vm8 = vmand %vm8849_vm6, %vm10847_vm14  ;;  %vm10933_vm6 = vnez %v10888_v53  ;;  %v8939_v2 = vsel %vm1491_vm9, 1.0, %v10858_v61  ;;  %vm10938_vm14 = vnez %v10902_v32 }
 0x25d   :  { %v8932_v38 = vsel %vm10933_vm6, 1.0, %v10858_v61  ;;  %v8942_v12 = vsel %vm1492_vm8, 1.0, %v10858_v61  ;;  %vm8948_vm15 = vmand %vm8891_vm10, %vm10849_vm2  ;;  %vm10939_vm9 = vnez %v10890_v54  ;;  %vm10941_vm10 = vcmp.lt.s32.totalorder %v8702_v46, 4 }
 0x25e   :  { %v10936_v16 = vsel %vm8948_vm15, 4294967295, %v10935_v16  ;;  %vm1444_vm1 = vmand %vm10938_vm14, %vm10937_vm3  ;;  %v8959_v34 = vsel %vm10939_vm9, 1.0, %v10858_v61  ;;  %v8971_v23 = vsel %vm10938_vm14, 1.0, %v10858_v61  ;;  %vm10943_vm3 = vcmp.lt.s32.totalorder %v1315_v45, 4 }
 0x25f   :  { %vm1448_vm8 = vmand %vm1444_vm1, %vm10941_vm10  ;;  %vm10945_vm1 = vcmp.ge.s32.totalorder %v8763_v7, 0  ;;  %vm10948_vm10 = vnez %v10896_v56  ;;  %vm10949_vm2 = vcmp.lt.s32.totalorder %v1315_v45, 4  ;;  %vm10962_vm9 = vcmp.lt.s32.totalorder %v8818_v33, 4  ;;  %v8065_v45 = vld [vmem:[%s10823_s2 + $0x20] sm:$0xff]  }
 0x260   :  { %vm1331_vm5 = vmand %vm10932_vm12, %vm10943_vm3  ;;  %v8988_v11 = vsel %vm1448_vm8, 1.0, %v10858_v61  ;;  %vm10946_vm12 = vcmp.lt.s32.totalorder %v8763_v7, 4  ;;  %vm1362_vm3 = vcmp.ge.s32.totalorder %v8712_v49, 0 }
 0x261   :  { %10944 = vst [vmem:[#allocation5_spill] sm:$0xff] %v8988_v11  ;;  %v8994_v44 = vsel %vm1331_vm5, 1.0, %v10858_v61  ;;  %vm1324_vm14 = vmand %vm10933_vm6, %vm10945_vm1  ;;  %vm1366_vm5 = vcmp.lt.s32.totalorder %v8712_v49, 4  ;;  %vm1367_vm6 = vcmp.lt.s32.totalorder %v8751_v62, 4  ;;  %v9026_v49 = vsel %vm8860_vm13, 1.0, %v10858_v61 }
 0x262   :  { %vm1332_vm4 = vmand %vm1324_vm14, %vm10946_vm12 }
 0x263   :  { %vm10947_vm11 = vmmov %vm10945_vm1  ;;  %v9019_v17 = vsel %vm1332_vm4, 1.0, %v10858_v61 }
 0x264   :  { %vm1406_vm8 = vmand %vm10948_vm10, %vm10947_vm11  ;;  %vm10956_vm11 = vcmp.ge.s32.totalorder %v8853_v43, 0 }
 0x265   :  { %vm1409_vm15 = vmand %vm10950_vm0, %vm10949_vm2  ;;  %vm10955_vm0 = vcmp.ge.s32.totalorder %v8715_v52, 0 }
 0x266   :  { %vm10951_vm1 = vmmov %vm10946_vm12  ;;  %v9035_v7 = vsel %vm1409_vm15, 1.0, %v10858_v61 }
 0x267   :  { %vm1410_vm14 = vmand %vm1406_vm8, %vm10951_vm1  ;;  %vm10958_vm8 = vcmp.ge.s32.totalorder %v8818_v33, 0  ;;  %vm10960_vm1 = vcmp.lt.s32.totalorder %v8853_v43, 4 }
 0x268   :  { %vm9028_vm12 = vmand %vm1362_vm3, %vm1366_vm5  ;;  %v9038_v22 = vsel %vm1410_vm14, 1.0, %v10858_v61  ;;  %vm10959_vm5 = vcmp.lt.s32.totalorder %v8715_v52, 4 }
 0x269   :  { %vm1371_vm2 = vmand %vm1363_vm7, %vm1367_vm6  ;;  %10954 = vst [vmem:[#allocation6_spill] sm:$0xff] %v9038_v22  ;;  %vm10957_vm7 = vcmp.ge.s32.totalorder %v8808_v28, 0 }
 0x26a   :  { %vm1374_vm4 = vmand %vm9028_vm12, %vm10955_vm0  ;;  %vm10961_vm0 = vcmp.lt.s32.totalorder %v8808_v28, 4  ;;  %v8068_v28 = vld [vmem:[%s10823_s2 + $0x38] sm:$0xff]  }
 0x26b   :  { %vm1375_vm15 = vmand %vm1371_vm2, %vm10956_vm11 }
 0x26c   :  { %vm1407_vm10 = vmand %vm9028_vm12, %vm10957_vm7  ;;  %vm1347_vm12 = vcmask 1040384  }
 0x26d   :  { %vm1408_vm3 = vmand %vm1371_vm2, %vm10958_vm8  ;;  %vm1261_vm2 = vcmask 1043456  }
 0x26e   :  { %vm1378_vm6 = vmand %vm1374_vm4, %vm10959_vm5  ;;  %vm1302_vm4 = vcmask 1042432   ;;  %vm10971_vm5 = vnez %v10918_v50 }
 0x26f   :  { %vm1379_vm14 = vmand %vm1375_vm15, %vm10960_vm1  ;;  %vm10880_vm15 = vcmask 1044480  }
 0x270   :  { %vm1411_vm13 = vmand %vm1407_vm10, %vm10961_vm0  ;;  %v9074_v42 = vsel %vm1379_vm14, 1.0, %v10858_v61  ;;  %vm10967_vm10 = vnez %v10890_v54 }
 0x271   :  { %vm9062_vm11 = vmand %vm1408_vm3, %vm10962_vm9  ;;  %vm1615_vm9 = vcmask 130048   ;;  %vm10970_vm3 = vcmp.ge.s32.totalorder %v8818_v33, 0 }
 0x272   :  { %vm9131_vm8 = vmand %vm10967_vm10, %vm10957_vm7  ;;  %vm10980_vm7 = vcmp.ge.s32.totalorder %v8715_v52, 0  ;;  %vm10981_vm10 = vnez %v10920_v51 }
 0x273   :  { %vm10974_vm1 = vmmov %vm10961_vm0  ;;  %vm10977_vm0 = vcmp.lt.s32.totalorder %v8818_v33, 4 }
 0x274   :  { %v6878_v24 = vpop.f32.mrb[12].mxu1  ;;  %vm9179_vm14 = vmand %vm9131_vm8, %vm10974_vm1  ;;  %vm10989_vm1 = vcmp.lt.s32.totalorder %v8715_v52, 4 }
 0x275   :  { %v800_v37 = vmax.f32 %v706_v8, %v6878_v24  ;;  %v780_v39 = vpop.f32.mrb[13].mxu1  ;;  %v9080_v24 = vsel %vm1411_vm13, 1.0, %v10858_v61  ;;  %vm1392_vm13 = vcmask 1046528   ;;  %vm9216_vm8 = vmand %vm10981_vm10, %vm10980_vm7 }
 0x276   :  { %v799_v46 = vmax.f32 %v705_v10, %v780_v39 }
 0x277   :  { %v894_v32 = vmax.f32 %v800_v37, %v8675_v25 }
 0x278   :  { %v893_v35 = vmax.f32 %v799_v46, %v8680_v30  ;;  %v6881_v29 = vpop.f32.mrb[14].mxu1  ;;  %v9087_v46 = vsel %vm9062_vm11, 1.0, %v10858_v61 }
 0x279   :  { %v802_v3 = vmax.f32 %v708_v27, %v6881_v29  ;;  %v790_v8 = vpop.f32.mrb[15].mxu1 }
 0x27a   :  { %v801_v13 = vmax.f32 %v707_v31, %v790_v8  ;;  %v8064_v31 = vld [vmem:[%s10823_s2 + $0x18] sm:$0xff]  }
 0x27b   :  { %v896_v25 = vmax.f32 %v802_v3, %v8687_v36  ;;  %1743 = vmatpush1.bf16.msra.mxu0 %v8064_v31 }
 0x27c   :  { %v895_v30 = vmax.f32 %v801_v13, %v8693_v41  ;;  %1744 = vmatprep.subr.bf16.mxu0 %v10856_v0  ;;  %v8066_v13 = vld [vmem:[%s10823_s2 + $0x28] sm:$0xff]  }
 0x27f   :  { %1745 = vmatpush1.bf16.msra.mxu0 %v8065_v45 }
 0x280   :  { %1746 = vmatprep.subr.bf16.mxu0 %v10856_v0 }
 0x283   :  { %1747 = vmatpush1.bf16.msra.mxu0 %v8066_v13 }
 0x284   :  { %1748 = vmatprep.subr.bf16.mxu0 %v10856_v0 }
 0x294   :  { %v6954_v15 = vpop.f32.mrb[16].mxu1 }
 0x295   :  { %v988_v36 = vmax.f32 %v894_v32, %v6954_v15  ;;  %v968_v41 = vpop.f32.mrb[17].mxu1 }
 0x296   :  { %v987_v6 = vmax.f32 %v893_v35, %v968_v41 }
 0x297   :  { %v1082_v62 = vmax.f32 %v988_v36, %v8753_v1 }
 0x298   :  { %v1081_v10 = vmax.f32 %v987_v6, %v8757_v5  ;;  %v6957_v56 = vpop.f32.mrb[18].mxu1 }
 0x299   :  { %v990_v14 = vmax.f32 %v896_v25, %v6957_v56  ;;  %v978_v20 = vpop.f32.mrb[19].mxu1 }
 0x29a   :  { %v989_v27 = vmax.f32 %v895_v30, %v978_v20 }
 0x29b   :  { %v1084_v1 = vmax.f32 %v990_v14, %v8770_v47 }
 0x29c   :  { %v1083_v5 = vmax.f32 %v989_v27, %v8781_v18  ;;  %v9067_v18 = vsel %vm1378_vm6, 1.0, %v10858_v61  ;;  %vm9144_vm6 = vmand %vm10971_vm5, %vm10970_vm3  ;;  %vm10984_vm3 = vcmp.ge.s32.totalorder %v8853_v43, 0  ;;  %vm10985_vm5 = vnez %v10925_v58 }
 0x29d   :  { %vm9198_vm11 = vmand %vm9144_vm6, %vm10977_vm0 }
 0x29e   :  { %vm9237_vm6 = vmand %vm10985_vm5, %vm10984_vm3  ;;  %vm11000_vm3 = vnez %v10886_v48 }
 0x29f   :  { %vm9257_vm0 = vmand %vm9216_vm8, %vm10989_vm1  ;;  %vm10998_vm8 = vnez %v10892_v55  ;;  %vm11001_vm1 = vcmask 261120  }
 0x2b4   :  { %v7030_v59 = vpop.f32.mrb[20].mxu1 }
 0x2b5   :  { %v9082_v37 = vmax.f32 %v1082_v62, %v7030_v59  ;;  %v1156_v39 = vpop.f32.mrb[21].mxu1 }
 0x2b6   :  { %v9090_v32 = vmax.f32 %v1081_v10, %v1156_v39 }
 0x2b7   :  { %10965 = vst [vmem:[#allocation7_spill] sm:$0xff] %v9082_v37  ;;  %v1349_v35 = vrot.slane %v9082_v37, 7  ;;  %v1263_v29 = vrot.slane %v9082_v37, 4  ;;  %v1304_v3 = vrot.slane %v9082_v37, 5  ;;  %v1202_v8 = vrot.slane %v9082_v37, 3 }
 0x2b8   :  { %v7033_v25 = vpop.f32.mrb[22].mxu1  ;;  %v7702_v30 = vpack.i.bf16 %v9082_v37, %v9090_v32  ;;  %v1348_v15 = vrot.slane %v9090_v32, 7  ;;  %v1262_v36 = vrot.slane %v9090_v32, 4  ;;  %v1303_v41 = vrot.slane %v9090_v32, 5 }
 0x2b9   :  { %v9104_v53 = vmax.f32 %v1084_v1, %v7033_v25  ;;  %v1166_v6 = vpop.f32.mrb[23].mxu1  ;;  %v10853_v62 = vrot.slane %v9090_v32, 3  ;;  %v1393_v10 = vrot.slane %v9090_v32, 1  ;;  %v1394_v56 = vrot.slane %v9082_v37, 1 }
 0x2ba   :  { %v9109_v14 = vmax.f32 %v1083_v5, %v1166_v6  ;;  %7703 = vrot.lane.b32.xlu1 %v7702_v30, %s8217_s14  ;;  %v1350_v20 = vsel %vm1347_vm12, %v1348_v15, %v1349_v35  ;;  %v1359_v27 = vsel %vm1347_vm12, 0.0, %v1348_v15  ;;  %v9119_v1 = vsel %vm1261_vm2, %v1262_v36, %v1263_v29 }
 0x2bb   :  { %10966 = vst [vmem:[#allocation8_spill] sm:$0xff] %v9104_v53  ;;  %v1388_v47 = vmul.f32 %v8917_v63, %v1359_v27  ;;  %v1389_v5 = vmul.f32 %v8922_v4, %v1350_v20  ;;  %v1273_v31 = vsel %vm1261_vm2, 0.0, %v1262_v36  ;;  %v1299_v45 = vmul.f32 %v8932_v38, %v9119_v1  ;;  %v8067_v20 = vld [vmem:[%s10823_s2 + $0x30] sm:$0xff]  }
 0x2bc   :  { %v7707_v39 = vpack.i.bf16 %v9104_v53, %v9109_v14  ;;  %v1298_v13 = vmul.f32 %v8927_v9, %v1273_v31  ;;  %v1305_v25 = vsel %vm1302_vm4, %v1303_v41, %v1304_v3  ;;  %v10855_v30 = vrot.slane %v9109_v14, 5  ;;  %1749 = vmatpush1.bf16.msra.mxu0 %v8067_v20 }
 0x2bd   :  { %v7722_v54 = vpack.i.bf16 %v1389_v5, %v1388_v47  ;;  %v9151_v36 = vsel %vm10880_vm15, %v10853_v62, %v1202_v8  ;;  %v10854_v6 = vrot.slane %v9109_v14, 3  ;;  %v1503_v47 = vmul.f32 %v8939_v2, %v1305_v25  ;;  %1750 = vmatprep.subr.bf16.mxu0 %v10856_v0 }
 0x2be   :  { %7708 = vrot.lane.b32.xlu0 %v7707_v39, %s8217_s14  ;;  %v7712_v27 = vpack.i.bf16 %v1299_v45, %v1298_v13  ;;  %v9161_v50 = vsel %vm1302_vm4, %v1304_v3, %v10855_v30  ;;  %v1459_v45 = vmul.f32 %v8977_v40, %v9151_v36  ;;  %v1314_v39 = vsel %vm1302_vm4, 0.0, %v1303_v41 }
 0x2bf   :  { %7723 = vrot.lane.b32.xlu1 %v7722_v54, %s8218_s17  ;;  %v1504_v5 = vmul.f32 %v8942_v12, %v9161_v50  ;;  %v9170_v31 = vsel %vm10880_vm15, %v1202_v8, %v10854_v6  ;;  %v1343_v8 = vmul.f32 %v8994_v44, %v1314_v39  ;;  %v1344_v54 = vmul.f32 %v9019_v17, %v1305_v25 }
 0x2c0   :  { %v1460_v13 = vmul.f32 %v8988_v11, %v9170_v31  ;;  %v1265_v62 = vrot.slane %v9109_v14, 4  ;;  %v1267_v59 = vrot.slane %v9104_v53, 4  ;;  %v1396_v20 = vrot.slane %v9109_v14, 1  ;;  %1751 = vmatpush1.bf16.msra.mxu0 %v8068_v28 }
 0x2c1   :  { %v1668_v41 = vpack.c.bf16 %v1504_v5, %v1503_v47  ;;  %v1395_v5 = vsel %vm1392_vm13, %v1393_v10, %v1394_v56  ;;  %v1351_v30 = vrot.slane %v9109_v14, 7  ;;  %1752 = vmatprep.subr.bf16.mxu0 %v10856_v0  ;;  %v1398_v28 = vrot.slane %v9104_v53, 1 }
 0x2c2   :  { %7713 = vrot.lane.b32.xlu0 %v7712_v27, %s8219_s20  ;;  %v7732_v25 = vpack.i.bf16 %v1460_v13, %v1459_v45  ;;  %v1266_v47 = vsel %vm1261_vm2, %v1263_v29, %v1265_v62  ;;  %v1268_v33 = vsel %vm1261_vm2, %v1265_v62, %v1267_v59  ;;  %v1397_v6 = vsel %vm1392_vm13, %v1394_v56, %v1396_v20  ;;  %v8069_v45 = vld [vmem:[%s10823_s2 + $0x40] sm:$0xff]  }
 0x2c3   :  { %6104 = vmatprep.mubr.msk.bf16.mxu0 %vm1615_vm9, %v1668_v41  ;;  %v1300_v15 = vmul.f32 %v8959_v34, %v1266_v47  ;;  %v7717_v29 = vpack.i.bf16 %v1344_v54, %v1343_v8  ;;  %v1301_v62 = vmul.f32 %v9026_v49, %v1268_v33  ;;  %v1422_v10 = vmul.f32 %v9038_v22, %v1397_v6 }
 0x2c4   :  { %7733 = vrot.lane.b32.xlu1 %v7732_v25, %s8220_s21  ;;  %v1353_v56 = vrot.slane %v9104_v53, 7  ;;  %v1352_v13 = vsel %vm1347_vm12, %v1349_v35, %v1351_v30  ;;  %v1308_v8 = vrot.slane %v9104_v53, 5  ;;  %v1421_v41 = vmul.f32 %v9035_v7, %v1395_v5  ;;  %1753 = vmatpush1.bf16.msra.mxu0 %v8069_v45 }
 0x2c5   :  { %v7742_v54 = vpack.i.bf16 %v1301_v62, %v1300_v15  ;;  %v1390_v25 = vmul.f32 %v9067_v18, %v1352_v13  ;;  %v1399_v61 = vsel %vm1392_vm13, %v1396_v20, %v1398_v28  ;;  %v1404_v19 = vsel %vm1392_vm13, %v1398_v28, 0.0 }
 0x2c6   :  { %7718 = vrot.lane.b32.xlu0 %v7717_v29, %s8221_s24  ;;  %v1354_v35 = vsel %vm1347_vm12, %v1351_v30, %v1353_v56  ;;  %v10988_v37 = vmov 0.0   ;;  %v7727_v30 = vpack.i.bf16 %v1422_v10, %v1421_v41  ;;  %v1482_v20 = vmul.f32 %v8971_v23, %v1266_v47 }
 0x2c7   :  { %v1391_v0 = vmul.f32 %v9074_v42, %v1354_v35  ;;  %v9251_v22 = vsel %vm9179_vm14, 1.0, %v10988_v37  ;;  %v1481_v15 = vmul.f32 %v8964_v21, %v9119_v1  ;;  %v10992_v3 = vrot.slane %v9109_v14, 5 }
 0x2c8   :  { %7743 = vrot.lane.b32.xlu1 %v7742_v54, %s8219_s20  ;;  %v9271_v52 = vsel %vm9198_vm11, 1.0, %v10988_v37  ;;  %vm10993_vm14 = vnez %v10923_v26  ;;  %v10994_v62 = vmov 0   ;;  %v1423_v47 = vmul.f32 %v9080_v24, %v1399_v61 }
 0x2c9   :  { %v1309_v29 = vsel %vm1302_vm4, %v10992_v3, %v1308_v8  ;;  %v9276_v27 = vsel %vm10993_vm14, 1.0, %v10988_v37  ;;  %2496 = vmatprep.subr.bf16.mxu0 %v10994_v62  ;;  %v7752_v1 = vpack.i.bf16 %v1391_v0, %v1390_v25  ;;  %v1424_v10 = vmul.f32 %v9087_v46, %v1404_v19 }
 0x2ca   :  { %7728 = vrot.lane.b32.xlu0 %v7727_v30, %s8222_s25  ;;  %v1206_v56 = vrot.slane %v9104_v53, 3  ;;  %vm10995_vm11 = vcmp.lt.s32.totalorder %v8853_v43, 4  ;;  %v1464_v26 = vsel %vm1261_vm2, %v1267_v59, 0.0  ;;  %v9291_v39 = vsel %vm10981_vm10, 1.0, %v10988_v37 }
 0x2cb   :  { %vm1450_vm7 = vmand %vm9237_vm6, %vm10995_vm11  ;;  %v9296_v0 = vsel %vm10985_vm5, 1.0, %v10988_v37  ;;  %v9301_v19 = vsel %vm9257_vm0, 1.0, %v10988_v37  ;;  %v7737_v43 = vpack.i.bf16 %v1482_v20, %v1481_v15  ;;  %v1345_v61 = vmul.f32 %v9251_v22, %v9161_v50 }
 0x2cc   :  { %7753 = vrot.lane.b32.xlu1 %v7752_v1, %s8218_s17  ;;  %v1346_v51 = vmul.f32 %v9271_v52, %v1309_v29  ;;  %vm10996_vm10 = vnez %v10936_v16  ;;  %v9313_v58 = vmul.f32 %v9276_v27, %v1309_v29  ;;  %v10997_v45 = vrot.slane %v9109_v14, 3  ;;  %vm11002_vm0 = vmmov %vm11001_vm1 }
 0x2cd   :  { %v9310_v59 = vsel %vm10996_vm10, 1.0, %v10988_v37  ;;  %v1426_v28 = vsel %vm10880_vm15, %v1206_v56, 0.0  ;;  %v9322_v6 = vsel %vm1450_vm7, 1.0, %v10988_v37  ;;  %v7757_v50 = vpack.i.bf16 %v1424_v10, %v1423_v47 }
 0x2ce   :  { %v9318_v13 = vsel %vm10880_vm15, %v10997_v45, %v1206_v56  ;;  %7738 = vrot.lane.b32.xlu0 %v7737_v43, %s8223_s26  ;;  %v1483_v16 = vmul.f32 %v9291_v39, %v1268_v33  ;;  %v1484_v54 = vmul.f32 %v9296_v0, %v1464_v26  ;;  %v1486_v41 = vsel %vm1302_vm4, %v1308_v8, 0.0 }
 0x2cf   :  { %v9329_v35 = vmul.f32 %v9310_v59, %v1486_v41  ;;  %v7747_v25 = vpack.i.bf16 %v1346_v51, %v1345_v61  ;;  %v1461_v5 = vmul.f32 %v9301_v19, %v9318_v13  ;;  %v1462_v30 = vmul.f32 %v9322_v6, %v1426_v28 }
 0x2d0   :  { %7758 = vrot.lane.b32.xlu1 %v7757_v50, %s8222_s25  ;;  %v7767_v33 = vpack.i.bf16 %v1484_v54, %v1483_v16  ;;  %v9345_v47 = vsel %vm10998_vm8, 1.0, %v10988_v37  ;;  %v10999_v10 = vrot.slane %v9090_v32, 3  ;;  %v9353_v26 = vsel %vm11000_vm3, 1.0, %v10988_v37  ;;  %vm11005_vm3 = vmmov %vm11002_vm0 }
 0x2d1   :  { %v1670_v20 = vpack.c.bf16 %v9329_v35, %v9313_v58  ;;  %v7762_v8 = vpack.i.bf16 %v1462_v30, %v1461_v5  ;;  %v1258_v45 = vmul.f32 %v9345_v47, %v9151_v36  ;;  %vm1624_vm5 = vcmask 392192  }
 0x2d2   :  { %7748 = vrot.lane.b32.xlu0 %v7747_v25, %s8221_s24  ;;  %v1212_v56 = vsel %vm10880_vm15, 0.0, %v10999_v10  ;;  %vm1629_vm6 = vcmask 523264   ;;  %vm1634_vm14 = vcmask 654336   ;;  %vm10881_vm11 = vcmask 785408  }
 0x2d3   :  { %v1257_v28 = vmul.f32 %v9353_v26, %v1212_v56  ;;  %vm1644_vm7 = vcmask 916480   ;;  %vm11003_vm10 = vnez %v10894_v57  ;;  %vm11004_vm8 = vnez %v10931_v60 }
 0x2d4   :  { %7768 = vrot.lane.b32.xlu1 %v7767_v33, %s8223_s26 }
 0x2d6   :  { %7763 = vrot.lane.b32.xlu0 %v7762_v8, %s8220_s21 }
 0x32c   :  { %v7704_v15 = vpop.permute.xlu1 %7703 }
 0x32d   :  { %v7706_v30 = vunpack.i.h.bf16 %v7704_v15  ;;  %v7705_v33 = vunpack.i.l.bf16 %v7704_v15 }
 0x330   :  { %v9340_v3 = vpop.permute.xlu0 %7708 }
 0x331   :  { %v7724_v29 = vpop.permute.xlu1 %7723 }
 0x332   :  { %v7726_v54 = vunpack.i.h.bf16 %v7724_v29  ;;  %v7725_v41 = vunpack.i.l.bf16 %v7724_v29 }
 0x334   :  { %v7714_v1 = vpop.permute.xlu0 %7713 }
 0x335   :  { %v7716_v43 = vunpack.i.h.bf16 %v7714_v1  ;;  %v7715_v61 = vunpack.i.l.bf16 %v7714_v1 }
 0x336   :  { %v7734_v51 = vpop.permute.xlu1 %7733 }
 0x337   :  { %v1617_v25 = vsel %vm1615_vm9, %v1258_v45, %v7716_v43  ;;  %v1616_v48 = vsel %vm1615_vm9, %v1257_v28, %v7715_v61  ;;  %v7736_v15 = vunpack.i.h.bf16 %v7734_v51  ;;  %v7735_v28 = vunpack.i.l.bf16 %v7734_v51 }
 0x338   :  { %v7719_v55 = vpop.permute.xlu0 %7718 }
 0x339   :  { %v7721_v50 = vunpack.i.h.bf16 %v7719_v55  ;;  %v7720_v16 = vunpack.i.l.bf16 %v7719_v55 }
 0x33a   :  { %v7744_v5 = vpop.permute.xlu1 %7743 }
 0x33b   :  { %v1620_v8 = vsel %vm11001_vm1, %v1616_v48, %v7720_v16  ;;  %v1621_v36 = vsel %vm11002_vm0, %v1617_v25, %v7721_v50  ;;  %v9376_v25 = vsel %vm11004_vm8, 1.0, %v10988_v37  ;;  %vm11006_vm1 = vmmov %vm11002_vm0 }
 0x33c   :  { %v1625_v1 = vsel %vm1624_vm5, %v1620_v8, %v7725_v41  ;;  %v1626_v10 = vsel %vm1624_vm5, %v1621_v36, %v7726_v54  ;;  %v7729_v56 = vpop.permute.xlu0 %7728  ;;  %v9371_v54 = vsel %vm11003_vm10, 1.0, %v10988_v37  ;;  %v7745_v8 = vunpack.i.l.bf16 %v7744_v5  ;;  %vm11011_vm10 = vmmov %vm11002_vm0 }
 0x33d   :  { %v1630_v55 = vsel %vm1629_vm6, %v1625_v1, %v7705_v33  ;;  %v1631_v29 = vsel %vm1629_vm6, %v1626_v10, %v7706_v30  ;;  %v7731_v43 = vunpack.i.h.bf16 %v7729_v56  ;;  %v7730_v45 = vunpack.i.l.bf16 %v7729_v56  ;;  %vm11012_vm8 = vmmov %vm11002_vm0 }
 0x33e   :  { %v7754_v61 = vpop.permute.xlu1 %7753  ;;  %v7746_v33 = vunpack.i.h.bf16 %v7744_v5  ;;  %v1259_v56 = vmul.f32 %v9371_v54, %v9170_v31  ;;  %v1260_v60 = vmul.f32 %v9376_v25, %v9318_v13 }
 0x33f   :  { %v1636_v16 = vsel %vm1634_vm14, %v1631_v29, %v7731_v43  ;;  %v1635_v50 = vsel %vm1634_vm14, %v1630_v55, %v7730_v45 }
 0x340   :  { %v7739_v41 = vpop.permute.xlu0 %7738  ;;  %v1640_v51 = vsel %vm10881_vm11, %v1635_v50, %v7735_v28  ;;  %v1641_v36 = vsel %vm10881_vm11, %v1636_v16, %v7736_v15  ;;  %v1619_v5 = vsel %vm1615_vm9, %v1260_v60, %v7746_v33  ;;  %v1618_v28 = vsel %vm1615_vm9, %v1259_v56, %v7745_v8 }
 0x341   :  { %v7741_v48 = vunpack.i.h.bf16 %v7739_v41  ;;  %v7740_v30 = vunpack.i.l.bf16 %v7739_v41  ;;  %v7756_v15 = vunpack.i.h.bf16 %v7754_v61  ;;  %v7755_v16 = vunpack.i.l.bf16 %v7754_v61 }
 0x342   :  { %v7759_v1 = vpop.permute.xlu1 %7758  ;;  %v7711_v50 = vunpack.i.h.bf16 %v9340_v3  ;;  %v7710_v41 = vunpack.i.l.bf16 %v9340_v3 }
 0x343   :  { %v1645_v10 = vsel %vm1644_vm7, %v1640_v51, %v7740_v30  ;;  %v1646_v57 = vsel %vm1644_vm7, %v1641_v36, %v7741_v48  ;;  %v7761_v30 = vunpack.i.h.bf16 %v7759_v1  ;;  %v7760_v33 = vunpack.i.l.bf16 %v7759_v1 }
 0x344   :  { %v1667_v55 = vpack.c.bf16 %v1646_v57, %v1645_v10  ;;  %v7749_v29 = vpop.permute.xlu0 %7748 }
 0x345   :  { %v7751_v43 = vunpack.i.h.bf16 %v7749_v29  ;;  %v7750_v45 = vunpack.i.l.bf16 %v7749_v29 }
 0x346   :  { %1769 = vmatmul.mubr.bf16.vlgmr.msra.gmra.mrb[44].mxu0 %v1667_v55  ;;  %v7769_v13 = vpop.permute.xlu1 %7768 }
 0x347   :  { %v1622_v31 = vsel %vm11005_vm3, %v1618_v28, %v7750_v45  ;;  %v1623_v48 = vsel %vm11006_vm1, %v1619_v5, %v7751_v43  ;;  %6105 = vmatprep.mubr.msk.bf16.mxu0 %vm1615_vm9, %v1670_v20  ;;  %v7771_v56 = vunpack.i.h.bf16 %v7769_v13  ;;  %v7770_v60 = vunpack.i.l.bf16 %v7769_v13  ;;  %v8070_v45 = vld [vmem:[%s10823_s2 + $0x48] sm:$0xff]   ;;  %v8071_v5 = vld [vmem:[%s10823_s2 + $0x50] sm:$0xff]   ;;  %v8072_v28 = vld [vmem:[%s10823_s2 + $0x58] sm:$0xff]  }
 0x348   :  { %v1627_v8 = vsel %vm1624_vm5, %v1622_v31, %v7755_v16  ;;  %v1628_v61 = vsel %vm1624_vm5, %v1623_v48, %v7756_v15  ;;  %v7764_v51 = vpop.permute.xlu0 %7763  ;;  %2115 = vmatpush1.bf16.msra.mxu1 %v8070_v45  ;;  %v8073_v15 = vld [vmem:[%s10823_s2 + $0x60] sm:$0xff]   ;;  %vm11013_vm3 = vmmov %vm11002_vm0 }
 0x349   :  { %v7766_v36 = vunpack.i.h.bf16 %v7764_v51  ;;  %v7765_v10 = vunpack.i.l.bf16 %v7764_v51  ;;  %v1632_v3 = vsel %vm1629_vm6, %v1627_v8, %v7710_v41  ;;  %v1633_v57 = vsel %vm1629_vm6, %v1628_v61, %v7711_v50  ;;  %2116 = vmatprep.subr.bf16.mxu1 %v10994_v62  ;;  %v6094_v16 = vld [vmem:[%s10822_s3 + $0x1] ss:$0 sm:$0xff]  ;;  %v8074_v8 = vld [vmem:[%s10823_s2 + $0x68] sm:$0xff]   ;;  %vm11022_vm1 = vmmov %vm11002_vm0 }
 0x34a   :  { %v1637_v55 = vsel %vm1634_vm14, %v1632_v3, %v7760_v33  ;;  %v1638_v58 = vsel %vm1634_vm14, %v1633_v57, %v7761_v30 }
 0x34b   :  { %v1642_v35 = vsel %vm10881_vm11, %v1637_v55, %v7765_v10  ;;  %v1643_v20 = vsel %vm10881_vm11, %v1638_v58, %v7766_v36  ;;  %v8075_v55 = vld [vmem:[%s10823_s2 + $0x70] sm:$0xff]  }
 0x34c   :  { %v1647_v1 = vsel %vm1644_vm7, %v1642_v35, %v7770_v60  ;;  %v1648_v29 = vsel %vm1644_vm7, %v1643_v20, %v7771_v56  ;;  %2117 = vmatpush1.bf16.msra.mxu1 %v8071_v5 }
 0x34d   :  { %v1669_v43 = vpack.c.bf16 %v1648_v29, %v1647_v1  ;;  %2118 = vmatprep.subr.bf16.mxu1 %v10994_v62 }
 0x34f   :  { %1777 = vmatmul.mubr.bf16.gmra.mrb[48].mxu0 %v1669_v43 }
 0x350   :  { %2119 = vmatpush1.bf16.msra.mxu1 %v8072_v28 }
 0x351   :  { %2120 = vmatprep.subr.bf16.mxu1 %v10994_v62 }
 0x354   :  { %2121 = vmatpush1.bf16.msra.mxu1 %v8073_v15 }
 0x355   :  { %2122 = vmatprep.subr.bf16.mxu1 %v10994_v62 }
 0x358   :  { %2123 = vmatpush1.bf16.msra.mxu1 %v8074_v8 }
 0x359   :  { %2124 = vmatprep.subr.bf16.mxu1 %v10994_v62 }
 0x35c   :  { %2125 = vmatpush1.bf16.msra.mxu1 %v8075_v55 }
 0x35d   :  { %2126 = vmatprep.subr.bf16.mxu1 %v10994_v62 }
 0x419   :  { %v1770_v50 = vpop.f32.mrb[44].mxu0 }
 0x41a   :  { %v1771_v41 = vadd.f32 %v6094_v16, %v1770_v50  ;;  %v1772_v31 = vpop.f32.mrb[45].mxu0 }
 0x41b   :  { %v1773_v48 = vpop.f32.mrb[46].mxu0 }
 0x41c   :  { %v9425_v13 = vmax.f32 %v1771_v41, 0.0  ;;  %v1774_v30 = vadd.f32 %v6094_v16, %v1773_v48  ;;  %v1775_v33 = vpop.f32.mrb[47].mxu0 }
 0x41e   :  { %v9430_v61 = vmax.f32 %v1774_v30, 0.0  ;;  %v1825_v51 = vrot.slane %v9425_v13, 5  ;;  %v1809_v36 = vrot.slane %v9425_v13, 4  ;;  %v1841_v10 = vrot.slane %v9425_v13, 7 }
 0x41f   :  { %v10867_v20 = vrot.slane %v9425_v13, 3  ;;  %v1857_v8 = vrot.slane %v9425_v13, 1 }
 0x420   :  { %v7772_v3 = vpack.i.bf16 %v9430_v61, %v9425_v13  ;;  %v1826_v57 = vrot.slane %v9430_v61, 5  ;;  %v1836_v56 = vsel %vm1302_vm4, 0.0, %v1825_v51  ;;  %v1810_v60 = vrot.slane %v9430_v61, 4 }
 0x421   :  { %v1820_v58 = vsel %vm1261_vm2, 0.0, %v1809_v36  ;;  %v10864_v35 = vrot.slane %v9430_v61, 7  ;;  %v1837_v43 = vmul.f32 %v8994_v44, %v1836_v56  ;;  %v1852_v5 = vsel %vm1347_vm12, 0.0, %v1841_v10 }
 0x422   :  { %7773 = vrot.lane.b32.xlu1 %v7772_v3, %s8217_s14  ;;  %v1778_v1 = vpop.f32.mrb[48].mxu0  ;;  %v1827_v29 = vsel %vm1302_vm4, %v1825_v51, %v1826_v57  ;;  %v1811_v45 = vsel %vm1261_vm2, %v1809_v36, %v1810_v60  ;;  %v1821_v41 = vmul.f32 %v8927_v9, %v1820_v58  ;;  %v1794_v33 = vrot.slane %v9430_v61, 3  ;;  %v8076_v36 = vld [vmem:[%s10823_s2 + $0x78] sm:$0xff]  }
 0x423   :  { %v1779_v28 = vadd.f32 %v6094_v16, %v1778_v1  ;;  %v1780_v15 = vpop.f32.mrb[49].mxu0  ;;  %v1838_v50 = vmul.f32 %v9019_v17, %v1827_v29  ;;  %v1822_v31 = vmul.f32 %v8932_v38, %v1811_v45  ;;  %v1843_v30 = vsel %vm1347_vm12, %v1841_v10, %v10864_v35  ;;  %2127 = vmatpush1.bf16.msra.mxu1 %v8076_v36 }
 0x424   :  { %v1781_v48 = vpop.f32.mrb[50].mxu0  ;;  %v1858_v51 = vrot.slane %v9430_v61, 1  ;;  %v1853_v10 = vmul.f32 %v8917_v63, %v1852_v5  ;;  %v1854_v15 = vmul.f32 %v8922_v4, %v1843_v30  ;;  %v9472_v35 = vsel %vm10880_vm15, %v10867_v20, %v1794_v33  ;;  %2128 = vmatprep.subr.bf16.mxu1 %v10994_v62 }
 0x425   :  { %v9465_v3 = vmax.f32 %v1779_v28, 0.0  ;;  %v1782_v56 = vadd.f32 %v6094_v16, %v1781_v48  ;;  %v1783_v55 = vpop.f32.mrb[51].mxu0  ;;  %v7782_v58 = vpack.i.bf16 %v1838_v50, %v1837_v43  ;;  %v7777_v1 = vpack.i.bf16 %v1822_v31, %v1821_v41 }
 0x426   :  { %v1859_v37 = vsel %vm1392_vm13, %v1857_v8, %v1858_v51  ;;  %v1887_v28 = vmul.f32 %v8939_v2, %v1827_v29  ;;  %v7787_v5 = vpack.i.bf16 %v1854_v15, %v1853_v10  ;;  %v9485_v31 = vmul.f32 %v8964_v21, %v1811_v45  ;;  %v8077_v29 = vld [vmem:[%s10823_s2 + $0x80] sm:$0xff]  }
 0x427   :  { %v9475_v53 = vmax.f32 %v1782_v56, 0.0  ;;  %7783 = vrot.lane.b32.xlu1 %v7782_v58, %s8221_s24  ;;  %7778 = vrot.lane.b32.xlu0 %v7777_v1, %s8219_s20  ;;  %v1828_v16 = vrot.slane %v9465_v3, 5  ;;  %v10868_v43 = vrot.slane %v9465_v3, 3  ;;  %v1812_v50 = vrot.slane %v9465_v3, 4  ;;  %v11007_v21 = vld [vmem:[#allocation6_spill] sm:$0xff] }
 0x428   :  { %v1860_v41 = vrot.slane %v9465_v3, 1  ;;  %v1875_v36 = vmul.f32 %v8977_v40, %v9472_v35  ;;  %v1869_v10 = vmul.f32 %v9035_v7, %v1859_v37  ;;  %2129 = vmatpush1.bf16.msra.mxu1 %v8077_v29  ;;  %v8078_v37 = vld [vmem:[%s10823_s2 + $0x88] sm:$0xff]  }
 0x429   :  { %v1829_v48 = vsel %vm1302_vm4, %v1826_v57, %v1828_v16  ;;  %v9494_v30 = vsel %vm10880_vm15, %v1794_v33, %v10868_v43  ;;  %v7792_v8 = vpack.i.bf16 %v9475_v53, %v9465_v3  ;;  %v1814_v56 = vrot.slane %v9475_v53, 4  ;;  %2130 = vmatprep.subr.bf16.mxu1 %v10994_v62 }
 0x42a   :  { %v1888_v45 = vmul.f32 %v8942_v12, %v1829_v48  ;;  %v1876_v57 = vmul.f32 %v8988_v11, %v9494_v30  ;;  %v1813_v55 = vsel %vm1261_vm2, %v1810_v60, %v1812_v50  ;;  %v1861_v1 = vsel %vm1392_vm13, %v1858_v51, %v1860_v41 }
 0x42b   :  { %7788 = vrot.lane.b32.xlu0 %v7787_v5, %s8218_s17  ;;  %v1815_v33 = vsel %vm1261_vm2, %v1812_v50, %v1814_v56  ;;  %v1823_v58 = vmul.f32 %v8959_v34, %v1813_v55  ;;  %v1870_v40 = vmul.f32 %v11007_v21, %v1861_v1  ;;  %v1844_v11 = vrot.slane %v9465_v3, 7 }
 0x42c   :  { %v2046_v15 = vpack.c.bf16 %v1888_v45, %v1887_v28  ;;  %v7802_v20 = vpack.i.bf16 %v1876_v57, %v1875_v36  ;;  %v1824_v43 = vmul.f32 %v9026_v49, %v1815_v33  ;;  %v1846_v60 = vrot.slane %v9475_v53, 7  ;;  %2131 = vmatpush1.bf16.msra.mxu1 %v8078_v37 }
 0x42d   :  { %v1882_v5 = vmul.f32 %v8971_v23, %v1813_v55  ;;  %v1862_v50 = vrot.slane %v9475_v53, 1  ;;  %v7797_v28 = vpack.i.bf16 %v1870_v40, %v1869_v10  ;;  %v1830_v29 = vrot.slane %v9475_v53, 5  ;;  %2874 = vmatprep.subr.bf16.mxu1 %v10994_v62 }
 0x42e   :  { %6116 = vmatprep.mubr.msk.bf16.mxu1 %vm1615_vm9, %v2046_v15  ;;  %7803 = vrot.lane.b32.xlu1 %v7802_v20, %s8220_s21  ;;  %v7812_v51 = vpack.i.bf16 %v1824_v43, %v1823_v58  ;;  %v1839_v45 = vmul.f32 %v9251_v22, %v1829_v48  ;;  %v11008_v36 = vrot.slane %v9430_v61, 7  ;;  %v1847_v55 = vsel %vm1347_vm12, %v1844_v11, %v1846_v60 }
 0x42f   :  { %7793 = vrot.lane.b32.xlu0 %v7792_v8, %s8217_s14  ;;  %v7807_v1 = vpack.i.bf16 %v1882_v5, %v9485_v31  ;;  %v1863_v15 = vsel %vm1392_vm13, %v1860_v41, %v1862_v50  ;;  %v1856_v40 = vmul.f32 %v9074_v42, %v1847_v55  ;;  %v1868_v43 = vsel %vm1392_vm13, %v1862_v50, 0.0 }
 0x430   :  { %v1845_v57 = vsel %vm1347_vm12, %v11008_v36, %v1844_v11  ;;  %v1871_v48 = vmul.f32 %v9080_v24, %v1863_v15  ;;  %v1872_v8 = vmul.f32 %v9087_v46, %v1868_v43  ;;  %v1831_v61 = vsel %vm1302_vm4, %v1828_v16, %v1830_v29 }
 0x431   :  { %v1855_v20 = vmul.f32 %v9067_v18, %v1845_v57  ;;  %v1880_v58 = vsel %vm1261_vm2, %v1814_v56, 0.0  ;;  %v1883_v11 = vmul.f32 %v9291_v39, %v1815_v33  ;;  %v1840_v31 = vmul.f32 %v9271_v52, %v1831_v61 }
 0x432   :  { %7813 = vrot.lane.b32.xlu1 %v7812_v51, %s8219_s20  ;;  %v9544_v10 = vmul.f32 %v9276_v27, %v1831_v61  ;;  %v1884_v60 = vmul.f32 %v9296_v0, %v1880_v58  ;;  %v7827_v5 = vpack.i.bf16 %v1872_v8, %v1871_v48  ;;  %v1798_v16 = vrot.slane %v9475_v53, 3 }
 0x433   :  { %v7822_v41 = vpack.i.bf16 %v1856_v40, %v1855_v20  ;;  %7798 = vrot.lane.b32.xlu0 %v7797_v28, %s8222_s25  ;;  %v1886_v56 = vsel %vm1302_vm4, %v1830_v29, 0.0  ;;  %v7817_v33 = vpack.i.bf16 %v1840_v31, %v1839_v45  ;;  %v11009_v51 = vrot.slane %v9465_v3, 3 }
 0x434   :  { %v7837_v50 = vpack.i.bf16 %v1884_v60, %v1883_v11  ;;  %v9551_v37 = vmul.f32 %v9310_v59, %v1886_v56  ;;  %v1874_v57 = vsel %vm10880_vm15, %v1798_v16, 0.0  ;;  %v11010_v15 = vrot.slane %v9425_v13, 3 }
 0x435   :  { %v1799_v36 = vsel %vm10880_vm15, %v11009_v51, %v1798_v16  ;;  %v1878_v55 = vmul.f32 %v9322_v6, %v1874_v57 }
 0x436   :  { %7823 = vrot.lane.b32.xlu1 %v7822_v41, %s8218_s17  ;;  %v1877_v28 = vmul.f32 %v9301_v19, %v1799_v36  ;;  %v2048_v53 = vpack.c.bf16 %v9551_v37, %v9544_v10  ;;  %v1804_v20 = vsel %vm10880_vm15, 0.0, %v11010_v15 }
 0x437   :  { %7808 = vrot.lane.b32.xlu0 %v7807_v1, %s8223_s26  ;;  %v1806_v1 = vmul.f32 %v9345_v47, %v9472_v35  ;;  %v1805_v61 = vmul.f32 %v9353_v26, %v1804_v20 }
 0x438   :  { %v7832_v29 = vpack.i.bf16 %v1878_v55, %v1877_v28 }
 0x43a   :  { %7828 = vrot.lane.b32.xlu1 %v7827_v5, %s8222_s25 }
 0x43b   :  { %7818 = vrot.lane.b32.xlu0 %v7817_v33, %s8221_s24 }
 0x43e   :  { %7838 = vrot.lane.b32.xlu1 %v7837_v50, %s8223_s26 }
 0x43f   :  { %7833 = vrot.lane.b32.xlu0 %v7832_v29, %s8220_s21 }
 0x494   :  { %v7774_v3 = vpop.permute.xlu1 %7773 }
 0x495   :  { %v7776_v57 = vunpack.i.h.bf16 %v7774_v3  ;;  %v7775_v28 = vunpack.i.l.bf16 %v7774_v3 }
 0x499   :  { %v7779_v45 = vpop.permute.xlu0 %7778  ;;  %v7784_v40 = vpop.permute.xlu1 %7783 }
 0x49a   :  { %v7781_v43 = vunpack.i.h.bf16 %v7779_v45  ;;  %v7780_v48 = vunpack.i.l.bf16 %v7779_v45  ;;  %v7786_v58 = vunpack.i.h.bf16 %v7784_v40  ;;  %v7785_v11 = vunpack.i.l.bf16 %v7784_v40 }
 0x49c   :  { %v1999_v41 = vsel %vm1615_vm9, %v1805_v61, %v7780_v48  ;;  %v2000_v31 = vsel %vm1615_vm9, %v1806_v1, %v7781_v43 }
 0x49d   :  { %v7789_v8 = vpop.permute.xlu0 %7788  ;;  %v2003_v56 = vsel %vm11002_vm0, %v1999_v41, %v7785_v11  ;;  %v2004_v33 = vsel %vm11011_vm10, %v2000_v31, %v7786_v58  ;;  %vm11023_vm10 = vmmov %vm11002_vm0 }
 0x49e   :  { %v7791_v60 = vunpack.i.h.bf16 %v7789_v8  ;;  %v7790_v5 = vunpack.i.l.bf16 %v7789_v8 }
 0x4a0   :  { %v7804_v13 = vpop.permute.xlu1 %7803  ;;  %v2007_v50 = vsel %vm1624_vm5, %v2003_v56, %v7790_v5  ;;  %v2008_v35 = vsel %vm1624_vm5, %v2004_v33, %v7791_v60 }
 0x4a1   :  { %v7794_v16 = vpop.permute.xlu0 %7793  ;;  %v2011_v15 = vsel %vm1629_vm6, %v2007_v50, %v7775_v28  ;;  %v2012_v20 = vsel %vm1629_vm6, %v2008_v35, %v7776_v57  ;;  %v7806_v8 = vunpack.i.h.bf16 %v7804_v13  ;;  %v7805_v1 = vunpack.i.l.bf16 %v7804_v13 }
 0x4a2   :  { %v1807_v50 = vmul.f32 %v9371_v54, %v9494_v30  ;;  %v1808_v35 = vmul.f32 %v9376_v25, %v1799_v36 }
 0x4a4   :  { %v7814_v51 = vpop.permute.xlu1 %7813 }
 0x4a5   :  { %v7799_v55 = vpop.permute.xlu0 %7798  ;;  %v7816_v41 = vunpack.i.h.bf16 %v7814_v51  ;;  %v7815_v31 = vunpack.i.l.bf16 %v7814_v51 }
 0x4a6   :  { %v7801_v29 = vunpack.i.h.bf16 %v7799_v55  ;;  %v7800_v45 = vunpack.i.l.bf16 %v7799_v55 }
 0x4a7   :  { %v2002_v51 = vsel %vm1615_vm9, %v1808_v35, %v7816_v41  ;;  %v8079_v35 = vld [vmem:[%s10823_s2 + $0x90] sm:$0xff]  }
 0x4a8   :  { %v2016_v40 = vsel %vm1634_vm14, %v2012_v20, %v7801_v29  ;;  %v2015_v43 = vsel %vm1634_vm14, %v2011_v15, %v7800_v45  ;;  %v7824_v48 = vpop.permute.xlu1 %7823  ;;  %v2001_v29 = vsel %vm1615_vm9, %v1807_v50, %v7815_v31  ;;  %v7796_v20 = vunpack.i.h.bf16 %v7794_v16  ;;  %2497 = vmatpush1.bf16.msra.mxu0 %v8079_v35 }
 0x4a9   :  { %v7809_v61 = vpop.permute.xlu0 %7808  ;;  %v2019_v3 = vsel %vm10881_vm11, %v2015_v43, %v7805_v1  ;;  %v2020_v60 = vsel %vm10881_vm11, %v2016_v40, %v7806_v8  ;;  %v7826_v45 = vunpack.i.h.bf16 %v7824_v48  ;;  %v7825_v15 = vunpack.i.l.bf16 %v7824_v48  ;;  %2498 = vmatprep.subr.bf16.mxu0 %v10994_v62 }
 0x4aa   :  { %v7811_v58 = vunpack.i.h.bf16 %v7809_v61  ;;  %v7810_v11 = vunpack.i.l.bf16 %v7809_v61  ;;  %v7795_v40 = vunpack.i.l.bf16 %v7794_v16 }
 0x4ac   :  { %v2023_v5 = vsel %vm1644_vm7, %v2019_v3, %v7810_v11  ;;  %v2024_v56 = vsel %vm1644_vm7, %v2020_v60, %v7811_v58  ;;  %v7829_v33 = vpop.permute.xlu1 %7828 }
 0x4ad   :  { %v2045_v13 = vpack.c.bf16 %v2024_v56, %v2023_v5  ;;  %v7819_v57 = vpop.permute.xlu0 %7818  ;;  %v7831_v36 = vunpack.i.h.bf16 %v7829_v33  ;;  %v7830_v1 = vunpack.i.l.bf16 %v7829_v33 }
 0x4ae   :  { %v7821_v28 = vunpack.i.h.bf16 %v7819_v57  ;;  %v7820_v55 = vunpack.i.l.bf16 %v7819_v57  ;;  %v8081_v57 = vld [vmem:[%s10823_s2 + $0xa0] sm:$0xff]  }
 0x4af   :  { %2147 = vmatmul.mubr.bf16.vlgmr.msra.gmra.mrb[24].mxu1 %v2045_v13  ;;  %v8080_v13 = vld [vmem:[%s10823_s2 + $0x98] sm:$0xff]  }
 0x4b0   :  { %v2005_v43 = vsel %vm11012_vm8, %v2001_v29, %v7820_v55  ;;  %v2006_v8 = vsel %vm11013_vm3, %v2002_v51, %v7821_v28  ;;  %v7839_v30 = vpop.permute.xlu1 %7838  ;;  %6117 = vmatprep.mubr.msk.bf16.mxu1 %vm1615_vm9, %v2048_v53  ;;  %2499 = vmatpush1.bf16.msra.mxu0 %v8080_v13  ;;  %v6106_v28 = vld [vmem:[%s10822_s3 + $0x2] ss:$0 sm:$0xff]  ;;  %v8082_v55 = vld [vmem:[%s10823_s2 + $0xa8] sm:$0xff]   ;;  %vm11024_vm8 = vmmov %vm11002_vm0 }
 0x4b1   :  { %v2009_v61 = vsel %vm1624_vm5, %v2005_v43, %v7825_v15  ;;  %v2010_v58 = vsel %vm1624_vm5, %v2006_v8, %v7826_v45  ;;  %v7834_v48 = vpop.permute.xlu0 %7833  ;;  %v7841_v3 = vunpack.i.h.bf16 %v7839_v30  ;;  %v7840_v60 = vunpack.i.l.bf16 %v7839_v30  ;;  %2500 = vmatprep.subr.bf16.mxu0 %v10994_v62  ;;  %v11014_v30 = vld [vmem:[#allocation7_spill] sm:$0xff]  ;;  %vm11027_vm3 = vmmov %vm11002_vm0 }
 0x4b2   :  { %v7836_v11 = vunpack.i.h.bf16 %v7834_v48  ;;  %v7835_v41 = vunpack.i.l.bf16 %v7834_v48  ;;  %v2013_v16 = vsel %vm1629_vm6, %v2009_v61, %v7795_v40  ;;  %v2014_v31 = vsel %vm1629_vm6, %v2010_v58, %v7796_v20 }
 0x4b3   :  { %v2017_v5 = vsel %vm1634_vm14, %v2013_v16, %v7830_v1  ;;  %v2018_v10 = vsel %vm1634_vm14, %v2014_v31, %v7831_v36  ;;  %v8083_v1 = vld [vmem:[%s10823_s2 + $0xb0] sm:$0xff]  }
 0x4b4   :  { %v2021_v37 = vsel %vm10881_vm11, %v2017_v5, %v7835_v41  ;;  %v2022_v53 = vsel %vm10881_vm11, %v2018_v10, %v7836_v11  ;;  %2501 = vmatpush1.bf16.msra.mxu0 %v8081_v57 }
 0x4b5   :  { %v2025_v56 = vsel %vm1644_vm7, %v2021_v37, %v7840_v60  ;;  %v2026_v33 = vsel %vm1644_vm7, %v2022_v53, %v7841_v3  ;;  %2502 = vmatprep.subr.bf16.mxu0 %v10994_v62  ;;  %v8084_v53 = vld [vmem:[%s10823_s2 + $0xb8] sm:$0xff]  }
 0x4b6   :  { %v2047_v50 = vpack.c.bf16 %v2026_v33, %v2025_v56 }
 0x4b8   :  { %2155 = vmatmul.mubr.bf16.gmra.mrb[28].mxu1 %v2047_v50  ;;  %2503 = vmatpush1.bf16.msra.mxu0 %v8082_v55 }
 0x4b9   :  { %2504 = vmatprep.subr.bf16.mxu0 %v10994_v62 }
 0x4bc   :  { %2505 = vmatpush1.bf16.msra.mxu0 %v8083_v1 }
 0x4bd   :  { %2506 = vmatprep.subr.bf16.mxu0 %v10994_v62 }
 0x4c0   :  { %2507 = vmatpush1.bf16.msra.mxu0 %v8084_v53 }
 0x4c1   :  { %2508 = vmatprep.subr.bf16.mxu0 %v10994_v62 }
 0x582   :  { %v2148_v51 = vpop.f32.mrb[24].mxu1 }
 0x583   :  { %v2149_v29 = vadd.f32 %v6106_v28, %v2148_v51  ;;  %v2150_v45 = vpop.f32.mrb[25].mxu1 }
 0x584   :  { %v2151_v15 = vpop.f32.mrb[26].mxu1  ;;  %v8085_v45 = vld [vmem:[%s10823_s2 + $0xc0] sm:$0xff]  }
 0x585   :  { %v2163_v20 = vadd.f32 %v2149_v29, %v9090_v32  ;;  %v2152_v40 = vadd.f32 %v6106_v28, %v2151_v15  ;;  %v2153_v43 = vpop.f32.mrb[27].mxu1  ;;  %2509 = vmatpush1.bf16.msra.mxu0 %v8085_v45  ;;  %v11018_v45 = vld [vmem:[#allocation5_spill] sm:$0xff] }
 0x586   :  { %v11016_v43 = vld [vmem:[#allocation8_spill] sm:$0xff]  ;;  %2510 = vmatprep.subr.bf16.mxu0 %v10994_v62 }
 0x587   :  { %v9628_v8 = vmax.f32 %v2163_v20, 0.0  ;;  %v2164_v36 = vadd.f32 %v2152_v40, %v11014_v30 }
 0x589   :  { %v9634_v61 = vmax.f32 %v2164_v36, 0.0  ;;  %v2207_v58 = vrot.slane %v9628_v8, 5  ;;  %v2191_v48 = vrot.slane %v9628_v8, 4  ;;  %v2223_v10 = vrot.slane %v9628_v8, 7 }
 0x58a   :  { %v10875_v35 = vrot.slane %v9628_v8, 3 }
 0x58b   :  { %11015 = vst [vmem:[#allocation6_spill] sm:$0xff] %v9634_v61  ;;  %v2156_v11 = vpop.f32.mrb[28].mxu1  ;;  %v7842_v32 = vpack.i.bf16 %v9634_v61, %v9628_v8  ;;  %v2208_v41 = vrot.slane %v9634_v61, 5  ;;  %v2218_v16 = vsel %vm1302_vm4, 0.0, %v2207_v58  ;;  %v2192_v31 = vrot.slane %v9634_v61, 4 }
 0x58c   :  { %v2157_v3 = vadd.f32 %v6106_v28, %v2156_v11  ;;  %v2158_v60 = vpop.f32.mrb[29].mxu1  ;;  %v2202_v5 = vsel %vm1261_vm2, 0.0, %v2191_v48  ;;  %v2224_v37 = vrot.slane %v9634_v61, 7  ;;  %v2219_v51 = vmul.f32 %v8994_v44, %v2218_v16 }
 0x58d   :  { %7843 = vrot.lane.b32.xlu1 %v7842_v32, %s8217_s14  ;;  %v2159_v56 = vpop.f32.mrb[30].mxu1  ;;  %v2209_v33 = vsel %vm1302_vm4, %v2207_v58, %v2208_v41  ;;  %v9653_v50 = vsel %vm1261_vm2, %v2191_v48, %v2192_v31  ;;  %v2203_v15 = vmul.f32 %v8927_v9, %v2202_v5  ;;  %v2234_v1 = vsel %vm1347_vm12, 0.0, %v2223_v10 }
 0x58e   :  { %v2165_v13 = vadd.f32 %v2157_v3, %v9109_v14  ;;  %v2160_v57 = vadd.f32 %v6106_v28, %v2159_v56  ;;  %v2161_v55 = vpop.f32.mrb[31].mxu1  ;;  %v2220_v29 = vmul.f32 %v9019_v17, %v2209_v33  ;;  %v2204_v20 = vmul.f32 %v8932_v38, %v9653_v50 }
 0x58f   :  { %v2225_v14 = vsel %vm1347_vm12, %v2223_v10, %v2224_v37  ;;  %v2176_v28 = vrot.slane %v9634_v61, 3  ;;  %v2269_v60 = vmul.f32 %v8939_v2, %v2209_v33  ;;  %v2235_v5 = vmul.f32 %v8917_v63, %v2234_v1 }
 0x590   :  { %v9670_v40 = vmax.f32 %v2165_v13, 0.0  ;;  %v2166_v30 = vadd.f32 %v2160_v57, %v11016_v43  ;;  %v7852_v36 = vpack.i.bf16 %v2220_v29, %v2219_v51  ;;  %v7847_v58 = vpack.i.bf16 %v2204_v20, %v2203_v15  ;;  %v8086_v57 = vld [vmem:[%s10823_s2 + $0xc8] sm:$0xff]  }
 0x591   :  { %v2236_v48 = vmul.f32 %v8922_v4, %v2225_v14  ;;  %v9682_v16 = vsel %vm10880_vm15, %v10875_v35, %v2176_v28  ;;  %v2240_v33 = vrot.slane %v9634_v61, 1  ;;  %2511 = vmatpush1.bf16.msra.mxu0 %v8086_v57 }
 0x592   :  { %v9675_v11 = vmax.f32 %v2166_v30, 0.0  ;;  %7853 = vrot.lane.b32.xlu1 %v7852_v36, %s8221_s24  ;;  %v2210_v32 = vrot.slane %v9670_v40, 5  ;;  %v10876_v3 = vrot.slane %v9670_v40, 3  ;;  %7848 = vrot.lane.b32.xlu0 %v7847_v58, %s8219_s20  ;;  %v2194_v10 = vrot.slane %v9670_v40, 4 }
 0x593   :  { %v7857_v55 = vpack.i.bf16 %v2236_v48, %v2235_v5  ;;  %v2242_v43 = vrot.slane %v9670_v40, 1  ;;  %v2226_v58 = vrot.slane %v9670_v40, 7  ;;  %2512 = vmatprep.subr.bf16.mxu0 %v10994_v62 }
 0x594   :  { %v9691_v53 = vsel %vm1302_vm4, %v2208_v41, %v2210_v32  ;;  %v9696_v56 = vsel %vm10880_vm15, %v2176_v28, %v10876_v3  ;;  %v2196_v13 = vrot.slane %v9675_v11, 4  ;;  %v11017_v41 = vld [vmem:[#allocation4_spill] sm:$0xff]  ;;  %v2195_v20 = vsel %vm1261_vm2, %v2192_v31, %v2194_v10 }
 0x595   :  { %v2270_v51 = vmul.f32 %v8942_v12, %v9691_v53  ;;  %v2257_v29 = vmul.f32 %v11017_v41, %v9682_v16  ;;  %v2258_v15 = vmul.f32 %v11018_v45, %v9696_v56  ;;  %v2239_v28 = vrot.slane %v9628_v8, 1 }
 0x596   :  { %v2197_v14 = vsel %vm1261_vm2, %v2194_v10, %v2196_v13  ;;  %7858 = vrot.lane.b32.xlu0 %v7857_v55, %s8218_s17  ;;  %v2243_v31 = vsel %vm1392_vm13, %v2240_v33, %v2242_v43  ;;  %v2228_v5 = vrot.slane %v9675_v11, 7  ;;  %v2244_v10 = vrot.slane %v9675_v11, 1 }
 0x597   :  { %v2428_v30 = vpack.c.bf16 %v2270_v51, %v2269_v60  ;;  %v7872_v36 = vpack.i.bf16 %v2258_v15, %v2257_v29  ;;  %v2206_v1 = vmul.f32 %v9026_v49, %v2197_v14  ;;  %v2241_v48 = vsel %vm1392_vm13, %v2239_v28, %v2240_v33  ;;  %v8087_v33 = vld [vmem:[%s10823_s2 + $0xd0] sm:$0xff]  }
 0x598   :  { %v7862_v60 = vpack.i.bf16 %v9675_v11, %v9670_v40  ;;  %v2205_v57 = vmul.f32 %v8959_v34, %v2195_v20  ;;  %v2252_v55 = vmul.f32 %v11007_v21, %v2243_v31  ;;  %v2212_v51 = vrot.slane %v9675_v11, 5  ;;  %2513 = vmatpush1.bf16.msra.mxu0 %v8087_v33 }
 0x599   :  { %6128 = vmatprep.mubr.msk.bf16.mxu0 %vm1615_vm9, %v2428_v30  ;;  %7873 = vrot.lane.b32.xlu1 %v7872_v36, %s8220_s21  ;;  %v2227_v29 = vsel %vm1347_vm12, %v2224_v37, %v2226_v58  ;;  %v2229_v15 = vsel %vm1347_vm12, %v2226_v58, %v2228_v5  ;;  %v2251_v30 = vmul.f32 %v9035_v7, %v2241_v48  ;;  %v2250_v35 = vsel %vm1392_vm13, %v2244_v10, 0.0 }
 0x59a   :  { %7863 = vrot.lane.b32.xlu0 %v7862_v60, %s8217_s14  ;;  %v7882_v28 = vpack.i.bf16 %v2206_v1, %v2205_v57  ;;  %v2238_v36 = vmul.f32 %v9074_v42, %v2229_v15  ;;  %v2245_v31 = vsel %vm1392_vm13, %v2242_v43, %v2244_v10  ;;  %v2213_v3 = vsel %vm1302_vm4, %v2210_v32, %v2212_v51  ;;  %v11019_v1 = vld [vmem:[#allocation3_spill] sm:$0xff] }
 0x59b   :  { %v7867_v61 = vpack.i.bf16 %v2252_v55, %v2251_v30  ;;  %v2237_v37 = vmul.f32 %v9067_v18, %v2227_v29  ;;  %v2264_v58 = vmul.f32 %v8971_v23, %v2195_v20  ;;  %v2263_v5 = vmul.f32 %v11019_v1, %v9653_v50 }
 0x59c   :  { %v9747_v48 = vmul.f32 %v9276_v27, %v2213_v3  ;;  %v2180_v60 = vrot.slane %v9675_v11, 3  ;;  %v2253_v32 = vmul.f32 %v9080_v24, %v2245_v31  ;;  %v2254_v10 = vmul.f32 %v9087_v46, %v2250_v35 }
 0x59d   :  { %7883 = vrot.lane.b32.xlu1 %v7882_v28, %s8219_s20  ;;  %v7892_v43 = vpack.i.bf16 %v2238_v36, %v2237_v37  ;;  %v2268_v57 = vsel %vm1302_vm4, %v2212_v51, 0.0  ;;  %v2262_v55 = vsel %vm1261_vm2, %v2196_v13, 0.0  ;;  %v7877_v50 = vpack.i.bf16 %v2264_v58, %v2263_v5 }
 0x59e   :  { %7868 = vrot.lane.b32.xlu0 %v7867_v61, %s8222_s25  ;;  %v9756_v20 = vmul.f32 %v9310_v59, %v2268_v57  ;;  %v2222_v33 = vmul.f32 %v9271_v52, %v2213_v3  ;;  %v11020_v29 = vrot.slane %v9670_v40, 3  ;;  %v2256_v15 = vsel %vm10880_vm15, %v2180_v60, 0.0 }
 0x59f   :  { %v7897_v13 = vpack.i.bf16 %v2254_v10, %v2253_v32  ;;  %v2221_v51 = vmul.f32 %v9251_v22, %v9691_v53  ;;  %v2265_v28 = vmul.f32 %v9291_v39, %v2197_v14  ;;  %v2266_v30 = vmul.f32 %v9296_v0, %v2262_v55 }
 0x5a0   :  { %v2181_v61 = vsel %vm10880_vm15, %v11020_v29, %v2180_v60  ;;  %v2260_v31 = vmul.f32 %v9322_v6, %v2256_v15  ;;  %v11021_v60 = vrot.slane %v9628_v8, 3  ;;  %v2188_v55 = vmul.f32 %v9345_v47, %v9682_v16 }
 0x5a1   :  { %7893 = vrot.lane.b32.xlu1 %v7892_v43, %s8218_s17  ;;  %v7887_v3 = vpack.i.bf16 %v2222_v33, %v2221_v51  ;;  %v2259_v36 = vmul.f32 %v9301_v19, %v2181_v61  ;;  %v7907_v37 = vpack.i.bf16 %v2266_v30, %v2265_v28 }
 0x5a2   :  { %7878 = vrot.lane.b32.xlu0 %v7877_v50, %s8223_s26  ;;  %v2186_v43 = vsel %vm10880_vm15, 0.0, %v11021_v60 }
 0x5a3   :  { %v7902_v58 = vpack.i.bf16 %v2260_v31, %v2259_v36  ;;  %v2187_v50 = vmul.f32 %v9353_v26, %v2186_v43 }
 0x5a5   :  { %7898 = vrot.lane.b32.xlu1 %v7897_v13, %s8222_s25 }
 0x5a6   :  { %7888 = vrot.lane.b32.xlu0 %v7887_v3, %s8221_s24 }
 0x5a9   :  { %7908 = vrot.lane.b32.xlu1 %v7907_v37, %s8223_s26 }
 0x5aa   :  { %7903 = vrot.lane.b32.xlu0 %v7902_v58, %s8220_s21 }
 0x5ff   :  { %v7844_v53 = vpop.permute.xlu1 %7843 }
 0x600   :  { %v7845_v60 = vunpack.i.l.bf16 %v7844_v53 }
 0x604   :  { %v7849_v5 = vpop.permute.xlu0 %7848  ;;  %v7854_v14 = vpop.permute.xlu1 %7853 }
 0x605   :  { %v7851_v32 = vunpack.i.h.bf16 %v7849_v5  ;;  %v7850_v10 = vunpack.i.l.bf16 %v7849_v5  ;;  %v7856_v33 = vunpack.i.h.bf16 %v7854_v14  ;;  %v7855_v29 = vunpack.i.l.bf16 %v7854_v14 }
 0x606   :  { %v7846_v5 = vunpack.i.h.bf16 %v7844_v53 }
 0x607   :  { %v2381_v13 = vsel %vm1615_vm9, %v2187_v50, %v7850_v10  ;;  %v2382_v51 = vsel %vm1615_vm9, %v2188_v55, %v7851_v32 }
 0x608   :  { %v7859_v57 = vpop.permute.xlu0 %7858  ;;  %v2385_v36 = vsel %vm11022_vm1, %v2381_v13, %v7855_v29  ;;  %v2386_v31 = vsel %vm11002_vm0, %v2382_v51, %v7856_v33  ;;  %vm11028_vm1 = vmmov %vm11002_vm0 }
 0x609   :  { %v7861_v28 = vunpack.i.h.bf16 %v7859_v57  ;;  %v7860_v30 = vunpack.i.l.bf16 %v7859_v57 }
 0x60b   :  { %v7874_v15 = vpop.permute.xlu1 %7873  ;;  %v2389_v58 = vsel %vm1624_vm5, %v2385_v36, %v7860_v30  ;;  %v2390_v16 = vsel %vm1624_vm5, %v2386_v31, %v7861_v28 }
 0x60c   :  { %v7864_v3 = vpop.permute.xlu0 %7863  ;;  %v2393_v10 = vsel %vm1629_vm6, %v2389_v58, %v7845_v60  ;;  %v2394_v32 = vsel %vm1629_vm6, %v2390_v16, %v7846_v5  ;;  %v7876_v33 = vunpack.i.h.bf16 %v7874_v15  ;;  %v7875_v29 = vunpack.i.l.bf16 %v7874_v15 }
 0x60d   :  { %v2189_v5 = vmul.f32 %v9371_v54, %v9696_v56 }
 0x60f   :  { %v7884_v37 = vpop.permute.xlu1 %7883 }
 0x610   :  { %v7869_v14 = vpop.permute.xlu0 %7868  ;;  %v7886_v28 = vunpack.i.h.bf16 %v7884_v37  ;;  %v7885_v36 = vunpack.i.l.bf16 %v7884_v37 }
 0x611   :  { %v7871_v43 = vunpack.i.h.bf16 %v7869_v14  ;;  %v7870_v35 = vunpack.i.l.bf16 %v7869_v14 }
 0x613   :  { %v7894_v57 = vpop.permute.xlu1 %7893  ;;  %v2398_v55 = vsel %vm1634_vm14, %v2394_v32, %v7871_v43  ;;  %v2397_v50 = vsel %vm1634_vm14, %v2393_v10, %v7870_v35  ;;  %v2190_v35 = vmul.f32 %v9376_v25, %v2181_v61  ;;  %v2383_v32 = vsel %vm1615_vm9, %v2189_v5, %v7885_v36 }
 0x614   :  { %v7879_v13 = vpop.permute.xlu0 %7878  ;;  %v2401_v53 = vsel %vm10881_vm11, %v2397_v50, %v7875_v29  ;;  %v2402_v31 = vsel %vm10881_vm11, %v2398_v55, %v7876_v33  ;;  %v7896_v50 = vunpack.i.h.bf16 %v7894_v57  ;;  %v7895_v55 = vunpack.i.l.bf16 %v7894_v57 }
 0x615   :  { %v7881_v51 = vunpack.i.h.bf16 %v7879_v13  ;;  %v7880_v30 = vunpack.i.l.bf16 %v7879_v13  ;;  %v2384_v37 = vsel %vm1615_vm9, %v2190_v35, %v7886_v28  ;;  %v7866_v33 = vunpack.i.h.bf16 %v7864_v3 }
 0x616   :  { %v7865_v29 = vunpack.i.l.bf16 %v7864_v3  ;;  %v11025_v61 = vpack.c.bf16 %v9756_v20, %v9747_v48 }
 0x617   :  { %v7899_v14 = vpop.permute.xlu1 %7898  ;;  %v2405_v58 = vsel %vm1644_vm7, %v2401_v53, %v7880_v30  ;;  %v2406_v16 = vsel %vm1644_vm7, %v2402_v31, %v7881_v51 }
 0x618   :  { %v2427_v15 = vpack.c.bf16 %v2406_v16, %v2405_v58  ;;  %v7889_v60 = vpop.permute.xlu0 %7888  ;;  %v7901_v30 = vunpack.i.h.bf16 %v7899_v14  ;;  %v7900_v53 = vunpack.i.l.bf16 %v7899_v14 }
 0x619   :  { %v7891_v43 = vunpack.i.h.bf16 %v7889_v60  ;;  %v7890_v10 = vunpack.i.l.bf16 %v7889_v60 }
 0x61a   :  { %2529 = vmatmul.mubr.bf16.vlgmr.msra.gmra.mrb[52].mxu0 %v2427_v15 }
 0x61b   :  { %v2387_v13 = vsel %vm11023_vm10, %v2383_v32, %v7890_v10  ;;  %v2388_v51 = vsel %vm11024_vm8, %v2384_v37, %v7891_v43  ;;  %v7909_v56 = vpop.permute.xlu1 %7908  ;;  %6129 = vmatprep.mubr.msk.bf16.mxu0 %vm1615_vm9, %v11025_v61  ;;  %v8088_v37 = vld [vmem:[%s10823_s2 + $0xd8] sm:$0xff]   ;;  %v8089_v32 = vld [vmem:[%s10823_s2 + $0xe0] sm:$0xff]   ;;  %vm10878_vm10 = vmmov 0   ;;  %vm11031_vm8 = vmmov %vm11002_vm0 }
 0x61c   :  { %v2391_v28 = vsel %vm1624_vm5, %v2387_v13, %v7895_v55  ;;  %v2392_v36 = vsel %vm1624_vm5, %v2388_v51, %v7896_v50  ;;  %v7904_v57 = vpop.permute.xlu0 %7903  ;;  %v7911_v5 = vunpack.i.h.bf16 %v7909_v56  ;;  %v7910_v35 = vunpack.i.l.bf16 %v7909_v56  ;;  %2875 = vmatpush1.bf16.msra.mxu1 %v8088_v37  ;;  %v8090_v50 = vld [vmem:[%s10823_s2 + $0xe8] sm:$0xff]   ;;  %v8091_v55 = vld [vmem:[%s10823_s2 + $0xf0] sm:$0xff]  }
 0x61d   :  { %v7906_v31 = vunpack.i.h.bf16 %v7904_v57  ;;  %v7905_v58 = vunpack.i.l.bf16 %v7904_v57  ;;  %v2395_v3 = vsel %vm1629_vm6, %v2391_v28, %v7865_v29  ;;  %v2396_v16 = vsel %vm1629_vm6, %v2392_v36, %v7866_v33  ;;  %2876 = vmatprep.subr.bf16.mxu1 %v10994_v62  ;;  %v6118_v33 = vld [vmem:[%s10822_s3 + $0x3] ss:$0 sm:$0xff]  ;;  %v8092_v28 = vld [vmem:[%s10823_s2 + $0xf8] sm:$0xff]  }
 0x61e   :  { %v2399_v15 = vsel %vm1634_vm14, %v2395_v3, %v7900_v53  ;;  %v2400_v48 = vsel %vm1634_vm14, %v2396_v16, %v7901_v30 }
 0x61f   :  { %v2403_v20 = vsel %vm10881_vm11, %v2399_v15, %v7905_v58  ;;  %v2404_v14 = vsel %vm10881_vm11, %v2400_v48, %v7906_v31  ;;  %v8093_v15 = vld [vmem:[%s10823_s2 + $0x100] sm:$0xff]  }
 0x620   :  { %v2407_v60 = vsel %vm1644_vm7, %v2403_v20, %v7910_v35  ;;  %v2408_v43 = vsel %vm1644_vm7, %v2404_v14, %v7911_v5  ;;  %2877 = vmatpush1.bf16.msra.mxu1 %v8089_v32 }
 0x621   :  { %v2429_v10 = vpack.c.bf16 %v2408_v43, %v2407_v60  ;;  %2878 = vmatprep.subr.bf16.mxu1 %v10994_v62 }
 0x623   :  { %2537 = vmatmul.mubr.bf16.gmra.mrb[56].mxu0 %v2429_v10 }
 0x624   :  { %2879 = vmatpush1.bf16.msra.mxu1 %v8090_v50 }
 0x625   :  { %2880 = vmatprep.subr.bf16.mxu1 %v10994_v62 }
 0x628   :  { %2881 = vmatpush1.bf16.msra.mxu1 %v8091_v55 }
 0x629   :  { %2882 = vmatprep.subr.bf16.mxu1 %v10994_v62 }
 0x62c   :  { %2883 = vmatpush1.bf16.msra.mxu1 %v8092_v28 }
 0x62d   :  { %2884 = vmatprep.subr.bf16.mxu1 %v10994_v62 }
 0x630   :  { %2885 = vmatpush1.bf16.msra.mxu1 %v8093_v15 }
 0x631   :  { %2886 = vmatprep.subr.bf16.mxu1 %v10994_v62 }
 0x6ed   :  { %v2530_v29 = vpop.f32.mrb[52].mxu0 }
 0x6ee   :  { %v2531_v13 = vadd.f32 %v6118_v33, %v2530_v29  ;;  %v2532_v51 = vpop.f32.mrb[53].mxu0 }
 0x6ef   :  { %v2533_v56 = vpop.f32.mrb[54].mxu0 }
 0x6f0   :  { %v9837_v61 = vmax.f32 %v2531_v13, 0.0  ;;  %v2534_v30 = vadd.f32 %v6118_v33, %v2533_v56  ;;  %v2535_v53 = vpop.f32.mrb[55].mxu0 }
 0x6f2   :  { %v9842_v36 = vmax.f32 %v2534_v30, 0.0  ;;  %v2585_v57 = vrot.slane %v9837_v61, 5  ;;  %v2569_v31 = vrot.slane %v9837_v61, 4  ;;  %v2601_v58 = vrot.slane %v9837_v61, 7 }
 0x6f3   :  { %v2553_v14 = vrot.slane %v9837_v61, 3  ;;  %v2617_v53 = vrot.slane %v9837_v61, 1 }
 0x6f4   :  { %v7912_v3 = vpack.i.bf16 %v9842_v36, %v9837_v61  ;;  %v2586_v16 = vrot.slane %v9842_v36, 5  ;;  %v2596_v5 = vsel %vm1302_vm4, 0.0, %v2585_v57  ;;  %v2570_v35 = vrot.slane %v9842_v36, 4 }
 0x6f5   :  { %v2580_v48 = vsel %vm1261_vm2, 0.0, %v2569_v31  ;;  %v2602_v20 = vrot.slane %v9842_v36, 7  ;;  %v2597_v10 = vmul.f32 %v8994_v44, %v2596_v5  ;;  %v2612_v32 = vsel %vm1347_vm12, 0.0, %v2601_v58 }
 0x6f6   :  { %7913 = vrot.lane.b32.xlu1 %v7912_v3, %s8217_s14  ;;  %v2538_v60 = vpop.f32.mrb[56].mxu0  ;;  %v2587_v43 = vsel %vm1302_vm4, %v2585_v57, %v2586_v16  ;;  %v2571_v37 = vsel %vm1261_vm2, %v2569_v31, %v2570_v35  ;;  %v2581_v13 = vmul.f32 %v8927_v9, %v2580_v48  ;;  %v2554_v44 = vrot.slane %v9842_v36, 3  ;;  %v8094_v9 = vld [vmem:[%s10823_s2 + $0x108] sm:$0xff]  }
 0x6f7   :  { %v2539_v50 = vadd.f32 %v6118_v33, %v2538_v60  ;;  %v2540_v55 = vpop.f32.mrb[57].mxu0  ;;  %v2598_v29 = vmul.f32 %v9019_v17, %v2587_v43  ;;  %v2582_v51 = vmul.f32 %v8932_v38, %v2571_v37  ;;  %v2603_v30 = vsel %vm1347_vm12, %v2601_v58, %v2602_v20  ;;  %2887 = vmatpush1.bf16.msra.mxu1 %v8094_v9 }
 0x6f8   :  { %v2541_v56 = vpop.f32.mrb[58].mxu0  ;;  %v2618_v28 = vrot.slane %v9842_v36, 1  ;;  %v2613_v58 = vmul.f32 %v8917_v63, %v2612_v32  ;;  %v2614_v5 = vmul.f32 %v8922_v4, %v2603_v30  ;;  %v9884_v15 = vsel %vm10880_vm15, %v2553_v14, %v2554_v44  ;;  %2888 = vmatprep.subr.bf16.mxu1 %v10994_v62 }
 0x6f9   :  { %v9877_v17 = vmax.f32 %v2539_v50, 0.0  ;;  %v2542_v38 = vadd.f32 %v6118_v33, %v2541_v56  ;;  %v2543_v57 = vpop.f32.mrb[59].mxu0  ;;  %v7922_v31 = vpack.i.bf16 %v2598_v29, %v2597_v10  ;;  %v7917_v3 = vpack.i.bf16 %v2582_v51, %v2581_v13 }
 0x6fa   :  { %v2619_v48 = vsel %vm1392_vm13, %v2617_v53, %v2618_v28  ;;  %v2647_v50 = vmul.f32 %v8939_v2, %v2587_v43  ;;  %v7927_v4 = vpack.i.bf16 %v2614_v5, %v2613_v58  ;;  %v9897_v55 = vmul.f32 %v11019_v1, %v2571_v37  ;;  %v8095_v2 = vld [vmem:[%s10823_s2 + $0x110] sm:$0xff]  }
 0x6fb   :  { %v9887_v60 = vmax.f32 %v2542_v38, 0.0  ;;  %7923 = vrot.lane.b32.xlu1 %v7922_v31, %s8221_s24  ;;  %7918 = vrot.lane.b32.xlu0 %v7917_v3, %s8219_s20  ;;  %v2588_v33 = vrot.slane %v9877_v17, 5  ;;  %v2556_v63 = vrot.slane %v9877_v17, 3  ;;  %v2572_v10 = vrot.slane %v9877_v17, 4 }
 0x6fc   :  { %v2620_v32 = vrot.slane %v9877_v17, 1  ;;  %v2635_v37 = vmul.f32 %v11017_v41, %v9884_v15  ;;  %v2629_v9 = vmul.f32 %v9035_v7, %v2619_v48  ;;  %2889 = vmatpush1.bf16.msra.mxu1 %v8095_v2 }
 0x6fd   :  { %v2589_v43 = vsel %vm1302_vm4, %v2586_v16, %v2588_v33  ;;  %v9906_v29 = vsel %vm10880_vm15, %v2554_v44, %v2556_v63  ;;  %v7932_v13 = vpack.i.bf16 %v9887_v60, %v9877_v17  ;;  %v2574_v51 = vrot.slane %v9887_v60, 4  ;;  %2890 = vmatprep.subr.bf16.mxu1 %v10994_v62 }
 0x6fe   :  { %v2648_v1 = vmul.f32 %v8942_v12, %v2589_v43  ;;  %v2636_v16 = vmul.f32 %v11018_v45, %v9906_v29  ;;  %v2573_v56 = vsel %vm1261_vm2, %v2570_v35, %v2572_v10  ;;  %v2621_v53 = vsel %vm1392_vm13, %v2618_v28, %v2620_v32 }
 0x6ff   :  { %7928 = vrot.lane.b32.xlu0 %v7927_v4, %s8218_s17  ;;  %v2575_v30 = vsel %vm1261_vm2, %v2572_v10, %v2574_v51  ;;  %v2583_v44 = vmul.f32 %v8959_v34, %v2573_v56  ;;  %v2630_v41 = vmul.f32 %v11007_v21, %v2621_v53  ;;  %v2604_v45 = vrot.slane %v9877_v17, 7  ;;  %v8096_v34 = vld [vmem:[%s10823_s2 + $0x118] sm:$0xff]  }
 0x700   :  { %v2806_v38 = vpack.c.bf16 %v2648_v1, %v2647_v50  ;;  %v7942_v12 = vpack.i.bf16 %v2636_v16, %v2635_v37  ;;  %v2584_v57 = vmul.f32 %v9026_v49, %v2575_v30  ;;  %v2606_v35 = vrot.slane %v9887_v60, 7  ;;  %2891 = vmatpush1.bf16.msra.mxu1 %v8096_v34 }
 0x701   :  { %v2642_v31 = vmul.f32 %v8971_v23, %v2573_v56  ;;  %v2622_v3 = vrot.slane %v9887_v60, 1  ;;  %v7937_v49 = vpack.i.bf16 %v2630_v41, %v2629_v9  ;;  %v2590_v7 = vrot.slane %v9887_v60, 5 }
 0x702   :  { %6140 = vmatprep.mubr.msk.bf16.mxu1 %vm1615_vm9, %v2806_v38  ;;  %7943 = vrot.lane.b32.xlu1 %v7942_v12, %s8220_s21  ;;  %v7952_v21 = vpack.i.bf16 %v2584_v57, %v2583_v44  ;;  %v2599_v28 = vmul.f32 %v9251_v22, %v2589_v43  ;;  %v2605_v23 = vsel %vm1347_vm12, %v2602_v20, %v2604_v45  ;;  %v2640_v20 = vsel %vm1261_vm2, %v2574_v51, 0.0  ;;  %vm11026_vm2 = vmmov %vm11002_vm0 }
 0x703   :  { %7933 = vrot.lane.b32.xlu0 %v7932_v13, %s8217_s14  ;;  %v2607_v58 = vsel %vm1347_vm12, %v2604_v45, %v2606_v35  ;;  %v7947_v5 = vpack.i.bf16 %v2642_v31, %v9897_v55  ;;  %v2623_v48 = vsel %vm1392_vm13, %v2620_v32, %v2622_v3  ;;  %v2615_v50 = vmul.f32 %v9067_v18, %v2605_v23 }
 0x704   :  { %v2616_v4 = vmul.f32 %v9074_v42, %v2607_v58  ;;  %v2628_v10 = vsel %vm1392_vm13, %v2622_v3, 0.0  ;;  %v2631_v22 = vmul.f32 %v9080_v24, %v2623_v48  ;;  %v2591_v36 = vsel %vm1302_vm4, %v2588_v33, %v2590_v7 }
 0x705   :  { %v2632_v2 = vmul.f32 %v9087_v46, %v2628_v10  ;;  %v2643_v43 = vmul.f32 %v9291_v39, %v2575_v30  ;;  %v2600_v18 = vmul.f32 %v9271_v52, %v2591_v36  ;;  %v9955_v42 = vmul.f32 %v9276_v27, %v2591_v36 }
 0x706   :  { %7953 = vrot.lane.b32.xlu1 %v7952_v21, %s8219_s20  ;;  %v7962_v32 = vpack.i.bf16 %v2616_v4, %v2615_v50  ;;  %v2644_v55 = vmul.f32 %v9296_v0, %v2640_v20  ;;  %v2558_v46 = vrot.slane %v9887_v60, 3  ;;  %v2646_v33 = vsel %vm1302_vm4, %v2590_v7, 0.0 }
 0x707   :  { %7938 = vrot.lane.b32.xlu0 %v7937_v49, %s8222_s25  ;;  %v7967_v24 = vpack.i.bf16 %v2632_v2, %v2631_v22  ;;  %v7957_v13 = vpack.i.bf16 %v2600_v18, %v2599_v28  ;;  %v9962_v39 = vmul.f32 %v9310_v59, %v2646_v33  ;;  %v2566_v30 = vmul.f32 %v9345_v47, %v9884_v15 }
 0x708   :  { %v7977_v51 = vpack.i.bf16 %v2644_v55, %v2643_v43  ;;  %v2559_v52 = vsel %vm10880_vm15, %v2556_v63, %v2558_v46  ;;  %v2634_v27 = vsel %vm10880_vm15, %v2558_v46, 0.0 }
 0x709   :  { %v2637_v0 = vmul.f32 %v9301_v19, %v2559_v52  ;;  %v2638_v1 = vmul.f32 %v9322_v6, %v2634_v27  ;;  %v2808_v60 = vpack.c.bf16 %v9962_v39, %v9955_v42  ;;  %v2564_v19 = vsel %vm10880_vm15, 0.0, %v2553_v14 }
 0x70a   :  { %7963 = vrot.lane.b32.xlu1 %v7962_v32, %s8218_s17  ;;  %v2565_v44 = vmul.f32 %v9353_v26, %v2564_v19  ;;  %v2568_v46 = vmul.f32 %v9376_v25, %v2559_v52 }
 0x70b   :  { %7948 = vrot.lane.b32.xlu0 %v7947_v5, %s8223_s26  ;;  %v7972_v37 = vpack.i.bf16 %v2638_v1, %v2637_v0 }
 0x70e   :  { %7968 = vrot.lane.b32.xlu1 %v7967_v24, %s8222_s25  ;;  %v2567_v24 = vmul.f32 %v9371_v54, %v9906_v29 }
 0x70f   :  { %7958 = vrot.lane.b32.xlu0 %v7957_v13, %s8221_s24 }
 0x712   :  { %7978 = vrot.lane.b32.xlu1 %v7977_v51, %s8223_s26 }
 0x713   :  { %7973 = vrot.lane.b32.xlu0 %v7972_v37, %s8220_s21 }
 0x768   :  { %v7914_v59 = vpop.permute.xlu1 %7913 }
 0x769   :  { %v7916_v26 = vunpack.i.h.bf16 %v7914_v59  ;;  %v7915_v3 = vunpack.i.l.bf16 %v7914_v59 }
 0x76d   :  { %v7919_v17 = vpop.permute.xlu0 %7918  ;;  %v7924_v6 = vpop.permute.xlu1 %7923 }
 0x76e   :  { %v7921_v63 = vunpack.i.h.bf16 %v7919_v17  ;;  %v7920_v16 = vunpack.i.l.bf16 %v7919_v17  ;;  %v7926_v53 = vunpack.i.h.bf16 %v7924_v6  ;;  %v7925_v9 = vunpack.i.l.bf16 %v7924_v6 }
 0x770   :  { %v2759_v38 = vsel %vm1615_vm9, %v2565_v44, %v7920_v16  ;;  %v2760_v12 = vsel %vm1615_vm9, %v2566_v30, %v7921_v63 }
 0x771   :  { %v7929_v56 = vpop.permute.xlu0 %7928  ;;  %v2763_v14 = vsel %vm11026_vm2, %v2759_v38, %v7925_v9  ;;  %v2764_v35 = vsel %vm11027_vm3, %v2760_v12, %v7926_v53  ;;  %vm11032_vm2 = vmmov %vm11002_vm0 }
 0x772   :  { %v7931_v57 = vunpack.i.h.bf16 %v7929_v56  ;;  %v7930_v41 = vunpack.i.l.bf16 %v7929_v56  ;;  %vm11033_vm3 = vmmov %vm11002_vm0 }
 0x774   :  { %v7944_v61 = vpop.permute.xlu1 %7943  ;;  %v2767_v31 = vsel %vm1624_vm5, %v2763_v14, %v7930_v41  ;;  %v2768_v47 = vsel %vm1624_vm5, %v2764_v35, %v7931_v57  ;;  %v8224_v14 = vmov 0.0|0.0   ;;  %v11029_v35 = vmov 0.0  }
 0x775   :  { %v7934_v45 = vpop.permute.xlu0 %7933  ;;  %v2771_v7 = vsel %vm1629_vm6, %v2767_v31, %v7915_v3  ;;  %v2772_v28 = vsel %vm1629_vm6, %v2768_v47, %v7916_v26  ;;  %v7946_v48 = vunpack.i.h.bf16 %v7944_v61  ;;  %v7945_v50 = vunpack.i.l.bf16 %v7944_v61  ;;  %7619 = vmatprep.subr.bf16.mxu0 %v8224_v14  ;;  %7649 = vmatprep.subr.bf16.mxu1 %v8224_v14  ;;  %v6130_v31 = vld [vmem:[%s10822_s3 + $0x4] ss:$0 sm:$0xff] }
 0x776   :  { %v7936_v17 = vunpack.i.h.bf16 %v7934_v45  ;;  %v7935_v19 = vunpack.i.l.bf16 %v7934_v45  ;;  %7042 = vmatprep.mubr.msk.f32.mxu0 %vm10878_vm10, %v11029_v35 }
 0x778   :  { %v7954_v15 = vpop.permute.xlu1 %7953 }
 0x779   :  { %v7939_v34 = vpop.permute.xlu0 %7938  ;;  %v7956_v2 = vunpack.i.h.bf16 %v7954_v15  ;;  %v7955_v36 = vunpack.i.l.bf16 %v7954_v15 }
 0x77a   :  { %v7941_v21 = vunpack.i.h.bf16 %v7939_v34  ;;  %v7940_v49 = vunpack.i.l.bf16 %v7939_v34 }
 0x77b   :  { %v2762_v0 = vsel %vm1615_vm9, %v2568_v46, %v7956_v2  ;;  %v2761_v1 = vsel %vm1615_vm9, %v2567_v24, %v7955_v36 }
 0x77c   :  { %v2776_v23 = vsel %vm1634_vm14, %v2772_v28, %v7941_v21  ;;  %v2775_v58 = vsel %vm1634_vm14, %v2771_v7, %v7940_v49  ;;  %v7964_v5 = vpop.permute.xlu1 %7963  ;;  %v11030_v7 = vld [vmem:[#allocation6_spill] sm:$0xff] }
 0x77d   :  { %v7949_v4 = vpop.permute.xlu0 %7948  ;;  %v2779_v20 = vsel %vm10881_vm11, %v2775_v58, %v7945_v50  ;;  %v2780_v43 = vsel %vm10881_vm11, %v2776_v23, %v7946_v48  ;;  %v7966_v37 = vunpack.i.h.bf16 %v7964_v5  ;;  %v7965_v59 = vunpack.i.l.bf16 %v7964_v5 }
 0x77e   :  { %v7951_v10 = vunpack.i.h.bf16 %v7949_v4  ;;  %v7950_v22 = vunpack.i.l.bf16 %v7949_v4 }
 0x780   :  { %v2783_v32 = vsel %vm1644_vm7, %v2779_v20, %v7950_v22  ;;  %v2784_v18 = vsel %vm1644_vm7, %v2780_v43, %v7951_v10  ;;  %v7969_v55 = vpop.permute.xlu1 %7968 }
 0x781   :  { %v2805_v33 = vpack.c.bf16 %v2784_v18, %v2783_v32  ;;  %v7959_v13 = vpop.permute.xlu0 %7958  ;;  %v7971_v25 = vunpack.i.h.bf16 %v7969_v55  ;;  %v7970_v29 = vunpack.i.l.bf16 %v7969_v55  ;;  %v2931_v18 = vld [vmem:[%s10824_s5] sm:$0xff] }
 0x782   :  { %v7961_v51 = vunpack.i.h.bf16 %v7959_v13  ;;  %v7960_v27 = vunpack.i.l.bf16 %v7959_v13  ;;  %v8097_v55 = vld [vmem:[%s10823_s2 + $0x120] sm:$0xff]   ;;  %v6146_v13 = vld [vmem:[%s10824_s5 + $0x8] sm:$0xff] }
 0x783   :  { %2907 = vmatmul.mubr.bf16.vlgmr.msra.gmra.mrb[32].mxu1 %v2805_v33 }
 0x784   :  { %v2765_v6 = vsel %vm11028_vm1, %v2761_v1, %v7960_v27  ;;  %v2766_v63 = vsel %vm11002_vm0, %v2762_v0, %v7961_v51  ;;  %v7979_v54 = vpop.permute.xlu1 %7978  ;;  %6141 = vmatprep.mubr.msk.bf16.mxu1 %vm1615_vm9, %v2808_v60  ;;  %vm11034_vm1 = vmmov %vm11002_vm0  ;;  %v6148_v51 = vld [vmem:[%s10824_s5 + $0x10] sm:$0xff]  ;;  %v6150_v27 = vld [vmem:[%s10824_s5 + $0x18] sm:$0xff] }
 0x785   :  { %v2769_v52 = vsel %vm1624_vm5, %v2765_v6, %v7965_v59  ;;  %v2770_v16 = vsel %vm1624_vm5, %v2766_v63, %v7966_v37  ;;  %v7974_v56 = vpop.permute.xlu0 %7973  ;;  %v7981_v38 = vunpack.i.h.bf16 %v7979_v54  ;;  %v7980_v12 = vunpack.i.l.bf16 %v7979_v54  ;;  %v6152_v0 = vld [vmem:[%s10824_s5 + $0x20] sm:$0xff]  ;;  %v6156_v1 = vld [vmem:[%s10824_s5 + $0x30] sm:$0xff]  ;;  %v8098_v6 = vld [vmem:[%s10823_s2 + $0x128] sm:$0xff]  }
 0x786   :  { %v7976_v30 = vunpack.i.h.bf16 %v7974_v56  ;;  %v7975_v44 = vunpack.i.l.bf16 %v7974_v56  ;;  %v2773_v53 = vsel %vm1629_vm6, %v2769_v52, %v7935_v19  ;;  %v2774_v9 = vsel %vm1629_vm6, %v2770_v16, %v7936_v17  ;;  %v6160_v37 = vld [vmem:[%s10824_s5 + $0x40] sm:$0xff]  ;;  %v8099_v54 = vld [vmem:[%s10823_s2 + $0x130] sm:$0xff]   ;;  %v8102_v56 = vld [vmem:[%s10823_s2 + $0x148] sm:$0xff]  }
 0x787   :  { %v2777_v57 = vsel %vm1634_vm14, %v2773_v53, %v7970_v29  ;;  %v2778_v42 = vsel %vm1634_vm14, %v2774_v9, %v7971_v25  ;;  %v8100_v25 = vld [vmem:[%s10823_s2 + $0x138] sm:$0xff]   ;;  %v8101_v29 = vld [vmem:[%s10823_s2 + $0x140] sm:$0xff]  }
 0x788   :  { %v2781_v39 = vsel %vm10881_vm11, %v2777_v57, %v7975_v44  ;;  %v2782_v60 = vsel %vm10881_vm11, %v2778_v42, %v7976_v30  ;;  %v8103_v30 = vld [vmem:[%s10823_s2 + $0x150] sm:$0xff]   ;;  %v8104_v9 = vld [vmem:[%s10823_s2 + $0x158] sm:$0xff]   ;;  %v8106_v42 = vld [vmem:[%s10823_s2 + $0x168] sm:$0xff]  }
 0x789   :  { %v2785_v41 = vsel %vm1644_vm7, %v2781_v39, %v7980_v12  ;;  %v2786_v61 = vsel %vm1644_vm7, %v2782_v60, %v7981_v38  ;;  %v8105_v38 = vld [vmem:[%s10823_s2 + $0x160] sm:$0xff]  }
 0x78a   :  { %v2807_v45 = vpack.c.bf16 %v2786_v61, %v2785_v41 }
 0x78c   :  { %2915 = vmatmul.mubr.bf16.gmra.mrb[36].mxu1 %v2807_v45 }
 0x78d   :  { %7103 = vmatprep.mubr.msk.f32.mxu1 %vm10878_vm10, %v11029_v35 }
 0x856   :  { %v2908_v47 = vpop.f32.mrb[32].mxu1 }
 0x857   :  { %v2909_v15 = vadd.f32 %v6130_v31, %v2908_v47  ;;  %v2910_v26 = vpop.f32.mrb[33].mxu1 }
 0x858   :  { %v2911_v3 = vpop.f32.mrb[34].mxu1 }
 0x859   :  { %v2923_v34 = vadd.f32 %v2909_v15, %v9628_v8  ;;  %v2912_v21 = vadd.f32 %v6130_v31, %v2911_v3  ;;  %v2913_v49 = vpop.f32.mrb[35].mxu1 }
 0x85b   :  { %v2924_v28 = vadd.f32 %v2912_v21, %v11030_v7  ;;  %v2927_v23 = vmax.f32 %v2923_v34, 0.0 }
 0x85d   :  { %v2928_v58 = vmax.f32 %v2924_v28, 0.0 }
 0x85f   :  { %v10030_v5 = vpack.c.bf16 %v2928_v58, %v2927_v23  ;;  %v2916_v48 = vpop.f32.mrb[36].mxu1 }
 0x860   :  { %v2917_v50 = vadd.f32 %v6130_v31, %v2916_v48  ;;  %v2918_v4 = vpop.f32.mrb[37].mxu1 }
 0x861   :  { %v2919_v10 = vpop.f32.mrb[38].mxu1  ;;  %7621 = vmatpush3.bf16.msra.mxu0 %v10030_v5  ;;  %7651 = vmatpush3.bf16.msra.mxu1 %v10030_v5  ;;  %v11039_v4 = vld [vmem:[#allocation2_spill] sm:$0xff] }
 0x862   :  { %v2925_v22 = vadd.f32 %v2917_v50, %v9670_v40  ;;  %v2920_v2 = vadd.f32 %v6130_v31, %v2919_v10  ;;  %v2921_v8 = vpop.f32.mrb[39].mxu1  ;;  %7622 = vmatprep.subr.bf16.mxu0 %v8224_v14  ;;  %7652 = vmatprep.subr.bf16.mxu1 %v8224_v14  ;;  %v6154_v40 = vld [vmem:[%s10824_s5 + $0x28] sm:$0xff]  ;;  %v3820_v10 = vand.u32 3, %v11039_v4 }
 0x864   :  { %v2926_v36 = vadd.f32 %v2920_v2, %v9675_v11  ;;  %v2929_v20 = vmax.f32 %v2925_v22, 0.0  ;;  %v6158_v11 = vld [vmem:[%s10824_s5 + $0x38] sm:$0xff]  ;;  %v3821_v22 = vshra.s32 %v3820_v10, 1  ;;  %v3822_v2 = vand.u32 1, %v3820_v10 }
 0x866   :  { %v2930_v43 = vmax.f32 %v2926_v36, 0.0  ;;  %v3827_v8 = vadd.s32 4294967295, %v3821_v22  ;;  %v3831_v36 = vadd.s32 4294967295, %v3822_v2 }
 0x868   :  { %v7623_v32 = vpack.c.bf16 %v2930_v43, %v2929_v20  ;;  %v3853_v20 = vadd.s32 1, %v3822_v2  ;;  %v3877_v43 = vadd.s32 1, %v3821_v22 }
 0x86a   :  { %7624 = vmatpush3.bf16.msra.mxu0 %v7623_v32  ;;  %7654 = vmatpush3.bf16.msra.mxu1 %v7623_v32 }
 0x86b   :  { %7661 = vmatprep.subr.bf16.mxu1 %v8224_v14  ;;  %7045 = vmatprep.subr.bf16.mxu0 %v11029_v35 }
 0x86d   :  { %7043 = vmatmul.mubr.msk.f32.vlgmr.msra.gmra.mrb[60].mxu0 %vm11031_vm8, %v2931_v18  ;;  %7104 = vmatmul.mubr.msk.f32.vlgmr.msra.gmra.mrb[40].mxu1 %vm11032_vm2, %v6154_v40  ;;  %vm11035_vm8 = vmmov %vm11002_vm0 }
 0x86e   :  { %7663 = vmatpush3.bf16.msra.mxu1 %v10030_v5  ;;  %7046 = vmatpush3.bf16.msra.mxu0 %v8097_v55  ;;  %vm11036_vm2 = vmmov %vm11002_vm0  ;;  %v8125_v55 = vld [vmem:[%s10823_s2 + $0x280] sm:$0xff]  }
 0x86f   :  { %7664 = vmatprep.subr.bf16.mxu1 %v8224_v14  ;;  %7047 = vmatprep.mubr.msk.bf16.mxu0 %vm10878_vm10, %v11029_v35 }
 0x870   :  { %7625 = vmatprep.subr.bf16.mxu0 %v8224_v14  ;;  %7125 = vmatprep.mubr.msk.f32.mxu1 %vm10878_vm10, %v11029_v35 }
 0x872   :  { %7666 = vmatpush3.bf16.msra.mxu1 %v7623_v32 }
 0x873   :  { %3779 = vmatprep.subr.bf16.mxu1 %v10994_v62 }
 0x875   :  { %7126 = vmatmul.mubr.msk.f32.vlgmr.msra.gmra.mrb[42].mxu1 %vm11033_vm3, %v6158_v11  ;;  %vm11037_vm3 = vmmov %vm11002_vm0  ;;  %v8107_v11 = vld [vmem:[%s10823_s2 + $0x1b0] sm:$0xff]  }
 0x876   :  { %3780 = vmatpush1.bf16.msra.mxu1 %v8098_v6 }
 0x877   :  { %3781 = vmatprep.subr.bf16.mxu1 %v10994_v62 }
 0x87a   :  { %3782 = vmatpush1.bf16.msra.mxu1 %v8099_v54 }
 0x87b   :  { %3783 = vmatprep.subr.bf16.mxu1 %v10994_v62 }
 0x87e   :  { %3784 = vmatpush1.bf16.msra.mxu1 %v8100_v25  ;;  %v8119_v25 = vld [vmem:[%s10823_s2 + $0x1e0] sm:$0xff]  }
 0x87f   :  { %3785 = vmatprep.subr.bf16.mxu1 %v10994_v62 }
 0x882   :  { %3786 = vmatpush1.bf16.msra.mxu1 %v8101_v29  ;;  %v8120_v29 = vld [vmem:[%s10823_s2 + $0x1a0] sm:$0xff]  }
 0x883   :  { %3787 = vmatprep.subr.bf16.mxu1 %v10994_v62 }
 0x886   :  { %3788 = vmatpush1.bf16.msra.mxu1 %v8102_v56 }
 0x887   :  { %3789 = vmatprep.subr.bf16.mxu1 %v10994_v62 }
 0x88a   :  { %3790 = vmatpush1.bf16.msra.mxu1 %v8103_v30 }
 0x88b   :  { %3791 = vmatprep.subr.bf16.mxu1 %v10994_v62 }
 0x88e   :  { %3792 = vmatpush1.bf16.msra.mxu1 %v8104_v9 }
 0x88f   :  { %3793 = vmatprep.subr.bf16.mxu1 %v10994_v62 }
 0x892   :  { %3794 = vmatpush1.bf16.msra.mxu1 %v8105_v38 }
 0x893   :  { %3795 = vmatprep.subr.bf16.mxu1 %v10994_v62 }
 0x896   :  { %3796 = vmatpush1.bf16.msra.mxu1 %v8106_v42 }
 0x940   :  { %v3001_v24 = vpop.f32.mrb[60].mxu0  ;;  %v3433_v59 = vpop.f32.mrb[40].mxu1 }
 0x941   :  { %v3007_v46 = vpack.c.bf16 %v3001_v24, %v3001_v24  ;;  %3675 = vrot.lane.b32.xlu1 %v3001_v24, %s8217_s14  ;;  %v7044_v33 = vpop.f32.mrb[61].mxu0  ;;  %3679 = vrot.lane.b32.xlu0 %v3433_v59, %s8222_s25  ;;  %v7105_v17 = vpop.f32.mrb[41].mxu1  ;;  %v8108_v24 = vld [vmem:[%s10823_s2 + $0x170] sm:$0xff]   ;;  %v8117_v59 = vld [vmem:[%s10823_s2 + $0x1d8] sm:$0xff]  }
 0x942   :  { %v8110_v33 = vld [vmem:[%s10823_s2 + $0x178] sm:$0xff]  }
 0x943   :  { %7048 = vmatmul.mubr.msk.bf16.vlgmr.msra.gmra.mrb[64].mxu0 %vm1615_vm9, %v3007_v46  ;;  %v8109_v46 = vld [vmem:[%s10823_s2 + $0x1b8] sm:$0xff]  }
 0x944   :  { %7627 = vmatpush3.bf16.msra.mxu0 %v10030_v5  ;;  %7059 = vmatprep.mubr.msk.f32.mxu0 %vm10878_vm10, %v11029_v35  ;;  %v8118_v17 = vld [vmem:[%s10823_s2 + $0x198] sm:$0xff]  }
 0x945   :  { %7628 = vmatprep.subr.bf16.mxu0 %v8224_v14 }
 0x948   :  { %7630 = vmatpush3.bf16.msra.mxu0 %v7623_v32  ;;  %v3583_v19 = vpop.f32.mrb[42].mxu1 }
 0x949   :  { %7631 = vmatprep.subr.bf16.mxu0 %v8224_v14  ;;  %v7127_v63 = vpop.f32.mrb[43].mxu1 }
 0x94b   :  { %7060 = vmatmul.mubr.msk.f32.vlgmr.msra.gmra.mrb[62].mxu0 %vm11034_vm1, %v6146_v13  ;;  %vm11038_vm1 = vmmov %vm11002_vm0  ;;  %v8111_v13 = vld [vmem:[%s10823_s2 + $0x1c0] sm:$0xff]  }
 0x94c   :  { %7633 = vmatpush3.bf16.msra.mxu0 %v10030_v5  ;;  %7070 = vmatprep.mubr.msk.f32.mxu0 %vm10878_vm10, %v11029_v35 }
 0x94d   :  { %7634 = vmatprep.subr.bf16.mxu0 %v8224_v14 }
 0x950   :  { %7636 = vmatpush3.bf16.msra.mxu0 %v7623_v32 }
 0x951   :  { %7637 = vmatprep.subr.bf16.mxu0 %v8224_v14 }
 0x953   :  { %7071 = vmatmul.mubr.msk.f32.vlgmr.msra.gmra.mrb[68].mxu0 %vm11002_vm0, %v6148_v51  ;;  %v8112_v51 = vld [vmem:[%s10823_s2 + $0x180] sm:$0xff]  }
 0x954   :  { %7639 = vmatpush3.bf16.msra.mxu0 %v10030_v5  ;;  %7081 = vmatprep.mubr.msk.f32.mxu0 %vm10878_vm10, %v11029_v35 }
 0x955   :  { %7640 = vmatprep.subr.bf16.mxu0 %v8224_v14 }
 0x958   :  { %7642 = vmatpush3.bf16.msra.mxu0 %v7623_v32 }
 0x959   :  { %7643 = vmatprep.subr.bf16.mxu0 %v8224_v14 }
 0x95b   :  { %7082 = vmatmul.mubr.msk.f32.vlgmr.msra.gmra.mrb[70].mxu0 %vm11035_vm8, %v6150_v27  ;;  %vm3832_vm8 = vcmp.ge.s32.totalorder %v3831_v36, 0  ;;  %v8113_v27 = vld [vmem:[%s10823_s2 + $0x1c8] sm:$0xff]  }
 0x95c   :  { %7645 = vmatpush3.bf16.msra.mxu0 %v10030_v5  ;;  %7092 = vmatprep.mubr.msk.f32.mxu0 %vm10878_vm10, %v11029_v35 }
 0x95d   :  { %7646 = vmatprep.subr.bf16.mxu0 %v8224_v14 }
 0x960   :  { %7648 = vmatpush3.bf16.msra.mxu0 %v7623_v32 }
 0x961   :  { %7655 = vmatprep.subr.bf16.mxu0 %v8224_v14 }
 0x963   :  { %7093 = vmatmul.mubr.msk.f32.vlgmr.msra.gmra.mrb[72].mxu0 %vm11036_vm2, %v6152_v0  ;;  %v8114_v0 = vld [vmem:[%s10823_s2 + $0x188] sm:$0xff]  }
 0x964   :  { %7657 = vmatpush3.bf16.msra.mxu0 %v10030_v5  ;;  %7114 = vmatprep.mubr.msk.f32.mxu0 %vm10878_vm10, %v11029_v35 }
 0x965   :  { %7658 = vmatprep.subr.bf16.mxu0 %v8224_v14 }
 0x968   :  { %7660 = vmatpush3.bf16.msra.mxu0 %v7623_v32 }
 0x969   :  { %7667 = vmatprep.subr.bf16.mxu0 %v8224_v14 }
 0x96b   :  { %7115 = vmatmul.mubr.msk.f32.vlgmr.msra.gmra.mrb[74].mxu0 %vm11037_vm3, %v6156_v1  ;;  %vm3879_vm3 = vcmp.lt.s32.totalorder %v3877_v43, 2  ;;  %v8115_v1 = vld [vmem:[%s10823_s2 + $0x1d0] sm:$0xff]  }
 0x96c   :  { %7669 = vmatpush3.bf16.msra.mxu0 %v10030_v5  ;;  %7136 = vmatprep.mubr.msk.f32.mxu0 %vm10878_vm10, %v11029_v35 }
 0x96d   :  { %7670 = vmatprep.subr.bf16.mxu0 %v8224_v14 }
 0x970   :  { %7672 = vmatpush3.bf16.msra.mxu0 %v7623_v32 }
 0x971   :  { %6545 = vmatprep.subr.bf16.mxu0 %v8107_v11 }
 0x973   :  { %7137 = vmatmul.mubr.msk.f32.vlgmr.msra.gmra.mrb[76].mxu0 %vm11038_vm1, %v6160_v37  ;;  %vm3856_vm1 = vcmp.lt.s32.totalorder %v3853_v20, 2  ;;  %v8116_v37 = vld [vmem:[%s10823_s2 + $0x190] sm:$0xff]  }
 0x974   :  { %6546 = vmatpush3.bf16.msra.mxu0 %v8108_v24 }
 0x975   :  { %6547 = vmatprep.subr.bf16.mxu0 %v8109_v46 }
 0x978   :  { %6548 = vmatpush3.bf16.msra.mxu0 %v8110_v33 }
 0x979   :  { %6549 = vmatprep.subr.bf16.mxu0 %v8111_v13 }
 0x97c   :  { %6550 = vmatpush3.bf16.msra.mxu0 %v8112_v51 }
 0x97d   :  { %6551 = vmatprep.subr.bf16.mxu0 %v8113_v27  ;;  %v8123_v27 = vld [vmem:[%s10823_s2 + $0x1f0] sm:$0xff]  }
 0x980   :  { %6552 = vmatpush3.bf16.msra.mxu0 %v8114_v0 }
 0x981   :  { %6553 = vmatprep.subr.bf16.mxu0 %v8115_v1 }
 0x984   :  { %6554 = vmatpush3.bf16.msra.mxu0 %v8116_v37  ;;  %v8124_v37 = vld [vmem:[%s10823_s2 + $0x1f8] sm:$0xff]  }
 0x985   :  { %6555 = vmatprep.subr.bf16.mxu0 %v8117_v59 }
 0x988   :  { %6556 = vmatpush3.bf16.msra.mxu0 %v8118_v17 }
 0x989   :  { %6557 = vmatprep.subr.bf16.mxu0 %v8119_v25  ;;  %v8130_v25 = vld [vmem:[%s10823_s2 + $0x208] sm:$0xff]  }
 0x98c   :  { %6558 = vmatpush3.bf16.msra.mxu0 %v8120_v29  ;;  %v8131_v29 = vld [vmem:[%s10823_s2 + $0x250] sm:$0xff]  }
 0x9b3   :  { %v3680_v62 = vpop.permute.xlu0 %3679  ;;  %v3676_v47 = vpop.permute.xlu1 %3675 }
 0xa1e   :  { %v3133_v52 = vpop.f32.mrb[62].mxu0 }
 0xa1f   :  { %v7061_v16 = vpop.f32.mrb[63].mxu0 }
 0xa26   :  { %v3208_v44 = vpop.f32.mrb[68].mxu0 }
 0xa27   :  { %3663 = vrot.lane.b32.xlu0 %v3208_v44, %s8219_s20  ;;  %v7072_v53 = vpop.f32.mrb[69].mxu0 }
 0xa2e   :  { %v3283_v12 = vpop.f32.mrb[70].mxu0 }
 0xa2f   :  { %3667 = vrot.lane.b32.xlu1 %v3283_v12, %s8221_s24  ;;  %v7083_v57 = vpop.f32.mrb[71].mxu0 }
 0xa36   :  { %v3358_v39 = vpop.f32.mrb[72].mxu0 }
 0xa37   :  { %3671 = vrot.lane.b32.xlu0 %v3358_v39, %s8218_s17  ;;  %v7094_v60 = vpop.f32.mrb[73].mxu0 }
 0xa3b   :  { %3687 = vrot.lane.b32.xlu0 %v3583_v19, %s8223_s26  ;;  %v6162_v19 = vld [vmem:[%s10822_s3 + $0x6] ss:$0 sm:$0xff] }
 0xa3e   :  { %v3508_v41 = vpop.f32.mrb[74].mxu0 }
 0xa3f   :  { %3683 = vrot.lane.b32.xlu1 %v3508_v41, %s8220_s21  ;;  %v7116_v61 = vpop.f32.mrb[75].mxu0  ;;  %v8121_v41 = vld [vmem:[%s10823_s2 + $0x1e8] sm:$0xff]  }
 0xa40   :  { %v8122_v61 = vld [vmem:[%s10823_s2 + $0x1a8] sm:$0xff]   ;;  %6559 = vmatprep.subr.bf16.mxu0 %v8121_v41 }
 0xa41   :  { %6560 = vmatpush3.bf16.msra.mxu0 %v8122_v61  ;;  %v6181_v61 = vld [vmem:[%s10822_s3 + $0x7] ss:$0 sm:$0xff] }
 0xa42   :  { %7139 = vmatprep.subr.bf16.mxu0 %v11029_v35 }
 0xa46   :  { %v3658_v45 = vpop.f32.mrb[76].mxu0 }
 0xa47   :  { %v3716_v14 = vpack.c.bf16 %v3658_v45, %v3658_v45  ;;  %v7138_v31 = vpop.f32.mrb[77].mxu0 }
 0xa49   :  { %6172 = vmatprep.mubr.msk.bf16.mxu1 %vm1615_vm9, %v3716_v14 }
 0xa99   :  { %v3664_v15 = vpop.permute.xlu0 %3663 }
 0xa9a   :  { %v3690_v3 = vsel %vm1615_vm9, %v3133_v52, %v3664_v15  ;;  %vm3828_vm9 = vcmp.ge.s32.totalorder %v3827_v8, 0 }
 0xaa1   :  { %v3668_v26 = vpop.permute.xlu1 %3667 }
 0xaa2   :  { %v3691_v21 = vsel %vm11002_vm0, %v3690_v3, %v3668_v26 }
 0xaa9   :  { %v3672_v34 = vpop.permute.xlu0 %3671 }
 0xaaa   :  { %v3692_v49 = vsel %vm1624_vm5, %v3691_v21, %v3672_v34  ;;  %vm3829_vm5 = vcmp.lt.s32.totalorder %v3827_v8, 2 }
 0xaab   :  { %v3693_v7 = vsel %vm1629_vm6, %v3692_v49, %v3676_v47  ;;  %vm10168_vm2 = vmand %vm3828_vm9, %vm3829_vm5  ;;  %vm3861_vm5 = vcmp.ge.s32.totalorder %v3821_v22, 0 }
 0xaac   :  { %v3694_v23 = vsel %vm1634_vm14, %v3693_v7, %v3680_v62  ;;  %vm3878_vm14 = vcmp.ge.s32.totalorder %v3877_v43, 0  ;;  %vm3857_vm10 = vmand %vm10168_vm2, %vm3856_vm1  ;;  %v10247_v30 = vsel %vm10168_vm2, 1.0, %v11029_v35 }
 0xaad   :  { %v3688_v28 = vpop.permute.xlu0 %3687  ;;  %vm10179_vm0 = vmand %vm3878_vm14, %vm3879_vm3  ;;  %vm3862_vm14 = vcmp.lt.s32.totalorder %v3821_v22, 2  ;;  %v10251_v44 = vsel %vm3857_vm10, 1.0, %v11029_v35  ;;  %vm11050_vm10 = vcmask 785408  }
 0xaae   :  { %vm10186_vm9 = vmand %vm10179_vm0, %vm3856_vm1  ;;  %v10269_v60 = vsel %vm10179_vm0, 1.0, %v11029_v35 }
 0xaaf   :  { %vm3863_vm3 = vmand %vm3861_vm5, %vm3862_vm14  ;;  %vm3841_vm5 = vcmask 1041408   ;;  %vm3888_vm14 = vcmask 1045504   ;;  %v10314_v1 = vsel %vm10186_vm9, 1.0, %v11029_v35 }
 0xab0   :  { %vm3881_vm15 = vmand %vm10179_vm0, %vm3832_vm8 }
 0xab1   :  { %v3684_v58 = vpop.permute.xlu1 %3683  ;;  %v10254_v53 = vsel %vm3881_vm15, 1.0, %v11029_v35  ;;  %vm11048_vm15 = vcmask 261120  }
 0xab2   :  { %v3695_v5 = vsel %vm10881_vm11, %v3694_v23, %v3684_v58  ;;  %vm3873_vm11 = vmand %vm3863_vm3, %vm3856_vm1 }
 0xab3   :  { %v3696_v48 = vsel %vm1644_vm7, %v3695_v5, %v3688_v28  ;;  %vm10175_vm7 = vmand %vm10168_vm2, %vm3832_vm8  ;;  %v10257_v9 = vsel %vm3873_vm11, 1.0, %v11029_v35  ;;  %vm11052_vm2 = vcmask 1044480  }
 0xab4   :  { %v3715_v50 = vpack.c.bf16 %v3696_v48, %v3696_v48  ;;  %vm3864_vm1 = vmand %vm3863_vm3, %vm3832_vm8  ;;  %v10295_v58 = vsel %vm10175_vm7, 1.0, %v11029_v35  ;;  %vm11053_vm7 = vmmov 0  }
 0xab5   :  { %v10264_v39 = vsel %vm3864_vm1, 1.0, %v11029_v35  ;;  %vm11049_vm11 = vmmov %vm11048_vm15 }
 0xab6   :  { %3812 = vmatmul.mubr.bf16.vlgmr.msra.gmra.mrb[44].mxu1 %v3715_v50  ;;  %vm11051_vm8 = vmmov %vm11050_vm10 }
 0xab7   :  { %vm11054_vm0 = vmmov %vm11049_vm11 }
 0xab8   :  { %vm11055_vm9 = vmmov %vm11052_vm2 }
 0xab9   :  { %vm11056_vm3 = vmmov %vm11054_vm0 }
 0xaba   :  { %vm11057_vm1 = vmmov %vm11054_vm0 }
 0xb89   :  { %v3813_v6 = vpop.f32.mrb[44].mxu1 }
 0xb8a   :  { %v3814_v63 = vadd.f32 %v6162_v19, %v3813_v6  ;;  %v3815_v54 = vpop.f32.mrb[45].mxu1  ;;  %v8126_v19 = vld [vmem:[%s10823_s2 + $0x288] sm:$0xff]   ;;  %v8127_v6 = vld [vmem:[%s10823_s2 + $0x240] sm:$0xff]  }
 0xb8b   :  { %v3816_v52 = vpop.f32.mrb[46].mxu1  ;;  %v8129_v54 = vld [vmem:[%s10823_s2 + $0x248] sm:$0xff]   ;;  %6570 = vmatprep.subr.bf16.mxu1 %v8127_v6 }
 0xb8c   :  { %v10242_v16 = vmax.f32 %v3814_v63, 0.0  ;;  %v3817_v56 = vpop.f32.mrb[47].mxu1  ;;  %v8128_v63 = vld [vmem:[%s10823_s2 + $0x200] sm:$0xff]   ;;  %v8132_v52 = vld [vmem:[%s10823_s2 + $0x210] sm:$0xff]  }
 0xb8d   :  { %6571 = vmatpush3.bf16.msra.mxu1 %v8128_v63  ;;  %v8134_v56 = vld [vmem:[%s10823_s2 + $0x218] sm:$0xff]  }
 0xb8e   :  { %v3850_v38 = vrot.slane %v10242_v16, 7  ;;  %v3869_v12 = vrot.slane %v10242_v16, 1  ;;  %v3839_v57 = vrot.slane %v10242_v16, 6  ;;  %v3886_v42 = vrot.slane %v10242_v16, 2  ;;  %6572 = vmatprep.subr.bf16.mxu1 %v8129_v54 }
 0xb8f   :  { %v3824_v23 = vrot.slane %v10242_v16, 5  ;;  %v3895_v24 = vrot.slane %v10242_v16, 3 }
 0xb90   :  { %v3852_v45 = vsel %vm1347_vm12, 0.0, %v3850_v38  ;;  %v3871_v14 = vsel %vm1392_vm13, %v3869_v12, 0.0  ;;  %v3842_v31 = vsel %vm3841_vm5, 0.0, %v3839_v57  ;;  %v3889_v62 = vsel %vm3888_vm14, %v3886_v42, 0.0  ;;  %v8135_v38 = vld [vmem:[%s10823_s2 + $0x260] sm:$0xff]   ;;  %v8137_v57 = vld [vmem:[%s10823_s2 + $0x268] sm:$0xff]  }
 0xb91   :  { %v3860_v47 = vmul.f32 %v10251_v44, %v3852_v45  ;;  %v3885_v15 = vmul.f32 %v10254_v53, %v3871_v14  ;;  %v3849_v26 = vmul.f32 %v10247_v30, %v3842_v31  ;;  %v3876_v3 = vmul.f32 %v10257_v9, %v3871_v14  ;;  %6573 = vmatpush3.bf16.msra.mxu1 %v8130_v25  ;;  %v8136_v12 = vld [vmem:[%s10823_s2 + $0x220] sm:$0xff]   ;;  %v8138_v42 = vld [vmem:[%s10823_s2 + $0x228] sm:$0xff]  }
 0xb92   :  { %v3868_v49 = vmul.f32 %v10264_v39, %v3852_v45  ;;  %v3894_v7 = vmul.f32 %v10269_v60, %v3889_v62  ;;  %v3826_v5 = vsel %vm1302_vm4, 0.0, %v3824_v23  ;;  %v3897_v0 = vsel %vm11052_vm2, %v3895_v24, 0.0  ;;  %6574 = vmatprep.subr.bf16.mxu1 %v8131_v29 }
 0xb93   :  { %v7987_v34 = vpack.i.bf16 %v3860_v47, %v3885_v15  ;;  %v7982_v21 = vpack.i.bf16 %v3849_v26, %v3876_v3  ;;  %v3838_v22 = vmul.f32 %v10295_v58, %v3826_v5  ;;  %v3902_v59 = vmul.f32 %v10314_v1, %v3897_v0  ;;  %v6143_v47 = vld [vmem:[%s10822_s3 + $0x5] ss:$0 sm:$0xff] }
 0xb94   :  { %v7992_v28 = vpack.i.bf16 %v3868_v49, %v3894_v7  ;;  %v8139_v7 = vld [vmem:[%s10823_s2 + $0x270] sm:$0xff]  }
 0xb95   :  { %7988 = vrot.lane.b32.xlu0 %v7987_v34, %s8217_s14  ;;  %7983 = vrot.lane.b32.xlu1 %v7982_v21, %s8221_s24  ;;  %v3971_v17 = vpack.c.bf16 %v3902_v59, %v3902_v59 }
 0xb96   :  { %6575 = vmatpush3.bf16.msra.mxu1 %v8132_v52 }
 0xb99   :  { %7993 = vrot.lane.b32.xlu1 %v7992_v28, %s8220_s21  ;;  %v8140_v28 = vld [vmem:[%s10823_s2 + $0x230] sm:$0xff]  }
 0xc07   :  { %v7989_v48 = vpop.permute.xlu0 %7988  ;;  %v7984_v50 = vpop.permute.xlu1 %7983 }
 0xc08   :  { %v7986_v4 = vunpack.i.h.bf16 %v7984_v50  ;;  %v7985_v10 = vunpack.i.l.bf16 %v7984_v50  ;;  %v7991_v2 = vunpack.i.h.bf16 %v7989_v48  ;;  %v7990_v8 = vunpack.i.l.bf16 %v7989_v48 }
 0xc0a   :  { %v3927_v36 = vsel %vm11048_vm15, %v3838_v22, %v7986_v4  ;;  %v3930_v20 = vsel %vm11049_vm11, %v10242_v16, %v7985_v10  ;;  %v8133_v16 = vld [vmem:[%s10823_s2 + $0x258] sm:$0xff]   ;;  %vm11058_vm15 = vmmov %vm11054_vm0 }
 0xc0b   :  { %v7994_v43 = vpop.permute.xlu1 %7993  ;;  %v3928_v40 = vsel %vm1629_vm6, %v3927_v36, %v7991_v2  ;;  %v3931_v11 = vsel %vm1629_vm6, %v3930_v20, %v7990_v8  ;;  %6576 = vmatprep.subr.bf16.mxu1 %v8133_v16  ;;  %vm11059_vm11 = vmmov %vm11051_vm8 }
 0xc0c   :  { %v7996_v32 = vunpack.i.h.bf16 %v7994_v43  ;;  %v7995_v18 = vunpack.i.l.bf16 %v7994_v43  ;;  %6577 = vmatpush3.bf16.msra.mxu1 %v8134_v56  ;;  %v8141_v43 = vld [vmem:[%s10823_s2 + $0x278] sm:$0xff]  }
 0xc0d   :  { %6578 = vmatprep.subr.bf16.mxu1 %v8135_v38 }
 0xc0e   :  { %v3929_v46 = vsel %vm11050_vm10, %v3928_v40, %v7996_v32  ;;  %v3932_v33 = vsel %vm11051_vm8, %v3931_v11, %v7995_v18  ;;  %v8142_v32 = vld [vmem:[%s10823_s2 + $0x238] sm:$0xff]   ;;  %vm11060_vm10 = vmmov %vm11051_vm8 }
 0xc0f   :  { %v3969_v13 = vpack.c.bf16 %v3929_v46, %v3929_v46  ;;  %v3970_v51 = vpack.c.bf16 %v3932_v33, %v3932_v33  ;;  %vm11061_vm8 = vmmov %vm11052_vm2  ;;  %vm4758_vm2 = vcmask 64512  }
 0xc10   :  { %6579 = vmatpush3.bf16.msra.mxu1 %v8136_v12 }
 0xc11   :  { %4120 = vmatprep.mubr.bf16.mxu0 %v3970_v51  ;;  %6580 = vmatprep.subr.bf16.mxu1 %v8137_v57 }
 0xc12   :  { %4121 = vmatmul.mubr.bf16.vlgmr.msra.gmra.mrb[80].mxu0 %v3969_v13 }
 0xc13   :  { %7140 = vmatpush3.bf16.msra.mxu0 %v8123_v27  ;;  %7143 = vmatprep.mubr.msk.bf16.mxu0 %vm11053_vm7, %v11029_v35 }
 0xc14   :  { %7141 = vmatprep.subr.bf16.mxu0 %v11029_v35  ;;  %6581 = vmatpush3.bf16.msra.mxu1 %v8138_v42 }
 0xc15   :  { %6582 = vmatprep.subr.bf16.mxu1 %v8139_v7  ;;  %v8147_v7 = vld [vmem:[%s10823_s2 + $0x2d8] sm:$0xff]  }
 0xc17   :  { %7142 = vmatpush3.bf16.msra.mxu0 %v8124_v37 }
 0xc18   :  { %7147 = vmatprep.subr.bf16.mxu0 %v11029_v35  ;;  %6583 = vmatpush3.bf16.msra.mxu1 %v8140_v28  ;;  %v8148_v28 = vld [vmem:[%s10823_s2 + $0x298] sm:$0xff]  }
 0xc19   :  { %6584 = vmatprep.subr.bf16.mxu1 %v8141_v43 }
 0xc1a   :  { %7144 = vmatmul.mubr.msk.bf16.vlgmr.msra.gmra.mrb[64].mxu0 %vm11054_vm0, %v3971_v17 }
 0xc1b   :  { %7151 = vmatprep.mubr.msk.bf16.mxu0 %vm11053_vm7, %v11029_v35  ;;  %7148 = vmatpush3.bf16.msra.mxu0 %v8125_v55 }
 0xc1c   :  { %7149 = vmatprep.subr.bf16.mxu0 %v11029_v35  ;;  %6585 = vmatpush3.bf16.msra.mxu1 %v8142_v32 }
 0xc1d   :  { %7155 = vmatprep.subr.bf16.mxu1 %v11029_v35 }
 0xc1f   :  { %7150 = vmatpush3.bf16.msra.mxu0 %v8126_v19 }
 0xce5   :  { %v6561_v41 = vpop.f32.mrb[80].mxu0 }
 0xce6   :  { %v6562_v45 = vpop.f32.mrb[81].mxu0 }
 0xce7   :  { %v6563_v14 = vadd.f32 %v6562_v45, %v6561_v41  ;;  %v6564_v31 = vpop.f32.mrb[82].mxu0 }
 0xce8   :  { %v6565_v62 = vpop.f32.mrb[83].mxu0 }
 0xce9   :  { %v4123_v15 = vadd.f32 %v6563_v14, %v6181_v61 }
 0xceb   :  { %v7673_v26 = vadd.f32 %v6143_v47, %v4123_v15 }
 0xced   :  { %v4162_v3 = vpop.f32.mrb[64].mxu0 }
 0xcee   :  { %v7674_v34 = vadd.f32 %v7673_v26, %v4162_v3  ;;  %v7145_v21 = vpop.f32.mrb[65].mxu0  ;;  %v8143_v3 = vld [vmem:[%s10823_s2 + $0x310] sm:$0xff]  }
 0xcef   :  { %v4165_v49 = vpop.f32.mrb[66].mxu0  ;;  %v8145_v21 = vld [vmem:[%s10823_s2 + $0x2d0] sm:$0xff]  }
 0xcf0   :  { %v10382_v23 = vmax.f32 %v7674_v34, 0.0  ;;  %v7146_v5 = vpop.f32.mrb[67].mxu0  ;;  %v8144_v34 = vld [vmem:[%s10823_s2 + $0x318] sm:$0xff]   ;;  %v8146_v49 = vld [vmem:[%s10823_s2 + $0x290] sm:$0xff]   ;;  %6595 = vmatprep.subr.bf16.mxu0 %v8145_v21 }
 0xcf1   :  { %v8149_v5 = vld [vmem:[%s10823_s2 + $0x2e0] sm:$0xff]  }
 0xcf2   :  { %v4193_v48 = vrot.slane %v10382_v23, 3  ;;  %v4179_v50 = vrot.slane %v10382_v23, 7  ;;  %v4184_v4 = vrot.slane %v10382_v23, 1  ;;  %v4175_v10 = vrot.slane %v10382_v23, 6 }
 0xcf3   :  { %v4189_v22 = vrot.slane %v10382_v23, 2  ;;  %v4171_v17 = vrot.slane %v10382_v23, 5 }
 0xcf4   :  { %v4195_v2 = vsel %vm11055_vm9, %v4193_v48, 0.0  ;;  %v4181_v8 = vsel %vm1347_vm12, 0.0, %v4179_v50  ;;  %v4186_v36 = vsel %vm1392_vm13, %v4184_v4, 0.0  ;;  %v4177_v20 = vsel %vm3841_vm5, 0.0, %v4175_v10  ;;  %v8150_v48 = vld [vmem:[%s10823_s2 + $0x2a0] sm:$0xff]   ;;  %v8151_v50 = vld [vmem:[%s10823_s2 + $0x2e8] sm:$0xff]   ;;  %vm11067_vm9 = vmmov %vm11054_vm0 }
 0xcf5   :  { %v4196_v18 = vmul.f32 %v10314_v1, %v4195_v2  ;;  %v4182_v40 = vmul.f32 %v10251_v44, %v4181_v8  ;;  %v4188_v11 = vmul.f32 %v10254_v53, %v4186_v36  ;;  %v4178_v24 = vmul.f32 %v10247_v30, %v4177_v20  ;;  %v8152_v4 = vld [vmem:[%s10823_s2 + $0x2a8] sm:$0xff]   ;;  %v8153_v10 = vld [vmem:[%s10823_s2 + $0x2f0] sm:$0xff]   ;;  %v8155_v2 = vld [vmem:[%s10823_s2 + $0x2f8] sm:$0xff]  }
 0xcf6   :  { %v4187_v46 = vmul.f32 %v10257_v9, %v4186_v36  ;;  %v4191_v33 = vsel %vm3888_vm14, %v4189_v22, 0.0  ;;  %v4183_v0 = vmul.f32 %v10264_v39, %v4181_v8  ;;  %v4173_v55 = vsel %vm1302_vm4, 0.0, %v4171_v17  ;;  %v8154_v22 = vld [vmem:[%s10823_s2 + $0x2b0] sm:$0xff]   ;;  %v8156_v8 = vld [vmem:[%s10823_s2 + $0x2b8] sm:$0xff]   ;;  %v6201_v20 = vld [vmem:[%s10822_s3 + $0x8] ss:$0 sm:$0xff] }
 0xcf7   :  { %v4265_v13 = vpack.c.bf16 %v4196_v18, %v4196_v18  ;;  %v8002_v51 = vpack.i.bf16 %v4182_v40, %v4188_v11  ;;  %v4192_v37 = vmul.f32 %v10269_v60, %v4191_v33  ;;  %v4174_v25 = vmul.f32 %v10295_v58, %v4173_v55  ;;  %v8158_v33 = vld [vmem:[%s10823_s2 + $0x2c0] sm:$0xff]  }
 0xcf8   :  { %v7997_v27 = vpack.i.bf16 %v4178_v24, %v4187_v46  ;;  %v8157_v46 = vld [vmem:[%s10823_s2 + $0x300] sm:$0xff]  }
 0xcf9   :  { %7152 = vmatmul.mubr.msk.bf16.vlgmr.msra.gmra.mrb[84].mxu0 %vm11056_vm3, %v4265_v13  ;;  %8003 = vrot.lane.b32.xlu1 %v8002_v51, %s8217_s14  ;;  %v8007_v59 = vpack.i.bf16 %v4183_v0, %v4192_v37 }
 0xcfa   :  { %7998 = vrot.lane.b32.xlu0 %v7997_v27, %s8221_s24  ;;  %6596 = vmatpush3.bf16.msra.mxu0 %v8146_v49 }
 0xcfb   :  { %6597 = vmatprep.subr.bf16.mxu0 %v8147_v7 }
 0xcfe   :  { %8008 = vrot.lane.b32.xlu0 %v8007_v59, %s8220_s21  ;;  %6598 = vmatpush3.bf16.msra.mxu0 %v8148_v28 }
 0xcff   :  { %6599 = vmatprep.subr.bf16.mxu0 %v8149_v5 }
 0xd02   :  { %6600 = vmatpush3.bf16.msra.mxu0 %v8150_v48 }
 0xd03   :  { %6601 = vmatprep.subr.bf16.mxu0 %v8151_v50 }
 0xd06   :  { %6602 = vmatpush3.bf16.msra.mxu0 %v8152_v4 }
 0xd07   :  { %6603 = vmatprep.subr.bf16.mxu0 %v8153_v10 }
 0xd0a   :  { %6604 = vmatpush3.bf16.msra.mxu0 %v8154_v22  ;;  %v6221_v22 = vld [vmem:[%s10822_s3 + $0x9] ss:$0 sm:$0xff] }
 0xd0b   :  { %6605 = vmatprep.subr.bf16.mxu0 %v8155_v2 }
 0xd0e   :  { %6606 = vmatpush3.bf16.msra.mxu0 %v8156_v8 }
 0xd0f   :  { %6607 = vmatprep.subr.bf16.mxu0 %v8157_v46  ;;  %v6250_v46 = vld [vmem:[%s10825_s6 + $0x18] sm:$0xff] }
 0xd12   :  { %6608 = vmatpush3.bf16.msra.mxu0 %v8158_v33  ;;  %v8161_v33 = vld [vmem:[%s10823_s2 + $0x320] sm:$0xff]  }
 0xd6b   :  { %v8004_v19 = vpop.permute.xlu1 %8003 }
 0xd6c   :  { %v7999_v6 = vpop.permute.xlu0 %7998  ;;  %v8006_v29 = vunpack.i.h.bf16 %v8004_v19  ;;  %v8005_v52 = vunpack.i.l.bf16 %v8004_v19 }
 0xd6d   :  { %v8001_v63 = vunpack.i.h.bf16 %v7999_v6  ;;  %v8000_v54 = vunpack.i.l.bf16 %v7999_v6 }
 0xd6f   :  { %v4221_v16 = vsel %vm11057_vm1, %v4174_v25, %v8001_v63  ;;  %v4224_v56 = vsel %vm11058_vm15, %v10382_v23, %v8000_v54  ;;  %v8159_v63 = vld [vmem:[%s10823_s2 + $0x308] sm:$0xff]  }
 0xd70   :  { %v8009_v38 = vpop.permute.xlu0 %8008  ;;  %v4222_v42 = vsel %vm1629_vm6, %v4221_v16, %v8006_v29  ;;  %v4225_v41 = vsel %vm1629_vm6, %v4224_v56, %v8005_v52  ;;  %v8160_v54 = vld [vmem:[%s10823_s2 + $0x2c8] sm:$0xff]   ;;  %6609 = vmatprep.subr.bf16.mxu0 %v8159_v63 }
 0xd71   :  { %v8011_v12 = vunpack.i.h.bf16 %v8009_v38  ;;  %v8010_v57 = vunpack.i.l.bf16 %v8009_v38  ;;  %6610 = vmatpush3.bf16.msra.mxu0 %v8160_v54 }
 0xd72   :  { %7168 = vmatprep.subr.bf16.mxu0 %v11029_v35 }
 0xd73   :  { %v4223_v61 = vsel %vm11059_vm11, %v4222_v42, %v8011_v12  ;;  %v4226_v45 = vsel %vm11060_vm10, %v4225_v41, %v8010_v57 }
 0xd74   :  { %v4263_v14 = vpack.c.bf16 %v4223_v61, %v4223_v61  ;;  %v4264_v31 = vpack.c.bf16 %v4226_v45, %v4226_v45 }
 0xd76   :  { %4414 = vmatprep.mubr.bf16.mxu1 %v4264_v31 }
 0xd77   :  { %4415 = vmatmul.mubr.bf16.vlgmr.msra.gmra.mrb[48].mxu1 %v4263_v14 }
 0xd78   :  { %7159 = vmatprep.mubr.msk.bf16.mxu1 %vm11053_vm7, %v11029_v35  ;;  %7156 = vmatpush3.bf16.msra.mxu1 %v8143_v3 }
 0xd79   :  { %7157 = vmatprep.subr.bf16.mxu1 %v11029_v35 }
 0xd7c   :  { %7158 = vmatpush3.bf16.msra.mxu1 %v8144_v34 }
 0xd7d   :  { %7163 = vmatprep.subr.mxu1 %v11029_v35 }
 0xdcc   :  { %v4456_v62 = vpop.f32.mrb[84].mxu0 }
 0xdcd   :  { %v7153_v47 = vpop.f32.mrb[85].mxu0 }
 0xdce   :  { %v4459_v15 = vpop.f32.mrb[86].mxu0 }
 0xdcf   :  { %v7154_v26 = vpop.f32.mrb[87].mxu0 }
 0xe4a   :  { %v6586_v36 = vpop.f32.mrb[48].mxu1 }
 0xe4b   :  { %v6587_v43 = vpop.f32.mrb[49].mxu1 }
 0xe4c   :  { %v6588_v32 = vadd.f32 %v6587_v43, %v6586_v36  ;;  %v6589_v18 = vpop.f32.mrb[50].mxu1 }
 0xe4d   :  { %v6590_v40 = vpop.f32.mrb[51].mxu1 }
 0xe4e   :  { %v4417_v11 = vadd.f32 %v6588_v32, %v6201_v20 }
 0xe50   :  { %v4457_v24 = vadd.f32 %v4456_v62, %v4417_v11  ;;  %v4757_v11 = vld [vmem:[%s10825_s6] sm:$0xff] }
 0xe52   :  { %v4462_v13 = vmax.f32 %v4457_v24, 0.0  ;;  %v6246_v24 = vld [vmem:[%s10825_s6 + $0x8] sm:$0xff] }
 0xe54   :  { %v4486_v51 = vrot.slane %v4462_v13, 3  ;;  %v4472_v27 = vrot.slane %v4462_v13, 7  ;;  %v4477_v0 = vrot.slane %v4462_v13, 1  ;;  %v4468_v37 = vrot.slane %v4462_v13, 6 }
 0xe55   :  { %v4482_v59 = vrot.slane %v4462_v13, 2 }
 0xe56   :  { %v4488_v17 = vsel %vm11061_vm8, %v4486_v51, 0.0  ;;  %v4474_v55 = vsel %vm1347_vm12, 0.0, %v4472_v27  ;;  %v4479_v19 = vsel %vm1392_vm13, %v4477_v0, 0.0  ;;  %v4470_v6 = vsel %vm3841_vm5, 0.0, %v4468_v37  ;;  %vm11062_vm12 = vmmov %vm11054_vm0  ;;  %v8163_v27 = vld [vmem:[%s10823_s2 + $0x330] sm:$0xff]  }
 0xe57   :  { %v4489_v25 = vmul.f32 %v10314_v1, %v4488_v17  ;;  %v4475_v29 = vmul.f32 %v10251_v44, %v4474_v55  ;;  %v4481_v52 = vmul.f32 %v10254_v53, %v4479_v19  ;;  %v4471_v16 = vmul.f32 %v10247_v30, %v4470_v6  ;;  %vm11063_vm13 = vmmov %vm11054_vm0  ;;  %v8164_v17 = vld [vmem:[%s10823_s2 + $0x338] sm:$0xff]   ;;  %v8165_v6 = vld [vmem:[%s10823_s2 + $0x340] sm:$0xff]  }
 0xe58   :  { %v4480_v56 = vmul.f32 %v10257_v9, %v4479_v19  ;;  %v4484_v38 = vsel %vm3888_vm14, %v4482_v59, 0.0  ;;  %v4476_v41 = vmul.f32 %v10264_v39, %v4474_v55  ;;  %v4464_v44 = vrot.slane %v4462_v13, 5  ;;  %vm11064_vm5 = vmmov %vm11054_vm0 }
 0xe59   :  { %v4558_v12 = vpack.c.bf16 %v4489_v25, %v4489_v25  ;;  %v8017_v57 = vpack.i.bf16 %v4475_v29, %v4481_v52  ;;  %v4485_v61 = vmul.f32 %v10269_v60, %v4484_v38  ;;  %v8166_v25 = vld [vmem:[%s10823_s2 + $0x348] sm:$0xff]   ;;  %v8167_v52 = vld [vmem:[%s10823_s2 + $0x350] sm:$0xff]  }
 0xe5a   :  { %v8012_v42 = vpack.i.bf16 %v4471_v16, %v4480_v56  ;;  %v4466_v53 = vsel %vm1302_vm4, 0.0, %v4464_v44  ;;  %vm11065_vm4 = vmmov %vm11060_vm10  ;;  %v8168_v16 = vld [vmem:[%s10823_s2 + $0x358] sm:$0xff]   ;;  %v8169_v56 = vld [vmem:[%s10823_s2 + $0x360] sm:$0xff]  }
 0xe5b   :  { %7160 = vmatmul.mubr.msk.bf16.vlgmr.msra.gmra.mrb[52].mxu1 %vm11062_vm12, %v4558_v12  ;;  %8018 = vrot.lane.b32.xlu0 %v8017_v57, %s8217_s14  ;;  %v8022_v30 = vpack.i.bf16 %v4476_v41, %v4485_v61  ;;  %v4467_v45 = vmul.f32 %v10295_v58, %v4466_v53  ;;  %vm11066_vm14 = vmmov %vm11065_vm4  ;;  %v8170_v38 = vld [vmem:[%s10823_s2 + $0x368] sm:$0xff]   ;;  %v8171_v44 = vld [vmem:[%s10823_s2 + $0x370] sm:$0xff]  }
 0xe5c   :  { %8013 = vrot.lane.b32.xlu1 %v8012_v42, %s8221_s24  ;;  %7165 = vmatprep.mubr.msk.f32.mxu1 %vm11053_vm7, %v11029_v35  ;;  %vm11068_vm3 = vmmov %vm11065_vm4 }
 0xe60   :  { %8023 = vrot.lane.b32.xlu1 %v8022_v30, %s8220_s21 }
 0xecd   :  { %v8019_v9 = vpop.permute.xlu0 %8018 }
 0xece   :  { %v8014_v39 = vpop.permute.xlu1 %8013  ;;  %v8021_v14 = vunpack.i.h.bf16 %v8019_v9  ;;  %v8020_v31 = vunpack.i.l.bf16 %v8019_v9  ;;  %v8172_v9 = vld [vmem:[%s10823_s2 + $0x378] sm:$0xff]  }
 0xecf   :  { %v8016_v60 = vunpack.i.h.bf16 %v8014_v39  ;;  %v8015_v1 = vunpack.i.l.bf16 %v8014_v39  ;;  %v8173_v39 = vld [vmem:[%s10823_s2 + $0x380] sm:$0xff]  }
 0xed1   :  { %v4514_v62 = vsel %vm11063_vm13, %v4467_v45, %v8016_v60  ;;  %v4517_v47 = vsel %vm11064_vm5, %v4462_v13, %v8015_v1  ;;  %v8162_v13 = vld [vmem:[%s10823_s2 + $0x328] sm:$0xff]   ;;  %v8175_v1 = vld [vmem:[%s10823_s2 + $0x390] sm:$0xff]   ;;  %v8176_v45 = vld [vmem:[%s10823_s2 + $0x398] sm:$0xff]  }
 0xed2   :  { %v8024_v15 = vpop.permute.xlu1 %8023  ;;  %v4515_v34 = vsel %vm1629_vm6, %v4514_v62, %v8021_v14  ;;  %v4518_v21 = vsel %vm1629_vm6, %v4517_v47, %v8020_v31  ;;  %v8174_v60 = vld [vmem:[%s10823_s2 + $0x388] sm:$0xff]  }
 0xed3   :  { %v8026_v26 = vunpack.i.h.bf16 %v8024_v15  ;;  %v8025_v3 = vunpack.i.l.bf16 %v8024_v15  ;;  %v6252_v14 = vld [vmem:[%s10822_s3 + $0xb] ss:$0 sm:$0xff] }
 0xed5   :  { %v4516_v49 = vsel %vm11065_vm4, %v4515_v34, %v8026_v26  ;;  %v4519_v7 = vsel %vm11066_vm14, %v4518_v21, %v8025_v3  ;;  %v8177_v21 = vld [vmem:[%s10823_s2 + $0x3a0] sm:$0xff]  }
 0xed6   :  { %v4556_v28 = vpack.c.bf16 %v4516_v49, %v4516_v49  ;;  %v4557_v5 = vpack.c.bf16 %v4519_v7, %v4519_v7  ;;  %v8178_v49 = vld [vmem:[%s10823_s2 + $0x3a8] sm:$0xff]  }
 0xed7   :  { %v6242_v7 = vld [vmem:[%s10822_s3 + $0xa] ss:$0 sm:$0xff] }
 0xed8   :  { %4707 = vmatprep.mubr.bf16.mxu0 %v4557_v5 }
 0xed9   :  { %4708 = vmatmul.mubr.bf16.vlgmr.msra.gmra.mrb[88].mxu0 %v4556_v28  ;;  %v6261_v28 = vld [vmem:[%s10822_s3 + $0xc] ss:$0 sm:$0xff] }
 0xeda   :  { %7172 = vmatprep.mubr.msk.bf16.mxu0 %vm11053_vm7, %v11029_v35  ;;  %7169 = vmatpush3.bf16.msra.mxu0 %v8161_v33  ;;  %v7675_v5 = vadd.f32 %v6261_v28, %v6242_v7  ;;  %v8207_v7 = vld [vmem:[%s10823_s2 + $0x490] sm:$0xff]   ;;  %v8208_v28 = vld [vmem:[%s10823_s2 + $0x498] sm:$0xff]  }
 0xedb   :  { %7170 = vmatprep.subr.bf16.mxu0 %v11029_v35 }
 0xede   :  { %7171 = vmatpush3.bf16.msra.mxu0 %v8162_v13 }
 0xedf   :  { %7191 = vmatprep.subr.bf16.mxu0 %v11029_v35 }
 0xf2e   :  { %v4749_v58 = vpop.f32.mrb[52].mxu1 }
 0xf2f   :  { %v7161_v48 = vpop.f32.mrb[53].mxu1 }
 0xf30   :  { %v4752_v50 = vpop.f32.mrb[54].mxu1 }
 0xf31   :  { %v7162_v4 = vpop.f32.mrb[55].mxu1 }
 0xfac   :  { %v6611_v10 = vpop.f32.mrb[88].mxu0 }
 0xfad   :  { %v6612_v2 = vpop.f32.mrb[89].mxu0 }
 0xfae   :  { %v6613_v8 = vadd.f32 %v6612_v2, %v6611_v10  ;;  %v6614_v36 = vpop.f32.mrb[90].mxu0  ;;  %v8179_v2 = vld [vmem:[%s10823_s2 + $0x3b0] sm:$0xff]  }
 0xfaf   :  { %v6615_v20 = vpop.f32.mrb[91].mxu0  ;;  %v8180_v36 = vld [vmem:[%s10823_s2 + $0x3b8] sm:$0xff]  }
 0xfb0   :  { %v4710_v43 = vadd.f32 %v6613_v8, %v6221_v22  ;;  %v8181_v20 = vld [vmem:[%s10823_s2 + $0x3c0] sm:$0xff]  }
 0xfb2   :  { %v4750_v32 = vadd.f32 %v4749_v58, %v4710_v43  ;;  %v8182_v43 = vld [vmem:[%s10823_s2 + $0x3c8] sm:$0xff]  }
 0xfb4   :  { %v4755_v18 = vadd.f32 %v4750_v32, %v10382_v23  ;;  %v6248_v23 = vld [vmem:[%s10825_s6 + $0x10] sm:$0xff] }
 0xfb5   :  { %v8184_v32 = vld [vmem:[%s10823_s2 + $0x3f0] sm:$0xff]  }
 0xfb6   :  { %v4756_v40 = vmax.f32 %v4755_v18, 0.0  ;;  %v8186_v18 = vld [vmem:[%s10823_s2 + $0x3f8] sm:$0xff]  }
 0xfb8   :  { %7164 = vmatpush3.msra.mxu1 %v4756_v40 }
 0xfb9   :  { %7166 = vmatmul.mubr.msk.f32.vlgmr.msra.gmra.mrb[56].mxu1 %vm4758_vm2, %v4757_v11  ;;  %7176 = vmatprep.subr.mxu1 %v11029_v35 }
 0xfba   :  { %7177 = vmatpush3.msra.mxu1 %v4756_v40  ;;  %7178 = vmatprep.mubr.msk.f32.mxu1 %vm11053_vm7, %v11029_v35 }
 0xfbb   :  { %7181 = vmatprep.subr.mxu1 %v11029_v35 }
 0xfbd   :  { %7179 = vmatmul.mubr.msk.f32.vlgmr.msra.gmra.mrb[58].mxu1 %vm4758_vm2, %v6246_v24 }
 0xfbe   :  { %7182 = vmatpush3.msra.mxu1 %v4756_v40  ;;  %7183 = vmatprep.mubr.msk.f32.mxu1 %vm11053_vm7, %v11029_v35 }
 0xfbf   :  { %7186 = vmatprep.subr.mxu1 %v11029_v35 }
 0xfc1   :  { %7184 = vmatmul.mubr.msk.f32.vlgmr.msra.gmra.mrb[60].mxu1 %vm4758_vm2, %v6248_v23 }
 0xfc2   :  { %7187 = vmatpush3.msra.mxu1 %v4756_v40  ;;  %7188 = vmatprep.mubr.msk.f32.mxu1 %vm11053_vm7, %v11029_v35  ;;  %v6267_v40 = vld [vmem:[%s10822_s3 + $0xd] ss:$0 sm:$0xff] }
 0xfc3   :  { %7223 = vmatprep.subr.bf16.mxu1 %v11029_v35 }
 0xfc5   :  { %7189 = vmatmul.mubr.msk.f32.vlgmr.msra.gmra.mrb[62].mxu1 %vm4758_vm2, %v6250_v46 }
 0xfc6   :  { %7231 = vmatprep.mubr.msk.bf16.mxu1 %vm11053_vm7, %v11029_v35  ;;  %7224 = vmatpush3.bf16.msra.mxu1 %v8175_v1  ;;  %v8203_v1 = vld [vmem:[%s10823_s2 + $0x470] sm:$0xff]  }
 0xfc7   :  { %7225 = vmatprep.subr.bf16.mxu1 %v11029_v35 }
 0xfca   :  { %7226 = vmatpush3.bf16.msra.mxu1 %v8176_v45  ;;  %v8204_v45 = vld [vmem:[%s10823_s2 + $0x478] sm:$0xff]  }
 0xfcb   :  { %7227 = vmatprep.subr.bf16.mxu1 %v11029_v35 }
 0xfce   :  { %7228 = vmatpush3.bf16.msra.mxu1 %v8177_v21  ;;  %v8205_v21 = vld [vmem:[%s10823_s2 + $0x480] sm:$0xff]  }
 0xfcf   :  { %7229 = vmatprep.subr.bf16.mxu1 %v11029_v35 }
 0xfd2   :  { %7230 = vmatpush3.bf16.msra.mxu1 %v8178_v49  ;;  %v8206_v49 = vld [vmem:[%s10823_s2 + $0x488] sm:$0xff]  }
 0xfd3   :  { %7235 = vmatprep.subr.bf16.mxu1 %v11029_v35 }
0x108c   :  { %v4828_v51 = vpop.f32.mrb[56].mxu1 }
0x108d   :  { %v4836_v0 = vpack.c.bf16 %v4828_v51, %v4828_v51  ;;  %v7167_v37 = vpop.f32.mrb[57].mxu1 }
0x108e   :  { %v8187_v37 = vld [vmem:[%s10823_s2 + $0x3e0] sm:$0xff]  }
0x108f   :  { %7173 = vmatmul.mubr.msk.bf16.vlgmr.msra.gmra.mrb[92].mxu0 %vm11054_vm0, %v4836_v0  ;;  %v8185_v0 = vld [vmem:[%s10823_s2 + $0x3d8] sm:$0xff]  }
0x1090   :  { %v4968_v59 = vpop.f32.mrb[58].mxu1  ;;  %7192 = vmatpush3.bf16.msra.mxu0 %v8163_v27  ;;  %7207 = vmatprep.mubr.msk.bf16.mxu0 %vm11053_vm7, %v11029_v35 }
0x1091   :  { %5123 = vrot.lane.b32.xlu0 %v4968_v59, %s8221_s24  ;;  %v7180_v55 = vpop.f32.mrb[59].mxu1  ;;  %7193 = vmatprep.subr.bf16.mxu0 %v11029_v35  ;;  %v8188_v59 = vld [vmem:[%s10823_s2 + $0x400] sm:$0xff]  }
0x1092   :  { %v8190_v55 = vld [vmem:[%s10823_s2 + $0x408] sm:$0xff]  }
0x1094   :  { %v5043_v19 = vpop.f32.mrb[60].mxu1  ;;  %7194 = vmatpush3.bf16.msra.mxu0 %v8164_v17  ;;  %v8189_v17 = vld [vmem:[%s10823_s2 + $0x3e8] sm:$0xff]  }
0x1095   :  { %5127 = vrot.lane.b32.xlu1 %v5043_v19, %s8217_s14  ;;  %v7185_v63 = vpop.f32.mrb[61].mxu1  ;;  %7195 = vmatprep.subr.bf16.mxu0 %v11029_v35  ;;  %v6273_v19 = vld [vmem:[%s10822_s3 + $0xe] ss:$0 sm:$0xff] }
0x1098   :  { %v5118_v54 = vpop.f32.mrb[62].mxu1  ;;  %7196 = vmatpush3.bf16.msra.mxu0 %v8165_v6 }
0x1099   :  { %5131 = vrot.lane.b32.xlu0 %v5118_v54, %s8220_s21  ;;  %v7190_v29 = vpop.f32.mrb[63].mxu1  ;;  %7197 = vmatprep.subr.bf16.mxu0 %v11029_v35 }
0x109c   :  { %7198 = vmatpush3.bf16.msra.mxu0 %v8166_v25 }
0x109d   :  { %7199 = vmatprep.subr.bf16.mxu0 %v11029_v35 }
0x10a0   :  { %7200 = vmatpush3.bf16.msra.mxu0 %v8167_v52 }
0x10a1   :  { %7201 = vmatprep.subr.bf16.mxu0 %v11029_v35 }
0x10a4   :  { %7202 = vmatpush3.bf16.msra.mxu0 %v8168_v16 }
0x10a5   :  { %7203 = vmatprep.subr.bf16.mxu0 %v11029_v35 }
0x10a8   :  { %7204 = vmatpush3.bf16.msra.mxu0 %v8169_v56  ;;  %v8191_v56 = vld [vmem:[%s10823_s2 + $0x410] sm:$0xff]  }
0x10a9   :  { %7205 = vmatprep.subr.bf16.mxu0 %v11029_v35 }
0x10ac   :  { %7206 = vmatpush3.bf16.msra.mxu0 %v8170_v38 }
0x10ad   :  { %7211 = vmatprep.subr.bf16.mxu0 %v11029_v35 }
0x1103   :  { %v5124_v12 = vpop.permute.xlu0 %5123 }
0x1104   :  { %v5134_v42 = vsel %vm11067_vm9, %v4828_v51, %v5124_v12  ;;  %v8183_v51 = vld [vmem:[%s10823_s2 + $0x3d0] sm:$0xff]   ;;  %v8192_v12 = vld [vmem:[%s10823_s2 + $0x418] sm:$0xff]  }
0x1107   :  { %v5128_v57 = vpop.permute.xlu1 %5127 }
0x1108   :  { %v5135_v41 = vsel %vm1629_vm6, %v5134_v42, %v5128_v57  ;;  %v8193_v57 = vld [vmem:[%s10823_s2 + $0x420] sm:$0xff]   ;;  %v8194_v42 = vld [vmem:[%s10823_s2 + $0x428] sm:$0xff]  }
0x110b   :  { %v5132_v61 = vpop.permute.xlu0 %5131 }
0x110c   :  { %v5136_v30 = vsel %vm11068_vm3, %v5135_v41, %v5132_v61  ;;  %v8195_v41 = vld [vmem:[%s10823_s2 + $0x430] sm:$0xff]   ;;  %v8196_v61 = vld [vmem:[%s10823_s2 + $0x438] sm:$0xff]  }
0x110d   :  { %v5153_v53 = vpack.c.bf16 %v5136_v30, %v5136_v30  ;;  %v8197_v30 = vld [vmem:[%s10823_s2 + $0x440] sm:$0xff]  }
0x110f   :  { %7208 = vmatmul.mubr.bf16.vlgmr.msra.gmra.mrb[96].mxu0 %v5153_v53  ;;  %v8199_v53 = vld [vmem:[%s10823_s2 + $0x450] sm:$0xff]  }
0x1110   :  { %7212 = vmatpush3.bf16.msra.mxu0 %v8171_v44  ;;  %7219 = vmatprep.mubr.msk.bf16.mxu0 %vm11053_vm7, %v11029_v35  ;;  %v8198_v44 = vld [vmem:[%s10823_s2 + $0x448] sm:$0xff]  }
0x1111   :  { %7213 = vmatprep.subr.bf16.mxu0 %v11029_v35 }
0x1114   :  { %7214 = vmatpush3.bf16.msra.mxu0 %v8172_v9  ;;  %v8200_v9 = vld [vmem:[%s10823_s2 + $0x458] sm:$0xff]  }
0x1115   :  { %7215 = vmatprep.subr.bf16.mxu0 %v11029_v35 }
0x1118   :  { %7216 = vmatpush3.bf16.msra.mxu0 %v8173_v39  ;;  %v8201_v39 = vld [vmem:[%s10823_s2 + $0x460] sm:$0xff]  }
0x1119   :  { %7217 = vmatprep.subr.bf16.mxu0 %v11029_v35 }
0x111c   :  { %7218 = vmatpush3.bf16.msra.mxu0 %v8174_v60  ;;  %v8202_v60 = vld [vmem:[%s10823_s2 + $0x468] sm:$0xff]  }
0x111d   :  { %7259 = vmatprep.subr.bf16.mxu0 %v11029_v35 }
0x11e2   :  { %v5241_v31 = vpop.f32.mrb[96].mxu0 }
0x11e3   :  { %v5242_v62 = vadd.f32 %v6252_v14, %v5241_v31  ;;  %v7209_v47 = vpop.f32.mrb[97].mxu0  ;;  %v6285_v14 = vld [vmem:[%s10822_s3 + $0x10] ss:$0 sm:$0xff] }
0x11e4   :  { %v5244_v15 = vpop.f32.mrb[98].mxu0 }
0x11e5   :  { %v5247_v26 = vmax.f32 %v5242_v62, 0.0  ;;  %v7210_v3 = vpop.f32.mrb[99].mxu0 }
0x11e7   :  { %v5256_v34 = vpack.c.bf16 %v5247_v26, %v5247_v26 }
0x11e9   :  { %7220 = vmatmul.mubr.msk.bf16.vlgmr.msra.gmra.mrb[92].mxu0 %vm1629_vm6, %v5256_v34 }
0x11ea   :  { %7267 = vmatprep.mubr.msk.bf16.mxu0 %vm11053_vm7, %v11029_v35  ;;  %7260 = vmatpush3.bf16.msra.mxu0 %v8184_v32 }
0x11eb   :  { %7261 = vmatprep.subr.bf16.mxu0 %v11029_v35 }
0x11ee   :  { %7262 = vmatpush3.bf16.msra.mxu0 %v8186_v18 }
0x11ef   :  { %7263 = vmatprep.subr.bf16.mxu0 %v11029_v35 }
0x11f2   :  { %7264 = vmatpush3.bf16.msra.mxu0 %v8188_v59 }
0x11f3   :  { %7265 = vmatprep.subr.bf16.mxu0 %v11029_v35 }
0x11f6   :  { %7266 = vmatpush3.bf16.msra.mxu0 %v8190_v55 }
0x11f7   :  { %7291 = vmatprep.subr.bf16.mxu0 %v11029_v35 }
0x12bc   :  { %v5323_v58 = vpop.f32.mrb[92].mxu0 }
0x12bd   :  { %v7676_v48 = vadd.f32 %v7675_v5, %v5323_v58  ;;  %v7221_v50 = vpop.f32.mrb[93].mxu0  ;;  %v8209_v5 = vld [vmem:[%s10823_s2 + $0x4a0] sm:$0xff]   ;;  %v8210_v58 = vld [vmem:[%s10823_s2 + $0x4a8] sm:$0xff]  }
0x12be   :  { %v5326_v4 = vpop.f32.mrb[94].mxu0  ;;  %v8212_v50 = vld [vmem:[%s10823_s2 + $0x4b8] sm:$0xff]  }
0x12bf   :  { %v5330_v10 = vmax.f32 %v7676_v48, 0.0  ;;  %v7222_v22 = vpop.f32.mrb[95].mxu0  ;;  %v8211_v48 = vld [vmem:[%s10823_s2 + $0x4b0] sm:$0xff]   ;;  %v6279_v4 = vld [vmem:[%s10822_s3 + $0xf] ss:$0 sm:$0xff] }
0x12c1   :  { %v5339_v8 = vpack.c.bf16 %v5330_v10, %v5330_v10 }
0x12c3   :  { %7232 = vmatmul.mubr.msk.bf16.vlgmr.msra.gmra.mrb[64].mxu1 %vm1629_vm6, %v5339_v8 }
0x12c4   :  { %7236 = vmatpush3.bf16.msra.mxu1 %v8179_v2  ;;  %7243 = vmatprep.mubr.msk.bf16.mxu1 %vm11053_vm7, %v11029_v35 }
0x12c5   :  { %7237 = vmatprep.subr.bf16.mxu1 %v11029_v35 }
0x12c8   :  { %7238 = vmatpush3.bf16.msra.mxu1 %v8180_v36 }
0x12c9   :  { %7239 = vmatprep.subr.bf16.mxu1 %v11029_v35 }
0x12cc   :  { %7240 = vmatpush3.bf16.msra.mxu1 %v8181_v20 }
0x12cd   :  { %7241 = vmatprep.subr.bf16.mxu1 %v11029_v35 }
0x12d0   :  { %7242 = vmatpush3.bf16.msra.mxu1 %v8182_v43 }
0x12d1   :  { %7247 = vmatprep.subr.bf16.mxu1 %v11029_v35 }
0x1396   :  { %v5406_v11 = vpop.f32.mrb[64].mxu1 }
0x1397   :  { %v5407_v24 = vadd.f32 %v6267_v40, %v5406_v11  ;;  %v7233_v23 = vpop.f32.mrb[65].mxu1  ;;  %v8213_v40 = vld [vmem:[%s10823_s2 + $0x4c0] sm:$0xff]   ;;  %v8214_v11 = vld [vmem:[%s10823_s2 + $0x4c8] sm:$0xff]  }
0x1398   :  { %v5409_v46 = vpop.f32.mrb[66].mxu1 }
0x1399   :  { %v5412_v33 = vmax.f32 %v5407_v24, 0.0  ;;  %v7234_v13 = vpop.f32.mrb[67].mxu1  ;;  %v6300_v24 = vld [vmem:[%s10822_s3 + $0x12] ss:$0 sm:$0xff] }
0x139b   :  { %v5421_v27 = vpack.c.bf16 %v5412_v33, %v5412_v33 }
0x139d   :  { %7244 = vmatmul.mubr.msk.bf16.vlgmr.msra.gmra.mrb[68].mxu1 %vm1629_vm6, %v5421_v27 }
0x139e   :  { %7248 = vmatpush3.bf16.msra.mxu1 %v8183_v51  ;;  %7255 = vmatprep.mubr.msk.bf16.mxu1 %vm11053_vm7, %v11029_v35 }
0x139f   :  { %7249 = vmatprep.subr.bf16.mxu1 %v11029_v35 }
0x13a2   :  { %7250 = vmatpush3.bf16.msra.mxu1 %v8185_v0 }
0x13a3   :  { %7251 = vmatprep.subr.bf16.mxu1 %v11029_v35 }
0x13a6   :  { %7252 = vmatpush3.bf16.msra.mxu1 %v8187_v37  ;;  %v6309_v37 = vld [vmem:[%s10822_s3 + $0x13] ss:$0 sm:$0xff] }
0x13a7   :  { %7253 = vmatprep.subr.bf16.mxu1 %v11029_v35 }
0x13aa   :  { %7254 = vmatpush3.bf16.msra.mxu1 %v8189_v17 }
0x13ab   :  { %7271 = vmatprep.subr.bf16.mxu1 %v11029_v35 }
0x1470   :  { %v5488_v6 = vpop.f32.mrb[68].mxu1 }
0x1471   :  { %v5489_v63 = vadd.f32 %v6273_v19, %v5488_v6  ;;  %v7245_v54 = vpop.f32.mrb[69].mxu1 }
0x1472   :  { %v5491_v25 = vpop.f32.mrb[70].mxu1 }
0x1473   :  { %v5494_v29 = vadd.f32 %v5489_v63, %v5330_v10  ;;  %v7246_v52 = vpop.f32.mrb[71].mxu1  ;;  %v6291_v10 = vld [vmem:[%s10822_s3 + $0x11] ss:$0 sm:$0xff] }
0x1474   :  { %v7677_v22 = vadd.f32 %v6291_v10, %v6279_v4 }
0x1475   :  { %v5495_v16 = vmax.f32 %v5494_v29, 0.0 }
0x1477   :  { %v5504_v38 = vpack.c.bf16 %v5495_v16, %v5495_v16 }
0x1479   :  { %7256 = vmatmul.mubr.msk.bf16.vlgmr.msra.gmra.mrb[72].mxu1 %vm1629_vm6, %v5504_v38  ;;  %7268 = vmatmul.mubr.msk.bf16.vlgmr.msra.gmra.mrb[100].mxu0 %vm1629_vm6, %v5504_v38 }
0x147a   :  { %7272 = vmatpush3.bf16.msra.mxu1 %v8191_v56  ;;  %7287 = vmatprep.mubr.msk.bf16.mxu1 %vm11053_vm7, %v11029_v35 }
0x147b   :  { %7273 = vmatprep.subr.bf16.mxu1 %v11029_v35  ;;  %7307 = vmatprep.mubr.msk.bf16.mxu0 %vm11053_vm7, %v11029_v35 }
0x147c   :  { %7292 = vmatpush3.bf16.msra.mxu0 %v8199_v53 }
0x147d   :  { %7293 = vmatprep.subr.bf16.mxu0 %v11029_v35 }
0x147e   :  { %7274 = vmatpush3.bf16.msra.mxu1 %v8192_v12 }
0x147f   :  { %7275 = vmatprep.subr.bf16.mxu1 %v11029_v35 }
0x1480   :  { %7294 = vmatpush3.bf16.msra.mxu0 %v8200_v9 }
0x1481   :  { %7295 = vmatprep.subr.bf16.mxu0 %v11029_v35 }
0x1482   :  { %7276 = vmatpush3.bf16.msra.mxu1 %v8193_v57 }
0x1483   :  { %7277 = vmatprep.subr.bf16.mxu1 %v11029_v35 }
0x1484   :  { %7296 = vmatpush3.bf16.msra.mxu0 %v8201_v39 }
0x1485   :  { %7297 = vmatprep.subr.bf16.mxu0 %v11029_v35 }
0x1486   :  { %7278 = vmatpush3.bf16.msra.mxu1 %v8194_v42 }
0x1487   :  { %7279 = vmatprep.subr.bf16.mxu1 %v11029_v35 }
0x1488   :  { %7298 = vmatpush3.bf16.msra.mxu0 %v8202_v60 }
0x1489   :  { %7299 = vmatprep.subr.bf16.mxu0 %v11029_v35 }
0x148a   :  { %7280 = vmatpush3.bf16.msra.mxu1 %v8195_v41 }
0x148b   :  { %7281 = vmatprep.subr.bf16.mxu1 %v11029_v35 }
0x148c   :  { %7300 = vmatpush3.bf16.msra.mxu0 %v8203_v1 }
0x148d   :  { %7301 = vmatprep.subr.bf16.mxu0 %v11029_v35 }
0x148e   :  { %7282 = vmatpush3.bf16.msra.mxu1 %v8196_v61 }
0x148f   :  { %7283 = vmatprep.subr.bf16.mxu1 %v11029_v35 }
0x1490   :  { %7302 = vmatpush3.bf16.msra.mxu0 %v8204_v45 }
0x1491   :  { %7303 = vmatprep.subr.bf16.mxu0 %v11029_v35 }
0x1492   :  { %7284 = vmatpush3.bf16.msra.mxu1 %v8197_v30 }
0x1493   :  { %7285 = vmatprep.subr.bf16.mxu1 %v11029_v35 }
0x1494   :  { %7304 = vmatpush3.bf16.msra.mxu0 %v8205_v21 }
0x1495   :  { %7305 = vmatprep.subr.bf16.mxu0 %v11029_v35 }
0x1496   :  { %7286 = vmatpush3.bf16.msra.mxu1 %v8198_v44 }
0x1497   :  { %7311 = vmatprep.subr.bf16.mxu1 %v11029_v35 }
0x1498   :  { %7306 = vmatpush3.bf16.msra.mxu0 %v8206_v49 }
0x154c   :  { %v5648_v31 = vpop.f32.mrb[100].mxu0 }
0x154d   :  { %v5649_v62 = vadd.f32 %v6285_v14, %v5648_v31  ;;  %v7269_v47 = vpop.f32.mrb[101].mxu0 }
0x154e   :  { %v5651_v15 = vpop.f32.mrb[102].mxu0 }
0x154f   :  { %v5654_v26 = vmax.f32 %v5649_v62, 0.0  ;;  %v7270_v3 = vpop.f32.mrb[103].mxu0 }
0x1551   :  { %v5671_v34 = vpack.c.bf16 %v5654_v26, %v5654_v26 }
0x1553   :  { %7288 = vmatmul.mubr.bf16.vlgmr.msra.gmra.mrb[72].mxu1 %v5671_v34 }
0x1554   :  { %7327 = vmatprep.mubr.msk.bf16.mxu1 %vm11053_vm7, %v11029_v35  ;;  %7312 = vmatpush3.bf16.msra.mxu1 %v8207_v7 }
0x1555   :  { %7313 = vmatprep.subr.bf16.mxu1 %v11029_v35 }
0x1558   :  { %7314 = vmatpush3.bf16.msra.mxu1 %v8208_v28 }
0x1559   :  { %7315 = vmatprep.subr.bf16.mxu1 %v11029_v35 }
0x155c   :  { %7316 = vmatpush3.bf16.msra.mxu1 %v8209_v5 }
0x155d   :  { %7317 = vmatprep.subr.bf16.mxu1 %v11029_v35 }
0x1560   :  { %7318 = vmatpush3.bf16.msra.mxu1 %v8210_v58 }
0x1561   :  { %7319 = vmatprep.subr.bf16.mxu1 %v11029_v35 }
0x1564   :  { %7320 = vmatpush3.bf16.msra.mxu1 %v8211_v48 }
0x1565   :  { %7321 = vmatprep.subr.bf16.mxu1 %v11029_v35 }
0x1568   :  { %7322 = vmatpush3.bf16.msra.mxu1 %v8212_v50 }
0x1569   :  { %7323 = vmatprep.subr.bf16.mxu1 %v11029_v35 }
0x156c   :  { %7324 = vmatpush3.bf16.msra.mxu1 %v8213_v40 }
0x156d   :  { %7325 = vmatprep.subr.bf16.mxu1 %v11029_v35 }
0x1570   :  { %7326 = vmatpush3.bf16.msra.mxu1 %v8214_v11 }
0x1626   :  { %v5759_v2 = vpop.f32.mrb[72].mxu1 }
0x1627   :  { %v7678_v8 = vadd.f32 %v7677_v22, %v5759_v2  ;;  %v7289_v36 = vpop.f32.mrb[73].mxu1 }
0x1628   :  { %v5762_v20 = vpop.f32.mrb[74].mxu1 }
0x1629   :  { %v5766_v43 = vmax.f32 %v7678_v8, 0.0  ;;  %v7290_v32 = vpop.f32.mrb[75].mxu1 }
0x162b   :  { %v5783_v18 = vpack.c.bf16 %v5766_v43, %v5766_v43 }
0x162d   :  { %7308 = vmatmul.mubr.bf16.vlgmr.msra.gmra.mrb[104].mxu0 %v5783_v18 }
0x1700   :  { %v5871_v23 = vpop.f32.mrb[104].mxu0 }
0x1701   :  { %v5872_v46 = vadd.f32 %v6300_v24, %v5871_v23  ;;  %v7309_v33 = vpop.f32.mrb[105].mxu0 }
0x1702   :  { %v5874_v13 = vpop.f32.mrb[106].mxu0 }
0x1703   :  { %v5877_v51 = vmax.f32 %v5872_v46, 0.0  ;;  %v7310_v27 = vpop.f32.mrb[107].mxu0 }
0x1705   :  { %v5894_v0 = vpack.c.bf16 %v5877_v51, %v5877_v51 }
0x1707   :  { %7328 = vmatmul.mubr.bf16.vlgmr.msra.gmra.mrb[76].mxu1 %v5894_v0 }
0x17da   :  { %v5982_v59 = vpop.f32.mrb[76].mxu1 }
0x17db   :  { %v5983_v17 = vadd.f32 %v6309_v37, %v5982_v59  ;;  %v7329_v35 = vpop.f32.mrb[77].mxu1 }
0x17dc   :  { %v5985_v55 = vpop.f32.mrb[78].mxu1 }
0x17dd   :  { %v5988_v19 = vadd.f32 %v5983_v17, %v5766_v43  ;;  %v7330_v6 = vpop.f32.mrb[79].mxu1 }
0x17df   :  { %v5989_v63 = vmax.f32 %v5988_v19, 0.0 }
0x17e1   :  { %5990 = vst [vmem:[%s10826_s7] sm:$0xff] %v5989_v63 }

</bundles_post_ra>
